<compile_context>
chip_gen: v7x
topology: tpu7x:2x2x1
jax: 0.10.0
libtpu: 0.0.40
codegen_flags: <defaults>
</compile_context>

<pallas_src>
import functools

import jax
import jax.numpy as jnp
import numpy as np
from jax.experimental import pallas as pl
from jax.experimental.pallas import tpu as pltpu


def _round_up(x, m):
    return ((x + m - 1) // m) * m


def _layernorm_f32(v, w, b, eps=1e-5):
    # PyTorch LayerNorm computed in fp32 (matches the fp16-safe LayerNorm subclass).
    v32 = v.astype(jnp.float32)
    mu = jnp.mean(v32, axis=-1, keepdims=True)
    var = jnp.mean((v32 - mu) ** 2, axis=-1, keepdims=True)
    return (v32 - mu) * jax.lax.rsqrt(var + eps) * w + b


def _block_kernel(x_ref, ln1w_ref, ln1b_ref, wqkv_ref, bqkv_ref, wo_ref, bo_ref,
                  ln2w_ref, ln2b_ref, wfc_ref, bfc_ref, wproj_ref, bproj_ref,
                  o_ref, *, n_head, s_valid, mm_dtype, mlp_chunk, recip_approx):
    f32 = jnp.float32
    b_blk, s_pad, d = x_ref.shape
    hd = d // n_head
    rows = b_blk * s_pad

    # All dense matmuls operate on (b_blk * s_pad, D) rows.
    x = x_ref[...].reshape(rows, d).astype(f32)

    # ---- LayerNorm 1 ----
    h1 = _layernorm_f32(x, ln1w_ref[...], ln1b_ref[...])                     # (rows, D)

    # ---- fused QKV projection (1/sqrt(hd) pre-folded into the Q columns on the host) ----
    qkv = jnp.dot(h1.astype(mm_dtype), wqkv_ref[...],
                  preferred_element_type=f32) + bqkv_ref[...]                # (rows, 3D)
    q = qkv[:, 0 * d:1 * d]
    k = qkv[:, 1 * d:2 * d]
    v = qkv[:, 2 * d:3 * d]

    # TODO(synk): these relayouts could use pltpu.einshape (split-dim equations) once
    # confirmed on this build; kept as reshape+transpose for portability.
    def to_heads(t):  # (rows, D) -> (b_blk * H, S, hd)
        t = t.reshape(b_blk, s_pad, n_head, hd)
        return jnp.transpose(t, (0, 2, 1, 3)).reshape(b_blk * n_head, s_pad, hd)

    qh = to_heads(q).astype(mm_dtype)
    kh = to_heads(k).astype(mm_dtype)
    vh = to_heads(v).astype(mm_dtype)

    # ---- head-batched attention ----
    # TODO(synk): for S >> 512 this should be flash-tiled over key blocks; the full
    # (b_blk*H, S, S) f32 scores are fine for CLIP-scale S (<= 257).
    scores = jnp.einsum("bqd,bkd->bqk", qh, kh, preferred_element_type=f32)  # (B*H, S, S)
    if s_valid < s_pad:  # static: mask out padded key columns
        key_id = jax.lax.broadcasted_iota(jnp.int32, scores.shape, 2)
        scores = jnp.where(key_id < s_valid, scores, -1e30)
    scores = scores - jnp.max(scores, axis=-1, keepdims=True)
    p = jnp.exp(scores)
    p = p * pl.reciprocal(jnp.sum(p, axis=-1, keepdims=True), approx=recip_approx)

    ctx = jnp.einsum("bqk,bkd->bqd", p.astype(mm_dtype), vh,
                     preferred_element_type=f32)                             # (B*H, S, hd)
    ctx = ctx.reshape(b_blk, n_head, s_pad, hd)
    attn = jnp.transpose(ctx, (0, 2, 1, 3)).reshape(rows, d)

    attn = jnp.dot(attn.astype(mm_dtype), wo_ref[...],
                   preferred_element_type=f32) + bo_ref[...]                 # (rows, D)

    x1 = x + attn                                                            # residual 1

    # ---- LayerNorm 2 + MLP (Linear -> QuickGELU -> Linear), chunked over 4D ----
    # TODO(synk): on v7x (64 MiB VMEM) the (D,4D)/(4D,D) MLP weights should be streamed
    # from HBM (memory_space=pl.ANY + double-buffered slabs) instead of held resident.
    h2 = _layernorm_f32(x1, ln2w_ref[...], ln2b_ref[...]).astype(mm_dtype)
    ffn = wfc_ref.shape[1]
    chunk = min(ffn, mlp_chunk)
    # Fold residual-2 and the c_proj bias into the accumulator (no zeros init, one fewer add).
    acc = x1 + bproj_ref[...]
    for c0 in range(0, ffn, chunk):
        c1 = min(c0 + chunk, ffn)
        h_mid = jnp.dot(h2, wfc_ref[:, c0:c1],
                        preferred_element_type=f32) + bfc_ref[:, c0:c1]      # (rows, chunk)
        g = h_mid * jax.nn.sigmoid(1.702 * h_mid)                            # QuickGELU
        acc = acc + jnp.dot(g.astype(mm_dtype), wproj_ref[c0:c1, :],
                            preferred_element_type=f32)

    o_ref[...] = acc.reshape(b_blk, s_pad, d).astype(o_ref.dtype)            # residual 2


def _vmem_budget_bytes():
    cap = 128 << 20
    try:
        info = pltpu.get_tpu_info()
        cap_attr = getattr(info, "vmem_capacity_bytes", None)
        if cap_attr:
            cap = int(cap_attr)
    except Exception:
        pass
    # ~80% of physical: ~102 MiB on 128 MiB parts (v5e/v6e), ~51 MiB on v7x.
    return max(32 << 20, int(cap * 0.80))


def _estimate_step_vmem(b_blk, s_pad, d, n_head, mlp_chunk, io_itemsize, mm_itemsize,
                        w_bytes):
    rows = b_blk * s_pad
    f32b = 4
    chunk = min(4 * d, mlp_chunk)
    io = 2 * 2 * rows * d * io_itemsize                       # double-buffered in+out tiles
    act = rows * d * f32b * 7                                  # x, h1, attn, x1, h2, ctx, acc
    act += rows * 3 * d * f32b                                 # qkv
    act += 3 * rows * d * mm_itemsize                          # qh / kh / vh
    act += 2 * b_blk * n_head * s_pad * s_pad * f32b           # scores + p
    act += rows * chunk * (f32b + mm_itemsize)                 # h_mid + g
    return w_bytes + io + int(act * 1.3)                       # slack: relayout copies


def _choose_b_blk(B, s_pad, d, n_head, mlp_chunk, io_itemsize, mm_itemsize, w_bytes,
                  budget, rows_target=512):
    b_blk = min(B, max(1, -(-rows_target // s_pad)))           # >= ~512 matmul rows / step
    if B >= 2:
        b_blk = min(b_blk, -(-B // 2))                         # grid length >= 2: both v7x TCs
    while b_blk > 1 and _estimate_step_vmem(b_blk, s_pad, d, n_head, mlp_chunk,
                                            io_itemsize, mm_itemsize, w_bytes) > budget:
        b_blk -= 1
    return b_blk


def residual_attention_block_bsd(x_bsd, params, n_head, *,
                                 matmul_dtype=jnp.bfloat16, mlp_chunk=2048):
    """Batch-first entry point. x_bsd: (B, S, D). Returns (B, S, D)."""
    B, S, D = x_bsd.shape
    assert D % n_head == 0, "d_model must be divisible by n_head"
    f32 = jnp.float32
    wdt = jnp.dtype(matmul_dtype)
    hd = D // n_head
    scale = 1.0 / float(np.sqrt(hd))

    # Host-side weight prep (once, outside the pallas_call): transpose to (K, N), fold
    # 1/sqrt(hd) into the Q columns, cast matmul operands to the MXU dtype.  LN params
    # and biases stay f32.
    w_in_t = jnp.asarray(params["in_proj_w"], f32).T                         # (D, 3D)
    w_in_t = jnp.concatenate([w_in_t[:, :D] * scale, w_in_t[:, D:]], axis=1)
    b_in = jnp.asarray(params["in_proj_b"], f32)
    b_in = jnp.concatenate([b_in[:D] * scale, b_in[D:]]).reshape(1, 3 * D)

    weight_args = [
        jnp.asarray(params["ln1_w"], f32).reshape(1, D),
        jnp.asarray(params["ln1_b"], f32).reshape(1, D),
        w_in_t.astype(wdt),
        b_in,
        jnp.asarray(params["out_proj_w"], f32).T.astype(wdt),
        jnp.asarray(params["out_proj_b"], f32).reshape(1, D),
        jnp.asarray(params["ln2_w"], f32).reshape(1, D),
        jnp.asarray(params["ln2_b"], f32).reshape(1, D),
        jnp.asarray(params["c_fc_w"], f32).T.astype(wdt),
        jnp.asarray(params["c_fc_b"], f32).reshape(1, 4 * D),
        jnp.asarray(params["c_proj_w"], f32).T.astype(wdt),
        jnp.asarray(params["c_proj_b"], f32).reshape(1, D),
    ]
    w_bytes = sum(int(np.prod(a.shape)) * a.dtype.itemsize for a in weight_args)

    s_pad = _round_up(S, 8)
    budget = _vmem_budget_bytes()
    b_blk = _choose_b_blk(B, s_pad, D, n_head, mlp_chunk,
                          x_bsd.dtype.itemsize, wdt.itemsize, w_bytes, budget)
    b_pad = _round_up(B, b_blk)

    x_in = x_bsd
    if (s_pad, b_pad) != (S, B):
        x_in = jnp.pad(x_bsd, ((0, b_pad - B), (0, s_pad - S), (0, 0)))

    kernel = functools.partial(
        _block_kernel, n_head=n_head, s_valid=S, mm_dtype=matmul_dtype,
        mlp_chunk=mlp_chunk, recip_approx=(wdt != jnp.dtype(jnp.float32)))

    def run(weight_buffer_count):
        def const_spec(a):
            nd = a.ndim
            idx = lambda i, _nd=nd: (0,) * _nd
            if weight_buffer_count is not None:
                # Constant index_map => no need to double-buffer; halves weight VMEM.
                return pl.BlockSpec(a.shape, idx,
                                    pipeline_mode=pl.Buffered(weight_buffer_count))
            return pl.BlockSpec(a.shape, idx)

        in_specs = [pl.BlockSpec((b_blk, s_pad, D), lambda i: (i, 0, 0))]
        in_specs += [const_spec(a) for a in weight_args]
        out_spec = pl.BlockSpec((b_blk, s_pad, D), lambda i: (i, 0, 0))

        return pl.pallas_call(
            kernel,
            out_shape=jax.ShapeDtypeStruct((b_pad, s_pad, D), x_bsd.dtype),
            grid_spec=pltpu.PrefetchScalarGridSpec(
                num_scalar_prefetch=0,
                grid=(b_pad // b_blk,),
                in_specs=in_specs,
                out_specs=out_spec,
            ),
            compiler_params=pltpu.CompilerParams(
                dimension_semantics=("parallel",),
                vmem_limit_bytes=budget,
            ),
        )(x_in, *weight_args)

    try:
        out = jax.block_until_ready(run(1))     # single-buffered constant weights
    except Exception:
        # Fallback if this jax build rejects pipeline_mode=pl.Buffered(1).
        out = run(None)

    if (s_pad, b_pad) != (S, B):
        out = out[:B, :S]
    return out


def residual_attention_block(x_sbd, params, n_head, **kwargs):
    """Seq-first entry point matching the PyTorch module layout: x is (S, B, D).

    Callers that already hold batch-first activations should use
    `residual_attention_block_bsd` directly and skip the two HBM transposes below.
    """
    out_bsd = residual_attention_block_bsd(jnp.transpose(x_sbd, (1, 0, 2)),
                                           params, n_head, **kwargs)
    return jnp.transpose(out_bsd, (1, 0, 2))


def _init_params(key, d_model):
    ks = jax.random.split(key, 8)
    s = 0.02
    return {
        "ln1_w": jnp.ones((d_model,), jnp.float32),
        "ln1_b": jnp.zeros((d_model,), jnp.float32),
        "in_proj_w": s * jax.random.normal(ks[0], (3 * d_model, d_model), jnp.float32),
        "in_proj_b": s * jax.random.normal(ks[1], (3 * d_model,), jnp.float32),
        "out_proj_w": s * jax.random.normal(ks[2], (d_model, d_model), jnp.float32),
        "out_proj_b": s * jax.random.normal(ks[3], (d_model,), jnp.float32),
        "ln2_w": jnp.ones((d_model,), jnp.float32),
        "ln2_b": jnp.zeros((d_model,), jnp.float32),
        "c_fc_w": s * jax.random.normal(ks[4], (4 * d_model, d_model), jnp.float32),
        "c_fc_b": s * jax.random.normal(ks[5], (4 * d_model,), jnp.float32),
        "c_proj_w": s * jax.random.normal(ks[6], (d_model, 4 * d_model), jnp.float32),
        "c_proj_b": s * jax.random.normal(ks[7], (d_model,), jnp.float32),
    }


def _reference(x_sbd, params, n_head):
    # Pure-JAX reference of the PyTorch forward, for correctness checking.
    S, B, D = x_sbd.shape
    hd = D // n_head
    hp = jax.lax.Precision.HIGHEST

    def ln(v, w, b):
        mu = jnp.mean(v, -1, keepdims=True)
        var = jnp.mean((v - mu) ** 2, -1, keepdims=True)
        return (v - mu) / jnp.sqrt(var + 1e-5) * w + b

    h1 = ln(x_sbd, params["ln1_w"], params["ln1_b"])
    qkv = jnp.einsum("sbd,ed->sbe", h1, params["in_proj_w"], precision=hp) + params["in_proj_b"]
    q, k, v = jnp.split(qkv, 3, axis=-1)

    def heads(t):  # (S,B,D) -> (B,H,S,hd)
        return jnp.transpose(t.reshape(S, B, n_head, hd), (1, 2, 0, 3))

    qh, kh, vh = heads(q), heads(k), heads(v)
    scores = jnp.einsum("bhqd,bhkd->bhqk", qh, kh, precision=hp) / jnp.sqrt(hd)
    p = jax.nn.softmax(scores, axis=-1)
    o = jnp.einsum("bhqk,bhkd->bhqd", p, vh, precision=hp)                 # (B,H,S,hd)
    o = jnp.transpose(o, (2, 0, 1, 3)).reshape(S, B, D)
    o = jnp.einsum("sbd,ed->sbe", o, params["out_proj_w"], precision=hp) + params["out_proj_b"]
    x1 = x_sbd + o
    h2 = ln(x1, params["ln2_w"], params["ln2_b"])
    m = jnp.einsum("sbd,ed->sbe", h2, params["c_fc_w"], precision=hp) + params["c_fc_b"]
    m = m * jax.nn.sigmoid(1.702 * m)
    m = jnp.einsum("sbe,de->sbd", m, params["c_proj_w"], precision=hp) + params["c_proj_b"]
    return x1 + m


if __name__ == "__main__":
    SEQ, BATCH, D_MODEL, N_HEAD = 16, 2, 256, 4
    key = jax.random.PRNGKey(0)
    k_x, k_p = jax.random.split(key)
    x = jax.random.normal(k_x, (SEQ, BATCH, D_MODEL), jnp.float32)
    params = _init_params(k_p, D_MODEL)

    ref = jax.block_until_ready(_reference(x, params, N_HEAD))

    # Strict path: f32 MXU operands, exact reciprocal — tight check of the fused math.
    out_f32 = jax.block_until_ready(
        residual_attention_block(x, params, N_HEAD, matmul_dtype=jnp.float32))
    np.testing.assert_allclose(np.asarray(out_f32), np.asarray(ref), atol=2e-3, rtol=2e-3)

    # Default fast path: bf16 MXU operands, f32 accumulation, approx reciprocal.
    out_bf16 = jax.block_until_ready(residual_attention_block(x, params, N_HEAD))
    np.testing.assert_allclose(np.asarray(out_bf16), np.asarray(ref), atol=3e-2, rtol=3e-2)

    print("KERNEL_OK")
</pallas_src>

<mosaic_0001>
module attributes {stable_mosaic.version = 11 : i64} {
  func.func @_block_kernel(%arg0: i32, %arg1: memref<1x16x256xf32, #tpu.memory_space<vmem>>, %arg2: memref<1x256xf32, #tpu.memory_space<vmem>>, %arg3: memref<1x256xf32, #tpu.memory_space<vmem>>, %arg4: memref<256x768xf32, #tpu.memory_space<vmem>>, %arg5: memref<1x768xf32, #tpu.memory_space<vmem>>, %arg6: memref<256x256xf32, #tpu.memory_space<vmem>>, %arg7: memref<1x256xf32, #tpu.memory_space<vmem>>, %arg8: memref<1x256xf32, #tpu.memory_space<vmem>>, %arg9: memref<1x256xf32, #tpu.memory_space<vmem>>, %arg10: memref<256x1024xf32, #tpu.memory_space<vmem>>, %arg11: memref<1x1024xf32, #tpu.memory_space<vmem>>, %arg12: memref<1024x256xf32, #tpu.memory_space<vmem>>, %arg13: memref<1x256xf32, #tpu.memory_space<vmem>>, %arg14: memref<1x16x256xf32, #tpu.memory_space<vmem>>) attributes {dimension_semantics = [#tpu.dimension_semantics<parallel>], iteration_bounds = array<i64: 2>, scalar_prefetch = 0 : i64, scratch_operands = 0 : i64, tpu.core_type = #tpu.core_type<tc>, window_params = [{transform_indices = @transform_0, window_bounds = array<i64: 1, 16, 256>}, {pipeline_mode = #tpu.pipeline_mode<synchronous>, transform_indices = @transform_1, window_bounds = array<i64: 1, 256>}, {pipeline_mode = #tpu.pipeline_mode<synchronous>, transform_indices = @transform_2, window_bounds = array<i64: 1, 256>}, {pipeline_mode = #tpu.pipeline_mode<synchronous>, transform_indices = @transform_3, window_bounds = array<i64: 256, 768>}, {pipeline_mode = #tpu.pipeline_mode<synchronous>, transform_indices = @transform_4, window_bounds = array<i64: 1, 768>}, {pipeline_mode = #tpu.pipeline_mode<synchronous>, transform_indices = @transform_5, window_bounds = array<i64: 256, 256>}, {pipeline_mode = #tpu.pipeline_mode<synchronous>, transform_indices = @transform_6, window_bounds = array<i64: 1, 256>}, {pipeline_mode = #tpu.pipeline_mode<synchronous>, transform_indices = @transform_7, window_bounds = array<i64: 1, 256>}, {pipeline_mode = #tpu.pipeline_mode<synchronous>, transform_indices = @transform_8, window_bounds = array<i64: 1, 256>}, {pipeline_mode = #tpu.pipeline_mode<synchronous>, transform_indices = @transform_9, window_bounds = array<i64: 256, 1024>}, {pipeline_mode = #tpu.pipeline_mode<synchronous>, transform_indices = @transform_10, window_bounds = array<i64: 1, 1024>}, {pipeline_mode = #tpu.pipeline_mode<synchronous>, transform_indices = @transform_11, window_bounds = array<i64: 1024, 256>}, {pipeline_mode = #tpu.pipeline_mode<synchronous>, transform_indices = @transform_12, window_bounds = array<i64: 1, 256>}, {transform_indices = @transform_13, window_bounds = array<i64: 1, 16, 256>}]} {
    %c0 = arith.constant 0 : index
    %c0_0 = arith.constant 0 : index
    %c0_1 = arith.constant 0 : index
    %0 = vector.load %arg1[%c0, %c0_0, %c0_1] : memref<1x16x256xf32, #tpu.memory_space<vmem>>, vector<1x16x256xf32>
    %1 = vector.shape_cast %0 : vector<1x16x256xf32> to vector<16x256xf32>
    %c0_2 = arith.constant 0 : index
    %c0_3 = arith.constant 0 : index
    %2 = vector.load %arg2[%c0_2, %c0_3] : memref<1x256xf32, #tpu.memory_space<vmem>>, vector<1x256xf32>
    %c0_4 = arith.constant 0 : index
    %c0_5 = arith.constant 0 : index
    %3 = vector.load %arg3[%c0_4, %c0_5] : memref<1x256xf32, #tpu.memory_space<vmem>>, vector<1x256xf32>
    %cst = arith.constant dense<0.000000e+00> : vector<16xf32>
    %4 = vector.multi_reduction <add>, %1, %cst [1] : vector<16x256xf32> to vector<16xf32>
    %5 = vector.shape_cast %4 : vector<16xf32> to vector<16x1xf32>
    %cst_6 = arith.constant 2.560000e+02 : f32
    %6 = vector.broadcast %cst_6 : f32 to vector<16x1xf32>
    %7 = arith.divf %5, %6 : vector<16x1xf32>
    %8 = vector.broadcast %7 : vector<16x1xf32> to vector<16x256xf32>
    %9 = arith.subf %1, %8 : vector<16x256xf32>
    %10 = arith.mulf %9, %9 : vector<16x256xf32>
    %cst_7 = arith.constant dense<0.000000e+00> : vector<16xf32>
    %11 = vector.multi_reduction <add>, %10, %cst_7 [1] : vector<16x256xf32> to vector<16xf32>
    %12 = vector.shape_cast %11 : vector<16xf32> to vector<16x1xf32>
    %cst_8 = arith.constant 2.560000e+02 : f32
    %13 = vector.broadcast %cst_8 : f32 to vector<16x1xf32>
    %14 = arith.divf %12, %13 : vector<16x1xf32>
    %15 = vector.broadcast %7 : vector<16x1xf32> to vector<16x256xf32>
    %16 = arith.subf %1, %15 : vector<16x256xf32>
    %cst_9 = arith.constant 9.99999974E-6 : f32
    %17 = vector.broadcast %cst_9 : f32 to vector<16x1xf32>
    %18 = arith.addf %14, %17 : vector<16x1xf32>
    %19 = math.rsqrt %18 : vector<16x1xf32>
    %20 = vector.broadcast %19 : vector<16x1xf32> to vector<16x256xf32>
    %21 = arith.mulf %16, %20 : vector<16x256xf32>
    %22 = vector.broadcast %2 : vector<1x256xf32> to vector<16x256xf32>
    %23 = arith.mulf %21, %22 : vector<16x256xf32>
    %24 = vector.broadcast %3 : vector<1x256xf32> to vector<16x256xf32>
    %25 = arith.addf %23, %24 : vector<16x256xf32>
    %c0_10 = arith.constant 0 : index
    %c0_11 = arith.constant 0 : index
    %26 = vector.load %arg4[%c0_10, %c0_11] : memref<256x768xf32, #tpu.memory_space<vmem>>, vector<256x768xf32>
    %cst_12 = arith.constant dense<0.000000e+00> : vector<16x768xf32>
    %27 = tpu.matmul %25, %26, %cst_12 {dimension_numbers = #tpu.dot_dimension_numbers<[1], [0], [0], [1], [0, 0, 1, 1], [], []>} : vector<16x256xf32>, vector<256x768xf32>, vector<16x768xf32> -> vector<16x768xf32>
    %c0_13 = arith.constant 0 : index
    %c0_14 = arith.constant 0 : index
    %28 = vector.load %arg5[%c0_13, %c0_14] : memref<1x768xf32, #tpu.memory_space<vmem>>, vector<1x768xf32>
    %29 = vector.broadcast %28 : vector<1x768xf32> to vector<16x768xf32>
    %30 = arith.addf %27, %29 : vector<16x768xf32>
    %31 = vector.extract_strided_slice %30 {offsets = [0, 0], sizes = [16, 256], strides = [1, 1]} : vector<16x768xf32> to vector<16x256xf32>
    %32 = vector.extract_strided_slice %30 {offsets = [0, 256], sizes = [16, 256], strides = [1, 1]} : vector<16x768xf32> to vector<16x256xf32>
    %33 = vector.extract_strided_slice %30 {offsets = [0, 512], sizes = [16, 256], strides = [1, 1]} : vector<16x768xf32> to vector<16x256xf32>
    %34 = vector.shape_cast %31 : vector<16x256xf32> to vector<1x16x4x64xf32>
    %35 = tpu.transpose %34, [0, 2, 1, 3] : vector<1x16x4x64xf32> -> vector<1x4x16x64xf32>
    %36 = vector.shape_cast %35 : vector<1x4x16x64xf32> to vector<4x16x64xf32>
    %37 = vector.shape_cast %32 : vector<16x256xf32> to vector<1x16x4x64xf32>
    %38 = tpu.transpose %37, [0, 2, 1, 3] : vector<1x16x4x64xf32> -> vector<1x4x16x64xf32>
    %39 = vector.shape_cast %38 : vector<1x4x16x64xf32> to vector<4x16x64xf32>
    %40 = vector.shape_cast %33 : vector<16x256xf32> to vector<1x16x4x64xf32>
    %41 = tpu.transpose %40, [0, 2, 1, 3] : vector<1x16x4x64xf32> -> vector<1x4x16x64xf32>
    %42 = vector.shape_cast %41 : vector<1x4x16x64xf32> to vector<4x16x64xf32>
    "tpu.trace_start"() <{level = 10 : i32, message = "bqd,bkd->bqk"}> : () -> ()
    %cst_15 = arith.constant dense<0.000000e+00> : vector<4x16x16xf32>
    %43 = tpu.matmul %36, %39, %cst_15 {dimension_numbers = #tpu.dot_dimension_numbers<[2], [2], [1], [1], [0, 0, 0, 1, 1, 1], [0], [0]>} : vector<4x16x64xf32>, vector<4x16x64xf32>, vector<4x16x16xf32> -> vector<4x16x16xf32>
    "tpu.trace_stop"() : () -> ()
    %cst_16 = arith.constant dense<0xFF800000> : vector<4x16xf32>
    %44 = vector.multi_reduction <maximumf>, %43, %cst_16 [2] : vector<4x16x16xf32> to vector<4x16xf32>
    %45 = vector.shape_cast %44 : vector<4x16xf32> to vector<4x16x1xf32>
    %46 = vector.broadcast %45 : vector<4x16x1xf32> to vector<4x16x16xf32>
    %47 = arith.subf %43, %46 : vector<4x16x16xf32>
    %48 = math.exp %47 : vector<4x16x16xf32>
    %cst_17 = arith.constant dense<0.000000e+00> : vector<4x16xf32>
    %49 = vector.multi_reduction <add>, %48, %cst_17 [2] : vector<4x16x16xf32> to vector<4x16xf32>
    %50 = vector.shape_cast %49 : vector<4x16xf32> to vector<4x16x1xf32>
    %51 = tpu.reciprocal %50 : vector<4x16x1xf32> -> vector<4x16x1xf32>
    %52 = vector.broadcast %51 : vector<4x16x1xf32> to vector<4x16x16xf32>
    %53 = arith.mulf %48, %52 : vector<4x16x16xf32>
    "tpu.trace_start"() <{level = 10 : i32, message = "bqk,bkd->bqd"}> : () -> ()
    %cst_18 = arith.constant dense<0.000000e+00> : vector<4x16x64xf32>
    %54 = tpu.matmul %53, %42, %cst_18 {dimension_numbers = #tpu.dot_dimension_numbers<[2], [1], [1], [2], [0, 0, 0, 1, 1, 2], [0], [0]>} : vector<4x16x16xf32>, vector<4x16x64xf32>, vector<4x16x64xf32> -> vector<4x16x64xf32>
    "tpu.trace_stop"() : () -> ()
    %55 = vector.shape_cast %54 : vector<4x16x64xf32> to vector<1x4x16x64xf32>
    %56 = tpu.transpose %55, [0, 2, 1, 3] : vector<1x4x16x64xf32> -> vector<1x16x4x64xf32>
    %57 = vector.shape_cast %56 : vector<1x16x4x64xf32> to vector<16x256xf32>
    %c0_19 = arith.constant 0 : index
    %c0_20 = arith.constant 0 : index
    %58 = vector.load %arg6[%c0_19, %c0_20] : memref<256x256xf32, #tpu.memory_space<vmem>>, vector<256x256xf32>
    %cst_21 = arith.constant dense<0.000000e+00> : vector<16x256xf32>
    %59 = tpu.matmul %57, %58, %cst_21 {dimension_numbers = #tpu.dot_dimension_numbers<[1], [0], [0], [1], [0, 0, 1, 1], [], []>} : vector<16x256xf32>, vector<256x256xf32>, vector<16x256xf32> -> vector<16x256xf32>
    %c0_22 = arith.constant 0 : index
    %c0_23 = arith.constant 0 : index
    %60 = vector.load %arg7[%c0_22, %c0_23] : memref<1x256xf32, #tpu.memory_space<vmem>>, vector<1x256xf32>
    %61 = vector.broadcast %60 : vector<1x256xf32> to vector<16x256xf32>
    %62 = arith.addf %59, %61 : vector<16x256xf32>
    %63 = arith.addf %1, %62 : vector<16x256xf32>
    %c0_24 = arith.constant 0 : index
    %c0_25 = arith.constant 0 : index
    %64 = vector.load %arg8[%c0_24, %c0_25] : memref<1x256xf32, #tpu.memory_space<vmem>>, vector<1x256xf32>
    %c0_26 = arith.constant 0 : index
    %c0_27 = arith.constant 0 : index
    %65 = vector.load %arg9[%c0_26, %c0_27] : memref<1x256xf32, #tpu.memory_space<vmem>>, vector<1x256xf32>
    %cst_28 = arith.constant dense<0.000000e+00> : vector<16xf32>
    %66 = vector.multi_reduction <add>, %63, %cst_28 [1] : vector<16x256xf32> to vector<16xf32>
    %67 = vector.shape_cast %66 : vector<16xf32> to vector<16x1xf32>
    %cst_29 = arith.constant 2.560000e+02 : f32
    %68 = vector.broadcast %cst_29 : f32 to vector<16x1xf32>
    %69 = arith.divf %67, %68 : vector<16x1xf32>
    %70 = vector.broadcast %69 : vector<16x1xf32> to vector<16x256xf32>
    %71 = arith.subf %63, %70 : vector<16x256xf32>
    %72 = arith.mulf %71, %71 : vector<16x256xf32>
    %cst_30 = arith.constant dense<0.000000e+00> : vector<16xf32>
    %73 = vector.multi_reduction <add>, %72, %cst_30 [1] : vector<16x256xf32> to vector<16xf32>
    %74 = vector.shape_cast %73 : vector<16xf32> to vector<16x1xf32>
    %cst_31 = arith.constant 2.560000e+02 : f32
    %75 = vector.broadcast %cst_31 : f32 to vector<16x1xf32>
    %76 = arith.divf %74, %75 : vector<16x1xf32>
    %77 = vector.broadcast %69 : vector<16x1xf32> to vector<16x256xf32>
    %78 = arith.subf %63, %77 : vector<16x256xf32>
    %cst_32 = arith.constant 9.99999974E-6 : f32
    %79 = vector.broadcast %cst_32 : f32 to vector<16x1xf32>
    %80 = arith.addf %76, %79 : vector<16x1xf32>
    %81 = math.rsqrt %80 : vector<16x1xf32>
    %82 = vector.broadcast %81 : vector<16x1xf32> to vector<16x256xf32>
    %83 = arith.mulf %78, %82 : vector<16x256xf32>
    %84 = vector.broadcast %64 : vector<1x256xf32> to vector<16x256xf32>
    %85 = arith.mulf %83, %84 : vector<16x256xf32>
    %86 = vector.broadcast %65 : vector<1x256xf32> to vector<16x256xf32>
    %87 = arith.addf %85, %86 : vector<16x256xf32>
    %c0_33 = arith.constant 0 : index
    %c0_34 = arith.constant 0 : index
    %88 = vector.load %arg13[%c0_33, %c0_34] : memref<1x256xf32, #tpu.memory_space<vmem>>, vector<1x256xf32>
    %89 = vector.broadcast %88 : vector<1x256xf32> to vector<16x256xf32>
    %90 = arith.addf %63, %89 : vector<16x256xf32>
    %c0_35 = arith.constant 0 : index
    %c0_36 = arith.constant 0 : index
    %91 = vector.load %arg10[%c0_35, %c0_36] : memref<256x1024xf32, #tpu.memory_space<vmem>>, vector<256x1024xf32>
    %cst_37 = arith.constant dense<0.000000e+00> : vector<16x1024xf32>
    %92 = tpu.matmul %87, %91, %cst_37 {dimension_numbers = #tpu.dot_dimension_numbers<[1], [0], [0], [1], [0, 0, 1, 1], [], []>} : vector<16x256xf32>, vector<256x1024xf32>, vector<16x1024xf32> -> vector<16x1024xf32>
    %c0_38 = arith.constant 0 : index
    %c0_39 = arith.constant 0 : index
    %93 = vector.load %arg11[%c0_38, %c0_39] : memref<1x1024xf32, #tpu.memory_space<vmem>>, vector<1x1024xf32>
    %94 = vector.broadcast %93 : vector<1x1024xf32> to vector<16x1024xf32>
    %95 = arith.addf %92, %94 : vector<16x1024xf32>
    %cst_40 = arith.constant 1.702000e+00 : f32
    %96 = vector.broadcast %cst_40 : f32 to vector<16x1024xf32>
    %97 = arith.mulf %96, %95 : vector<16x1024xf32>
    %98 = arith.negf %97 : vector<16x1024xf32>
    %99 = math.exp %98 : vector<16x1024xf32>
    %cst_41 = arith.constant 1.000000e+00 : f32
    %100 = vector.broadcast %cst_41 : f32 to vector<16x1024xf32>
    %101 = arith.addf %100, %99 : vector<16x1024xf32>
    %102 = arith.divf %100, %101 : vector<16x1024xf32>
    %103 = arith.mulf %95, %102 : vector<16x1024xf32>
    %c0_42 = arith.constant 0 : index
    %c0_43 = arith.constant 0 : index
    %104 = vector.load %arg12[%c0_42, %c0_43] : memref<1024x256xf32, #tpu.memory_space<vmem>>, vector<1024x256xf32>
    %cst_44 = arith.constant dense<0.000000e+00> : vector<16x256xf32>
    %105 = tpu.matmul %103, %104, %cst_44 {dimension_numbers = #tpu.dot_dimension_numbers<[1], [0], [0], [1], [0, 0, 1, 1], [], []>} : vector<16x1024xf32>, vector<1024x256xf32>, vector<16x256xf32> -> vector<16x256xf32>
    %106 = arith.addf %90, %105 : vector<16x256xf32>
    %107 = vector.shape_cast %106 : vector<16x256xf32> to vector<1x16x256xf32>
    %c0_45 = arith.constant 0 : index
    %c0_46 = arith.constant 0 : index
    %c0_47 = arith.constant 0 : index
    %108 = vector.load %arg14[%c0_45, %c0_46, %c0_47] : memref<1x16x256xf32, #tpu.memory_space<vmem>>, vector<1x16x256xf32>
    tpu.vector_store %arg14[%c0_45, %c0_46, %c0_47], %107 {strides = array<i32>} : memref<1x16x256xf32, #tpu.memory_space<vmem>>, vector<1x16x256xf32>,
    return
  }
  func.func @transform_0(%arg0: i32) -> (i32, i32, i32) {
    %c0_i32 = arith.constant 0 : i32
    %c0_i32_0 = arith.constant 0 : i32
    %c0_i32_1 = arith.constant 0 : i32
    return %arg0, %c0_i32, %c0_i32_0 : i32, i32, i32
  }
  func.func @transform_1(%arg0: i32) -> (i32, i32) {
    %c0_i32 = arith.constant 0 : i32
    %c0_i32_0 = arith.constant 0 : i32
    %c0_i32_1 = arith.constant 0 : i32
    return %c0_i32, %c0_i32_0 : i32, i32
  }
  func.func @transform_2(%arg0: i32) -> (i32, i32) {
    %c0_i32 = arith.constant 0 : i32
    %c0_i32_0 = arith.constant 0 : i32
    %c0_i32_1 = arith.constant 0 : i32
    return %c0_i32, %c0_i32_0 : i32, i32
  }
  func.func @transform_3(%arg0: i32) -> (i32, i32) {
    %c0_i32 = arith.constant 0 : i32
    %c0_i32_0 = arith.constant 0 : i32
    %c0_i32_1 = arith.constant 0 : i32
    return %c0_i32, %c0_i32_0 : i32, i32
  }
  func.func @transform_4(%arg0: i32) -> (i32, i32) {
    %c0_i32 = arith.constant 0 : i32
    %c0_i32_0 = arith.constant 0 : i32
    %c0_i32_1 = arith.constant 0 : i32
    return %c0_i32, %c0_i32_0 : i32, i32
  }
  func.func @transform_5(%arg0: i32) -> (i32, i32) {
    %c0_i32 = arith.constant 0 : i32
    %c0_i32_0 = arith.constant 0 : i32
    %c0_i32_1 = arith.constant 0 : i32
    return %c0_i32, %c0_i32_0 : i32, i32
  }
  func.func @transform_6(%arg0: i32) -> (i32, i32) {
    %c0_i32 = arith.constant 0 : i32
    %c0_i32_0 = arith.constant 0 : i32
    %c0_i32_1 = arith.constant 0 : i32
    return %c0_i32, %c0_i32_0 : i32, i32
  }
  func.func @transform_7(%arg0: i32) -> (i32, i32) {
    %c0_i32 = arith.constant 0 : i32
    %c0_i32_0 = arith.constant 0 : i32
    %c0_i32_1 = arith.constant 0 : i32
    return %c0_i32, %c0_i32_0 : i32, i32
  }
  func.func @transform_8(%arg0: i32) -> (i32, i32) {
    %c0_i32 = arith.constant 0 : i32
    %c0_i32_0 = arith.constant 0 : i32
    %c0_i32_1 = arith.constant 0 : i32
    return %c0_i32, %c0_i32_0 : i32, i32
  }
  func.func @transform_9(%arg0: i32) -> (i32, i32) {
    %c0_i32 = arith.constant 0 : i32
    %c0_i32_0 = arith.constant 0 : i32
    %c0_i32_1 = arith.constant 0 : i32
    return %c0_i32, %c0_i32_0 : i32, i32
  }
  func.func @transform_10(%arg0: i32) -> (i32, i32) {
    %c0_i32 = arith.constant 0 : i32
    %c0_i32_0 = arith.constant 0 : i32
    %c0_i32_1 = arith.constant 0 : i32
    return %c0_i32, %c0_i32_0 : i32, i32
  }
  func.func @transform_11(%arg0: i32) -> (i32, i32) {
    %c0_i32 = arith.constant 0 : i32
    %c0_i32_0 = arith.constant 0 : i32
    %c0_i32_1 = arith.constant 0 : i32
    return %c0_i32, %c0_i32_0 : i32, i32
  }
  func.func @transform_12(%arg0: i32) -> (i32, i32) {
    %c0_i32 = arith.constant 0 : i32
    %c0_i32_0 = arith.constant 0 : i32
    %c0_i32_1 = arith.constant 0 : i32
    return %c0_i32, %c0_i32_0 : i32, i32
  }
  func.func @transform_13(%arg0: i32) -> (i32, i32, i32) {
    %c0_i32 = arith.constant 0 : i32
    %c0_i32_0 = arith.constant 0 : i32
    %c0_i32_1 = arith.constant 0 : i32
    return %arg0, %c0_i32, %c0_i32_0 : i32, i32, i32
  }
}

module attributes {stable_mosaic.version = 11 : i64} {
  func.func @_block_kernel(%arg0: i32, %arg1: memref<1x16x256xf32, #tpu.memory_space<vmem>>, %arg2: memref<1x256xf32, #tpu.memory_space<vmem>>, %arg3: memref<1x256xf32, #tpu.memory_space<vmem>>, %arg4: memref<256x768xf32, #tpu.memory_space<vmem>>, %arg5: memref<1x768xf32, #tpu.memory_space<vmem>>, %arg6: memref<256x256xf32, #tpu.memory_space<vmem>>, %arg7: memref<1x256xf32, #tpu.memory_space<vmem>>, %arg8: memref<1x256xf32, #tpu.memory_space<vmem>>, %arg9: memref<1x256xf32, #tpu.memory_space<vmem>>, %arg10: memref<256x1024xf32, #tpu.memory_space<vmem>>, %arg11: memref<1x1024xf32, #tpu.memory_space<vmem>>, %arg12: memref<1024x256xf32, #tpu.memory_space<vmem>>, %arg13: memref<1x256xf32, #tpu.memory_space<vmem>>, %arg14: memref<1x16x256xf32, #tpu.memory_space<vmem>>) attributes {dimension_semantics = [#tpu.dimension_semantics<parallel>], iteration_bounds = array<i64: 2>, scalar_prefetch = 0 : i64, scratch_operands = 0 : i64, tpu.core_type = #tpu.core_type<tc>, window_params = [{transform_indices = @transform_0, window_bounds = array<i64: 1, 16, 256>}, {pipeline_mode = #tpu.pipeline_mode<synchronous>, transform_indices = @transform_1, window_bounds = array<i64: 1, 256>}, {pipeline_mode = #tpu.pipeline_mode<synchronous>, transform_indices = @transform_2, window_bounds = array<i64: 1, 256>}, {pipeline_mode = #tpu.pipeline_mode<synchronous>, transform_indices = @transform_3, window_bounds = array<i64: 256, 768>}, {pipeline_mode = #tpu.pipeline_mode<synchronous>, transform_indices = @transform_4, window_bounds = array<i64: 1, 768>}, {pipeline_mode = #tpu.pipeline_mode<synchronous>, transform_indices = @transform_5, window_bounds = array<i64: 256, 256>}, {pipeline_mode = #tpu.pipeline_mode<synchronous>, transform_indices = @transform_6, window_bounds = array<i64: 1, 256>}, {pipeline_mode = #tpu.pipeline_mode<synchronous>, transform_indices = @transform_7, window_bounds = array<i64: 1, 256>}, {pipeline_mode = #tpu.pipeline_mode<synchronous>, transform_indices = @transform_8, window_bounds = array<i64: 1, 256>}, {pipeline_mode = #tpu.pipeline_mode<synchronous>, transform_indices = @transform_9, window_bounds = array<i64: 256, 1024>}, {pipeline_mode = #tpu.pipeline_mode<synchronous>, transform_indices = @transform_10, window_bounds = array<i64: 1, 1024>}, {pipeline_mode = #tpu.pipeline_mode<synchronous>, transform_indices = @transform_11, window_bounds = array<i64: 1024, 256>}, {pipeline_mode = #tpu.pipeline_mode<synchronous>, transform_indices = @transform_12, window_bounds = array<i64: 1, 256>}, {transform_indices = @transform_13, window_bounds = array<i64: 1, 16, 256>}]} {
    %c0 = arith.constant 0 : index
    %c0_0 = arith.constant 0 : index
    %c0_1 = arith.constant 0 : index
    %0 = vector.load %arg1[%c0, %c0_0, %c0_1] : memref<1x16x256xf32, #tpu.memory_space<vmem>>, vector<1x16x256xf32>
    %1 = vector.shape_cast %0 : vector<1x16x256xf32> to vector<16x256xf32>
    %c0_2 = arith.constant 0 : index
    %c0_3 = arith.constant 0 : index
    %2 = vector.load %arg2[%c0_2, %c0_3] : memref<1x256xf32, #tpu.memory_space<vmem>>, vector<1x256xf32>
    %c0_4 = arith.constant 0 : index
    %c0_5 = arith.constant 0 : index
    %3 = vector.load %arg3[%c0_4, %c0_5] : memref<1x256xf32, #tpu.memory_space<vmem>>, vector<1x256xf32>
    %cst = arith.constant dense<0.000000e+00> : vector<16xf32>
    %4 = vector.multi_reduction <add>, %1, %cst [1] : vector<16x256xf32> to vector<16xf32>
    %5 = vector.shape_cast %4 : vector<16xf32> to vector<16x1xf32>
    %cst_6 = arith.constant 2.560000e+02 : f32
    %6 = vector.broadcast %cst_6 : f32 to vector<16x1xf32>
    %7 = arith.divf %5, %6 : vector<16x1xf32>
    %8 = vector.broadcast %7 : vector<16x1xf32> to vector<16x256xf32>
    %9 = arith.subf %1, %8 : vector<16x256xf32>
    %10 = arith.mulf %9, %9 : vector<16x256xf32>
    %cst_7 = arith.constant dense<0.000000e+00> : vector<16xf32>
    %11 = vector.multi_reduction <add>, %10, %cst_7 [1] : vector<16x256xf32> to vector<16xf32>
    %12 = vector.shape_cast %11 : vector<16xf32> to vector<16x1xf32>
    %cst_8 = arith.constant 2.560000e+02 : f32
    %13 = vector.broadcast %cst_8 : f32 to vector<16x1xf32>
    %14 = arith.divf %12, %13 : vector<16x1xf32>
    %15 = vector.broadcast %7 : vector<16x1xf32> to vector<16x256xf32>
    %16 = arith.subf %1, %15 : vector<16x256xf32>
    %cst_9 = arith.constant 9.99999974E-6 : f32
    %17 = vector.broadcast %cst_9 : f32 to vector<16x1xf32>
    %18 = arith.addf %14, %17 : vector<16x1xf32>
    %19 = math.rsqrt %18 : vector<16x1xf32>
    %20 = vector.broadcast %19 : vector<16x1xf32> to vector<16x256xf32>
    %21 = arith.mulf %16, %20 : vector<16x256xf32>
    %22 = vector.broadcast %2 : vector<1x256xf32> to vector<16x256xf32>
    %23 = arith.mulf %21, %22 : vector<16x256xf32>
    %24 = vector.broadcast %3 : vector<1x256xf32> to vector<16x256xf32>
    %25 = arith.addf %23, %24 : vector<16x256xf32>
    %c0_10 = arith.constant 0 : index
    %c0_11 = arith.constant 0 : index
    %26 = vector.load %arg4[%c0_10, %c0_11] : memref<256x768xf32, #tpu.memory_space<vmem>>, vector<256x768xf32>
    %cst_12 = arith.constant dense<0.000000e+00> : vector<16x768xf32>
    %27 = tpu.matmul %25, %26, %cst_12 {dimension_numbers = #tpu.dot_dimension_numbers<[1], [0], [0], [1], [0, 0, 1, 1], [], []>} : vector<16x256xf32>, vector<256x768xf32>, vector<16x768xf32> -> vector<16x768xf32>
    %c0_13 = arith.constant 0 : index
    %c0_14 = arith.constant 0 : index
    %28 = vector.load %arg5[%c0_13, %c0_14] : memref<1x768xf32, #tpu.memory_space<vmem>>, vector<1x768xf32>
    %29 = vector.broadcast %28 : vector<1x768xf32> to vector<16x768xf32>
    %30 = arith.addf %27, %29 : vector<16x768xf32>
    %31 = vector.extract_strided_slice %30 {offsets = [0, 0], sizes = [16, 256], strides = [1, 1]} : vector<16x768xf32> to vector<16x256xf32>
    %32 = vector.extract_strided_slice %30 {offsets = [0, 256], sizes = [16, 256], strides = [1, 1]} : vector<16x768xf32> to vector<16x256xf32>
    %33 = vector.extract_strided_slice %30 {offsets = [0, 512], sizes = [16, 256], strides = [1, 1]} : vector<16x768xf32> to vector<16x256xf32>
    %34 = vector.shape_cast %31 : vector<16x256xf32> to vector<1x16x4x64xf32>
    %35 = tpu.transpose %34, [0, 2, 1, 3] : vector<1x16x4x64xf32> -> vector<1x4x16x64xf32>
    %36 = vector.shape_cast %35 : vector<1x4x16x64xf32> to vector<4x16x64xf32>
    %37 = vector.shape_cast %32 : vector<16x256xf32> to vector<1x16x4x64xf32>
    %38 = tpu.transpose %37, [0, 2, 1, 3] : vector<1x16x4x64xf32> -> vector<1x4x16x64xf32>
    %39 = vector.shape_cast %38 : vector<1x4x16x64xf32> to vector<4x16x64xf32>
    %40 = vector.shape_cast %33 : vector<16x256xf32> to vector<1x16x4x64xf32>
    %41 = tpu.transpose %40, [0, 2, 1, 3] : vector<1x16x4x64xf32> -> vector<1x4x16x64xf32>
    %42 = vector.shape_cast %41 : vector<1x4x16x64xf32> to vector<4x16x64xf32>
    "tpu.trace_start"() <{level = 10 : i32, message = "bqd,bkd->bqk"}> : () -> ()
    %cst_15 = arith.constant dense<0.000000e+00> : vector<4x16x16xf32>
    %43 = tpu.matmul %36, %39, %cst_15 {dimension_numbers = #tpu.dot_dimension_numbers<[2], [2], [1], [1], [0, 0, 0, 1, 1, 1], [0], [0]>} : vector<4x16x64xf32>, vector<4x16x64xf32>, vector<4x16x16xf32> -> vector<4x16x16xf32>
    "tpu.trace_stop"() : () -> ()
    %cst_16 = arith.constant dense<0xFF800000> : vector<4x16xf32>
    %44 = vector.multi_reduction <maximumf>, %43, %cst_16 [2] : vector<4x16x16xf32> to vector<4x16xf32>
    %45 = vector.shape_cast %44 : vector<4x16xf32> to vector<4x16x1xf32>
    %46 = vector.broadcast %45 : vector<4x16x1xf32> to vector<4x16x16xf32>
    %47 = arith.subf %43, %46 : vector<4x16x16xf32>
    %48 = math.exp %47 : vector<4x16x16xf32>
    %cst_17 = arith.constant dense<0.000000e+00> : vector<4x16xf32>
    %49 = vector.multi_reduction <add>, %48, %cst_17 [2] : vector<4x16x16xf32> to vector<4x16xf32>
    %50 = vector.shape_cast %49 : vector<4x16xf32> to vector<4x16x1xf32>
    %51 = tpu.reciprocal %50 : vector<4x16x1xf32> -> vector<4x16x1xf32>
    %52 = vector.broadcast %51 : vector<4x16x1xf32> to vector<4x16x16xf32>
    %53 = arith.mulf %48, %52 : vector<4x16x16xf32>
    "tpu.trace_start"() <{level = 10 : i32, message = "bqk,bkd->bqd"}> : () -> ()
    %cst_18 = arith.constant dense<0.000000e+00> : vector<4x16x64xf32>
    %54 = tpu.matmul %53, %42, %cst_18 {dimension_numbers = #tpu.dot_dimension_numbers<[2], [1], [1], [2], [0, 0, 0, 1, 1, 2], [0], [0]>} : vector<4x16x16xf32>, vector<4x16x64xf32>, vector<4x16x64xf32> -> vector<4x16x64xf32>
    "tpu.trace_stop"() : () -> ()
    %55 = vector.shape_cast %54 : vector<4x16x64xf32> to vector<1x4x16x64xf32>
    %56 = tpu.transpose %55, [0, 2, 1, 3] : vector<1x4x16x64xf32> -> vector<1x16x4x64xf32>
    %57 = vector.shape_cast %56 : vector<1x16x4x64xf32> to vector<16x256xf32>
    %c0_19 = arith.constant 0 : index
    %c0_20 = arith.constant 0 : index
    %58 = vector.load %arg6[%c0_19, %c0_20] : memref<256x256xf32, #tpu.memory_space<vmem>>, vector<256x256xf32>
    %cst_21 = arith.constant dense<0.000000e+00> : vector<16x256xf32>
    %59 = tpu.matmul %57, %58, %cst_21 {dimension_numbers = #tpu.dot_dimension_numbers<[1], [0], [0], [1], [0, 0, 1, 1], [], []>} : vector<16x256xf32>, vector<256x256xf32>, vector<16x256xf32> -> vector<16x256xf32>
    %c0_22 = arith.constant 0 : index
    %c0_23 = arith.constant 0 : index
    %60 = vector.load %arg7[%c0_22, %c0_23] : memref<1x256xf32, #tpu.memory_space<vmem>>, vector<1x256xf32>
    %61 = vector.broadcast %60 : vector<1x256xf32> to vector<16x256xf32>
    %62 = arith.addf %59, %61 : vector<16x256xf32>
    %63 = arith.addf %1, %62 : vector<16x256xf32>
    %c0_24 = arith.constant 0 : index
    %c0_25 = arith.constant 0 : index
    %64 = vector.load %arg8[%c0_24, %c0_25] : memref<1x256xf32, #tpu.memory_space<vmem>>, vector<1x256xf32>
    %c0_26 = arith.constant 0 : index
    %c0_27 = arith.constant 0 : index
    %65 = vector.load %arg9[%c0_26, %c0_27] : memref<1x256xf32, #tpu.memory_space<vmem>>, vector<1x256xf32>
    %cst_28 = arith.constant dense<0.000000e+00> : vector<16xf32>
    %66 = vector.multi_reduction <add>, %63, %cst_28 [1] : vector<16x256xf32> to vector<16xf32>
    %67 = vector.shape_cast %66 : vector<16xf32> to vector<16x1xf32>
    %cst_29 = arith.constant 2.560000e+02 : f32
    %68 = vector.broadcast %cst_29 : f32 to vector<16x1xf32>
    %69 = arith.divf %67, %68 : vector<16x1xf32>
    %70 = vector.broadcast %69 : vector<16x1xf32> to vector<16x256xf32>
    %71 = arith.subf %63, %70 : vector<16x256xf32>
    %72 = arith.mulf %71, %71 : vector<16x256xf32>
    %cst_30 = arith.constant dense<0.000000e+00> : vector<16xf32>
    %73 = vector.multi_reduction <add>, %72, %cst_30 [1] : vector<16x256xf32> to vector<16xf32>
    %74 = vector.shape_cast %73 : vector<16xf32> to vector<16x1xf32>
    %cst_31 = arith.constant 2.560000e+02 : f32
    %75 = vector.broadcast %cst_31 : f32 to vector<16x1xf32>
    %76 = arith.divf %74, %75 : vector<16x1xf32>
    %77 = vector.broadcast %69 : vector<16x1xf32> to vector<16x256xf32>
    %78 = arith.subf %63, %77 : vector<16x256xf32>
    %cst_32 = arith.constant 9.99999974E-6 : f32
    %79 = vector.broadcast %cst_32 : f32 to vector<16x1xf32>
    %80 = arith.addf %76, %79 : vector<16x1xf32>
    %81 = math.rsqrt %80 : vector<16x1xf32>
    %82 = vector.broadcast %81 : vector<16x1xf32> to vector<16x256xf32>
    %83 = arith.mulf %78, %82 : vector<16x256xf32>
    %84 = vector.broadcast %64 : vector<1x256xf32> to vector<16x256xf32>
    %85 = arith.mulf %83, %84 : vector<16x256xf32>
    %86 = vector.broadcast %65 : vector<1x256xf32> to vector<16x256xf32>
    %87 = arith.addf %85, %86 : vector<16x256xf32>
    %c0_33 = arith.constant 0 : index
    %c0_34 = arith.constant 0 : index
    %88 = vector.load %arg13[%c0_33, %c0_34] : memref<1x256xf32, #tpu.memory_space<vmem>>, vector<1x256xf32>
    %89 = vector.broadcast %88 : vector<1x256xf32> to vector<16x256xf32>
    %90 = arith.addf %63, %89 : vector<16x256xf32>
    %c0_35 = arith.constant 0 : index
    %c0_36 = arith.constant 0 : index
    %91 = vector.load %arg10[%c0_35, %c0_36] : memref<256x1024xf32, #tpu.memory_space<vmem>>, vector<256x1024xf32>
    %cst_37 = arith.constant dense<0.000000e+00> : vector<16x1024xf32>
    %92 = tpu.matmul %87, %91, %cst_37 {dimension_numbers = #tpu.dot_dimension_numbers<[1], [0], [0], [1], [0, 0, 1, 1], [], []>} : vector<16x256xf32>, vector<256x1024xf32>, vector<16x1024xf32> -> vector<16x1024xf32>
    %c0_38 = arith.constant 0 : index
    %c0_39 = arith.constant 0 : index
    %93 = vector.load %arg11[%c0_38, %c0_39] : memref<1x1024xf32, #tpu.memory_space<vmem>>, vector<1x1024xf32>
    %94 = vector.broadcast %93 : vector<1x1024xf32> to vector<16x1024xf32>
    %95 = arith.addf %92, %94 : vector<16x1024xf32>
    %cst_40 = arith.constant 1.702000e+00 : f32
    %96 = vector.broadcast %cst_40 : f32 to vector<16x1024xf32>
    %97 = arith.mulf %96, %95 : vector<16x1024xf32>
    %98 = arith.negf %97 : vector<16x1024xf32>
    %99 = math.exp %98 : vector<16x1024xf32>
    %cst_41 = arith.constant 1.000000e+00 : f32
    %100 = vector.broadcast %cst_41 : f32 to vector<16x1024xf32>
    %101 = arith.addf %100, %99 : vector<16x1024xf32>
    %102 = arith.divf %100, %101 : vector<16x1024xf32>
    %103 = arith.mulf %95, %102 : vector<16x1024xf32>
    %c0_42 = arith.constant 0 : index
    %c0_43 = arith.constant 0 : index
    %104 = vector.load %arg12[%c0_42, %c0_43] : memref<1024x256xf32, #tpu.memory_space<vmem>>, vector<1024x256xf32>
    %cst_44 = arith.constant dense<0.000000e+00> : vector<16x256xf32>
    %105 = tpu.matmul %103, %104, %cst_44 {dimension_numbers = #tpu.dot_dimension_numbers<[1], [0], [0], [1], [0, 0, 1, 1], [], []>} : vector<16x1024xf32>, vector<1024x256xf32>, vector<16x256xf32> -> vector<16x256xf32>
    %106 = arith.addf %90, %105 : vector<16x256xf32>
    %107 = vector.shape_cast %106 : vector<16x256xf32> to vector<1x16x256xf32>
    %c0_45 = arith.constant 0 : index
    %c0_46 = arith.constant 0 : index
    %c0_47 = arith.constant 0 : index
    %108 = vector.load %arg14[%c0_45, %c0_46, %c0_47] : memref<1x16x256xf32, #tpu.memory_space<vmem>>, vector<1x16x256xf32>
    tpu.vector_store %arg14[%c0_45, %c0_46, %c0_47], %107 {strides = array<i32>} : memref<1x16x256xf32, #tpu.memory_space<vmem>>, vector<1x16x256xf32>,
    return
  }
  func.func @transform_0(%arg0: i32) -> (i32, i32, i32) {
    %c0_i32 = arith.constant 0 : i32
    %c0_i32_0 = arith.constant 0 : i32
    %c0_i32_1 = arith.constant 0 : i32
    return %arg0, %c0_i32, %c0_i32_0 : i32, i32, i32
  }
  func.func @transform_1(%arg0: i32) -> (i32, i32) {
    %c0_i32 = arith.constant 0 : i32
    %c0_i32_0 = arith.constant 0 : i32
    %c0_i32_1 = arith.constant 0 : i32
    return %c0_i32, %c0_i32_0 : i32, i32
  }
  func.func @transform_2(%arg0: i32) -> (i32, i32) {
    %c0_i32 = arith.constant 0 : i32
    %c0_i32_0 = arith.constant 0 : i32
    %c0_i32_1 = arith.constant 0 : i32
    return %c0_i32, %c0_i32_0 : i32, i32
  }
  func.func @transform_3(%arg0: i32) -> (i32, i32) {
    %c0_i32 = arith.constant 0 : i32
    %c0_i32_0 = arith.constant 0 : i32
    %c0_i32_1 = arith.constant 0 : i32
    return %c0_i32, %c0_i32_0 : i32, i32
  }
  func.func @transform_4(%arg0: i32) -> (i32, i32) {
    %c0_i32 = arith.constant 0 : i32
    %c0_i32_0 = arith.constant 0 : i32
    %c0_i32_1 = arith.constant 0 : i32
    return %c0_i32, %c0_i32_0 : i32, i32
  }
  func.func @transform_5(%arg0: i32) -> (i32, i32) {
    %c0_i32 = arith.constant 0 : i32
    %c0_i32_0 = arith.constant 0 : i32
    %c0_i32_1 = arith.constant 0 : i32
    return %c0_i32, %c0_i32_0 : i32, i32
  }
  func.func @transform_6(%arg0: i32) -> (i32, i32) {
    %c0_i32 = arith.constant 0 : i32
    %c0_i32_0 = arith.constant 0 : i32
    %c0_i32_1 = arith.constant 0 : i32
    return %c0_i32, %c0_i32_0 : i32, i32
  }
  func.func @transform_7(%arg0: i32) -> (i32, i32) {
    %c0_i32 = arith.constant 0 : i32
    %c0_i32_0 = arith.constant 0 : i32
    %c0_i32_1 = arith.constant 0 : i32
    return %c0_i32, %c0_i32_0 : i32, i32
  }
  func.func @transform_8(%arg0: i32) -> (i32, i32) {
    %c0_i32 = arith.constant 0 : i32
    %c0_i32_0 = arith.constant 0 : i32
    %c0_i32_1 = arith.constant 0 : i32
    return %c0_i32, %c0_i32_0 : i32, i32
  }
  func.func @transform_9(%arg0: i32) -> (i32, i32) {
    %c0_i32 = arith.constant 0 : i32
    %c0_i32_0 = arith.constant 0 : i32
    %c0_i32_1 = arith.constant 0 : i32
    return %c0_i32, %c0_i32_0 : i32, i32
  }
  func.func @transform_10(%arg0: i32) -> (i32, i32) {
    %c0_i32 = arith.constant 0 : i32
    %c0_i32_0 = arith.constant 0 : i32
    %c0_i32_1 = arith.constant 0 : i32
    return %c0_i32, %c0_i32_0 : i32, i32
  }
  func.func @transform_11(%arg0: i32) -> (i32, i32) {
    %c0_i32 = arith.constant 0 : i32
    %c0_i32_0 = arith.constant 0 : i32
    %c0_i32_1 = arith.constant 0 : i32
    return %c0_i32, %c0_i32_0 : i32, i32
  }
  func.func @transform_12(%arg0: i32) -> (i32, i32) {
    %c0_i32 = arith.constant 0 : i32
    %c0_i32_0 = arith.constant 0 : i32
    %c0_i32_1 = arith.constant 0 : i32
    return %c0_i32, %c0_i32_0 : i32, i32
  }
  func.func @transform_13(%arg0: i32) -> (i32, i32, i32) {
    %c0_i32 = arith.constant 0 : i32
    %c0_i32_0 = arith.constant 0 : i32
    %c0_i32_1 = arith.constant 0 : i32
    return %arg0, %c0_i32, %c0_i32_0 : i32, i32, i32
  }
}

</mosaic_0001>

<bundles_post_ra>
// kernel: tpu_custom_call.1
= control target key start
LH: loop header
LB: loop body
LE: loop exit
PB: predicated region body
PF: predicated region fallthrough
CT: control target
= control target key end

     0   :  { %s7687_s0 = inlined_call_operand.hbm [shape: f32[2,16,256], index: 0, kind: input, shape index: {}]   ;;  %s7688_s1 = inlined_call_operand.hbm [shape: f32[1,256], index: 1, kind: input, shape index: {}]   ;;  %s7689_s2 = inlined_call_operand.hbm [shape: f32[1,256], index: 2, kind: input, shape index: {}]   ;;  %s7690_s3 = inlined_call_operand.hbm [shape: f32[256,768], index: 3, kind: input, shape index: {}]   ;;  %s7691_s4 = inlined_call_operand.hbm [shape: f32[1,768], index: 4, kind: input, shape index: {}]   ;;  %s7692_s5 = inlined_call_operand.hbm [shape: f32[256,256], index: 5, kind: input, shape index: {}]   ;;  %s7693_s6 = inlined_call_operand.hbm [shape: f32[1,256], index: 6, kind: input, shape index: {}]   ;;  %s7694_s7 = inlined_call_operand.hbm [shape: f32[1,256], index: 7, kind: input, shape index: {}]   ;;  %s7695_s8 = inlined_call_operand.hbm [shape: f32[1,256], index: 8, kind: input, shape index: {}]   ;;  %s7696_s9 = inlined_call_operand.hbm [shape: f32[256,1024], index: 9, kind: input, shape index: {}]   ;;  %s7697_s10 = inlined_call_operand.hbm [shape: f32[1,1024], index: 10, kind: input, shape index: {}]   ;;  %s7698_s11 = inlined_call_operand.hbm [shape: f32[1024,256], index: 11, kind: input, shape index: {}]   ;;  %s7699_s12 = inlined_call_operand.hbm [shape: f32[1,256], index: 12, kind: input, shape index: {}]   ;;  %s7700_s13 = inlined_call_operand.hbm [shape: f32[2,16,256], index: 13, kind: output, shape index: {}]  }
   0x1   :  { %7714 = sst [smem:[#allocation35_spill]] %s7687_s0 }
   0x2   :  { %7715 = sst [smem:[#allocation36_spill]] %s7688_s1 }
   0x3   :  { %7716 = sst [smem:[#allocation37_spill]] %s7689_s2 }
   0x4   :  { %7717 = sst [smem:[#allocation38_spill]] %s7690_s3 }
   0x5   :  { %7718 = sst [smem:[#allocation39_spill]] %s7700_s13 }
   0x6   :  { %18 = vsyncpa [#allocation3], 0 }
   0x7   :  { %20 = vsyncpa [#allocation3 + $0x1], 0 }
   0x8   :  { %21 = vsyncpa [#allocation6], 0 }
   0x9   :  { %22 = vsyncpa [#allocation9], 0 }
   0xa   :  { %23 = vsyncpa [#allocation12], 0 }
   0xb   :  { %24 = vsyncpa [#allocation15], 0 }
   0xc   :  { %25 = vsyncpa [#allocation18], 0 }
   0xd   :  { %26 = vsyncpa [#allocation21], 0 }
   0xe   :  { %27 = vsyncpa [#allocation4], 0 }
   0xf   :  { %29 = vsyncpa [#allocation4 + $0x1], 0  ;;  %s6656_s25 = smov 0   ;;  %s6658_s26 = smov 0  }
  0x10   :  { %s6660_s27 = smov 0   ;;  %s6662_s28 = smov 0  }
  0x11 LB: > { %7719 = sst [smem:[#allocation32_spill]] %s6547_s25  ;;  %s6561_s29 = smov [#allocation5]   ;;  %s6559_s28 = sphi %s6662_s28, %s7764_s28   ;;  %s6555_s27 = sphi %s6660_s27, %s7763_s27   ;;  %s6551_s26 = sphi %s6658_s26, %s7762_s26   ;;  %s6547_s25 = sphi %s6656_s25, %s7761_s25  }
  0x12   : > { %s357_s30 = sshll.u32 %s6561_s29, 4  ;;  %s6677_s14 = sadd.s32 4294967295, %s6559_s28   ;;  %s358_s30 = int_to_ptr.vmem [resolvable:$true] %s357_s30 }
  0x13   : > { %7720 = sst [smem:[#allocation33_spill]] %s6677_s14  ;;  %p4804_p0 = scmp.ge.s32.totalorder %s6559_s28, 1 }
  0x14   : > { %p7702_p1 = scmp.eq.s32.totalorder %s6677_s14, 0  ;;  %p344_p2 = scmp.lt.s32.totalorder %s6559_s28, 3 }
  0x15   : > { %s6562_s16 = smov [#allocation8]   ;;  %s6563_s19 = smov [#allocation11]  }
  0x16   : > { %p6682_p3 = pnand %p4804_p0, %p344_p2  ;;  %s378_s17 = sshll.u32 %s6562_s16, 4  ;;  %s6689_s17 = int_to_ptr.vmem [resolvable:$true] %s378_s17 }
  0x17   : > { %s402_s20 = sshll.u32 %s6563_s19, 4  ;;  %s7724_s1 = sld [smem:[#allocation36_spill]]  ;;  %s6697_s20 = int_to_ptr.vmem [resolvable:$true] %s402_s20 }
  0x18   : > { %s7721_s15 = scalar_select %p6682_p3, 1, 0 }
  0x19   : > { %p5859_p5 = pneg %p6682_p3 }
  0x1a   : > { %7722 = sst [smem:[#allocation34_spill]] %s7721_s15 }
  0x1b   : > { %p6693_p6 = pnand %p5859_p5, %p7702_p1 }
  0x1d   : > { %s6103_s23 = scalar_lea.hbm %s7724_s1, 32  ;;  %p6707_p8 = pneg %p6693_p6 }
  0x1e   : > { %p6104_p7 = scmp.ne.s32.totalorder %s7724_s1, %s6103_s23  ;;  %p6110_p11 = scmp.lt.u32.totalorder %s6103_s23, %s7724_s1 }
  0x20   : > { %p6106_p9 = pnand %p6707_p8, %p6104_p7 }
  0x22   : > { %p6107_p10 = pneg %p6106_p9 }
  0x24   : > { %p6112_p12 = pnand %p6110_p11, %p6107_p10 }
  0x26   : > { %6115 = shalt.err (!%p6112_p12)
}
  0x27   : > { %s6116_s21 = scalar_lea.vmem %s358_s30, 32  ;;  %p6124_p5 = scmp.lt.s32.totalorder %s358_s30, %s358_s30 }
  0x28   : > { %p6117_p13 = scmp.ne.s32.totalorder %s358_s30, %s6116_s21  ;;  %p6125_p4 = scmp.lt.s32.totalorder %s6116_s21, %s6116_s21 }
  0x2a   : > { %p6119_p0 = pnand %p6117_p13, %p6707_p8  ;;  %p6126_p1 = por %p6125_p4, %p6124_p5 }
  0x2c   : > { %p6120_p2 = pneg %p6119_p0 }
  0x2e   : > { %p6127_p3 = pnand %p6126_p1, %p6120_p2 }
  0x30   : > { %6130 = shalt.err (!%p6127_p3)
}
  0x31   : > { %5862 = dma.hbm_to_vmem [thread:$0]  (!%p6693_p6), %s7724_s1, 32, %s358_s30, [#allocation6]  }
  0x32   : > { %s7726_s3 = sld [smem:[#allocation38_spill]] }
  0x38   : > { %s6131_s29 = scalar_lea.hbm %s7726_s3, 24576 }
  0x39   : > { %p6132_p7 = scmp.ne.s32.totalorder %s7726_s3, %s6131_s29  ;;  %p6138_p1 = scmp.lt.u32.totalorder %s6131_s29, %s7726_s3 }
  0x3b   : > { %p6134_p9 = pnand %p6132_p7, %p6707_p8 }
  0x3d   : > { %p6135_p4 = pneg %p6134_p9 }
  0x3f   : > { %p6140_p3 = pnand %p6138_p1, %p6135_p4 }
  0x41   : > { %6143 = shalt.err (!%p6140_p3)
}
  0x42   : > { %s6144_s30 = scalar_lea.vmem %s6689_s17, 24576  ;;  %p6152_p13 = scmp.lt.s32.totalorder %s6689_s17, %s6689_s17 }
  0x43   : > { %p6145_p10 = scmp.ne.s32.totalorder %s6689_s17, %s6144_s30  ;;  %p6153_p0 = scmp.lt.s32.totalorder %s6144_s30, %s6144_s30 }
  0x45   : > { %p6147_p11 = pnand %p6145_p10, %p6707_p8  ;;  %p6154_p2 = por %p6153_p0, %p6152_p13 }
  0x47   : > { %p6148_p12 = pneg %p6147_p11 }
  0x49   : > { %p6155_p5 = pnand %p6154_p2, %p6148_p12 }
  0x4b   : > { %6158 = shalt.err (!%p6155_p5)
}
  0x4c   : > { %s6564_s15 = smov 768   ;;  %s6565_s0 = smov 48  }
  0x4d   : > { %5868 = dma.hbm_to_vmem [thread:$0]  (!%p6693_p6), %s7726_s3, 24576, %s6689_s17, [#allocation9], %s6564_s15, %s6564_s15, %s6565_s0  }
  0x4e   : > { %s6159_s29 = scalar_lea.hbm %s7692_s5, 8192 }
  0x4f   : > { %p6160_p7 = scmp.ne.s32.totalorder %s7692_s5, %s6159_s29  ;;  %p6166_p1 = scmp.lt.u32.totalorder %s6159_s29, %s7692_s5 }
  0x51   : > { %p6162_p9 = pnand %p6160_p7, %p6707_p8 }
  0x53   : > { %p6163_p4 = pneg %p6162_p9 }
  0x55   : > { %p6168_p3 = pnand %p6166_p1, %p6163_p4 }
  0x57   : > { %6171 = shalt.err (!%p6168_p3)
}
  0x58   : > { %s6172_s17 = scalar_lea.vmem %s6697_s20, 8192  ;;  %p6180_p13 = scmp.lt.s32.totalorder %s6697_s20, %s6697_s20 }
  0x59   : > { %p6173_p10 = scmp.ne.s32.totalorder %s6697_s20, %s6172_s17  ;;  %p6181_p0 = scmp.lt.s32.totalorder %s6172_s17, %s6172_s17 }
  0x5b   : > { %p6175_p11 = pnand %p6173_p10, %p6707_p8  ;;  %p6182_p2 = por %p6181_p0, %p6180_p13 }
  0x5d   : > { %p6176_p12 = pneg %p6175_p11 }
  0x5f   : > { %p6183_p5 = pnand %p6182_p2, %p6176_p12 }
  0x61   : > { %6186 = shalt.err (!%p6183_p5)
}
  0x62   : > { %s7709_s15 = smov 256   ;;  %s7711_s1 = smov 16  }
  0x63   : > { %5874 = dma.hbm_to_vmem [thread:$0]  (!%p6693_p6), %s7692_s5, 8192, %s6697_s20, [#allocation12], %s7709_s15, %s7709_s15, %s7711_s1  }
  0x64   : > { %s6568_s24 = smov [#allocation14]   ;;  %s6569_s23 = smov [#allocation17]  }
  0x65   : > { %s427_s13 = sshll.u32 %s6568_s24, 4  ;;  %s448_s29 = sshll.u32 %s6569_s23, 4  ;;  %s428_s13 = int_to_ptr.vmem [resolvable:$true] %s427_s13  ;;  %s449_s29 = int_to_ptr.vmem [resolvable:$true] %s448_s29 }
  0x66   : > { %s6187_s30 = scalar_lea.hbm %s7694_s7, 32 }
  0x67   : > { %p6188_p7 = scmp.ne.s32.totalorder %s7694_s7, %s6187_s30  ;;  %p6194_p1 = scmp.lt.u32.totalorder %s6187_s30, %s7694_s7 }
  0x69   : > { %p6190_p9 = pnand %p6188_p7, %p6707_p8 }
  0x6b   : > { %p6191_p4 = pneg %p6190_p9 }
  0x6d   : > { %p6196_p3 = pnand %p6194_p1, %p6191_p4 }
  0x6f   : > { %6199 = shalt.err (!%p6196_p3)
}
  0x70   : > { %s6200_s20 = scalar_lea.vmem %s428_s13, 32  ;;  %p6208_p13 = scmp.lt.s32.totalorder %s428_s13, %s428_s13 }
  0x71   : > { %p6201_p10 = scmp.ne.s32.totalorder %s428_s13, %s6200_s20  ;;  %p6209_p0 = scmp.lt.s32.totalorder %s6200_s20, %s6200_s20 }
  0x73   : > { %p6203_p11 = pnand %p6201_p10, %p6707_p8  ;;  %p6210_p2 = por %p6209_p0, %p6208_p13 }
  0x75   : > { %p6204_p12 = pneg %p6203_p11 }
  0x77   : > { %p6211_p5 = pnand %p6210_p2, %p6204_p12 }
  0x79   : > { %6214 = shalt.err (!%p6211_p5)
}
  0x7a   : > { %5880 = dma.hbm_to_vmem [thread:$0]  (!%p6693_p6), %s7694_s7, 32, %s428_s13, [#allocation15]  }
  0x7b   : > { %s6215_s22 = scalar_lea.hbm %s7696_s9, 32768 }
  0x7c   : > { %p6216_p7 = scmp.ne.s32.totalorder %s7696_s9, %s6215_s22  ;;  %p6222_p1 = scmp.lt.u32.totalorder %s6215_s22, %s7696_s9 }
  0x7e   : > { %p6218_p9 = pnand %p6216_p7, %p6707_p8 }
  0x80   : > { %p6219_p4 = pneg %p6218_p9 }
  0x82   : > { %p6224_p3 = pnand %p6222_p1, %p6219_p4 }
  0x84   : > { %6227 = shalt.err (!%p6224_p3)
}
  0x85   : > { %s6228_s30 = scalar_lea.vmem %s449_s29, 32768  ;;  %p6236_p13 = scmp.lt.s32.totalorder %s449_s29, %s449_s29 }
  0x86   : > { %p6229_p10 = scmp.ne.s32.totalorder %s449_s29, %s6228_s30  ;;  %p6237_p0 = scmp.lt.s32.totalorder %s6228_s30, %s6228_s30 }
  0x88   : > { %p6231_p11 = pnand %p6229_p10, %p6707_p8  ;;  %p6238_p2 = por %p6237_p0, %p6236_p13 }
  0x8a   : > { %p6232_p12 = pneg %p6231_p11 }
  0x8c   : > { %p6239_p5 = pnand %p6238_p2, %p6232_p12 }
  0x8e   : > { %6242 = shalt.err (!%p6239_p5)
}
  0x8f   : > { %s6570_s13 = smov 1024   ;;  %s6571_s17 = smov 64  }
  0x90   : > { %5886 = dma.hbm_to_vmem [thread:$0]  (!%p6693_p6), %s7696_s9, 32768, %s449_s29, [#allocation18], %s6570_s13, %s6570_s13, %s6571_s17  }
  0x91   : > { %s6572_s0 = smov [#allocation20]   ;;  %s6573_s14 = smov [#allocation7]  }
  0x92   : > { %s472_s25 = sshll.u32 %s6572_s0, 4  ;;  %s368_s22 = sshll.u32 %s6573_s14, 4  ;;  %s473_s25 = int_to_ptr.vmem [resolvable:$true] %s472_s25  ;;  %s369_s22 = int_to_ptr.vmem [resolvable:$true] %s368_s22 }
  0x93   : > { %s6243_s19 = scalar_lea.hbm %s7698_s11, 32768 }
  0x94   : > { %p6244_p7 = scmp.ne.s32.totalorder %s7698_s11, %s6243_s19  ;;  %p6250_p1 = scmp.lt.u32.totalorder %s6243_s19, %s7698_s11 }
  0x96   : > { %p6246_p9 = pnand %p6244_p7, %p6707_p8 }
  0x98   : > { %p6247_p4 = pneg %p6246_p9 }
  0x9a   : > { %p6252_p3 = pnand %p6250_p1, %p6247_p4 }
  0x9c   : > { %6255 = shalt.err (!%p6252_p3)
}
  0x9d   : > { %s6256_s29 = scalar_lea.vmem %s473_s25, 32768  ;;  %p6264_p13 = scmp.lt.s32.totalorder %s473_s25, %s473_s25 }
  0x9e   : > { %p6257_p10 = scmp.ne.s32.totalorder %s473_s25, %s6256_s29  ;;  %p6265_p0 = scmp.lt.s32.totalorder %s6256_s29, %s6256_s29 }
  0xa0   : > { %p6259_p11 = pnand %p6257_p10, %p6707_p8  ;;  %p6266_p2 = por %p6265_p0, %p6264_p13 }
  0xa2   : > { %p6260_p12 = pneg %p6259_p11 }
  0xa4   : > { %p6267_p5 = pnand %p6266_p2, %p6260_p12 }
  0xa6   : > { %6270 = shalt.err (!%p6267_p5)
}
  0xa7   : > { %s7727_s13 = smov 16   ;;  %s7728_s17 = smov 256  }
  0xa8   : > { %5892 = dma.hbm_to_vmem [thread:$0]  (!%p6693_p6), %s7698_s11, 32768, %s473_s25, [#allocation21], %s7728_s17, %s7728_s17, %s7727_s13  }
  0xa9   : > { %s7729_s2 = sld [smem:[#allocation37_spill]] }
  0xaf   : > { %s6271_s0 = scalar_lea.hbm %s7729_s2, 32 }
  0xb0   : > { %p6272_p7 = scmp.ne.s32.totalorder %s7729_s2, %s6271_s0  ;;  %p6278_p1 = scmp.lt.u32.totalorder %s6271_s0, %s7729_s2 }
  0xb2   : > { %p6274_p9 = pnand %p6272_p7, %p6707_p8 }
  0xb4   : > { %p6275_p4 = pneg %p6274_p9 }
  0xb6   : > { %p6280_p3 = pnand %p6278_p1, %p6275_p4 }
  0xb8   : > { %6283 = shalt.err (!%p6280_p3)
}
  0xb9   : > { %s6284_s21 = scalar_lea.vmem %s369_s22, 32  ;;  %p6292_p13 = scmp.lt.s32.totalorder %s369_s22, %s369_s22 }
  0xba   : > { %p6285_p10 = scmp.ne.s32.totalorder %s369_s22, %s6284_s21  ;;  %p6293_p0 = scmp.lt.s32.totalorder %s6284_s21, %s6284_s21 }
  0xbc   : > { %p6287_p11 = pnand %p6285_p10, %p6707_p8  ;;  %p6294_p2 = por %p6293_p0, %p6292_p13 }
  0xbe   : > { %p6288_p12 = pneg %p6287_p11 }
  0xc0   : > { %p6295_p5 = pnand %p6294_p2, %p6288_p12 }
  0xc2   : > { %6298 = shalt.err (!%p6295_p5)
}
  0xc3   : > { %5865 = dma.hbm_to_vmem [thread:$0]  (!%p6693_p6), %s7729_s2, 32, %s369_s22, [#allocation6]  }
  0xc4   : > { %s6574_s29 = smov [#allocation10]   ;;  %s6575_s1 = smov [#allocation13]  }
  0xc5   : > { %s392_s15 = sshll.u32 %s6574_s29, 4  ;;  %s416_s20 = sshll.u32 %s6575_s1, 4  ;;  %s393_s15 = int_to_ptr.vmem [resolvable:$true] %s392_s15  ;;  %s417_s20 = int_to_ptr.vmem [resolvable:$true] %s416_s20 }
  0xc6   : > { %s6299_s14 = scalar_lea.hbm %s7691_s4, 96 }
  0xc7   : > { %p6300_p7 = scmp.ne.s32.totalorder %s7691_s4, %s6299_s14  ;;  %p6306_p1 = scmp.lt.u32.totalorder %s6299_s14, %s7691_s4 }
  0xc9   : > { %p6302_p9 = pnand %p6300_p7, %p6707_p8 }
  0xcb   : > { %p6303_p4 = pneg %p6302_p9 }
  0xcd   : > { %p6308_p3 = pnand %p6306_p1, %p6303_p4 }
  0xcf   : > { %6311 = shalt.err (!%p6308_p3)
}
  0xd0   : > { %s6312_s22 = scalar_lea.vmem %s393_s15, 96  ;;  %p6320_p13 = scmp.lt.s32.totalorder %s393_s15, %s393_s15 }
  0xd1   : > { %p6313_p10 = scmp.ne.s32.totalorder %s393_s15, %s6312_s22  ;;  %p6321_p0 = scmp.lt.s32.totalorder %s6312_s22, %s6312_s22 }
  0xd3   : > { %p6315_p11 = pnand %p6313_p10, %p6707_p8  ;;  %p6322_p2 = por %p6321_p0, %p6320_p13 }
  0xd5   : > { %p6316_p12 = pneg %p6315_p11 }
  0xd7   : > { %p6323_p5 = pnand %p6322_p2, %p6316_p12 }
  0xd9   : > { %6326 = shalt.err (!%p6323_p5)
}
  0xda   : > { %5871 = dma.hbm_to_vmem [thread:$0]  (!%p6693_p6), %s7691_s4, 96, %s393_s15, [#allocation9]  }
  0xdb   : > { %s6327_s3 = scalar_lea.hbm %s7693_s6, 32 }
  0xdc   : > { %p6328_p7 = scmp.ne.s32.totalorder %s7693_s6, %s6327_s3  ;;  %p6334_p1 = scmp.lt.u32.totalorder %s6327_s3, %s7693_s6 }
  0xde   : > { %p6330_p9 = pnand %p6328_p7, %p6707_p8 }
  0xe0   : > { %p6331_p4 = pneg %p6330_p9 }
  0xe2   : > { %p6336_p3 = pnand %p6334_p1, %p6331_p4 }
  0xe4   : > { %6339 = shalt.err (!%p6336_p3)
}
  0xe5   : > { %s6340_s19 = scalar_lea.vmem %s417_s20, 32  ;;  %p6348_p13 = scmp.lt.s32.totalorder %s417_s20, %s417_s20 }
  0xe6   : > { %p6341_p10 = scmp.ne.s32.totalorder %s417_s20, %s6340_s19  ;;  %p6349_p0 = scmp.lt.s32.totalorder %s6340_s19, %s6340_s19 }
  0xe8   : > { %p6343_p11 = pnand %p6341_p10, %p6707_p8  ;;  %p6350_p2 = por %p6349_p0, %p6348_p13 }
  0xea   : > { %p6344_p12 = pneg %p6343_p11 }
  0xec   : > { %p6351_p5 = pnand %p6350_p2, %p6344_p12 }
  0xee   : > { %6354 = shalt.err (!%p6351_p5)
}
  0xef   : > { %5877 = dma.hbm_to_vmem [thread:$0]  (!%p6693_p6), %s7693_s6, 32, %s417_s20, [#allocation12]  }
  0xf0   : > { %s6576_s22 = smov [#allocation16]   ;;  %s6577_s30 = smov [#allocation19]  }
  0xf1   : > { %s438_s25 = sshll.u32 %s6576_s22, 4  ;;  %s462_s29 = sshll.u32 %s6577_s30, 4  ;;  %s439_s25 = int_to_ptr.vmem [resolvable:$true] %s438_s25  ;;  %s463_s29 = int_to_ptr.vmem [resolvable:$true] %s462_s29 }
  0xf2   : > { %s6355_s0 = scalar_lea.hbm %s7695_s8, 32 }
  0xf3   : > { %p6356_p7 = scmp.ne.s32.totalorder %s7695_s8, %s6355_s0  ;;  %p6362_p1 = scmp.lt.u32.totalorder %s6355_s0, %s7695_s8 }
  0xf5   : > { %p6358_p9 = pnand %p6356_p7, %p6707_p8 }
  0xf7   : > { %p6359_p4 = pneg %p6358_p9 }
  0xf9   : > { %p6364_p3 = pnand %p6362_p1, %p6359_p4 }
  0xfb   : > { %6367 = shalt.err (!%p6364_p3)
}
  0xfc   : > { %s6368_s20 = scalar_lea.vmem %s439_s25, 32  ;;  %p6376_p13 = scmp.lt.s32.totalorder %s439_s25, %s439_s25 }
  0xfd   : > { %p6369_p10 = scmp.ne.s32.totalorder %s439_s25, %s6368_s20  ;;  %p6377_p0 = scmp.lt.s32.totalorder %s6368_s20, %s6368_s20 }
  0xff   : > { %p6371_p11 = pnand %p6369_p10, %p6707_p8  ;;  %p6378_p2 = por %p6377_p0, %p6376_p13 }
 0x101   : > { %p6372_p12 = pneg %p6371_p11 }
 0x103   : > { %p6379_p5 = pnand %p6378_p2, %p6372_p12 }
 0x105   : > { %6382 = shalt.err (!%p6379_p5)
}
 0x106   : > { %5883 = dma.hbm_to_vmem [thread:$0]  (!%p6693_p6), %s7695_s8, 32, %s439_s25, [#allocation15]  }
 0x107   : > { %s6383_s1 = scalar_lea.hbm %s7697_s10, 128 }
 0x108   : > { %p6384_p7 = scmp.ne.s32.totalorder %s7697_s10, %s6383_s1  ;;  %p6390_p1 = scmp.lt.u32.totalorder %s6383_s1, %s7697_s10 }
 0x10a   : > { %p6386_p9 = pnand %p6384_p7, %p6707_p8 }
 0x10c   : > { %p6387_p4 = pneg %p6386_p9 }
 0x10e   : > { %p6392_p3 = pnand %p6390_p1, %p6387_p4 }
 0x110   : > { %6395 = shalt.err (!%p6392_p3)
}
 0x111   : > { %s6396_s23 = scalar_lea.vmem %s463_s29, 128  ;;  %p6404_p13 = scmp.lt.s32.totalorder %s463_s29, %s463_s29 }
 0x112   : > { %p6397_p10 = scmp.ne.s32.totalorder %s463_s29, %s6396_s23  ;;  %p6405_p0 = scmp.lt.s32.totalorder %s6396_s23, %s6396_s23 }
 0x114   : > { %p6399_p11 = pnand %p6397_p10, %p6707_p8  ;;  %p6406_p2 = por %p6405_p0, %p6404_p13 }
 0x116   : > { %p6400_p12 = pneg %p6399_p11 }
 0x118   : > { %p6407_p5 = pnand %p6406_p2, %p6400_p12 }
 0x11a   : > { %6410 = shalt.err (!%p6407_p5)
}
 0x11b   : > { %5889 = dma.hbm_to_vmem [thread:$0]  (!%p6693_p6), %s7697_s10, 128, %s463_s29, [#allocation18]  }
 0x11c   : > { %s6578_s20 = smov [#allocation22]   ;;  %s6411_s30 = scalar_lea.hbm %s7699_s12, 32 }
 0x11d   : > { %s486_s15 = sshll.u32 %s6578_s20, 4  ;;  %p6412_p7 = scmp.ne.s32.totalorder %s7699_s12, %s6411_s30  ;;  %s487_s15 = int_to_ptr.vmem [resolvable:$true] %s486_s15 }
 0x11e   : > { %p6418_p1 = scmp.lt.u32.totalorder %s6411_s30, %s7699_s12 }
 0x11f   : > { %p6414_p9 = pnand %p6412_p7, %p6707_p8 }
 0x121   : > { %p6415_p4 = pneg %p6414_p9 }
 0x123   : > { %p6420_p3 = pnand %p6418_p1, %p6415_p4 }
 0x125   : > { %6423 = shalt.err (!%p6420_p3)
}
 0x126   : > { %s6424_s29 = scalar_lea.vmem %s487_s15, 32  ;;  %p6432_p13 = scmp.lt.s32.totalorder %s487_s15, %s487_s15 }
 0x127   : > { %p6425_p10 = scmp.ne.s32.totalorder %s487_s15, %s6424_s29  ;;  %p6433_p0 = scmp.lt.s32.totalorder %s6424_s29, %s6424_s29 }
 0x129   : > { %p6427_p11 = pnand %p6425_p10, %p6707_p8  ;;  %p6434_p2 = por %p6433_p0, %p6432_p13 }
 0x12b   : > { %p6428_p12 = pneg %p6427_p11 }
 0x12d   : > { %p6435_p5 = pnand %p6434_p2, %p6428_p12 }
 0x12f   : > { %6438 = shalt.err (!%p6435_p5)
}
 0x130   : > { %s7730_s16 = sld [smem:[#allocation32_spill]]  ;;  %s7731_s25 = sld [smem:[#allocation33_spill]] }
 0x131   : > { %5895 = dma.hbm_to_vmem [thread:$0]  (!%p6693_p6), %s7699_s12, 32, %s487_s15, [#allocation21]  }
 0x132   : > { %s4803_s19 = sadd.s32 4294967294, %s6559_s28   ;;  %s6939_s18 = sadd.s32 1, %s6559_s28  }
 0x133   : > { %s39_s20 = ssub.s32 %s6559_s28, %s6939_s18  ;;  %s42_s21 = sadd.s32 1, %s6555_s27 }
 0x134   : > { %p40_p8 = scmp.eq.s32.totalorder %s39_s20, 0  ;;  %p49_p7 = scmp.ne.s32.totalorder %s6555_s27, %s6551_s26 }
 0x135   : > { %p50_p9 = scmp.eq.s32.totalorder %s6559_s28, 0  ;;  %p337_p11 = scmp.eq.s32.totalorder %s4803_s19, 1 }
 0x136   : > { %p55_p4 = scmp.ne.s32.totalorder %s6551_s26, %s7730_s16  ;;  %p7733_p3 = scmp.eq.s32.totalorder %s7731_s25, 0 }
 0x137   : > { %s6950_s22 = scalar_select %p40_p8, %s6555_s27, %s42_s21  }
 0x138   : > { %p6952_p1 = por %p50_p9, %p49_p7  ;;  %p6958_p6 = por %p7733_p3, %p55_p4 }
 0x139   : > { %p331_p10 = scmp.eq.s32.totalorder %s7731_s25, 1  ;;  %p5916_p12 = scmp.lt.s32.totalorder %s6559_s28, 2 }
 0x13a   : > { %s497_s1 = sand.u32 1, %s6555_s27   ;;  %p6969_p0 = por %p337_p11, %p55_p4 }
 0x13b   : > { %p6965_p13 = por %p331_p10, %p49_p7  ;;  %s4818_s14 = sshll.u32 %s497_s1, 5 }
 0x13c   : > { %s7736_s0 = scalar_select %p6969_p0, 1, 0 }
 0x13d   : > { %s7735_s3 = scalar_select %p6965_p13, 1, 0 }
 0x13e   : > { %s4897_s29 = sshll.u32 %s6559_s28, 9  ;;  %s7737_s16 = sld [smem:[#allocation35_spill]] }
 0x13f   : > { %s501_s25 = scalar_lea.vmem [#allocation2], %s4818_s14  ;;  %p6983_p2 = pnand %p5916_p12, %p6952_p1 }
 0x140   : > { %s508_s19 = sshll.u32 %s501_s25, 4  ;;  %s6987_s2 = scalar_lea.sflag [#allocation3], %s497_s1  ;;  %s6979_s19 = int_to_ptr.vmem [resolvable:$true] %s508_s19 }
 0x141   : > { %p6441_p8 = pneg %p6983_p2 }
 0x144   : > { %s6977_s20 = scalar_lea.hbm %s7737_s16, %s4897_s29  ;;  %s6444_s30 = scalar_lea.hbm %s7737_s16, 1024 }
 0x145   : > { %s6439_s24 = scalar_lea.hbm %s6977_s20, 512  ;;  %p6445_p4 = scmp.lt.u32.totalorder %s6977_s20, %s7737_s16 }
 0x146   : > { %p6440_p5 = scmp.ne.s32.totalorder %s6977_s20, %s6439_s24  ;;  %p6446_p1 = scmp.lt.u32.totalorder %s6444_s30, %s6439_s24 }
 0x147   : > { %p6448_p10 = scmp.lt.u32.totalorder %s6439_s24, %s6977_s20 }
 0x148   : > { %p6442_p7 = pnand %p6441_p8, %p6440_p5  ;;  %p6447_p3 = por %p6446_p1, %p6445_p4 }
 0x14a   : > { %p6443_p9 = pneg %p6442_p7  ;;  %p6449_p11 = por %p6448_p10, %p6447_p3 }
 0x14c   : > { %p6450_p12 = pnand %p6449_p11, %p6443_p9 }
 0x14e   : > { %6453 = shalt.err (!%p6450_p12)
}
 0x14f   : > { %s6454_s1 = scalar_lea.vmem %s6979_s19, 512  ;;  %s6579_s14 = smov [#allocation2]  }
 0x150   : > { %p6455_p5 = scmp.ne.s32.totalorder %s6979_s19, %s6454_s1  ;;  %s6459_s29 = sshll.u32 %s6579_s14, 4  ;;  %s6460_s29 = int_to_ptr.vmem [resolvable:$false] %s6459_s29 }
 0x151   : > { %s6461_s23 = scalar_lea.vmem %s6460_s29, 1024  ;;  %p6462_p13 = scmp.lt.s32.totalorder %s6979_s19, %s6460_s29 }
 0x152   : > { %p6457_p7 = pnand %p6455_p5, %p6441_p8  ;;  %p6463_p4 = scmp.lt.s32.totalorder %s6461_s23, %s6454_s1 }
 0x154   : > { %p6458_p0 = pneg %p6457_p7  ;;  %p6464_p1 = por %p6463_p4, %p6462_p13 }
 0x156   : > { %p6465_p3 = pnand %p6464_p1, %p6458_p0 }
 0x158   : > { %6468 = shalt.err (!%p6465_p3)
}
 0x159   : > { %5899 = dma.hbm_to_vmem [thread:$0]  (!%p6983_p2), %s6977_s20, 512, %s6979_s19, %s6987_s2, %s7728_s17, %s7728_s17, %s7727_s13  }
 0x15a   : > { %s7739_s24 = sld [smem:[#allocation34_spill]] }
 0x160   : > { %p7740_p8 = scmp.ne.s32.totalorder %s7739_s24, 0 }
 0x161   : > { %s7021_s30 = sand.u32 (!%p7740_p8), 1, %s6551_s26  }
 0x162   : > { %520 = sbr.rel (%p7740_p8) target bundleno = 3249 (0xcb1), region = 72  ;;  %s4822_s25 = sshll.u32 (!%p7740_p8), %s7021_s30, 5 }
 0x163   : > { %s523_s1 = scalar_lea.sflag (!%p7740_p8), [#allocation3], %s7021_s30  ;;  %s7027_s21 = scalar_lea.vmem (!%p7740_p8), [#allocation2], %s4822_s25 }
 0x169   : > { %6514 = dma.done.wait (%p6958_p6), %s523_s1, 512  }
 0x16a   : > { %6516 = vsyncadd (%p6958_p6), %s523_s1, 4294966784  ;;  %s7741_s2 = sld [smem:[#allocation33_spill]] }
 0x170   : > { %p7742_p13 = scmp.eq.s32.totalorder %s7741_s2, 0 }
 0x172   : > { %6518 = dma.done.wait (%p7742_p13), [#allocation6], 64   ;;  %p7743_p0 = pmov %p7742_p13 }
 0x174   : > { %6520 = vsyncadd (%p7743_p0), [#allocation6], 4294967232  ;;  %p7744_p2 = pmov %p7743_p0 }
 0x175   : > { %p7745_p9 = pmov %p7743_p0 }
 0x176   : > { %6522 = dma.done.wait (%p7744_p2), [#allocation9], 24672  }
 0x177   : > { %6524 = vsyncadd (%p7745_p9), [#allocation9], 4294942624  ;;  %p7746_p10 = pmov %p7743_p0 }
 0x178   : > { %p7747_p11 = pmov %p7743_p0 }
 0x179   : > { %6526 = dma.done.wait (%p7746_p10), [#allocation12], 8224  }
 0x17a   : > { %6528 = vsyncadd (%p7747_p11), [#allocation12], 4294959072  ;;  %p7748_p6 = pmov %p7743_p0 }
 0x17b   : > { %p7749_p12 = pmov %p7743_p0 }
 0x17c   : > { %6530 = dma.done.wait (%p7748_p6), [#allocation15], 64  }
 0x17d   : > { %6532 = vsyncadd (%p7749_p12), [#allocation15], 4294967232  ;;  %p7750_p5 = pmov %p7743_p0 }
 0x17e   : > { %p7751_p7 = pmov %p7743_p0 }
 0x17f   : > { %6534 = dma.done.wait (%p7750_p5), [#allocation18], 32896  }
 0x180   : > { %6536 = vsyncadd (%p7751_p7), [#allocation18], 4294934400  ;;  %p7752_p4 = pmov %p7743_p0 }
 0x181   : > { %p7753_p1 = pmov %p7743_p0 }
 0x182   : > { %6538 = dma.done.wait (%p7752_p4), [#allocation21], 32800  }
 0x183   : > { %6540 = vsyncadd (%p7753_p1), [#allocation21], 4294934496  ;;  %v7058_v0 = vld [vmem:[%s7027_s21] sm:$0xff]  ;;  %v7061_v1 = vld [vmem:[%s7027_s21 + $0x8] sm:$0xff]  ;;  %s6580_s13 = smov 64   ;;  %vm2005_vm0 = vcmask 523264  }
 0x184   : > { %v7064_v2 = vld [vmem:[%s7027_s21 + $0x10] sm:$0xff]  ;;  %v623_v3 = vadd.f32 %v7061_v1, %v7058_v0  ;;  %v7069_v4 = vld [vmem:[%s7027_s21 + $0x18] sm:$0xff]  ;;  %v686_v8 = vld [vmem:[#allocation8] sm:$0xff]  ;;  %vm2354_vm2 = vcmask 130048   ;;  %s616_s17 = scalar_lea.vmem [#allocation23], %s4822_s25  ;;  %s4898_s20 = sshll.u32 %s7741_s2, 9 }
 0x185   : > { %v626_v5 = vadd.f32 %v7069_v4, %v7064_v2  ;;  %v687_v6 = vld [vmem:[#allocation8 + $0x8] sm:$0xff]  ;;  %v693_v7 = vld [vmem:[#allocation8 + $0x38] sm:$0xff]  ;;  %v692_v10 = vld [vmem:[#allocation8 + $0x30] sm:$0xff]  ;;  %s4616_s15 = sshll.u32 %s616_s17, 4  ;;  %s7756_s29 = sld [smem:[#allocation39_spill]]  ;;  %s7637_s15 = int_to_ptr.vmem [resolvable:$true] %s4616_s15 }
 0x186   : > { %624 = vadd.xlane.f32.xlu0 %v623_v3  ;;  %v4987_v9 = vpack.c.bf16 %v693_v7, %v687_v6  ;;  %v699_v11 = vld [vmem:[#allocation8 + $0x68] sm:$0xff]  ;;  %v705_v12 = vld [vmem:[#allocation8 + $0x98] sm:$0xff]  ;;  %v4989_v13 = vpack.c.bf16 %v692_v10, %v686_v8  ;;  %v698_v15 = vld [vmem:[#allocation8 + $0x60] sm:$0xff]  ;;  %s4603_s24 = scalar_lea.sflag [#allocation4], %s7021_s30  ;;  %s6469_s25 = scalar_lea.vmem %s7637_s15, 512 }
 0x187   : > { %v4991_v14 = vpack.c.bf16 %v705_v12, %v699_v11  ;;  %v704_v16 = vld [vmem:[#allocation8 + $0x90] sm:$0xff]  ;;  %v711_v17 = vld [vmem:[#allocation8 + $0xc8] sm:$0xff]  ;;  %v717_v18 = vld [vmem:[#allocation8 + $0xf8] sm:$0xff]  ;;  %p6470_p3 = scmp.ne.s32.totalorder %s7637_s15, %s6469_s25  ;;  %p7757_p8 = scmp.ne.s32.totalorder %s7735_s3, 0 }
 0x188   : > { %4988 = vmatprep.subr.bf16.mxu1 %v4987_v9  ;;  %v4993_v19 = vpack.c.bf16 %v704_v16, %v698_v15  ;;  %v4995_v20 = vpack.c.bf16 %v717_v18, %v711_v17  ;;  %v710_v21 = vld [vmem:[#allocation8 + $0xc0] sm:$0xff]  ;;  %v716_v22 = vld [vmem:[#allocation8 + $0xf0] sm:$0xff]  ;;  %v723_v23 = vld [vmem:[#allocation8 + $0x128] sm:$0xff]  ;;  %s6583_s1 = smov [#allocation23]  }
 0x189   : > { %4990 = vmatpush1.bf16.msra.mxu1 %v4989_v13  ;;  %v729_v24 = vld [vmem:[#allocation8 + $0x158] sm:$0xff]  ;;  %v4997_v25 = vpack.c.bf16 %v716_v22, %v710_v21  ;;  %v722_v27 = vld [vmem:[#allocation8 + $0x120] sm:$0xff]  ;;  %v728_v28 = vld [vmem:[#allocation8 + $0x150] sm:$0xff]  ;;  %p6471_p13 = pnand %p6470_p3, %p7757_p8 }
 0x18a   : > { %627 = vadd.xlane.f32.xlu0 %v626_v5  ;;  %4992 = vmatprep.subr.bf16.mxu1 %v4991_v14  ;;  %v4999_v26 = vpack.c.bf16 %v729_v24, %v723_v23  ;;  %v735_v29 = vld [vmem:[#allocation8 + $0x188] sm:$0xff]  ;;  %v741_v30 = vld [vmem:[#allocation8 + $0x1b8] sm:$0xff]  ;;  %v5001_v31 = vpack.c.bf16 %v728_v28, %v722_v27  ;;  %v734_v33 = vld [vmem:[#allocation8 + $0x180] sm:$0xff] }
 0x18b   : > { %v5003_v32 = vpack.c.bf16 %v741_v30, %v735_v29  ;;  %v740_v34 = vld [vmem:[#allocation8 + $0x1b0] sm:$0xff]  ;;  %v747_v35 = vld [vmem:[#allocation8 + $0x1e8] sm:$0xff]  ;;  %v753_v36 = vld [vmem:[#allocation8 + $0x218] sm:$0xff]  ;;  %s7643_s23 = scalar_lea.hbm %s7756_s29, %s4898_s20  ;;  %p6472_p0 = pneg %p6471_p13 }
 0x18c   : > { %v5005_v37 = vpack.c.bf16 %v740_v34, %v734_v33  ;;  %v5007_v38 = vpack.c.bf16 %v753_v36, %v747_v35  ;;  %v746_v39 = vld [vmem:[#allocation8 + $0x1e0] sm:$0xff]  ;;  %v752_v40 = vld [vmem:[#allocation8 + $0x210] sm:$0xff]  ;;  %v759_v41 = vld [vmem:[#allocation8 + $0x248] sm:$0xff] }
 0x18d   : > { %4994 = vmatpush1.bf16.msra.mxu1 %v4993_v19  ;;  %v765_v42 = vld [vmem:[#allocation8 + $0x278] sm:$0xff]  ;;  %v5009_v43 = vpack.c.bf16 %v752_v40, %v746_v39  ;;  %v758_v45 = vld [vmem:[#allocation8 + $0x240] sm:$0xff]  ;;  %v764_v46 = vld [vmem:[#allocation8 + $0x270] sm:$0xff] }
 0x18e   : > { %4996 = vmatprep.subr.bf16.mxu1 %v4995_v20  ;;  %v5011_v44 = vpack.c.bf16 %v765_v42, %v759_v41  ;;  %v771_v47 = vld [vmem:[#allocation8 + $0x2a8] sm:$0xff]  ;;  %v777_v48 = vld [vmem:[#allocation8 + $0x2d8] sm:$0xff]  ;;  %v5013_v49 = vpack.c.bf16 %v764_v46, %v758_v45  ;;  %v770_v51 = vld [vmem:[#allocation8 + $0x2a0] sm:$0xff] }
 0x18f   : > { %v5015_v50 = vpack.c.bf16 %v777_v48, %v771_v47  ;;  %v776_v52 = vld [vmem:[#allocation8 + $0x2d0] sm:$0xff]  ;;  %v783_v53 = vld [vmem:[#allocation8 + $0x308] sm:$0xff]  ;;  %v789_v54 = vld [vmem:[#allocation8 + $0x338] sm:$0xff] }
 0x190   : > { %v5017_v55 = vpack.c.bf16 %v776_v52, %v770_v51  ;;  %v5019_v56 = vpack.c.bf16 %v789_v54, %v783_v53  ;;  %v782_v57 = vld [vmem:[#allocation8 + $0x300] sm:$0xff]  ;;  %v788_v58 = vld [vmem:[#allocation8 + $0x330] sm:$0xff]  ;;  %v795_v59 = vld [vmem:[#allocation8 + $0x368] sm:$0xff] }
 0x191   : > { %4998 = vmatpush1.bf16.msra.mxu1 %v4997_v25  ;;  %v801_v60 = vld [vmem:[#allocation8 + $0x398] sm:$0xff]  ;;  %v5021_v61 = vpack.c.bf16 %v788_v58, %v782_v57  ;;  %v794_v63 = vld [vmem:[#allocation8 + $0x360] sm:$0xff]  ;;  %v800_v3 = vld [vmem:[#allocation8 + $0x390] sm:$0xff]  ;;  %v657_v57 = vlaneseq }
 0x192   : > { %5000 = vmatprep.subr.bf16.mxu1 %v4999_v26  ;;  %v5023_v62 = vpack.c.bf16 %v801_v60, %v795_v59  ;;  %v807_v5 = vld [vmem:[#allocation8 + $0x3c8] sm:$0xff]  ;;  %v813_v6 = vld [vmem:[#allocation8 + $0x3f8] sm:$0xff]  ;;  %v5025_v7 = vpack.c.bf16 %v800_v3, %v794_v63  ;;  %v806_v9 = vld [vmem:[#allocation8 + $0x3c0] sm:$0xff] }
 0x193   : > { %v5027_v8 = vpack.c.bf16 %v813_v6, %v807_v5  ;;  %v812_v10 = vld [vmem:[#allocation8 + $0x3f0] sm:$0xff]  ;;  %v819_v24 = vld [vmem:[#allocation8 + $0x428] sm:$0xff]  ;;  %v825_v25 = vld [vmem:[#allocation8 + $0x458] sm:$0xff] }
 0x194   : > { %v5029_v11 = vpack.c.bf16 %v812_v10, %v806_v9  ;;  %v5031_v26 = vpack.c.bf16 %v825_v25, %v819_v24  ;;  %v818_v27 = vld [vmem:[#allocation8 + $0x420] sm:$0xff]  ;;  %v824_v28 = vld [vmem:[#allocation8 + $0x450] sm:$0xff]  ;;  %v837_v29 = vld [vmem:[#allocation8 + $0x4b8] sm:$0xff] }
 0x195   : > { %5002 = vmatpush1.bf16.msra.mxu1 %v5001_v31  ;;  %v830_v31 = vld [vmem:[#allocation8 + $0x480] sm:$0xff]  ;;  %v843_v34 = vld [vmem:[#allocation8 + $0x4e8] sm:$0xff]  ;;  %v849_v35 = vld [vmem:[#allocation8 + $0x518] sm:$0xff] }
 0x196   : > { %5004 = vmatprep.subr.bf16.mxu1 %v5003_v32  ;;  %v836_v32 = vld [vmem:[#allocation8 + $0x4b0] sm:$0xff]  ;;  %v5039_v36 = vpack.c.bf16 %v849_v35, %v843_v34  ;;  %v855_v40 = vld [vmem:[#allocation8 + $0x548] sm:$0xff]  ;;  %v861_v41 = vld [vmem:[#allocation8 + $0x578] sm:$0xff] }
 0x197   : > { %v5037_v33 = vpack.c.bf16 %v836_v32, %v830_v31  ;;  %v854_v42 = vld [vmem:[#allocation8 + $0x540] sm:$0xff]  ;;  %v867_v45 = vld [vmem:[#allocation8 + $0x5a8] sm:$0xff]  ;;  %v873_v46 = vld [vmem:[#allocation8 + $0x5d8] sm:$0xff] }
 0x198   : > { %v5047_v48 = vpack.c.bf16 %v873_v46, %v867_v45  ;;  %v689_v52 = vld [vmem:[#allocation8 + $0x18] sm:$0xff]  ;;  %v695_v53 = vld [vmem:[#allocation8 + $0x48] sm:$0xff]  ;;  %v718_v34 = vld [vmem:[#allocation8 + $0x100] sm:$0xff] }
 0x199   : > { %5006 = vmatpush1.bf16.msra.mxu1 %v5005_v37  ;;  %v842_v37 = vld [vmem:[#allocation8 + $0x4e0] sm:$0xff]  ;;  %v5051_v54 = vpack.c.bf16 %v695_v53, %v689_v52  ;;  %v621_v5 = vld [vmem:[#allocation5] sm:$0x3]  ;;  %v622_v6 = vld [vmem:[#allocation7] sm:$0x3] }
 0x19a   : > { %5008 = vmatprep.subr.bf16.mxu1 %v5007_v38  ;;  %v848_v38 = vld [vmem:[#allocation8 + $0x510] sm:$0xff]  ;;  %v725_v35 = vld [vmem:[#allocation8 + $0x138] sm:$0xff]  ;;  %v742_v46 = vld [vmem:[#allocation8 + $0x1c0] sm:$0xff] }
 0x19b   : > { %v5041_v39 = vpack.c.bf16 %v848_v38, %v842_v37  ;;  %v736_v45 = vld [vmem:[#allocation8 + $0x190] sm:$0xff]  ;;  %v754_v52 = vld [vmem:[#allocation8 + $0x220] sm:$0xff]  ;;  %v761_v53 = vld [vmem:[#allocation8 + $0x258] sm:$0xff] }
 0x19c   : > { %vm7248_vm1 = vmpackc.low %vm2005_vm0, %vm2005_vm0 }
 0x19d   : > { %5010 = vmatpush1.bf16.msra.mxu1 %v5009_v43  ;;  %v5043_v43 = vpack.c.bf16 %v861_v41, %v855_v40  ;;  %v730_v40 = vld [vmem:[#allocation8 + $0x160] sm:$0xff]  ;;  %v737_v41 = vld [vmem:[#allocation8 + $0x198] sm:$0xff] }
 0x19e   : > { %5012 = vmatprep.subr.bf16.mxu1 %v5011_v44  ;;  %v860_v44 = vld [vmem:[#allocation8 + $0x570] sm:$0xff] }
 0x19f   : > { %v5045_v47 = vpack.c.bf16 %v860_v44, %v854_v42  ;;  %v743_v42 = vld [vmem:[#allocation8 + $0x1c8] sm:$0xff] }
 0x1a0   : > { %v5067_v44 = vpack.c.bf16 %v743_v42, %v737_v41  ;;  %v844_v42 = vld [vmem:[#allocation8 + $0x4f0] sm:$0xff] }
 0x1a1   : > { %5014 = vmatpush1.bf16.msra.mxu1 %v5013_v49  ;;  %v866_v49 = vld [vmem:[#allocation8 + $0x5a0] sm:$0xff] }
 0x1a2   : > { %5016 = vmatprep.subr.bf16.mxu1 %v5015_v50  ;;  %v872_v50 = vld [vmem:[#allocation8 + $0x5d0] sm:$0xff] }
 0x1a3   : > { %v5049_v51 = vpack.c.bf16 %v872_v50, %v866_v49  ;;  %v5069_v49 = vpack.c.bf16 %v742_v46, %v736_v45  ;;  %v863_v45 = vld [vmem:[#allocation8 + $0x588] sm:$0xff] }
 0x1a5   : > { %5018 = vmatpush1.bf16.msra.mxu1 %v5017_v55 }
 0x1a6   : > { %5020 = vmatprep.subr.bf16.mxu1 %v5019_v56 }
 0x1a9   : > { %5022 = vmatpush1.bf16.msra.mxu1 %v5021_v61  ;;  %v7093_v61 = vshrl.u32 %v657_v57, 7  ;;  %v760_v57 = vld [vmem:[#allocation8 + $0x250] sm:$0xff] }
 0x1aa   : > { %5024 = vmatprep.subr.bf16.mxu1 %v5023_v62 }
 0x1ab   : > { %v7096_v63 = vsub.s32 1, %v7093_v61  ;;  %v7099_v3 = vsub.s32 0, %v7093_v61 }
 0x1ad   : > { %5026 = vmatpush1.bf16.msra.mxu1 %v5025_v7  ;;  %v664_v7 = vrot.slane %v621_v5, %v7096_v63 }
 0x1ae   : > { %5028 = vmatprep.subr.bf16.mxu1 %v5027_v8  ;;  %v660_v8 = vrot.slane %v621_v5, %v7099_v3 }
 0x1b1   : > { %5030 = vmatpush1.bf16.msra.mxu1 %v5029_v11  ;;  %v679_v11 = vrot.slane %v622_v6, %v7096_v63 }
 0x1b2   : > { %5032 = vmatprep.subr.bf16.mxu1 %v5031_v26 }
 0x213   : > { %v625_v12 = vpop.xlane.xlu0 %624 }
 0x214   : > { %v630_v13 = vmul.f32 0.00390625, %v625_v12 }
 0x216   : > { %v7074_v14 = vsub.f32 %v7058_v0, %v630_v13  ;;  %v7077_v15 = vsub.f32 %v7061_v1, %v630_v13  ;;  %v675_v13 = vrot.slane %v622_v6, %v7099_v3  ;;  %v772_v6 = vld [vmem:[#allocation8 + $0x2b0] sm:$0xff] }
 0x217   : > { %v628_v16 = vpop.xlane.xlu0 %627 }
 0x218   : > { %v631_v17 = vmul.f32 0.00390625, %v628_v16  ;;  %v636_v18 = vmul.f32 %v7074_v14, %v7074_v14  ;;  %v637_v19 = vmul.f32 %v7077_v15, %v7077_v15  ;;  %v688_v16 = vld [vmem:[#allocation8 + $0x10] sm:$0xff] }
 0x21a   : > { %v7084_v20 = vsub.f32 %v7064_v2, %v631_v17  ;;  %v7087_v21 = vsub.f32 %v7069_v4, %v631_v17  ;;  %v640_v22 = vadd.f32 %v637_v19, %v636_v18  ;;  %v5033_v2 = vpack.c.bf16 %v824_v28, %v818_v27  ;;  %v831_v4 = vld [vmem:[#allocation8 + $0x488] sm:$0xff]  ;;  %v694_v17 = vld [vmem:[#allocation8 + $0x40] sm:$0xff] }
 0x21b   : > { %v5035_v30 = vpack.c.bf16 %v837_v29, %v831_v4  ;;  %v706_v28 = vld [vmem:[#allocation8 + $0xa0] sm:$0xff]  ;;  %v713_v29 = vld [vmem:[#allocation8 + $0xd8] sm:$0xff] }
 0x21c   : > { %641 = vadd.xlane.f32.xlu1 %v640_v22  ;;  %v638_v0 = vmul.f32 %v7084_v20, %v7084_v20  ;;  %v639_v1 = vmul.f32 %v7087_v21, %v7087_v21  ;;  %5034 = vmatpush1.bf16.msra.mxu1 %v5033_v2  ;;  %v701_v22 = vld [vmem:[#allocation8 + $0x78] sm:$0xff] }
 0x21d   : > { %5036 = vmatprep.subr.bf16.mxu1 %v5035_v30  ;;  %v719_v30 = vld [vmem:[#allocation8 + $0x108] sm:$0xff] }
 0x21e   : > { %v643_v23 = vadd.f32 %v639_v1, %v638_v0  ;;  %v707_v0 = vld [vmem:[#allocation8 + $0xa8] sm:$0xff] }
 0x21f   : > { %v5055_v27 = vpack.c.bf16 %v707_v0, %v701_v22  ;;  %v796_v22 = vld [vmem:[#allocation8 + $0x370] sm:$0xff]  ;;  %v802_v0 = vld [vmem:[#allocation8 + $0x3a0] sm:$0xff] }
 0x220   : > { %644 = vadd.xlane.f32.xlu1 %v643_v23  ;;  %5038 = vmatpush1.bf16.msra.mxu1 %v5037_v33  ;;  %v5053_v23 = vpack.c.bf16 %v694_v17, %v688_v16  ;;  %v797_v16 = vld [vmem:[#allocation8 + $0x378] sm:$0xff]  ;;  %v803_v17 = vld [vmem:[#allocation8 + $0x3a8] sm:$0xff] }
 0x221   : > { %5040 = vmatprep.subr.bf16.mxu1 %v5039_v36  ;;  %v731_v36 = vld [vmem:[#allocation8 + $0x168] sm:$0xff] }
 0x222   : > { %v5063_v38 = vpack.c.bf16 %v731_v36, %v725_v35  ;;  %v832_v36 = vld [vmem:[#allocation8 + $0x490] sm:$0xff] }
 0x224   : > { %5042 = vmatpush1.bf16.msra.mxu1 %v5041_v39  ;;  %v724_v39 = vld [vmem:[#allocation8 + $0x130] sm:$0xff] }
 0x225   : > { %5044 = vmatprep.subr.bf16.mxu1 %v5043_v43  ;;  %v5065_v43 = vpack.c.bf16 %v730_v40, %v724_v39  ;;  %v851_v39 = vld [vmem:[#allocation8 + $0x528] sm:$0xff] }
 0x228   : > { %5046 = vmatpush1.bf16.msra.mxu1 %v5045_v47  ;;  %v749_v47 = vld [vmem:[#allocation8 + $0x1f8] sm:$0xff] }
 0x229   : > { %5048 = vmatprep.subr.bf16.mxu1 %v5047_v48  ;;  %v755_v48 = vld [vmem:[#allocation8 + $0x228] sm:$0xff] }
 0x22a   : > { %v5071_v50 = vpack.c.bf16 %v755_v48, %v749_v47  ;;  %v856_v48 = vld [vmem:[#allocation8 + $0x550] sm:$0xff] }
 0x22c   : > { %5050 = vmatpush1.bf16.msra.mxu1 %v5049_v51  ;;  %v748_v51 = vld [vmem:[#allocation8 + $0x1f0] sm:$0xff] }
 0x22d   : > { %5052 = vmatprep.subr.bf16.mxu1 %v5051_v54  ;;  %v767_v54 = vld [vmem:[#allocation8 + $0x288] sm:$0xff] }
 0x2a9   : > { %v642_v55 = vpop.xlane.xlu1 %641 }
 0x2aa   : > { %v646_v56 = vmul.f32 0.00390625, %v642_v55  ;;  %v5073_v55 = vpack.c.bf16 %v754_v52, %v748_v51  ;;  %v875_v51 = vld [vmem:[#allocation8 + $0x5e8] sm:$0xff] }
 0x2ac   : > { %v648_v58 = vadd.f32 1e-05, %v646_v56  ;;  %v5075_v56 = vpack.c.bf16 %v767_v54, %v761_v53  ;;  %v868_v54 = vld [vmem:[#allocation8 + $0x5b0] sm:$0xff] }
 0x2ad   : > { %v645_v59 = vpop.xlane.xlu1 %644 }
 0x2ae   : > { %5995 = vrsqrt.f32 %v648_v58  ;;  %v647_v60 = vmul.f32 0.00390625, %v645_v59  ;;  %v766_v58 = vld [vmem:[#allocation8 + $0x280] sm:$0xff]  ;;  %v773_v59 = vld [vmem:[#allocation8 + $0x2b8] sm:$0xff] }
 0x2b0   : > { %v649_v62 = vadd.f32 1e-05, %v647_v60  ;;  %v779_v60 = vld [vmem:[#allocation8 + $0x2e8] sm:$0xff] }
 0x2b1   : > { %v5079_v5 = vpack.c.bf16 %v779_v60, %v773_v59  ;;  %v690_v60 = vld [vmem:[#allocation8 + $0x20] sm:$0xff] }
 0x2b2   : > { %5997 = vrsqrt.f32 %v649_v62  ;;  %v5077_v62 = vpack.c.bf16 %v766_v58, %v760_v57  ;;  %v697_v57 = vld [vmem:[#allocation8 + $0x58] sm:$0xff] }
 0x2b8   : > { %v5996_v9 = vpop.eup %5995 }
 0x2b9   : > { %v653_v10 = vmul.f32 %v5996_v9, %v7077_v15  ;;  %v652_v12 = vmul.f32 %v5996_v9, %v7074_v14  ;;  %v700_v14 = vld [vmem:[#allocation8 + $0x70] sm:$0xff]  ;;  %v791_v9 = vld [vmem:[#allocation8 + $0x348] sm:$0xff] }
 0x2ba   : > { %v5057_v33 = vpack.c.bf16 %v706_v28, %v700_v14  ;;  %v814_v14 = vld [vmem:[#allocation8 + $0x400] sm:$0xff]  ;;  %v821_v28 = vld [vmem:[#allocation8 + $0x438] sm:$0xff] }
 0x2bb   : > { %v668_v18 = vmul.f32 %v664_v7, %v653_v10  ;;  %v667_v19 = vmul.f32 %v660_v8, %v652_v12  ;;  %v784_v12 = vld [vmem:[#allocation8 + $0x310] sm:$0xff] }
 0x2bc   : > { %v5998_v1 = vpop.eup %5997 }
 0x2bd   : > { %v7107_v24 = vadd.f32 %v679_v11, %v668_v18  ;;  %v7109_v25 = vadd.f32 %v675_v13, %v667_v19  ;;  %v655_v15 = vmul.f32 %v5998_v1, %v7087_v21  ;;  %v654_v26 = vmul.f32 %v5998_v1, %v7084_v20  ;;  %v712_v20 = vld [vmem:[#allocation8 + $0xd0] sm:$0xff]  ;;  %v809_v1 = vld [vmem:[#allocation8 + $0x3d8] sm:$0xff] }
 0x2be   : > { %v5059_v21 = vpack.c.bf16 %v719_v30, %v713_v29  ;;  %v5061_v37 = vpack.c.bf16 %v718_v34, %v712_v20  ;;  %v5087_v19 = vpack.c.bf16 %v803_v17, %v797_v16  ;;  %v820_v30 = vld [vmem:[#allocation8 + $0x430] sm:$0xff]  ;;  %v839_v20 = vld [vmem:[#allocation8 + $0x4c8] sm:$0xff]  ;;  %v714_v17 = vld [vmem:[#allocation8 + $0xe0] sm:$0xff] }
 0x2bf   : > { %974 = vmatprep.mubr.f32.mxu1 %v7107_v24  ;;  %v670_v2 = vmul.f32 %v664_v7, %v655_v15  ;;  %v669_v4 = vmul.f32 %v660_v8, %v654_v26  ;;  %v778_v7 = vld [vmem:[#allocation8 + $0x2e0] sm:$0xff]  ;;  %v785_v8 = vld [vmem:[#allocation8 + $0x318] sm:$0xff]  ;;  %v5089_v15 = vpack.c.bf16 %v802_v0, %v796_v22 }
 0x2c0   : > { %975 = vmatmul.mubr.f32.vlgmr.msra.gmra.mrb[0].mxu1 %v7109_v25  ;;  %v5081_v10 = vpack.c.bf16 %v778_v7, %v772_v6  ;;  %v709_v6 = vld [vmem:[#allocation8 + $0xb8] sm:$0xff] }
 0x2c1   : > { %5054 = vmatpush1.bf16.msra.mxu1 %v5053_v23  ;;  %v7115_v31 = vadd.f32 %v679_v11, %v670_v2  ;;  %v7117_v32 = vadd.f32 %v675_v13, %v669_v4  ;;  %v5083_v11 = vpack.c.bf16 %v791_v9, %v785_v8  ;;  %v790_v13 = vld [vmem:[#allocation8 + $0x340] sm:$0xff]  ;;  %v815_v23 = vld [vmem:[#allocation8 + $0x408] sm:$0xff]  ;;  %v733_v22 = vld [vmem:[#allocation8 + $0x178] sm:$0xff] }
 0x2c2   : > { %5056 = vmatprep.subr.bf16.mxu1 %v5055_v27  ;;  %v5085_v18 = vpack.c.bf16 %v790_v13, %v784_v12  ;;  %v5091_v26 = vpack.c.bf16 %v815_v23, %v809_v1  ;;  %v808_v27 = vld [vmem:[#allocation8 + $0x3d0] sm:$0xff]  ;;  %v827_v2 = vld [vmem:[#allocation8 + $0x468] sm:$0xff]  ;;  %v702_v9 = vld [vmem:[#allocation8 + $0x80] sm:$0xff] }
 0x2c3   : > { %980 = vmatprep.mubr.f32.mxu1 %v7115_v31  ;;  %v5093_v4 = vpack.c.bf16 %v814_v14, %v808_v27  ;;  %v5095_v29 = vpack.c.bf16 %v827_v2, %v821_v28  ;;  %v721_v12 = vld [vmem:[#allocation8 + $0x118] sm:$0xff]  ;;  %v726_v23 = vld [vmem:[#allocation8 + $0x140] sm:$0xff] }
 0x2c4   : > { %981 = vmatmul.mubr.f32.gmra.mrb[2].mxu1 %v7117_v32  ;;  %v745_v27 = vld [vmem:[#allocation8 + $0x1d8] sm:$0xff]  ;;  %v738_v2 = vld [vmem:[#allocation8 + $0x1a0] sm:$0xff] }
 0x2c5   : > { %5058 = vmatpush1.bf16.msra.mxu1 %v5057_v33  ;;  %1051 = vmatprep.mubr.f32.mxu1 %v7107_v24  ;;  %v826_v33 = vld [vmem:[#allocation8 + $0x460] sm:$0xff] }
 0x2c6   : > { %5060 = vmatprep.subr.bf16.mxu1 %v5059_v21  ;;  %v833_v21 = vld [vmem:[#allocation8 + $0x498] sm:$0xff]  ;;  %v5097_v34 = vpack.c.bf16 %v826_v33, %v820_v30 }
 0x2c7   : > { %v5099_v35 = vpack.c.bf16 %v839_v20, %v833_v21  ;;  %v757_v30 = vld [vmem:[#allocation8 + $0x238] sm:$0xff]  ;;  %v756_v20 = vld [vmem:[#allocation8 + $0x230] sm:$0xff] }
 0x2c9   : > { %5062 = vmatpush1.bf16.msra.mxu1 %v5061_v37  ;;  %v838_v37 = vld [vmem:[#allocation8 + $0x4c0] sm:$0xff] }
 0x2ca   : > { %5064 = vmatprep.subr.bf16.mxu1 %v5063_v38  ;;  %v845_v38 = vld [vmem:[#allocation8 + $0x4f8] sm:$0xff]  ;;  %v5101_v40 = vpack.c.bf16 %v838_v37, %v832_v36 }
 0x2cb   : > { %v5103_v41 = vpack.c.bf16 %v851_v39, %v845_v38  ;;  %v762_v38 = vld [vmem:[#allocation8 + $0x260] sm:$0xff]  ;;  %v768_v39 = vld [vmem:[#allocation8 + $0x290] sm:$0xff] }
 0x2cd   : > { %5066 = vmatpush1.bf16.msra.mxu1 %v5065_v43  ;;  %v850_v43 = vld [vmem:[#allocation8 + $0x520] sm:$0xff] }
 0x2ce   : > { %5068 = vmatprep.subr.bf16.mxu1 %v5067_v44  ;;  %v857_v44 = vld [vmem:[#allocation8 + $0x558] sm:$0xff]  ;;  %v5105_v46 = vpack.c.bf16 %v850_v43, %v844_v42  ;;  %v5141_v42 = vpack.c.bf16 %v768_v39, %v762_v38 }
 0x2cf   : > { %v5107_v47 = vpack.c.bf16 %v863_v45, %v857_v44  ;;  %v774_v44 = vld [vmem:[#allocation8 + $0x2c0] sm:$0xff]  ;;  %v780_v45 = vld [vmem:[#allocation8 + $0x2f0] sm:$0xff] }
 0x2d1   : > { %5070 = vmatpush1.bf16.msra.mxu1 %v5069_v49  ;;  %v862_v49 = vld [vmem:[#allocation8 + $0x580] sm:$0xff] }
 0x2d2   : > { %5072 = vmatprep.subr.bf16.mxu1 %v5071_v50  ;;  %v869_v50 = vld [vmem:[#allocation8 + $0x5b8] sm:$0xff]  ;;  %v5109_v52 = vpack.c.bf16 %v862_v49, %v856_v48  ;;  %v5145_v48 = vpack.c.bf16 %v780_v45, %v774_v44 }
 0x2d3   : > { %v5111_v53 = vpack.c.bf16 %v875_v51, %v869_v50  ;;  %v786_v50 = vld [vmem:[#allocation8 + $0x320] sm:$0xff]  ;;  %v792_v51 = vld [vmem:[#allocation8 + $0x350] sm:$0xff] }
 0x2d5   : > { %5074 = vmatpush1.bf16.msra.mxu1 %v5073_v55  ;;  %v874_v55 = vld [vmem:[#allocation8 + $0x5e0] sm:$0xff] }
 0x2d6   : > { %5076 = vmatprep.subr.bf16.mxu1 %v5075_v56  ;;  %v691_v56 = vld [vmem:[#allocation8 + $0x28] sm:$0xff]  ;;  %v5113_v58 = vpack.c.bf16 %v874_v55, %v868_v54  ;;  %v5149_v54 = vpack.c.bf16 %v792_v51, %v786_v50 }
 0x2d7   : > { %v5115_v59 = vpack.c.bf16 %v697_v57, %v691_v56  ;;  %v798_v56 = vld [vmem:[#allocation8 + $0x380] sm:$0xff]  ;;  %v804_v57 = vld [vmem:[#allocation8 + $0x3b0] sm:$0xff] }
 0x2d9   : > { %5078 = vmatpush1.bf16.msra.mxu1 %v5077_v62  ;;  %v696_v62 = vld [vmem:[#allocation8 + $0x50] sm:$0xff] }
 0x2da   : > { %5080 = vmatprep.subr.bf16.mxu1 %v5079_v5  ;;  %v703_v5 = vld [vmem:[#allocation8 + $0x88] sm:$0xff]  ;;  %v5117_v7 = vpack.c.bf16 %v696_v62, %v690_v60  ;;  %v5153_v60 = vpack.c.bf16 %v804_v57, %v798_v56 }
 0x2db   : > { %v5119_v8 = vpack.c.bf16 %v709_v6, %v703_v5  ;;  %v810_v5 = vld [vmem:[#allocation8 + $0x3e0] sm:$0xff]  ;;  %v816_v6 = vld [vmem:[#allocation8 + $0x410] sm:$0xff] }
 0x2dd   : > { %5082 = vmatpush1.bf16.msra.mxu1 %v5081_v10  ;;  %v708_v10 = vld [vmem:[#allocation8 + $0xb0] sm:$0xff] }
 0x2de   : > { %5084 = vmatprep.subr.bf16.mxu1 %v5083_v11  ;;  %v715_v11 = vld [vmem:[#allocation8 + $0xe8] sm:$0xff]  ;;  %v5121_v13 = vpack.c.bf16 %v708_v10, %v702_v9  ;;  %v5157_v9 = vpack.c.bf16 %v816_v6, %v810_v5 }
 0x2df   : > { %v5123_v16 = vpack.c.bf16 %v721_v12, %v715_v11  ;;  %v822_v11 = vld [vmem:[#allocation8 + $0x440] sm:$0xff]  ;;  %v828_v12 = vld [vmem:[#allocation8 + $0x470] sm:$0xff] }
 0x2e1   : > { %5086 = vmatpush1.bf16.msra.mxu1 %v5085_v18  ;;  %v720_v18 = vld [vmem:[#allocation8 + $0x110] sm:$0xff] }
 0x2e2   : > { %5088 = vmatprep.subr.bf16.mxu1 %v5087_v19  ;;  %v727_v19 = vld [vmem:[#allocation8 + $0x148] sm:$0xff]  ;;  %v5125_v0 = vpack.c.bf16 %v720_v18, %v714_v17  ;;  %v5161_v17 = vpack.c.bf16 %v828_v12, %v822_v11 }
 0x2e3   : > { %v5127_v1 = vpack.c.bf16 %v733_v22, %v727_v19  ;;  %v834_v19 = vld [vmem:[#allocation8 + $0x4a0] sm:$0xff]  ;;  %v840_v22 = vld [vmem:[#allocation8 + $0x4d0] sm:$0xff] }
 0x2e5   : > { %5090 = vmatpush1.bf16.msra.mxu1 %v5089_v15  ;;  %v732_v15 = vld [vmem:[#allocation8 + $0x170] sm:$0xff] }
 0x2e6   : > { %5092 = vmatprep.subr.bf16.mxu1 %v5091_v26  ;;  %v739_v26 = vld [vmem:[#allocation8 + $0x1a8] sm:$0xff]  ;;  %v5129_v14 = vpack.c.bf16 %v732_v15, %v726_v23  ;;  %v5165_v23 = vpack.c.bf16 %v840_v22, %v834_v19 }
 0x2e7   : > { %v5131_v28 = vpack.c.bf16 %v745_v27, %v739_v26  ;;  %v846_v26 = vld [vmem:[#allocation8 + $0x500] sm:$0xff]  ;;  %v852_v27 = vld [vmem:[#allocation8 + $0x530] sm:$0xff] }
 0x2e9   : > { %5094 = vmatpush1.bf16.msra.mxu1 %v5093_v4  ;;  %v744_v4 = vld [vmem:[#allocation8 + $0x1d0] sm:$0xff] }
 0x2ea   : > { %5096 = vmatprep.subr.bf16.mxu1 %v5095_v29  ;;  %v751_v29 = vld [vmem:[#allocation8 + $0x208] sm:$0xff]  ;;  %v5133_v33 = vpack.c.bf16 %v744_v4, %v738_v2  ;;  %v5169_v2 = vpack.c.bf16 %v852_v27, %v846_v26 }
 0x2eb   : > { %v5135_v21 = vpack.c.bf16 %v757_v30, %v751_v29  ;;  %v858_v29 = vld [vmem:[#allocation8 + $0x560] sm:$0xff]  ;;  %v864_v30 = vld [vmem:[#allocation8 + $0x590] sm:$0xff] }
 0x2ed   : > { %5098 = vmatpush1.bf16.msra.mxu1 %v5097_v34  ;;  %v763_v34 = vld [vmem:[#allocation8 + $0x268] sm:$0xff] }
 0x2ee   : > { %5100 = vmatprep.subr.bf16.mxu1 %v5099_v35  ;;  %v769_v35 = vld [vmem:[#allocation8 + $0x298] sm:$0xff] }
 0x2ef   : > { %v5139_v37 = vpack.c.bf16 %v769_v35, %v763_v34  ;;  %v870_v34 = vld [vmem:[#allocation8 + $0x5c0] sm:$0xff]  ;;  %v876_v35 = vld [vmem:[#allocation8 + $0x5f0] sm:$0xff] }
 0x2f1   : > { %5102 = vmatpush1.bf16.msra.mxu1 %v5101_v40  ;;  %v775_v40 = vld [vmem:[#allocation8 + $0x2c8] sm:$0xff] }
 0x2f2   : > { %5104 = vmatprep.subr.bf16.mxu1 %v5103_v41  ;;  %v781_v41 = vld [vmem:[#allocation8 + $0x2f8] sm:$0xff] }
 0x2f3   : > { %v5143_v43 = vpack.c.bf16 %v781_v41, %v775_v40  ;;  %v890_v41 = vsub.s32 2, %v7093_v61 }
 0x2f5   : > { %5106 = vmatpush1.bf16.msra.mxu1 %v5105_v46  ;;  %v787_v46 = vld [vmem:[#allocation8 + $0x328] sm:$0xff] }
 0x2f6   : > { %5108 = vmatprep.subr.bf16.mxu1 %v5107_v47  ;;  %v793_v47 = vld [vmem:[#allocation8 + $0x358] sm:$0xff] }
 0x2f7   : > { %v5147_v49 = vpack.c.bf16 %v793_v47, %v787_v46 }
 0x2f9   : > { %5110 = vmatpush1.bf16.msra.mxu1 %v5109_v52  ;;  %v799_v52 = vld [vmem:[#allocation8 + $0x388] sm:$0xff] }
 0x2fa   : > { %5112 = vmatprep.subr.bf16.mxu1 %v5111_v53  ;;  %v805_v53 = vld [vmem:[#allocation8 + $0x3b8] sm:$0xff] }
 0x2fb   : > { %v5151_v55 = vpack.c.bf16 %v805_v53, %v799_v52 }
 0x2fd   : > { %5114 = vmatpush1.bf16.msra.mxu1 %v5113_v58  ;;  %v811_v58 = vld [vmem:[#allocation8 + $0x3e8] sm:$0xff] }
 0x2fe   : > { %5116 = vmatprep.subr.bf16.mxu1 %v5115_v59  ;;  %v817_v59 = vld [vmem:[#allocation8 + $0x418] sm:$0xff] }
 0x2ff   : > { %v5155_v62 = vpack.c.bf16 %v817_v59, %v811_v58 }
 0x300   : > { %1052 = vmatmul.mubr.f32.vlgmr.msra.gmra.mrb[4].mxu1 %v7109_v25 }
 0x301   : > { %1057 = vmatprep.mubr.f32.mxu1 %v7115_v31  ;;  %5118 = vmatpush1.bf16.msra.mxu1 %v5117_v7  ;;  %v823_v7 = vld [vmem:[#allocation8 + $0x448] sm:$0xff] }
 0x302   : > { %5120 = vmatprep.subr.bf16.mxu1 %v5119_v8  ;;  %v829_v8 = vld [vmem:[#allocation8 + $0x478] sm:$0xff] }
 0x303   : > { %v5159_v10 = vpack.c.bf16 %v829_v8, %v823_v7  ;;  %v6581_v8 = vmov 1983009808  }
 0x304   : > { %1058 = vmatmul.mubr.f32.gmra.mrb[6].mxu1 %v7117_v32 }
 0x305   : > { %5122 = vmatpush1.bf16.msra.mxu1 %v5121_v13  ;;  %1128 = vmatprep.mubr.f32.mxu1 %v7107_v24  ;;  %v750_v24 = vld [vmem:[#allocation8 + $0x200] sm:$0xff]  ;;  %v835_v13 = vld [vmem:[#allocation8 + $0x4a8] sm:$0xff] }
 0x306   : > { %5124 = vmatprep.subr.bf16.mxu1 %v5123_v16  ;;  %v5137_v36 = vpack.c.bf16 %v756_v20, %v750_v24  ;;  %v841_v16 = vld [vmem:[#allocation8 + $0x4d8] sm:$0xff]  ;;  %v5173_v24 = vpack.c.bf16 %v864_v30, %v858_v29 }
 0x307   : > { %v5163_v18 = vpack.c.bf16 %v841_v16, %v835_v13 }
 0x309   : > { %5126 = vmatpush1.bf16.msra.mxu1 %v5125_v0  ;;  %v847_v0 = vld [vmem:[#allocation8 + $0x508] sm:$0xff] }
 0x30a   : > { %5128 = vmatprep.subr.bf16.mxu1 %v5127_v1  ;;  %v853_v1 = vld [vmem:[#allocation8 + $0x538] sm:$0xff] }
 0x30b   : > { %v5167_v15 = vpack.c.bf16 %v853_v1, %v847_v0 }
 0x30d   : > { %5130 = vmatpush1.bf16.msra.mxu1 %v5129_v14  ;;  %v859_v14 = vld [vmem:[#allocation8 + $0x568] sm:$0xff] }
 0x30e   : > { %5132 = vmatprep.subr.bf16.mxu1 %v5131_v28  ;;  %v865_v28 = vld [vmem:[#allocation8 + $0x598] sm:$0xff] }
 0x30f   : > { %v5171_v4 = vpack.c.bf16 %v865_v28, %v859_v14 }
 0x311   : > { %5134 = vmatpush1.bf16.msra.mxu1 %v5133_v33  ;;  %v871_v33 = vld [vmem:[#allocation8 + $0x5c8] sm:$0xff] }
 0x312   : > { %5136 = vmatprep.subr.bf16.mxu1 %v5135_v21  ;;  %v877_v21 = vld [vmem:[#allocation8 + $0x5f8] sm:$0xff] }
 0x313   : > { %v5175_v20 = vpack.c.bf16 %v877_v21, %v871_v33 }
 0x315   : > { %5138 = vmatpush1.bf16.msra.mxu1 %v5137_v36  ;;  %v5177_v36 = vpack.c.bf16 %v876_v35, %v870_v34 }
 0x316   : > { %5140 = vmatprep.subr.bf16.mxu1 %v5139_v37 }
 0x319   : > { %5142 = vmatpush1.bf16.msra.mxu1 %v5141_v42  ;;  %v894_v42 = vsub.s32 3, %v7093_v61 }
 0x31a   : > { %5144 = vmatprep.subr.bf16.mxu1 %v5143_v43  ;;  %v7131_v43 = vld [vmem:[#allocation10] sm:$0x3f] }
 0x31b   : > { %v891_v44 = vrot.slane %v7131_v43, %v890_v41  ;;  %v887_v58 = vrot.slane %v7131_v43, %v7096_v63 }
 0x31d   : > { %5146 = vmatpush1.bf16.msra.mxu1 %v5145_v48 }
 0x31e   : > { %5148 = vmatprep.subr.bf16.mxu1 %v5147_v49 }
 0x321   : > { %5150 = vmatpush1.bf16.msra.mxu1 %v5149_v54 }
 0x322   : > { %5152 = vmatprep.subr.bf16.mxu1 %v5151_v55 }
 0x325   : > { %5154 = vmatpush1.bf16.msra.mxu1 %v5153_v60 }
 0x326   : > { %5156 = vmatprep.subr.bf16.mxu1 %v5155_v62 }
 0x329   : > { %5158 = vmatpush1.bf16.msra.mxu1 %v5157_v9  ;;  %v1160_v9 = vunpack.c.l.s4 %v6581_v8 }
 0x32a   : > { %5160 = vmatprep.subr.bf16.mxu1 %v5159_v10  ;;  %v6582_v10 = vmov 1934713408  }
 0x32b   : > { %v1192_v11 = vunpack.c.l.s4 %v6582_v10  ;;  %v1161_v12 = vunpack.c.0.s8 %v1160_v9 }
 0x32d   : > { %5162 = vmatpush1.bf16.msra.mxu1 %v5161_v17  ;;  %v1193_v13 = vunpack.c.0.s8 %v1192_v11 }
 0x32e   : > { %5164 = vmatprep.subr.bf16.mxu1 %v5163_v18  ;;  %v7170_v18 = vsub.s32 %v1161_v12, %v7093_v61 }
 0x32f   : > { %v7173_v0 = vsub.s32 %v1193_v13, %v7093_v61 }
 0x331   : > { %5166 = vmatpush1.bf16.msra.mxu1 %v5165_v23 }
 0x332   : > { %5168 = vmatprep.subr.bf16.mxu1 %v5167_v15 }
 0x335   : > { %5170 = vmatpush1.bf16.msra.mxu1 %v5169_v2 }
 0x336   : > { %5172 = vmatprep.subr.bf16.mxu1 %v5171_v4 }
 0x339   : > { %5174 = vmatpush1.bf16.msra.mxu1 %v5173_v24 }
 0x33a   : > { %5176 = vmatprep.subr.bf16.mxu1 %v5175_v20 }
 0x33d   : > { %5178 = vmatpush1.bf16.msra.mxu1 %v5177_v36 }
 0x340   : > { %1129 = vmatmul.mubr.f32.vlgmr.msra.gmra.mrb[8].mxu1 %v7109_v25  ;;  %v895_v25 = vrot.slane %v7131_v43, %v894_v42 }
 0x341   : > { %1134 = vmatprep.mubr.f32.mxu1 %v7115_v31 }
 0x344   : > { %1135 = vmatmul.mubr.f32.gmra.mrb[10].mxu1 %v7117_v32  ;;  %v883_v32 = vrot.slane %v7131_v43, %v7099_v3 }
 0x393   : > { %v976_v37 = vpop.f32.mrb[0].mxu1 }
 0x394   : > { %v978_v38 = vpop.f32.mrb[1].mxu1  ;;  %v977_v51 = vadd.f32 %v976_v37, %v883_v32 }
 0x395   : > { %v979_v59 = vadd.f32 %v978_v38, %v887_v58 }
 0x397   : > { %v982_v39 = vpop.f32.mrb[2].mxu1  ;;  %v1157_v27 = vcombine.low %v977_v51, %v979_v59  ;;  %v1158_v14 = vcombine.high %v977_v51, %v979_v59 }
 0x398   : > { %v984_v40 = vpop.f32.mrb[3].mxu1  ;;  %v983_v57 = vadd.f32 %v982_v39, %v883_v32 }
 0x399   : > { %v985_v60 = vadd.f32 %v984_v40, %v887_v58  ;;  %v1165_v36 = vrot.slane %v1157_v27, %v7170_v18  ;;  %v1172_v37 = vrot.slane %v1158_v14, %v7170_v18 }
 0x39b   : > { %v1225_v33 = vcombine.low %v983_v57, %v985_v60  ;;  %v1226_v21 = vcombine.high %v983_v57, %v985_v60 }
 0x39d   : > { %v7189_v32 = vrot.slane %v1226_v21, %v7170_v18 }
 0x3d3   : > { %v1053_v31 = vpop.f32.mrb[4].mxu1 }
 0x3d4   : > { %v1054_v45 = vadd.f32 %v1053_v31, %v891_v44  ;;  %v1055_v46 = vpop.f32.mrb[5].mxu1  ;;  %v7186_v31 = vrot.slane %v1225_v33, %v7170_v18 }
 0x3d5   : > { %v1056_v47 = vadd.f32 %v1055_v46, %v895_v25 }
 0x3d6   : > { %1431 = vrot.lane.b32.xlu0 %v1054_v45, %s6580_s13 }
 0x3d7   : > { %v1445_v48 = vcombine.low %v1054_v45, %v1056_v47  ;;  %v1446_v49 = vcombine.high %v1054_v45, %v1056_v47  ;;  %v1059_v50 = vpop.f32.mrb[6].mxu1  ;;  %1439 = vrot.lane.b32.xlu1 %v1056_v47, %s6580_s13 }
 0x3d8   : > { %v7143_v52 = vadd.f32 %v1059_v50, %v891_v44  ;;  %v1061_v53 = vpop.f32.mrb[7].mxu1 }
 0x3d9   : > { %v7145_v54 = vadd.f32 %v1061_v53, %v895_v25  ;;  %v1453_v1 = vrot.slane %v1445_v48, %v7170_v18  ;;  %v1460_v23 = vrot.slane %v1446_v49, %v7170_v18 }
 0x3da   : > { %1143 = vrot.lane.b32.xlu0 %v977_v51, %s6580_s13 }
 0x3db   : > { %v1513_v55 = vcombine.low %v7143_v52, %v7145_v54  ;;  %v1514_v56 = vcombine.high %v7143_v52, %v7145_v54  ;;  %1433 = vrot.lane.b32.xlu1 %v7143_v52, %s6580_s13 }
 0x3dd   : > { %v1521_v51 = vrot.slane %v1513_v55, %v7170_v18  ;;  %v1528_v52 = vrot.slane %v1514_v56, %v7170_v18 }
 0x3de   : > { %1145 = vrot.lane.b32.xlu0 %v983_v57, %s6580_s13 }
 0x3df   : > { %1441 = vrot.lane.b32.xlu1 %v7145_v54, %s6580_s13 }
 0x3e3   : > { %1151 = vrot.lane.b32.xlu1 %v979_v59, %s6580_s13 }
 0x3e7   : > { %1153 = vrot.lane.b32.xlu1 %v985_v60, %s6580_s13 }
 0x413   : > { %v7161_v62 = vpop.f32.mrb[8].mxu1 }
 0x414   : > { %v7163_v5 = vpop.f32.mrb[9].mxu1 }
 0x417   : > { %v7165_v6 = vpop.f32.mrb[10].mxu1 }
 0x418   : > { %v7167_v7 = vpop.f32.mrb[11].mxu1 }
 0x448   : > { %v1432_v16 = vpop.permute.xlu0 %1431 }
 0x449   : > { %v1440_v17 = vpop.permute.xlu1 %1439 }
 0x44a   : > { %v1461_v19 = vcombine.low %v1432_v16, %v1440_v17  ;;  %v1462_v22 = vcombine.high %v1432_v16, %v1440_v17 }
 0x44c   : > { %v1469_v15 = vrot.slane %v1461_v19, %v7170_v18  ;;  %v1476_v26 = vrot.slane %v1462_v22, %v7170_v18  ;;  %v1144_v53 = vpop.permute.xlu0 %1143 }
 0x44d   : > { %v1434_v28 = vpop.permute.xlu1 %1433 }
 0x44e   : > { %v1477_v2 = vcombine.low %v1453_v1, %v1469_v15  ;;  %v1478_v4 = vcombine.high %v1453_v1, %v1469_v15  ;;  %v1493_v29 = vcombine.low %v1460_v23, %v1476_v26  ;;  %v1494_v30 = vcombine.high %v1460_v23, %v1476_v26 }
 0x450   : > { %v1485_v24 = vrot.slane %v1477_v2, %v7173_v0  ;;  %v1492_v20 = vrot.slane %v1478_v4, %v7173_v0  ;;  %v1501_v34 = vrot.slane %v1493_v29, %v7173_v0  ;;  %v1508_v35 = vrot.slane %v1494_v30, %v7173_v0  ;;  %v1146_v33 = vpop.permute.xlu0 %1145 }
 0x451   : > { %v1442_v38 = vpop.permute.xlu1 %1441 }
 0x452   : > { %v1581_v39 = vcombine.low %v1485_v24, %v1492_v20  ;;  %v4840_v40 = vcombine.high %v1485_v24, %v1492_v20  ;;  %v1597_v44 = vcombine.low %v1501_v34, %v1508_v35  ;;  %v4841_v25 = vcombine.high %v1501_v34, %v1508_v35 }
 0x453   : > { %v1529_v45 = vcombine.low %v1434_v28, %v1442_v38  ;;  %v1530_v46 = vcombine.high %v1434_v28, %v1442_v38 }
 0x454   : > { %v7192_v47 = vrot.slane %v1581_v39, %v7170_v18  ;;  %v7195_v48 = vrot.slane %v4840_v40, %v7170_v18  ;;  %v7198_v49 = vrot.slane %v1597_v44, %v7170_v18  ;;  %v1612_v50 = vrot.slane %v4841_v25, %v7170_v18 }
 0x455   : > { %v1537_v54 = vrot.slane %v1529_v45, %v7170_v18  ;;  %v1544_v57 = vrot.slane %v1530_v46, %v7170_v18  ;;  %v1152_v58 = vpop.permute.xlu1 %1151 }
 0x456   : > { %v1173_v59 = vcombine.low %v1144_v53, %v1152_v58  ;;  %v1174_v60 = vcombine.high %v1144_v53, %v1152_v58  ;;  %v1613_v8 = vcombine.low %v7192_v47, %v7195_v48  ;;  %v1614_v9 = vcombine.high %v7192_v47, %v7195_v48 }
 0x457   : > { %v1545_v10 = vcombine.low %v1521_v51, %v1537_v54  ;;  %v1546_v11 = vcombine.high %v1521_v51, %v1537_v54  ;;  %v1561_v12 = vcombine.low %v1528_v52, %v1544_v57  ;;  %v1562_v55 = vcombine.high %v1528_v52, %v1544_v57 }
 0x458   : > { %v1181_v56 = vrot.slane %v1173_v59, %v7170_v18  ;;  %v1188_v13 = vrot.slane %v1174_v60, %v7170_v18  ;;  %v7212_v16 = vrot.slane %v1613_v8, %v7173_v0  ;;  %v1629_v17 = vcombine.low %v7198_v49, %v1612_v50 }
 0x459   : > { %v1553_v19 = vrot.slane %v1545_v10, %v7173_v0  ;;  %v1560_v22 = vrot.slane %v1546_v11, %v7173_v0  ;;  %v1569_v1 = vrot.slane %v1561_v12, %v7173_v0  ;;  %v1576_v23 = vrot.slane %v1562_v55, %v7173_v0  ;;  %v1154_v28 = vpop.permute.xlu1 %1153 }
 0x45a   : > { %v1189_v15 = vcombine.low %v1165_v36, %v1181_v56  ;;  %v1190_v26 = vcombine.high %v1165_v36, %v1181_v56  ;;  %v1205_v27 = vcombine.low %v1172_v37, %v1188_v13  ;;  %v1206_v14 = vcombine.high %v1172_v37, %v1188_v13 }
 0x45b   : > { %v1649_v2 = vcombine.low %v1553_v19, %v1560_v22  ;;  %v4842_v4 = vcombine.high %v1553_v19, %v1560_v22  ;;  %v1665_v29 = vcombine.low %v1569_v1, %v1576_v23  ;;  %v4843_v30 = vcombine.high %v1569_v1, %v1576_v23 }
 0x45c   : > { %v1197_v21 = vrot.slane %v1189_v15, %v7173_v0  ;;  %v1204_v24 = vrot.slane %v1190_v26, %v7173_v0  ;;  %v1213_v20 = vrot.slane %v1205_v27, %v7173_v0  ;;  %v1220_v34 = vrot.slane %v1206_v14, %v7173_v0 }
 0x45d   : > { %v1241_v35 = vcombine.low %v1146_v33, %v1154_v28  ;;  %v1242_v38 = vcombine.high %v1146_v33, %v1154_v28  ;;  %v1630_v36 = vcombine.high %v7198_v49, %v1612_v50  ;;  %v1637_v37 = vrot.slane %v1629_v17, %v7173_v0 }
 0x45e   : > { %v1656_v39 = vrot.slane %v1649_v2, %v7170_v18  ;;  %v1664_v40 = vrot.slane %v4842_v4, %v7170_v18  ;;  %v1672_v44 = vrot.slane %v1665_v29, %v7170_v18  ;;  %v1680_v25 = vrot.slane %v4843_v30, %v7170_v18 }
 0x45f   : > { %v1249_v45 = vrot.slane %v1241_v35, %v7170_v18  ;;  %v1256_v46 = vrot.slane %v1242_v38, %v7170_v18  ;;  %v1645_v47 = vcombine.low %v7212_v16, %v1637_v37  ;;  %v1646_v48 = vcombine.high %v7212_v16, %v1637_v37 }
 0x460   : > { %v1681_v51 = vcombine.low %v1656_v39, %v1664_v40  ;;  %v1682_v49 = vcombine.high %v1656_v39, %v1664_v40  ;;  %v1697_v50 = vcombine.low %v1672_v44, %v1680_v25  ;;  %v1698_v52 = vcombine.high %v1672_v44, %v1680_v25 }
 0x461   : > { %v1257_v53 = vcombine.low %v7186_v31, %v1249_v45  ;;  %v1258_v54 = vcombine.high %v7186_v31, %v1249_v45  ;;  %v1273_v57 = vcombine.low %v7189_v32, %v1256_v46  ;;  %v1274_v58 = vcombine.high %v7189_v32, %v1256_v46 }
 0x462   : > { %v1689_v59 = vrot.slane %v1681_v51, %v7173_v0  ;;  %v1705_v60 = vrot.slane %v1697_v50, %v7173_v0  ;;  %v1628_v8 = vrot.slane %v1614_v9, %v7173_v0  ;;  %v1644_v10 = vrot.slane %v1630_v36, %v7173_v0 }
 0x463   : > { %v1265_v11 = vrot.slane %v1257_v53, %v7173_v0  ;;  %v1272_v12 = vrot.slane %v1258_v54, %v7173_v0  ;;  %v1281_v55 = vrot.slane %v1273_v57, %v7173_v0  ;;  %v1288_v31 = vrot.slane %v1274_v58, %v7173_v0 }
 0x464   : > { %v1713_v56 = vcombine.low %v1689_v59, %v1705_v60  ;;  %v1714_v13 = vcombine.high %v1689_v59, %v1705_v60  ;;  %v1648_v16 = vcombine.high %v1628_v8, %v1644_v10  ;;  %v1696_v32 = vrot.slane %v1682_v49, %v7173_v0 }
 0x465   : > { %v1361_v17 = vcombine.low %v1265_v11, %v1272_v12  ;;  %v4838_v19 = vcombine.high %v1265_v11, %v1272_v12  ;;  %v1377_v22 = vcombine.low %v1281_v55, %v1288_v31  ;;  %v4839_v1 = vcombine.high %v1281_v55, %v1288_v31 }
 0x466   : > { %v5179_v23 = vpack.c.bf16 %v1713_v56, %v1645_v47  ;;  %v1712_v15 = vrot.slane %v1698_v52, %v7173_v0  ;;  %v1293_v26 = vcombine.low %v1197_v21, %v1204_v24  ;;  %v4836_v27 = vcombine.high %v1197_v21, %v1204_v24 }
 0x467   : > { %v1368_v14 = vrot.slane %v1361_v17, %v7170_v18  ;;  %v1376_v28 = vrot.slane %v4838_v19, %v7170_v18  ;;  %v1384_v2 = vrot.slane %v1377_v22, %v7170_v18  ;;  %v1392_v4 = vrot.slane %v4839_v1, %v7170_v18 }
 0x468   : > { %5181 = vmatprep.subr.msk.bf16.mxu0 %vm7248_vm1, %v5179_v23  ;;  %v1716_v29 = vcombine.high %v1696_v32, %v1712_v15  ;;  %v1300_v30 = vrot.slane %v1293_v26, %v7170_v18  ;;  %v1308_v33 = vrot.slane %v4836_v27, %v7170_v18  ;;  %v1309_v35 = vcombine.low %v1213_v20, %v1220_v34 }
 0x469   : > { %v1394_v38 = vcombine.high %v1368_v14, %v1376_v28  ;;  %v1410_v36 = vcombine.high %v1384_v2, %v1392_v4  ;;  %5184 = vmatpush3.bf16.xpose.msk.msra.mxu0 %vm7248_vm1, %v5179_v23  ;;  %v4837_v21 = vcombine.high %v1213_v20, %v1220_v34  ;;  %v5185_v24 = vpack.c.bf16 %v1714_v13, %v1646_v48 }
 0x46a   : > { %v5197_v37 = vpack.c.bf16 %v1716_v29, %v1648_v16  ;;  %v1316_v39 = vrot.slane %v1309_v35, %v7170_v18  ;;  %v1325_v40 = vcombine.low %v1300_v30, %v1308_v33  ;;  %v1326_v44 = vcombine.high %v1300_v30, %v1308_v33 }
 0x46b   : > { %v1324_v25 = vrot.slane %v4837_v21, %v7170_v18  ;;  %5187 = vmatprep.subr.msk.bf16.mxu0 %vm7248_vm1, %v5185_v24  ;;  %v1393_v45 = vcombine.low %v1368_v14, %v1376_v28  ;;  %v1408_v46 = vrot.slane %v1394_v38, %v7173_v0  ;;  %v1409_v47 = vcombine.low %v1384_v2, %v1392_v4 }
 0x46c   : > { %5199 = vmatprep.subr.msk.bf16.mxu1 %vm7248_vm1, %v5197_v37  ;;  %v1647_v51 = vcombine.low %v1628_v8, %v1644_v10  ;;  %v1333_v20 = vrot.slane %v1325_v40, %v7173_v0  ;;  %v1340_v49 = vrot.slane %v1326_v44, %v7173_v0  ;;  %v1424_v50 = vrot.slane %v1410_v36, %v7173_v0 }
 0x46d   : > { %5202 = vmatpush3.bf16.xpose.msk.msra.mxu1 %vm7248_vm1, %v5197_v37  ;;  %v1341_v34 = vcombine.low %v1316_v39, %v1324_v25  ;;  %v1342_v48 = vcombine.high %v1316_v39, %v1324_v25  ;;  %v1401_v52 = vrot.slane %v1393_v45, %v7173_v0  ;;  %v1417_v53 = vrot.slane %v1409_v47, %v7173_v0 }
 0x46e   : > { %v1715_v54 = vcombine.low %v1696_v32, %v1712_v15  ;;  %v1428_v11 = vcombine.high %v1408_v46, %v1424_v50  ;;  %v1427_v56 = vcombine.low %v1408_v46, %v1424_v50  ;;  %v898_v29 = vsub.s32 4, %v7093_v61 }
 0x46f   : > { %v1349_v57 = vrot.slane %v1341_v34, %v7173_v0  ;;  %v1356_v58 = vrot.slane %v1342_v48, %v7173_v0  ;;  %v1425_v10 = vcombine.low %v1401_v52, %v1417_v53  ;;  %v1426_v55 = vcombine.high %v1401_v52, %v1417_v53 }
 0x470   : > { %v5191_v59 = vpack.c.bf16 %v1715_v54, %v1647_v51  ;;  %v902_v30 = vsub.s32 5, %v7093_v61  ;;  %v899_v33 = vrot.slane %v7131_v43, %v898_v29 }
 0x471   : > { %v1357_v60 = vcombine.low %v1333_v20, %v1349_v57  ;;  %v1360_v8 = vcombine.high %v1340_v49, %v1356_v58  ;;  %v1358_v12 = vcombine.high %v1333_v20, %v1349_v57  ;;  %v1359_v31 = vcombine.low %v1340_v49, %v1356_v58 }
 0x472   : > { %v903_v35 = vrot.slane %v7131_v43, %v902_v30  ;;  %v7316_v38 = vadd.f32 %v7165_v6, %v899_v33  ;;  %v1131_v21 = vadd.f32 %v7161_v62, %v899_v33 }
 0x473   : > { %4935 = vmatprep.mubr.msk.f32.mxu0 %vm2005_vm0, %v1357_v60  ;;  %4956 = vmatprep.mubr.msk.f32.mxu1 %vm2005_vm0, %v1360_v8 }
 0x474   : > { %4936 = vmatmul.mubr.msk.f32.vlgmr.msra.gmra.mrb[0].mxu0 %vm2005_vm0, %v1425_v10  ;;  %4957 = vmatmul.mubr.msk.f32.vlgmr.msra.gmra.mrb[12].mxu1 %vm2005_vm0, %v1428_v11  ;;  %v1133_v36 = vadd.f32 %v7163_v5, %v903_v35 }
 0x475   : > { %5190 = vmatpush3.bf16.xpose.msk.msra.mxu0 %vm7248_vm1, %v5185_v24  ;;  %4942 = vmatprep.mubr.msk.f32.mxu0 %vm2005_vm0, %v1358_v12  ;;  %v7324_v24 = vadd.f32 %v7167_v7, %v903_v35 }
 0x476   : > { %5193 = vmatprep.subr.msk.bf16.mxu0 %vm7248_vm1, %v5191_v59 }
 0x47c   : > { %4943 = vmatmul.mubr.msk.f32.vlgmr.msra.gmra.mrb[2].mxu0 %vm2005_vm0, %v1426_v55 }
 0x47d   : > { %5196 = vmatpush3.bf16.xpose.msk.msra.mxu0 %vm7248_vm1, %v5191_v59  ;;  %4949 = vmatprep.mubr.msk.f32.mxu0 %vm2005_vm0, %v1359_v31 }
 0x484   : > { %4950 = vmatmul.mubr.msk.f32.vlgmr.msra.gmra.mrb[4].mxu0 %vm2005_vm0, %v1427_v56  ;;  %v1733_v56 = vcombine.low %v1131_v21, %v1133_v36 }
 0x547   : > { %v4937_v13 = vpop.f32.mrb[0].mxu0  ;;  %v7293_v16 = vpop.f32.mrb[12].mxu1 }
 0x548   : > { %v2084_v32 = vpop.f32.mrb[1].mxu0  ;;  %v7295_v17 = vpop.f32.mrb[13].mxu1  ;;  %v2358_v19 = vsel %vm2354_vm2, %v4937_v13, -inf  ;;  %v2376_v2 = vsel %vm2354_vm2, %v7293_v16, -inf }
 0x549   : > { %2359 = vmax.xlane.f32.xlu1 %v2358_v19  ;;  %v2355_v22 = vsel %vm2354_vm2, %v2084_v32, -inf  ;;  %v2373_v4 = vsel %vm2354_vm2, %v7295_v17, -inf }
 0x54a   : > { %2356 = vmax.xlane.f32.xlu0 %v2355_v22 }
 0x54f   : > { %v4944_v1 = vpop.f32.mrb[2].mxu0 }
 0x550   : > { %v2171_v9 = vpop.f32.mrb[3].mxu0  ;;  %v2364_v23 = vsel %vm2354_vm2, %v4944_v1, -inf }
 0x551   : > { %2365 = vmax.xlane.f32.xlu0 %v2364_v23  ;;  %v2361_v15 = vsel %vm2354_vm2, %v2171_v9, -inf }
 0x555   : > { %2362 = vmax.xlane.f32.xlu0 %v2361_v15  ;;  %v1741_v15 = vrot.slane %v1733_v56, %v7170_v18 }
 0x557   : > { %v4951_v26 = vpop.f32.mrb[4].mxu0 }
 0x558   : > { %v2258_v27 = vpop.f32.mrb[5].mxu0  ;;  %v2370_v14 = vsel %vm2354_vm2, %v4951_v26, -inf }
 0x559   : > { %2371 = vmax.xlane.f32.xlu1 %v2370_v14  ;;  %v2367_v28 = vsel %vm2354_vm2, %v2258_v27, -inf }
 0x55a   : > { %2368 = vmax.xlane.f32.xlu0 %v2367_v28 }
 0x55d   : > { %2377 = vmax.xlane.f32.xlu1 %v2376_v2 }
 0x55e   : > { %2374 = vmax.xlane.f32.xlu0 %v2373_v4 }
 0x56e   : > { %1721 = vrot.lane.b32.xlu1 %v7316_v38, %s6580_s13 }
 0x572   : > { %1727 = vrot.lane.b32.xlu1 %v1133_v36, %s6580_s13 }
 0x574   : > { %1719 = vrot.lane.b32.xlu0 %v1131_v21, %s6580_s13 }
 0x576   : > { %1729 = vrot.lane.b32.xlu1 %v7324_v24, %s6580_s13 }
 0x5d6   : > { %v2360_v43 = vpop.xlane.xlu1 %2359 }
 0x5d7   : > { %v2380_v6 = vsub.f32 %v4937_v13, %v2360_v43  ;;  %v2357_v37 = vpop.xlane.xlu0 %2356  ;;  %v1734_v13 = vcombine.high %v1131_v21, %v1133_v36 }
 0x5d8   : > { %v2379_v39 = vsub.f32 %v2084_v32, %v2357_v37 }
 0x5d9   : > { %v2389_v40 = vmul.f32 1.442695, %v2380_v6 }
 0x5da   : > { %v2387_v44 = vmul.f32 1.442695, %v2379_v39 }
 0x5db   : > { %5999 = vpow2.f32 %v2389_v40 }
 0x5dc   : > { %6001 = vpow2.f32 %v2387_v44 }
 0x5de   : > { %v2366_v5 = vpop.xlane.xlu0 %2365 }
 0x5df   : > { %v2382_v62 = vsub.f32 %v4944_v1, %v2366_v5  ;;  %v1801_v1 = vcombine.low %v7316_v38, %v7324_v24 }
 0x5e1   : > { %v2393_v25 = vmul.f32 1.442695, %v2382_v62  ;;  %v1809_v21 = vrot.slane %v1801_v1, %v7170_v18 }
 0x5e2   : > { %v2363_v45 = vpop.xlane.xlu0 %2362 }
 0x5e3   : > { %6003 = vpow2.f32 %v2393_v25  ;;  %v2381_v7 = vsub.f32 %v2171_v9, %v2363_v45  ;;  %v1802_v9 = vcombine.high %v7316_v38, %v7324_v24 }
 0x5e5   : > { %v7329_v46 = vpop.eup %5999  ;;  %v2391_v47 = vmul.f32 1.442695, %v2381_v7  ;;  %v1816_v24 = vrot.slane %v1802_v9, %v7170_v18 }
 0x5e6   : > { %v7331_v51 = vpop.eup %6001  ;;  %v2372_v20 = vpop.xlane.xlu1 %2371  ;;  %v2406_v34 = vsel %vm2354_vm2, %v7329_v46, 0.0 }
 0x5e7   : > { %6005 = vpow2.f32 %v2391_v47  ;;  %v2384_v48 = vsub.f32 %v4951_v26, %v2372_v20  ;;  %2407 = vadd.xlane.f32.xlu1 %v2406_v34  ;;  %v2369_v49 = vpop.xlane.xlu0 %2368  ;;  %v2403_v50 = vsel %vm2354_vm2, %v7331_v51, 0.0  ;;  %v1748_v26 = vrot.slane %v1734_v13, %v7170_v18 }
 0x5e8   : > { %v2383_v52 = vsub.f32 %v2258_v27, %v2369_v49  ;;  %2404 = vadd.xlane.f32.xlu0 %v2403_v50 }
 0x5e9   : > { %v2397_v53 = vmul.f32 1.442695, %v2384_v48 }
 0x5ea   : > { %v2395_v54 = vmul.f32 1.442695, %v2383_v52  ;;  %v2378_v57 = vpop.xlane.xlu1 %2377 }
 0x5eb   : > { %6007 = vpow2.f32 %v2397_v53  ;;  %v2386_v58 = vsub.f32 %v7293_v16, %v2378_v57  ;;  %v2375_v59 = vpop.xlane.xlu0 %2374 }
 0x5ec   : > { %v2385_v60 = vsub.f32 %v7295_v17, %v2375_v59  ;;  %6009 = vpow2.f32 %v2395_v54 }
 0x5ed   : > { %v7339_v8 = vpop.eup %6003  ;;  %v2401_v10 = vmul.f32 1.442695, %v2386_v58 }
 0x5ee   : > { %v2399_v11 = vmul.f32 1.442695, %v2385_v60  ;;  %v1722_v12 = vpop.permute.xlu1 %1721  ;;  %v2412_v55 = vsel %vm2354_vm2, %v7339_v8, 0.0 }
 0x5ef   : > { %6011 = vpow2.f32 %v2401_v10  ;;  %2413 = vadd.xlane.f32.xlu1 %v2412_v55  ;;  %v1720_v16 = vpop.permute.xlu0 %1719 }
 0x5f0   : > { %6013 = vpow2.f32 %v2399_v11 }
 0x5f1   : > { %v7343_v31 = vpop.eup %6005 }
 0x5f2   : > { %v1728_v32 = vpop.permute.xlu1 %1727  ;;  %v2409_v17 = vsel %vm2354_vm2, %v7343_v31, 0.0 }
 0x5f3   : > { %v1749_v19 = vcombine.low %v1720_v16, %v1728_v32  ;;  %v1750_v22 = vcombine.high %v1720_v16, %v1728_v32  ;;  %2410 = vadd.xlane.f32.xlu0 %v2409_v17 }
 0x5f5   : > { %v7351_v23 = vpop.eup %6007  ;;  %v1757_v27 = vrot.slane %v1749_v19, %v7170_v18  ;;  %v1764_v14 = vrot.slane %v1750_v22, %v7170_v18 }
 0x5f6   : > { %v1730_v28 = vpop.permute.xlu1 %1729  ;;  %v2418_v2 = vsel %vm2354_vm2, %v7351_v23, 0.0  ;;  %v7359_v4 = vpop.eup %6009 }
 0x5f7   : > { %v1765_v33 = vcombine.low %v1741_v15, %v1757_v27  ;;  %v1766_v35 = vcombine.high %v1741_v15, %v1757_v27  ;;  %v1781_v36 = vcombine.low %v1748_v26, %v1764_v14  ;;  %v1782_v38 = vcombine.high %v1748_v26, %v1764_v14  ;;  %2419 = vadd.xlane.f32.xlu0 %v2418_v2 }
 0x5f8   : > { %v1817_v43 = vcombine.low %v1722_v12, %v1730_v28  ;;  %v1818_v6 = vcombine.high %v1722_v12, %v1730_v28  ;;  %v2415_v7 = vsel %vm2354_vm2, %v7359_v4, 0.0 }
 0x5f9   : > { %v7363_v37 = vpop.eup %6011  ;;  %v1773_v39 = vrot.slane %v1765_v33, %v7173_v0  ;;  %v1780_v40 = vrot.slane %v1766_v35, %v7173_v0  ;;  %v1789_v44 = vrot.slane %v1781_v36, %v7173_v0  ;;  %v1796_v5 = vrot.slane %v1782_v38, %v7173_v0 }
 0x5fa   : > { %v1825_v62 = vrot.slane %v1817_v43, %v7170_v18  ;;  %v1832_v25 = vrot.slane %v1818_v6, %v7170_v18  ;;  %v2424_v45 = vsel %vm2354_vm2, %v7363_v37, 0.0  ;;  %v7375_v49 = vpop.eup %6013 }
 0x5fb   : > { %v1869_v47 = vcombine.low %v1773_v39, %v1780_v40  ;;  %v4844_v20 = vcombine.high %v1773_v39, %v1780_v40  ;;  %v1885_v34 = vcombine.low %v1789_v44, %v1796_v5  ;;  %v4845_v48 = vcombine.high %v1789_v44, %v1796_v5  ;;  %2425 = vadd.xlane.f32.xlu1 %v2424_v45 }
 0x5fc   : > { %v1833_v50 = vcombine.low %v1809_v21, %v1825_v62  ;;  %v1834_v52 = vcombine.high %v1809_v21, %v1825_v62  ;;  %v1849_v53 = vcombine.low %v1816_v24, %v1832_v25  ;;  %v1850_v54 = vcombine.high %v1816_v24, %v1832_v25  ;;  %2416 = vadd.xlane.f32.xlu0 %v2415_v7 }
 0x5fd   : > { %v1876_v57 = vrot.slane %v1869_v47, %v7170_v18  ;;  %v1884_v58 = vrot.slane %v4844_v20, %v7170_v18  ;;  %v1892_v59 = vrot.slane %v1885_v34, %v7170_v18  ;;  %v1900_v60 = vrot.slane %v4845_v48, %v7170_v18 }
 0x5fe   : > { %v1841_v10 = vrot.slane %v1833_v50, %v7173_v0  ;;  %v1848_v11 = vrot.slane %v1834_v52, %v7173_v0  ;;  %v1857_v12 = vrot.slane %v1849_v53, %v7173_v0  ;;  %v1864_v55 = vrot.slane %v1850_v54, %v7173_v0 }
 0x5ff   : > { %v2421_v56 = vsel %vm2354_vm2, %v7375_v49, 0.0  ;;  %v1901_v13 = vcombine.low %v1876_v57, %v1884_v58  ;;  %v1917_v16 = vcombine.low %v1892_v59, %v1900_v60  ;;  %v1902_v32 = vcombine.high %v1876_v57, %v1884_v58 }
 0x600   : > { %v1937_v17 = vcombine.low %v1841_v10, %v1848_v11  ;;  %v4846_v19 = vcombine.high %v1841_v10, %v1848_v11  ;;  %v1953_v22 = vcombine.low %v1857_v12, %v1864_v55  ;;  %v4847_v1 = vcombine.high %v1857_v12, %v1864_v55  ;;  %2422 = vadd.xlane.f32.xlu0 %v2421_v56 }
 0x601   : > { %v1916_v9 = vrot.slane %v1902_v32, %v7173_v0  ;;  %v1918_v15 = vcombine.high %v1892_v59, %v1900_v60  ;;  %v1909_v2 = vrot.slane %v1901_v13, %v7173_v0  ;;  %v1925_v33 = vrot.slane %v1917_v16, %v7173_v0 }
 0x602   : > { %v1944_v26 = vrot.slane %v1937_v17, %v7170_v18  ;;  %v1952_v27 = vrot.slane %v4846_v19, %v7170_v18  ;;  %v1960_v14 = vrot.slane %v1953_v22, %v7170_v18  ;;  %v1968_v28 = vrot.slane %v4847_v1, %v7170_v18 }
 0x603   : > { %v1932_v35 = vrot.slane %v1918_v15, %v7173_v0  ;;  %v1933_v62 = vcombine.low %v1909_v2, %v1925_v33  ;;  %v1934_v34 = vcombine.high %v1909_v2, %v1925_v33  ;;  %v3066_v2 = vld [vmem:[#allocation11 + $0x38] sm:$0xff] }
 0x604   : > { %v1969_v36 = vcombine.low %v1944_v26, %v1952_v27  ;;  %v1985_v38 = vcombine.low %v1960_v14, %v1968_v28  ;;  %v1970_v21 = vcombine.high %v1944_v26, %v1952_v27  ;;  %v1986_v24 = vcombine.high %v1960_v14, %v1968_v28  ;;  %v3060_v26 = vld [vmem:[#allocation11 + $0x8] sm:$0xff]  ;;  %v3062_v27 = vld [vmem:[#allocation11 + $0x18] sm:$0xff] }
 0x605   : > { %v1935_v43 = vcombine.low %v1916_v9, %v1932_v35  ;;  %v1936_v6 = vcombine.high %v1916_v9, %v1932_v35  ;;  %v5219_v14 = vpack.c.bf16 %v3062_v27, %v3060_v26  ;;  %v3064_v28 = vld [vmem:[#allocation11 + $0x28] sm:$0xff] }
 0x606   : > { %v1977_v39 = vrot.slane %v1969_v36, %v7173_v0  ;;  %v1993_v40 = vrot.slane %v1985_v38, %v7173_v0  ;;  %v1984_v44 = vrot.slane %v1970_v21, %v7173_v0  ;;  %v2000_v5 = vrot.slane %v1986_v24, %v7173_v0  ;;  %v3063_v36 = vld [vmem:[#allocation11 + $0x20] sm:$0xff]  ;;  %v3065_v38 = vld [vmem:[#allocation11 + $0x30] sm:$0xff]  ;;  %v3068_v21 = vld [vmem:[#allocation11 + $0x48] sm:$0xff] }
 0x607   : > { %v5223_v35 = vpack.c.bf16 %v3066_v2, %v3064_v28  ;;  %v3102_v28 = vld [vmem:[#allocation11 + $0x158] sm:$0xff] }
 0x608   : > { %v2001_v25 = vcombine.low %v1977_v39, %v1993_v40  ;;  %v2002_v45 = vcombine.high %v1977_v39, %v1993_v40  ;;  %v2003_v7 = vcombine.low %v1984_v44, %v2000_v5  ;;  %v2004_v47 = vcombine.high %v1984_v44, %v2000_v5  ;;  %v3072_v39 = vld [vmem:[#allocation11 + $0x68] sm:$0xff]  ;;  %v3074_v40 = vld [vmem:[#allocation11 + $0x78] sm:$0xff] }
 0x609   : > { %v5231_v5 = vpack.c.bf16 %v3074_v40, %v3072_v39  ;;  %v3110_v39 = vld [vmem:[#allocation11 + $0x198] sm:$0xff] }
 0x60a   : > { %v5203_v20 = vpack.c.bf16 %v2001_v25, %v1933_v62  ;;  %v5211_v48 = vpack.c.bf16 %v2003_v7, %v1935_v43  ;;  %v5215_v50 = vpack.c.bf16 %v2004_v47, %v1936_v6  ;;  %v5207_v52 = vpack.c.bf16 %v2002_v45, %v1934_v34  ;;  %v3067_v43 = vld [vmem:[#allocation11 + $0x40] sm:$0xff]  ;;  %v3069_v6 = vld [vmem:[#allocation11 + $0x50] sm:$0xff]  ;;  %v3076_v45 = vld [vmem:[#allocation11 + $0x88] sm:$0xff] }
 0x60b   : > { %v5229_v44 = vpack.c.bf16 %v3069_v6, %v3067_v43  ;;  %v3071_v62 = vld [vmem:[#allocation11 + $0x60] sm:$0xff]  ;;  %v3073_v25 = vld [vmem:[#allocation11 + $0x70] sm:$0xff]  ;;  %v3078_v7 = vld [vmem:[#allocation11 + $0x98] sm:$0xff] }
 0x60c   : > { %5204 = vmatprep.subr.bf16.mxu1 %v5203_v20  ;;  %v5233_v47 = vpack.c.bf16 %v3073_v25, %v3071_v62  ;;  %v3075_v34 = vld [vmem:[#allocation11 + $0x80] sm:$0xff]  ;;  %v3105_v43 = vld [vmem:[#allocation11 + $0x170] sm:$0xff]  ;;  %v3108_v6 = vld [vmem:[#allocation11 + $0x188] sm:$0xff] }
 0x60d   : > { %5206 = vmatpush3.bf16.msra.mxu1 %v5203_v20  ;;  %v5235_v20 = vpack.c.bf16 %v3078_v7, %v3076_v45  ;;  %v3109_v62 = vld [vmem:[#allocation11 + $0x190] sm:$0xff]  ;;  %v3112_v25 = vld [vmem:[#allocation11 + $0x1a8] sm:$0xff]  ;;  %v3114_v45 = vld [vmem:[#allocation11 + $0x1b8] sm:$0xff] }
 0x60e   : > { %5208 = vmatprep.subr.bf16.mxu1 %v5207_v52 }
 0x674   : > { %v2408_v53 = vpop.xlane.xlu1 %2407 }
 0x675   : > { %6015 = vrcp.f32 %v2408_v53  ;;  %v2405_v54 = vpop.xlane.xlu0 %2404 }
 0x676   : > { %6017 = vrcp.f32 %v2405_v54 }
 0x67c   : > { %v2414_v57 = vpop.xlane.xlu1 %2413 }
 0x67d   : > { %6019 = vrcp.f32 %v2414_v57  ;;  %v3079_v57 = vld [vmem:[#allocation11 + $0xa0] sm:$0xff] }
 0x67f   : > { %v6016_v58 = vpop.eup %6015 }
 0x680   : > { %v6018_v59 = vpop.eup %6017  ;;  %v2411_v60 = vpop.xlane.xlu0 %2410  ;;  %v2436_v11 = vmul.f32 %v6016_v58, %v7329_v46  ;;  %v3081_v58 = vld [vmem:[#allocation11 + $0xb0] sm:$0xff] }
 0x681   : > { %6021 = vrcp.f32 %v2411_v60  ;;  %v2435_v10 = vmul.f32 %v6018_v59, %v7331_v51  ;;  %v3084_v59 = vld [vmem:[#allocation11 + $0xc8] sm:$0xff]  ;;  %v3086_v60 = vld [vmem:[#allocation11 + $0xd8] sm:$0xff] }
 0x683   : > { %4963 = vmatprep.mubr.msk.f32.mxu1 %vm2354_vm2, %v2435_v10  ;;  %v5241_v10 = vpack.c.bf16 %v3081_v58, %v3079_v57  ;;  %v3117_v57 = vld [vmem:[#allocation11 + $0x1d0] sm:$0xff] }
 0x684   : > { %4964 = vmatmul.mubr.msk.f32.vlgmr.msra.gmra.mrb[14].mxu1 %vm2354_vm2, %v2436_v11  ;;  %v2420_v12 = vpop.xlane.xlu0 %2419  ;;  %v5243_v11 = vpack.c.bf16 %v3086_v60, %v3084_v59 }
 0x685   : > { %5210 = vmatpush3.bf16.msra.mxu1 %v5207_v52  ;;  %6023 = vrcp.f32 %v2420_v12  ;;  %v3082_v52 = vld [vmem:[#allocation11 + $0xb8] sm:$0xff]  ;;  %v3083_v12 = vld [vmem:[#allocation11 + $0xc0] sm:$0xff] }
 0x686   : > { %5212 = vmatprep.subr.bf16.mxu1 %v5211_v48 }
 0x687   : > { %v6020_v56 = vpop.eup %6019 }
 0x688   : > { %v2426_v13 = vpop.xlane.xlu1 %2425  ;;  %v2438_v17 = vmul.f32 %v6020_v56, %v7339_v8  ;;  %v3088_v56 = vld [vmem:[#allocation11 + $0xe8] sm:$0xff] }
 0x689   : > { %v2417_v55 = vpop.xlane.xlu0 %2416 }
 0x68a   : > { %6025 = vrcp.f32 %v2417_v55  ;;  %v3085_v55 = vld [vmem:[#allocation11 + $0xd0] sm:$0xff] }
 0x68b   : > { %v6022_v16 = vpop.eup %6021  ;;  %6027 = vrcp.f32 %v2426_v13  ;;  %v3090_v13 = vld [vmem:[#allocation11 + $0xf8] sm:$0xff] }
 0x68c   : > { %v2437_v32 = vmul.f32 %v6022_v16, %v7343_v31  ;;  %v5245_v16 = vpack.c.bf16 %v3085_v55, %v3083_v12 }
 0x68d   : > { %v2423_v51 = vpop.xlane.xlu0 %2422 }
 0x68e   : > { %6029 = vrcp.f32 %v2423_v51  ;;  %4970 = vmatprep.mubr.msk.f32.mxu1 %vm2354_vm2, %v2437_v32  ;;  %v5247_v32 = vpack.c.bf16 %v3090_v13, %v3088_v56  ;;  %v3089_v51 = vld [vmem:[#allocation11 + $0xf0] sm:$0xff] }
 0x68f   : > { %4971 = vmatmul.mubr.msk.f32.vlgmr.msra.gmra.mrb[16].mxu1 %vm2354_vm2, %v2438_v17  ;;  %v6024_v46 = vpop.eup %6023  ;;  %v3087_v17 = vld [vmem:[#allocation11 + $0xe0] sm:$0xff] }
 0x690   : > { %5214 = vmatpush3.bf16.msra.mxu1 %v5211_v48  ;;  %v2440_v1 = vmul.f32 %v6024_v46, %v7351_v23  ;;  %v3061_v23 = vld [vmem:[#allocation11 + $0x10] sm:$0xff]  ;;  %v3092_v46 = vld [vmem:[#allocation11 + $0x108] sm:$0xff] }
 0x691   : > { %5216 = vmatprep.subr.bf16.mxu1 %v5215_v50  ;;  %v3077_v48 = vld [vmem:[#allocation11 + $0x90] sm:$0xff] }
 0x692   : > { %v5237_v53 = vpack.c.bf16 %v3077_v48, %v3075_v34  ;;  %v3113_v34 = vld [vmem:[#allocation11 + $0x1b0] sm:$0xff]  ;;  %v3116_v48 = vld [vmem:[#allocation11 + $0x1c8] sm:$0xff] }
 0x694   : > { %v6026_v19 = vpop.eup %6025 }
 0x695   : > { %v2439_v22 = vmul.f32 %v6026_v19, %v7359_v4  ;;  %v6028_v9 = vpop.eup %6027  ;;  %v3059_v4 = vld [vmem:[#allocation11] sm:$0xff]  ;;  %v3094_v19 = vld [vmem:[#allocation11 + $0x118] sm:$0xff] }
 0x696   : > { %v2442_v15 = vmul.f32 %v6028_v9, %v7363_v37  ;;  %v5221_v33 = vpack.c.bf16 %v3061_v23, %v3059_v4  ;;  %v5225_v37 = vpack.c.bf16 %v3065_v38, %v3063_v36  ;;  %v3091_v9 = vld [vmem:[#allocation11 + $0x100] sm:$0xff]  ;;  %v3100_v23 = vld [vmem:[#allocation11 + $0x148] sm:$0xff]  ;;  %v3101_v36 = vld [vmem:[#allocation11 + $0x150] sm:$0xff] }
 0x697   : > { %4977 = vmatprep.mubr.msk.f32.mxu1 %vm2354_vm2, %v2439_v22  ;;  %v5249_v22 = vpack.c.bf16 %v3089_v51, %v3087_v17  ;;  %v3095_v4 = vld [vmem:[#allocation11 + $0x120] sm:$0xff]  ;;  %v3104_v38 = vld [vmem:[#allocation11 + $0x168] sm:$0xff] }
 0x698   : > { %v6030_v31 = vpop.eup %6029  ;;  %4978 = vmatmul.mubr.msk.f32.vlgmr.msra.gmra.mrb[18].mxu1 %vm2354_vm2, %v2440_v1  ;;  %v5251_v1 = vpack.c.bf16 %v3094_v19, %v3092_v46 }
 0x699   : > { %5218 = vmatpush3.bf16.msra.mxu1 %v5215_v50  ;;  %v2441_v8 = vmul.f32 %v6030_v31, %v7375_v49  ;;  %v3070_v49 = vld [vmem:[#allocation11 + $0x58] sm:$0xff]  ;;  %v3080_v50 = vld [vmem:[#allocation11 + $0xa8] sm:$0xff]  ;;  %v3093_v31 = vld [vmem:[#allocation11 + $0x110] sm:$0xff] }
 0x69a   : > { %5220 = vmatprep.subr.bf16.mxu1 %v5219_v14  ;;  %v5227_v24 = vpack.c.bf16 %v3070_v49, %v3068_v21  ;;  %v5239_v54 = vpack.c.bf16 %v3082_v52, %v3080_v50  ;;  %v5253_v26 = vpack.c.bf16 %v3093_v31, %v3091_v9  ;;  %v3097_v14 = vld [vmem:[#allocation11 + $0x130] sm:$0xff]  ;;  %v3106_v21 = vld [vmem:[#allocation11 + $0x178] sm:$0xff] }
 0x69b   : > { %4984 = vmatprep.mubr.msk.f32.mxu1 %vm2354_vm2, %v2441_v8  ;;  %v3096_v8 = vld [vmem:[#allocation11 + $0x128] sm:$0xff]  ;;  %v5257_v2 = vpack.c.bf16 %v3097_v14, %v3095_v4  ;;  %v3118_v50 = vld [vmem:[#allocation11 + $0x1d8] sm:$0xff] }
 0x69c   : > { %4985 = vmatmul.mubr.msk.f32.vlgmr.msra.gmra.mrb[20].mxu1 %vm2354_vm2, %v2442_v15  ;;  %v3098_v15 = vld [vmem:[#allocation11 + $0x138] sm:$0xff] }
 0x69d   : > { %5222 = vmatpush1.bf16.msra.mxu1 %v5221_v33  ;;  %v5255_v27 = vpack.c.bf16 %v3098_v15, %v3096_v8  ;;  %v5259_v33 = vpack.c.bf16 %v3102_v28, %v3100_v23 }
 0x69e   : > { %5224 = vmatprep.subr.bf16.mxu1 %v5223_v35  ;;  %v3099_v35 = vld [vmem:[#allocation11 + $0x140] sm:$0xff] }
 0x69f   : > { %v5261_v49 = vpack.c.bf16 %v3101_v36, %v3099_v35 }
 0x6a1   : > { %5226 = vmatpush1.bf16.msra.mxu1 %v5225_v37  ;;  %v5263_v37 = vpack.c.bf16 %v3106_v21, %v3104_v38 }
 0x6a2   : > { %5228 = vmatprep.subr.bf16.mxu1 %v5227_v24  ;;  %v3103_v24 = vld [vmem:[#allocation11 + $0x160] sm:$0xff] }
 0x6a3   : > { %v5265_v40 = vpack.c.bf16 %v3105_v43, %v3103_v24 }
 0x6a5   : > { %5230 = vmatpush1.bf16.msra.mxu1 %v5229_v44  ;;  %v5267_v44 = vpack.c.bf16 %v3110_v39, %v3108_v6 }
 0x6a6   : > { %5232 = vmatprep.subr.bf16.mxu1 %v5231_v5  ;;  %v3107_v5 = vld [vmem:[#allocation11 + $0x180] sm:$0xff] }
 0x6a7   : > { %v5269_v7 = vpack.c.bf16 %v3109_v62, %v3107_v5 }
 0x6a9   : > { %5234 = vmatpush1.bf16.msra.mxu1 %v5233_v47  ;;  %v5271_v47 = vpack.c.bf16 %v3114_v45, %v3112_v25 }
 0x6aa   : > { %5236 = vmatprep.subr.bf16.mxu1 %v5235_v20  ;;  %v3111_v20 = vld [vmem:[#allocation11 + $0x1a0] sm:$0xff] }
 0x6ab   : > { %v5273_v52 = vpack.c.bf16 %v3113_v34, %v3111_v20 }
 0x6ad   : > { %5238 = vmatpush1.bf16.msra.mxu1 %v5237_v53  ;;  %v5275_v53 = vpack.c.bf16 %v3118_v50, %v3116_v48 }
 0x6ae   : > { %5240 = vmatprep.subr.bf16.mxu1 %v5239_v54  ;;  %v3115_v54 = vld [vmem:[#allocation11 + $0x1c0] sm:$0xff] }
 0x6af   : > { %v5277_v58 = vpack.c.bf16 %v3117_v57, %v3115_v54 }
 0x6b1   : > { %5242 = vmatpush1.bf16.msra.mxu1 %v5241_v10 }
 0x6b2   : > { %5244 = vmatprep.subr.bf16.mxu1 %v5243_v11 }
 0x6b5   : > { %5246 = vmatpush1.bf16.msra.mxu1 %v5245_v16 }
 0x6b6   : > { %5248 = vmatprep.subr.bf16.mxu1 %v5247_v32 }
 0x6b9   : > { %5250 = vmatpush1.bf16.msra.mxu1 %v5249_v22 }
 0x6ba   : > { %5252 = vmatprep.subr.bf16.mxu1 %v5251_v1 }
 0x6bd   : > { %5254 = vmatpush1.bf16.msra.mxu1 %v5253_v26 }
 0x6be   : > { %5256 = vmatprep.subr.bf16.mxu1 %v5255_v27 }
 0x6c1   : > { %5258 = vmatpush1.bf16.msra.mxu1 %v5257_v2 }
 0x6c2   : > { %5260 = vmatprep.subr.bf16.mxu1 %v5259_v33 }
 0x6c5   : > { %5262 = vmatpush1.bf16.msra.mxu1 %v5261_v49 }
 0x6c6   : > { %5264 = vmatprep.subr.bf16.mxu1 %v5263_v37 }
 0x6c9   : > { %5266 = vmatpush1.bf16.msra.mxu1 %v5265_v40 }
 0x6ca   : > { %5268 = vmatprep.subr.bf16.mxu1 %v5267_v44 }
 0x6cd   : > { %5270 = vmatpush1.bf16.msra.mxu1 %v5269_v7 }
 0x6ce   : > { %5272 = vmatprep.subr.bf16.mxu1 %v5271_v47 }
 0x6d1   : > { %5274 = vmatpush1.bf16.msra.mxu1 %v5273_v52 }
 0x6d2   : > { %5276 = vmatprep.subr.bf16.mxu1 %v5275_v53 }
 0x6d5   : > { %5278 = vmatpush1.bf16.msra.mxu1 %v5277_v58 }
 0x757   : > { %v4965_v59 = vpop.f32.mrb[14].mxu1 }
 0x758   : > { %v2515_v60 = vpop.f32.mrb[15].mxu1 }
 0x762   : > { %v4972_v10 = vpop.f32.mrb[16].mxu1 }
 0x763   : > { %v2596_v11 = vpop.f32.mrb[17].mxu1 }
 0x76b   : > { %v4979_v12 = vpop.f32.mrb[18].mxu1 }
 0x76c   : > { %v2835_v55 = vcombine.low %v4965_v59, %v4979_v12  ;;  %v2836_v56 = vcombine.high %v4965_v59, %v4979_v12  ;;  %v2677_v13 = vpop.f32.mrb[19].mxu1 }
 0x76d   : > { %v2767_v16 = vcombine.low %v2515_v60, %v2677_v13  ;;  %v2768_v32 = vcombine.high %v2515_v60, %v2677_v13 }
 0x76e   : > { %v2843_v9 = vrot.slane %v2835_v55, %v7170_v18  ;;  %v2850_v31 = vrot.slane %v2836_v56, %v7170_v18  ;;  %v3120_v55 = vld [vmem:[#allocation11 + $0x1e8] sm:$0xff] }
 0x76f   : > { %v4986_v17 = vpop.f32.mrb[20].mxu1  ;;  %v2775_v26 = vrot.slane %v2767_v16, %v7170_v18  ;;  %v2782_v27 = vrot.slane %v2768_v32, %v7170_v18 }
 0x770   : > { %v2851_v51 = vcombine.low %v4972_v10, %v4986_v17  ;;  %v2852_v46 = vcombine.high %v4972_v10, %v4986_v17  ;;  %v2758_v19 = vpop.f32.mrb[21].mxu1  ;;  %v3122_v17 = vld [vmem:[#allocation11 + $0x1f8] sm:$0xff] }
 0x771   : > { %v2783_v22 = vcombine.low %v2596_v11, %v2758_v19  ;;  %v2784_v1 = vcombine.high %v2596_v11, %v2758_v19 }
 0x772   : > { %v2859_v8 = vrot.slane %v2851_v51, %v7170_v18  ;;  %v2866_v15 = vrot.slane %v2852_v46, %v7170_v18  ;;  %v3119_v51 = vld [vmem:[#allocation11 + $0x1e0] sm:$0xff]  ;;  %v3121_v46 = vld [vmem:[#allocation11 + $0x1f0] sm:$0xff] }
 0x773   : > { %v2791_v4 = vrot.slane %v2783_v22, %v7170_v18  ;;  %v2798_v14 = vrot.slane %v2784_v1, %v7170_v18 }
 0x774   : > { %v2867_v23 = vcombine.low %v2843_v9, %v2859_v8  ;;  %v2868_v28 = vcombine.high %v2843_v9, %v2859_v8  ;;  %v2883_v2 = vcombine.low %v2850_v31, %v2866_v15  ;;  %v2884_v33 = vcombine.high %v2850_v31, %v2866_v15 }
 0x775   : > { %v2799_v35 = vcombine.low %v2775_v26, %v2791_v4  ;;  %v2800_v36 = vcombine.high %v2775_v26, %v2791_v4  ;;  %v2815_v38 = vcombine.low %v2782_v27, %v2798_v14  ;;  %v2816_v21 = vcombine.high %v2782_v27, %v2798_v14 }
 0x776   : > { %v2875_v49 = vrot.slane %v2867_v23, %v7173_v0  ;;  %v2882_v37 = vrot.slane %v2868_v28, %v7173_v0  ;;  %v2891_v24 = vrot.slane %v2883_v2, %v7173_v0  ;;  %v2898_v43 = vrot.slane %v2884_v33, %v7173_v0 }
 0x777   : > { %v2807_v6 = vrot.slane %v2799_v35, %v7173_v0  ;;  %v2814_v39 = vrot.slane %v2800_v36, %v7173_v0  ;;  %v2823_v40 = vrot.slane %v2815_v38, %v7173_v0  ;;  %v2830_v44 = vrot.slane %v2816_v21, %v7173_v0 }
 0x778   : > { %v2971_v5 = vcombine.low %v2875_v49, %v2882_v37  ;;  %v4874_v62 = vcombine.high %v2875_v49, %v2882_v37  ;;  %v2987_v25 = vcombine.low %v2891_v24, %v2898_v43  ;;  %v4875_v45 = vcombine.high %v2891_v24, %v2898_v43 }
 0x779   : > { %v2903_v7 = vcombine.low %v2807_v6, %v2814_v39  ;;  %v4872_v47 = vcombine.high %v2807_v6, %v2814_v39  ;;  %v2919_v20 = vcombine.low %v2823_v40, %v2830_v44  ;;  %v4873_v34 = vcombine.high %v2823_v40, %v2830_v44 }
 0x77a   : > { %v2978_v48 = vrot.slane %v2971_v5, %v7170_v18  ;;  %v2986_v50 = vrot.slane %v4874_v62, %v7170_v18  ;;  %v2994_v52 = vrot.slane %v2987_v25, %v7170_v18  ;;  %v3002_v53 = vrot.slane %v4875_v45, %v7170_v18  ;;  %v3123_v62 = vld [vmem:[#allocation13] sm:$0x3] }
 0x77b   : > { %v2910_v54 = vrot.slane %v2903_v7, %v7170_v18  ;;  %v2918_v57 = vrot.slane %v4872_v47, %v7170_v18  ;;  %v2926_v58 = vrot.slane %v2919_v20, %v7170_v18  ;;  %v2934_v59 = vrot.slane %v4873_v34, %v7170_v18 }
 0x77c   : > { %v3003_v60 = vcombine.low %v2978_v48, %v2986_v50  ;;  %v3004_v10 = vcombine.high %v2978_v48, %v2986_v50  ;;  %v3019_v11 = vcombine.low %v2994_v52, %v3002_v53  ;;  %v3020_v12 = vcombine.high %v2994_v52, %v3002_v53  ;;  %v6099_v48 = vld [vmem:[%s7027_s21] sm:$0xff]  ;;  %v6100_v52 = vld [vmem:[%s7027_s21 + $0x8] sm:$0xff] }
 0x77d   : > { %v2935_v56 = vcombine.low %v2910_v54, %v2918_v57  ;;  %v2936_v13 = vcombine.high %v2910_v54, %v2918_v57  ;;  %v2951_v16 = vcombine.low %v2926_v58, %v2934_v59  ;;  %v2952_v32 = vcombine.high %v2926_v58, %v2934_v59 }
 0x77e   : > { %v3011_v19 = vrot.slane %v3003_v60, %v7173_v0  ;;  %v3018_v22 = vrot.slane %v3004_v10, %v7173_v0  ;;  %v3027_v1 = vrot.slane %v3019_v11, %v7173_v0  ;;  %v3034_v18 = vrot.slane %v3020_v12, %v7173_v0  ;;  %v6101_v10 = vld [vmem:[%s7027_s21 + $0x10] sm:$0xff]  ;;  %v6102_v12 = vld [vmem:[%s7027_s21 + $0x18] sm:$0xff]  ;;  %s6473_s21 = sshll.u32 %s6583_s1, 4  ;;  %s6474_s21 = int_to_ptr.vmem [resolvable:$false] %s6473_s21 }
 0x77f   : > { %v2943_v9 = vrot.slane %v2935_v56, %v7173_v0  ;;  %v2950_v31 = vrot.slane %v2936_v13, %v7173_v0  ;;  %v2959_v8 = vrot.slane %v2951_v16, %v7173_v0  ;;  %v2966_v15 = vrot.slane %v2952_v32, %v7173_v0  ;;  %v3297_v13 = vld [vmem:[#allocation17 + $0x8] sm:$0xff]  ;;  %v3299_v32 = vld [vmem:[#allocation17 + $0x18] sm:$0xff]  ;;  %s6475_s2 = scalar_lea.vmem %s6474_s21, 1024  ;;  %p6476_p2 = scmp.lt.s32.totalorder %s7637_s15, %s6474_s21 }
 0x780   : > { %v3036_v26 = vcombine.high %v3011_v19, %v3027_v1  ;;  %v3038_v27 = vcombine.high %v3018_v22, %v3034_v18  ;;  %v5279_v4 = vpack.c.bf16 %v3122_v17, %v3120_v55  ;;  %v5281_v14 = vpack.c.bf16 %v3121_v46, %v3119_v51  ;;  %v3305_v16 = vld [vmem:[#allocation17 + $0x48] sm:$0xff]  ;;  %v3307_v51 = vld [vmem:[#allocation17 + $0x58] sm:$0xff]  ;;  %v3296_v46 = vld [vmem:[#allocation17] sm:$0xff]  ;;  %p6477_p9 = scmp.lt.s32.totalorder %s6475_s2, %s6469_s25 }
 0x781   : > { %v2968_v23 = vcombine.high %v2943_v9, %v2959_v8  ;;  %v2970_v28 = vcombine.high %v2950_v31, %v2966_v15  ;;  %v2969_v2 = vcombine.low %v2950_v31, %v2966_v15  ;;  %v2967_v33 = vcombine.low %v2943_v9, %v2959_v8  ;;  %v3306_v9 = vld [vmem:[#allocation17 + $0x50] sm:$0xff]  ;;  %v3313_v31 = vld [vmem:[#allocation17 + $0x88] sm:$0xff] }
 0x782   : > { %v5990_v35 = vpack.i.bf16 %v3036_v26, %v3038_v27  ;;  %5280 = vmatprep.subr.bf16.mxu1 %v5279_v4  ;;  %v3037_v36 = vcombine.low %v3018_v22, %v3034_v18  ;;  %v3035_v38 = vcombine.low %v3011_v19, %v3027_v1  ;;  %v3128_v25 = vrot.slane %v3123_v62, %v7099_v3  ;;  %v3304_v19 = vld [vmem:[#allocation17 + $0x40] sm:$0xff]  ;;  %v3298_v18 = vld [vmem:[#allocation17 + $0x10] sm:$0xff]  ;;  %v3321_v15 = vld [vmem:[#allocation17 + $0xc8] sm:$0xff]  ;;  %p6478_p10 = por %p6477_p9, %p6476_p2 }
 0x783   : > { %v5985_v21 = vpack.i.bf16 %v2968_v23, %v2970_v28  ;;  %5282 = vmatpush1.bf16.msra.mxu1 %v5281_v14  ;;  %v3132_v45 = vrot.slane %v3123_v62, %v7096_v63  ;;  %v5283_v17 = vpack.c.bf16 %v3305_v16, %v3297_v13  ;;  %v5347_v22 = vpack.c.bf16 %v3307_v51, %v3299_v32  ;;  %v3315_v26 = vld [vmem:[#allocation17 + $0x98] sm:$0xff]  ;;  %v3312_v23 = vld [vmem:[#allocation17 + $0x80] sm:$0xff]  ;;  %v3353_v62 = vld [vmem:[#allocation17 + $0x1c8] sm:$0xff] }
 0x784   : > { %5991 = vrot.lane.b32.xlu1 %v5990_v35, %s6580_s13  ;;  %v5285_v1 = vpack.c.bf16 %v3304_v19, %v3296_v46  ;;  %v5349_v8 = vpack.c.bf16 %v3306_v9, %v3298_v18  ;;  %v3323_v27 = vld [vmem:[#allocation17 + $0xd8] sm:$0xff]  ;;  %v5287_v4 = vpack.c.bf16 %v3321_v15, %v3313_v31  ;;  %v3320_v28 = vld [vmem:[#allocation17 + $0xc0] sm:$0xff]  ;;  %v3322_v35 = vld [vmem:[#allocation17 + $0xd0] sm:$0xff]  ;;  %p6479_p11 = pnand %p6478_p10, %p6472_p0 }
 0x785   : > { %5986 = vrot.lane.b32.xlu0 %v5985_v21, %s6580_s13  ;;  %5284 = vmatprep.subr.bf16.mxu0 %v5283_v17  ;;  %v5351_v14 = vpack.c.bf16 %v3323_v27, %v3315_v26  ;;  %v3360_v13 = vld [vmem:[#allocation17 + $0x200] sm:$0xff]  ;;  %v3362_v32 = vld [vmem:[#allocation17 + $0x210] sm:$0xff]  ;;  %v3377_v46 = vld [vmem:[#allocation17 + $0x288] sm:$0xff] }
 0x786   : > { %5348 = vmatprep.subr.bf16.mxu1 %v5347_v22  ;;  %5286 = vmatpush1.bf16.msra.mxu0 %v5285_v1  ;;  %v3368_v16 = vld [vmem:[#allocation17 + $0x240] sm:$0xff]  ;;  %v3370_v51 = vld [vmem:[#allocation17 + $0x250] sm:$0xff]  ;;  %v3385_v19 = vld [vmem:[#allocation17 + $0x2c8] sm:$0xff] }
 0x787   : > { %5288 = vmatprep.subr.bf16.mxu0 %v5287_v4  ;;  %v3379_v22 = vld [vmem:[#allocation17 + $0x298] sm:$0xff]  ;;  %v5301_v18 = vpack.c.bf16 %v3368_v16, %v3360_v13  ;;  %v5365_v9 = vpack.c.bf16 %v3370_v51, %v3362_v32  ;;  %v5303_v31 = vpack.c.bf16 %v3385_v19, %v3377_v46  ;;  %v3384_v15 = vld [vmem:[#allocation17 + $0x2c0] sm:$0xff]  ;;  %v3378_v26 = vld [vmem:[#allocation17 + $0x290] sm:$0xff] }
 0x788   : > { %v3387_v1 = vld [vmem:[#allocation17 + $0x2d8] sm:$0xff]  ;;  %v3386_v4 = vld [vmem:[#allocation17 + $0x2d0] sm:$0xff]  ;;  %v3441_v13 = vld [vmem:[#allocation17 + $0x488] sm:$0xff] }
 0x789   : > { %v5367_v27 = vpack.c.bf16 %v3387_v1, %v3379_v22  ;;  %v3449_v16 = vld [vmem:[#allocation17 + $0x4c8] sm:$0xff]  ;;  %v3443_v32 = vld [vmem:[#allocation17 + $0x498] sm:$0xff]  ;;  %v3440_v22 = vld [vmem:[#allocation17 + $0x480] sm:$0xff] }
 0x78a   : > { %v5319_v19 = vpack.c.bf16 %v3449_v16, %v3441_v13  ;;  %v3448_v1 = vld [vmem:[#allocation17 + $0x4c0] sm:$0xff]  ;;  %v3497_v13 = vld [vmem:[#allocation17 + $0x648] sm:$0xff]  ;;  %v3491_v16 = vld [vmem:[#allocation17 + $0x618] sm:$0xff] }
 0x7f6   : > { %v5992_v49 = vpop.permute.xlu1 %5991 }
 0x7f7   : > { %v5987_v0 = vpop.permute.xlu0 %5986  ;;  %v5993_v37 = vunpack.i.l.bf16 %v5992_v49  ;;  %v5994_v40 = vunpack.i.h.bf16 %v5992_v49 }
 0x7f8   : > { %v5989_v24 = vunpack.i.h.bf16 %v5987_v0  ;;  %v5988_v43 = vunpack.i.l.bf16 %v5987_v0  ;;  %v3331_v0 = vld [vmem:[#allocation17 + $0x118] sm:$0xff] }
 0x7f9   : > { %v3058_v44 = vsel %vm2005_vm0, %v3037_v36, %v5993_v37  ;;  %v3056_v5 = vsel %vm2005_vm0, %v3035_v38, %v5994_v40  ;;  %v3329_v36 = vld [vmem:[#allocation17 + $0x108] sm:$0xff]  ;;  %v3339_v37 = vld [vmem:[#allocation17 + $0x158] sm:$0xff]  ;;  %v3338_v40 = vld [vmem:[#allocation17 + $0x150] sm:$0xff] }
 0x7fa   : > { %v3057_v6 = vsel %vm2005_vm0, %v2969_v2, %v5988_v43  ;;  %v3055_v39 = vsel %vm2005_vm0, %v2967_v33, %v5989_v24  ;;  %v3314_v2 = vld [vmem:[#allocation17 + $0x90] sm:$0xff]  ;;  %v5289_v33 = vpack.c.bf16 %v3320_v28, %v3312_v23  ;;  %v3337_v38 = vld [vmem:[#allocation17 + $0x148] sm:$0xff]  ;;  %v3328_v24 = vld [vmem:[#allocation17 + $0x100] sm:$0xff]  ;;  %v5355_v43 = vpack.c.bf16 %v3339_v37, %v3331_v0 }
 0x7fb   : > { %3199 = vmatprep.mubr.f32.mxu1 %v3057_v6  ;;  %v5353_v21 = vpack.c.bf16 %v3322_v35, %v3314_v2  ;;  %v5291_v49 = vpack.c.bf16 %v3337_v38, %v3329_v36  ;;  %v3336_v6 = vld [vmem:[#allocation17 + $0x140] sm:$0xff]  ;;  %v3401_v23 = vld [vmem:[#allocation17 + $0x348] sm:$0xff]  ;;  %v3395_v28 = vld [vmem:[#allocation17 + $0x318] sm:$0xff]  ;;  %v5369_v35 = vpack.c.bf16 %v3386_v4, %v3378_v26  ;;  %v5321_v4 = vpack.c.bf16 %v3448_v1, %v3440_v22 }
 0x7fc   : > { %3200 = vmatmul.mubr.f32.vlgmr.msra.gmra.mrb[22].mxu1 %v3055_v39  ;;  %v3330_v39 = vld [vmem:[#allocation17 + $0x110] sm:$0xff]  ;;  %5290 = vmatpush1.bf16.msra.mxu0 %v5289_v33  ;;  %v3403_v2 = vld [vmem:[#allocation17 + $0x358] sm:$0xff]  ;;  %v3392_v38 = vld [vmem:[#allocation17 + $0x300] sm:$0xff] }
 0x7fd   : > { %3205 = vmatprep.mubr.f32.mxu1 %v3058_v44  ;;  %5350 = vmatpush1.bf16.msra.mxu1 %v5349_v8  ;;  %v5293_v44 = vpack.c.bf16 %v3336_v6, %v3328_v24  ;;  %v3376_v8 = vld [vmem:[#allocation17 + $0x280] sm:$0xff]  ;;  %v5371_v0 = vpack.c.bf16 %v3403_v2, %v3395_v28  ;;  %v3402_v37 = vld [vmem:[#allocation17 + $0x350] sm:$0xff]  ;;  %v3409_v24 = vld [vmem:[#allocation17 + $0x388] sm:$0xff] }
 0x7fe   : > { %5352 = vmatprep.subr.bf16.mxu1 %v5351_v14  ;;  %5292 = vmatprep.subr.bf16.mxu0 %v5291_v49  ;;  %v3393_v14 = vld [vmem:[#allocation17 + $0x308] sm:$0xff]  ;;  %v5305_v33 = vpack.c.bf16 %v3384_v15, %v3376_v8  ;;  %v3394_v49 = vld [vmem:[#allocation17 + $0x310] sm:$0xff]  ;;  %v3411_v6 = vld [vmem:[#allocation17 + $0x398] sm:$0xff] }
 0x7ff   : > { %v5307_v36 = vpack.c.bf16 %v3401_v23, %v3393_v14  ;;  %v3457_v8 = vld [vmem:[#allocation17 + $0x508] sm:$0xff]  ;;  %v3459_v26 = vld [vmem:[#allocation17 + $0x518] sm:$0xff]  ;;  %v3456_v28 = vld [vmem:[#allocation17 + $0x500] sm:$0xff] }
 0x800   : > { %3206 = vmatmul.mubr.f32.gmra.mrb[24].mxu1 %v3056_v5  ;;  %v3345_v5 = vld [vmem:[#allocation17 + $0x188] sm:$0xff]  ;;  %5294 = vmatpush1.bf16.msra.mxu0 %v5293_v44  ;;  %v5373_v44 = vpack.c.bf16 %v3402_v37, %v3394_v49  ;;  %v3464_v2 = vld [vmem:[#allocation17 + $0x540] sm:$0xff]  ;;  %v3490_v1 = vld [vmem:[#allocation17 + $0x610] sm:$0xff] }
 0x801   : > { %5354 = vmatpush1.bf16.msra.mxu1 %v5353_v21  ;;  %v3400_v21 = vld [vmem:[#allocation17 + $0x340] sm:$0xff]  ;;  %v3465_v15 = vld [vmem:[#allocation17 + $0x548] sm:$0xff] }
 0x802   : > { %5356 = vmatprep.subr.bf16.mxu1 %v5355_v43  ;;  %v3417_v43 = vld [vmem:[#allocation17 + $0x3c8] sm:$0xff]  ;;  %v5323_v23 = vpack.c.bf16 %v3465_v15, %v3457_v8  ;;  %v3507_v15 = vld [vmem:[#allocation17 + $0x698] sm:$0xff] }
 0x803   : > { %v3513_v8 = vld [vmem:[#allocation17 + $0x6c8] sm:$0xff] }
 0x8cf   : > { %v3201_v7 = vpop.f32.mrb[22].mxu1 }
 0x8d0   : > { %v3202_v47 = vadd.f32 %v3201_v7, %v3128_v25  ;;  %v3203_v20 = vpop.f32.mrb[23].mxu1  ;;  %v5295_v7 = vpack.c.bf16 %v3353_v62, %v3345_v5  ;;  %v5311_v5 = vpack.c.bf16 %v3417_v43, %v3409_v24  ;;  %v3408_v62 = vld [vmem:[#allocation17 + $0x380] sm:$0xff] }
 0x8d1   : > { %v3204_v34 = vadd.f32 %v3203_v20, %v3132_v45  ;;  %v3344_v20 = vld [vmem:[#allocation17 + $0x180] sm:$0xff] }
 0x8d2   : > { %v7456_v50 = vadd.f32 %v6099_v48, %v3202_v47  ;;  %v3355_v47 = vld [vmem:[#allocation17 + $0x1d8] sm:$0xff]  ;;  %5296 = vmatprep.subr.bf16.mxu0 %v5295_v7 }
 0x8d3   : > { %v7459_v53 = vadd.f32 %v6100_v52, %v3204_v34  ;;  %v3207_v54 = vpop.f32.mrb[24].mxu1  ;;  %v3352_v34 = vld [vmem:[#allocation17 + $0x1c0] sm:$0xff]  ;;  %v3346_v52 = vld [vmem:[#allocation17 + $0x190] sm:$0xff] }
 0x8d4   : > { %v3208_v57 = vadd.f32 %v3207_v54, %v3128_v25  ;;  %v3209_v58 = vpop.f32.mrb[25].mxu1  ;;  %v3347_v25 = vld [vmem:[#allocation17 + $0x198] sm:$0xff]  ;;  %v3354_v54 = vld [vmem:[#allocation17 + $0x1d0] sm:$0xff] }
 0x8d5   : > { %v3210_v59 = vadd.f32 %v3209_v58, %v3132_v45  ;;  %v3218_v60 = vadd.f32 %v7459_v53, %v7456_v50  ;;  %v5357_v45 = vpack.c.bf16 %v3338_v40, %v3330_v39  ;;  %v5359_v48 = vpack.c.bf16 %v3355_v47, %v3347_v25  ;;  %v3369_v58 = vld [vmem:[#allocation17 + $0x248] sm:$0xff]  ;;  %v3419_v39 = vld [vmem:[#allocation17 + $0x3d8] sm:$0xff]  ;;  %v3416_v25 = vld [vmem:[#allocation17 + $0x3c0] sm:$0xff] }
 0x8d6   : > { %v7464_v11 = vadd.f32 %v6101_v10, %v3208_v57  ;;  %v3361_v57 = vld [vmem:[#allocation17 + $0x208] sm:$0xff]  ;;  %v5297_v10 = vpack.c.bf16 %v3352_v34, %v3344_v20  ;;  %v5309_v40 = vpack.c.bf16 %v3400_v21, %v3392_v38  ;;  %v5375_v7 = vpack.c.bf16 %v3419_v39, %v3411_v6  ;;  %v3418_v47 = vld [vmem:[#allocation17 + $0x3d0] sm:$0xff] }
 0x8d7   : > { %v7467_v55 = vadd.f32 %v6102_v12, %v3210_v59  ;;  %3219 = vadd.xlane.f32.xlu1 %v3218_v60  ;;  %v3363_v59 = vld [vmem:[#allocation17 + $0x218] sm:$0xff]  ;;  %5358 = vmatpush1.bf16.msra.mxu1 %v5357_v45  ;;  %v5361_v12 = vpack.c.bf16 %v3354_v54, %v3346_v52  ;;  %v3410_v45 = vld [vmem:[#allocation17 + $0x390] sm:$0xff]  ;;  %v3425_v20 = vld [vmem:[#allocation17 + $0x408] sm:$0xff]  ;;  %v5313_v54 = vpack.c.bf16 %v3416_v25, %v3408_v62 }
 0x8d8   : > { %v3371_v60 = vld [vmem:[#allocation17 + $0x258] sm:$0xff]  ;;  %5360 = vmatprep.subr.bf16.mxu1 %v5359_v48  ;;  %5298 = vmatpush1.bf16.msra.mxu0 %v5297_v10  ;;  %v3433_v34 = vld [vmem:[#allocation17 + $0x448] sm:$0xff]  ;;  %v3426_v10 = vld [vmem:[#allocation17 + $0x410] sm:$0xff]  ;;  %v5325_v38 = vpack.c.bf16 %v3464_v2, %v3456_v28 }
 0x8d9   : > { %v3221_v56 = vadd.f32 %v7467_v55, %v7464_v11  ;;  %v5363_v17 = vpack.c.bf16 %v3371_v60, %v3363_v59  ;;  %v3427_v48 = vld [vmem:[#allocation17 + $0x418] sm:$0xff]  ;;  %v3424_v59 = vld [vmem:[#allocation17 + $0x400] sm:$0xff]  ;;  %v3506_v28 = vld [vmem:[#allocation17 + $0x690] sm:$0xff] }
 0x8da   : > { %v3435_v52 = vld [vmem:[#allocation17 + $0x458] sm:$0xff]  ;;  %v3432_v60 = vld [vmem:[#allocation17 + $0x440] sm:$0xff] }
 0x8db   : > { %3222 = vadd.xlane.f32.xlu0 %v3221_v56  ;;  %v5299_v56 = vpack.c.bf16 %v3369_v58, %v3361_v57  ;;  %5362 = vmatpush1.bf16.msra.mxu1 %v5361_v12  ;;  %v5377_v57 = vpack.c.bf16 %v3418_v47, %v3410_v45  ;;  %v5315_v58 = vpack.c.bf16 %v3433_v34, %v3425_v20  ;;  %v3473_v47 = vld [vmem:[#allocation17 + $0x588] sm:$0xff]  ;;  %v3475_v34 = vld [vmem:[#allocation17 + $0x598] sm:$0xff] }
 0x8dc   : > { %5364 = vmatprep.subr.bf16.mxu1 %v5363_v17  ;;  %v5379_v12 = vpack.c.bf16 %v3435_v52, %v3427_v48  ;;  %v3451_v17 = vld [vmem:[#allocation17 + $0x4d8] sm:$0xff]  ;;  %v5317_v51 = vpack.c.bf16 %v3432_v60, %v3424_v59  ;;  %v3481_v20 = vld [vmem:[#allocation17 + $0x5c8] sm:$0xff]  ;;  %v3474_v60 = vld [vmem:[#allocation17 + $0x590] sm:$0xff] }
 0x8dd   : > { %5300 = vmatprep.subr.bf16.mxu0 %v5299_v56  ;;  %v3434_v56 = vld [vmem:[#allocation17 + $0x450] sm:$0xff]  ;;  %v5327_v48 = vpack.c.bf16 %v3481_v20, %v3473_v47  ;;  %v3483_v52 = vld [vmem:[#allocation17 + $0x5d8] sm:$0xff] }
 0x8de   : > { %5302 = vmatpush1.bf16.msra.mxu0 %v5301_v18  ;;  %v5381_v46 = vpack.c.bf16 %v3434_v56, %v3426_v10  ;;  %v3442_v18 = vld [vmem:[#allocation17 + $0x490] sm:$0xff]  ;;  %v3489_v56 = vld [vmem:[#allocation17 + $0x608] sm:$0xff]  ;;  %v3539_v47 = vld [vmem:[#allocation17 + $0x798] sm:$0xff] }
 0x8df   : > { %5366 = vmatpush1.bf16.msra.mxu1 %v5365_v9  ;;  %5304 = vmatprep.subr.bf16.mxu0 %v5303_v31  ;;  %v5383_v9 = vpack.c.bf16 %v3451_v17, %v3443_v32  ;;  %v3450_v31 = vld [vmem:[#allocation17 + $0x4d0] sm:$0xff]  ;;  %v5331_v32 = vpack.c.bf16 %v3497_v13, %v3489_v56  ;;  %v3499_v17 = vld [vmem:[#allocation17 + $0x658] sm:$0xff]  ;;  %v3309_v56 = vld [vmem:[#allocation17 + $0x68] sm:$0xff] }
 0x8e0   : > { %5368 = vmatprep.subr.bf16.mxu1 %v5367_v27  ;;  %v3467_v27 = vld [vmem:[#allocation17 + $0x558] sm:$0xff]  ;;  %v5385_v14 = vpack.c.bf16 %v3450_v31, %v3442_v18  ;;  %v3482_v10 = vld [vmem:[#allocation17 + $0x5d0] sm:$0xff] }
 0x8e1   : > { %v3498_v18 = vld [vmem:[#allocation17 + $0x650] sm:$0xff]  ;;  %v3303_v13 = vld [vmem:[#allocation17 + $0x38] sm:$0xff] }
 0x8e2   : > { %5306 = vmatpush1.bf16.msra.mxu0 %v5305_v33  ;;  %v5387_v33 = vpack.c.bf16 %v3467_v27, %v3459_v26  ;;  %v5397_v31 = vpack.c.bf16 %v3498_v18, %v3490_v1  ;;  %v3515_v26 = vld [vmem:[#allocation17 + $0x6d8] sm:$0xff] }
 0x8e3   : > { %5370 = vmatpush1.bf16.msra.mxu1 %v5369_v35  ;;  %5308 = vmatprep.subr.bf16.mxu0 %v5307_v36  ;;  %v3458_v35 = vld [vmem:[#allocation17 + $0x510] sm:$0xff] }
 0x8e4   : > { %5372 = vmatprep.subr.bf16.mxu1 %v5371_v0  ;;  %v3466_v36 = vld [vmem:[#allocation17 + $0x550] sm:$0xff] }
 0x8e5   : > { %v5389_v21 = vpack.c.bf16 %v3466_v36, %v3458_v35  ;;  %v3521_v35 = vld [vmem:[#allocation17 + $0x708] sm:$0xff] }
 0x8e6   : > { %5310 = vmatpush1.bf16.msra.mxu0 %v5309_v40  ;;  %v3529_v36 = vld [vmem:[#allocation17 + $0x748] sm:$0xff] }
 0x8e7   : > { %5374 = vmatpush1.bf16.msra.mxu1 %v5373_v44  ;;  %5312 = vmatprep.subr.bf16.mxu0 %v5311_v5 }
 0x8e8   : > { %5376 = vmatprep.subr.bf16.mxu1 %v5375_v7 }
 0x8ea   : > { %5314 = vmatpush1.bf16.msra.mxu0 %v5313_v54  ;;  %v3472_v54 = vld [vmem:[#allocation17 + $0x580] sm:$0xff] }
 0x8eb   : > { %5378 = vmatpush1.bf16.msra.mxu1 %v5377_v57  ;;  %5316 = vmatprep.subr.bf16.mxu0 %v5315_v58  ;;  %v3480_v57 = vld [vmem:[#allocation17 + $0x5c0] sm:$0xff]  ;;  %v5391_v58 = vpack.c.bf16 %v3483_v52, %v3475_v34 }
 0x8ec   : > { %5380 = vmatprep.subr.bf16.mxu1 %v5379_v12  ;;  %v5329_v59 = vpack.c.bf16 %v3480_v57, %v3472_v54  ;;  %v5393_v12 = vpack.c.bf16 %v3482_v10, %v3474_v60  ;;  %v3536_v52 = vld [vmem:[#allocation17 + $0x780] sm:$0xff] }
 0x8ed   : > { %v3544_v54 = vld [vmem:[#allocation17 + $0x7c0] sm:$0xff] }
 0x8ee   : > { %5318 = vmatpush1.bf16.msra.mxu0 %v5317_v51  ;;  %v3488_v51 = vld [vmem:[#allocation17 + $0x600] sm:$0xff]  ;;  %v5345_v60 = vpack.c.bf16 %v3544_v54, %v3536_v52 }
 0x8ef   : > { %5382 = vmatpush1.bf16.msra.mxu1 %v5381_v46  ;;  %5320 = vmatprep.subr.bf16.mxu0 %v5319_v19  ;;  %v3496_v46 = vld [vmem:[#allocation17 + $0x640] sm:$0xff]  ;;  %v5395_v19 = vpack.c.bf16 %v3499_v17, %v3491_v16 }
 0x8f0   : > { %5384 = vmatprep.subr.bf16.mxu1 %v5383_v9  ;;  %v5333_v22 = vpack.c.bf16 %v3496_v46, %v3488_v51  ;;  %v3505_v9 = vld [vmem:[#allocation17 + $0x688] sm:$0xff] }
 0x8f1   : > { %v5335_v27 = vpack.c.bf16 %v3513_v8, %v3505_v9  ;;  %v3216_v9 = vld [vmem:[#allocation14] sm:$0x3] }
 0x8f2   : > { %5322 = vmatpush1.bf16.msra.mxu0 %v5321_v4  ;;  %v5399_v4 = vpack.c.bf16 %v3515_v26, %v3507_v15  ;;  %v3258_v8 = vrot.slane %v3216_v9, %v7096_v63  ;;  %v3254_v15 = vrot.slane %v3216_v9, %v7099_v3 }
 0x8f3   : > { %5386 = vmatpush1.bf16.msra.mxu1 %v5385_v14  ;;  %5324 = vmatprep.subr.bf16.mxu0 %v5323_v23  ;;  %v3504_v14 = vld [vmem:[#allocation17 + $0x680] sm:$0xff] }
 0x8f4   : > { %5388 = vmatprep.subr.bf16.mxu1 %v5387_v33  ;;  %v3512_v23 = vld [vmem:[#allocation17 + $0x6c0] sm:$0xff]  ;;  %v3514_v33 = vld [vmem:[#allocation17 + $0x6d0] sm:$0xff] }
 0x8f5   : > { %v5337_v2 = vpack.c.bf16 %v3512_v23, %v3504_v14 }
 0x8f6   : > { %5326 = vmatpush1.bf16.msra.mxu0 %v5325_v38  ;;  %v5401_v38 = vpack.c.bf16 %v3514_v33, %v3506_v28  ;;  %v3302_v33 = vld [vmem:[#allocation17 + $0x30] sm:$0xff] }
 0x8f7   : > { %5390 = vmatpush1.bf16.msra.mxu1 %v5389_v21  ;;  %5328 = vmatprep.subr.bf16.mxu0 %v5327_v48  ;;  %v5339_v21 = vpack.c.bf16 %v3529_v36, %v3521_v35  ;;  %v3547_v48 = vld [vmem:[#allocation17 + $0x7d8] sm:$0xff]  ;;  %v3310_v35 = vld [vmem:[#allocation17 + $0x70] sm:$0xff]  ;;  %v3317_v36 = vld [vmem:[#allocation17 + $0xa8] sm:$0xff] }
 0x8f8   : > { %5392 = vmatprep.subr.bf16.mxu1 %v5391_v58  ;;  %v5407_v57 = vpack.c.bf16 %v3547_v48, %v3539_v47  ;;  %v3538_v58 = vld [vmem:[#allocation17 + $0x790] sm:$0xff] }
 0x8f9   : > { %v3326_v48 = vld [vmem:[#allocation17 + $0xf0] sm:$0xff] }
 0x8fa   : > { %5330 = vmatpush1.bf16.msra.mxu0 %v5329_v59  ;;  %v3546_v59 = vld [vmem:[#allocation17 + $0x7d0] sm:$0xff] }
 0x8fb   : > { %5394 = vmatpush1.bf16.msra.mxu1 %v5393_v12  ;;  %5332 = vmatprep.subr.bf16.mxu0 %v5331_v32  ;;  %v5409_v10 = vpack.c.bf16 %v3546_v59, %v3538_v58  ;;  %v3301_v12 = vld [vmem:[#allocation17 + $0x28] sm:$0xff]  ;;  %v3311_v32 = vld [vmem:[#allocation17 + $0x78] sm:$0xff] }
 0x8fc   : > { %5396 = vmatprep.subr.bf16.mxu1 %v5395_v19  ;;  %v5411_v16 = vpack.c.bf16 %v3309_v56, %v3301_v12  ;;  %v5475_v17 = vpack.c.bf16 %v3311_v32, %v3303_v13  ;;  %v3341_v59 = vld [vmem:[#allocation17 + $0x168] sm:$0xff]  ;;  %v3332_v56 = vld [vmem:[#allocation17 + $0x120] sm:$0xff]  ;;  %v3342_v32 = vld [vmem:[#allocation17 + $0x170] sm:$0xff] }
 0x8fd   : > { %v3340_v13 = vld [vmem:[#allocation17 + $0x160] sm:$0xff] }
 0x8fe   : > { %5334 = vmatpush1.bf16.msra.mxu0 %v5333_v22 }
 0x8ff   : > { %5398 = vmatpush1.bf16.msra.mxu1 %v5397_v31  ;;  %5336 = vmatprep.subr.bf16.mxu0 %v5335_v27  ;;  %v3217_v31 = vld [vmem:[#allocation16] sm:$0x3]  ;;  %v3300_v27 = vld [vmem:[#allocation17 + $0x20] sm:$0xff] }
 0x900   : > { %5400 = vmatprep.subr.bf16.mxu1 %v5399_v4  ;;  %v3273_v14 = vrot.slane %v3217_v31, %v7096_v63  ;;  %v3269_v28 = vrot.slane %v3217_v31, %v7099_v3  ;;  %v3348_v31 = vld [vmem:[#allocation17 + $0x1a0] sm:$0xff] }
 0x902   : > { %5338 = vmatpush1.bf16.msra.mxu0 %v5337_v2  ;;  %v3308_v2 = vld [vmem:[#allocation17 + $0x60] sm:$0xff] }
 0x903   : > { %5402 = vmatpush1.bf16.msra.mxu1 %v5401_v38  ;;  %5340 = vmatprep.subr.bf16.mxu0 %v5339_v21 }
 0x964   : > { %v3220_v49 = vpop.xlane.xlu1 %3219 }
 0x965   : > { %v3224_v0 = vmul.f32 0.00390625, %v3220_v49  ;;  %v3523_v49 = vld [vmem:[#allocation17 + $0x718] sm:$0xff] }
 0x967   : > { %v7472_v37 = vsub.f32 %v7456_v50, %v3224_v0  ;;  %v7475_v24 = vsub.f32 %v7459_v53, %v3224_v0  ;;  %v3531_v0 = vld [vmem:[#allocation17 + $0x758] sm:$0xff] }
 0x968   : > { %v3223_v43 = vpop.xlane.xlu0 %3222 }
 0x969   : > { %v3225_v6 = vmul.f32 0.00390625, %v3223_v43  ;;  %v3230_v39 = vmul.f32 %v7472_v37, %v7472_v37  ;;  %v3231_v40 = vmul.f32 %v7475_v24, %v7475_v24  ;;  %v3520_v43 = vld [vmem:[#allocation17 + $0x700] sm:$0xff] }
 0x96b   : > { %v7482_v44 = vsub.f32 %v7464_v11, %v3225_v6  ;;  %v7485_v5 = vsub.f32 %v7467_v55, %v3225_v6  ;;  %v3234_v62 = vadd.f32 %v3231_v40, %v3230_v39  ;;  %v5403_v6 = vpack.c.bf16 %v3531_v0, %v3523_v49  ;;  %v3528_v39 = vld [vmem:[#allocation17 + $0x740] sm:$0xff]  ;;  %v3522_v40 = vld [vmem:[#allocation17 + $0x710] sm:$0xff]  ;;  %v3325_v49 = vld [vmem:[#allocation17 + $0xe8] sm:$0xff] }
 0x96c   : > { %v3319_v0 = vld [vmem:[#allocation17 + $0xb8] sm:$0xff]  ;;  %v5415_v47 = vpack.c.bf16 %v3325_v49, %v3317_v36  ;;  %v3364_v36 = vld [vmem:[#allocation17 + $0x220] sm:$0xff] }
 0x96d   : > { %3235 = vadd.xlane.f32.xlu0 %v3234_v62  ;;  %v3232_v25 = vmul.f32 %v7482_v44, %v7482_v44  ;;  %v3233_v45 = vmul.f32 %v7485_v5, %v7485_v5  ;;  %v3530_v62 = vld [vmem:[#allocation17 + $0x750] sm:$0xff]  ;;  %5404 = vmatprep.subr.bf16.mxu1 %v5403_v6 }
 0x96e   : > { %v5405_v20 = vpack.c.bf16 %v3530_v62, %v3522_v40  ;;  %v5477_v40 = vpack.c.bf16 %v3310_v35, %v3302_v33 }
 0x96f   : > { %v3237_v7 = vadd.f32 %v3233_v45, %v3232_v25  ;;  %v5341_v25 = vpack.c.bf16 %v3528_v39, %v3520_v43  ;;  %v3537_v45 = vld [vmem:[#allocation17 + $0x788] sm:$0xff]  ;;  %v3327_v43 = vld [vmem:[#allocation17 + $0xf8] sm:$0xff]  ;;  %v5413_v39 = vpack.c.bf16 %v3308_v2, %v3300_v27  ;;  %v3350_v27 = vld [vmem:[#allocation17 + $0x1b0] sm:$0xff] }
 0x970   : > { %5406 = vmatpush1.bf16.msra.mxu1 %v5405_v20  ;;  %v5479_v20 = vpack.c.bf16 %v3327_v43, %v3319_v0  ;;  %v3375_v2 = vld [vmem:[#allocation17 + $0x278] sm:$0xff]  ;;  %v3366_v0 = vld [vmem:[#allocation17 + $0x230] sm:$0xff] }
 0x971   : > { %3238 = vadd.xlane.f32.xlu1 %v3237_v7  ;;  %v3545_v7 = vld [vmem:[#allocation17 + $0x7c8] sm:$0xff]  ;;  %5342 = vmatpush1.bf16.msra.mxu0 %v5341_v25  ;;  %v3374_v43 = vld [vmem:[#allocation17 + $0x270] sm:$0xff] }
 0x972   : > { %v5343_v34 = vpack.c.bf16 %v3545_v7, %v3537_v45  ;;  %5408 = vmatprep.subr.bf16.mxu1 %v5407_v57  ;;  %v3316_v45 = vld [vmem:[#allocation17 + $0xa0] sm:$0xff]  ;;  %v3333_v57 = vld [vmem:[#allocation17 + $0x128] sm:$0xff] }
 0x973   : > { %v3324_v7 = vld [vmem:[#allocation17 + $0xe0] sm:$0xff] }
 0x974   : > { %5344 = vmatprep.subr.bf16.mxu0 %v5343_v34  ;;  %5410 = vmatpush1.bf16.msra.mxu1 %v5409_v10  ;;  %v3318_v34 = vld [vmem:[#allocation17 + $0xb0] sm:$0xff]  ;;  %v5417_v58 = vpack.c.bf16 %v3324_v7, %v3316_v45  ;;  %v3380_v45 = vld [vmem:[#allocation17 + $0x2a0] sm:$0xff] }
 0x975   : > { %5346 = vmatpush1.bf16.msra.mxu0 %v5345_v60  ;;  %5476 = vmatprep.subr.bf16.mxu1 %v5475_v17  ;;  %v3343_v60 = vld [vmem:[#allocation17 + $0x178] sm:$0xff]  ;;  %v5481_v12 = vpack.c.bf16 %v3326_v48, %v3318_v34  ;;  %v3349_v17 = vld [vmem:[#allocation17 + $0x1a8] sm:$0xff]  ;;  %v3388_v7 = vld [vmem:[#allocation17 + $0x2e0] sm:$0xff] }
 0x976   : > { %5412 = vmatprep.subr.bf16.mxu0 %v5411_v16  ;;  %v3334_v16 = vld [vmem:[#allocation17 + $0x130] sm:$0xff] }
 0x977   : > { %v5485_v9 = vpack.c.bf16 %v3342_v32, %v3334_v16  ;;  %v3382_v34 = vld [vmem:[#allocation17 + $0x2b0] sm:$0xff] }
 0x978   : > { %v3390_v48 = vld [vmem:[#allocation17 + $0x2f0] sm:$0xff] }
 0x979   : > { %v3398_v16 = vld [vmem:[#allocation17 + $0x330] sm:$0xff] }
 0x97a   : > { %v3406_v32 = vld [vmem:[#allocation17 + $0x370] sm:$0xff] }
 0x9fa   : > { %v3236_v51 = vpop.xlane.xlu0 %3235 }
 0x9fb   : > { %v3240_v46 = vmul.f32 0.00390625, %v3236_v51  ;;  %v5419_v51 = vpack.c.bf16 %v3341_v59, %v3333_v57  ;;  %v3399_v57 = vld [vmem:[#allocation17 + $0x338] sm:$0xff]  ;;  %v5433_v59 = vpack.c.bf16 %v3388_v7, %v3380_v45 }
 0x9fd   : > { %v3242_v19 = vadd.f32 1e-05, %v3240_v46 }
 0x9fe   : > { %v3239_v22 = vpop.xlane.xlu1 %3238 }
 0x9ff   : > { %6031 = vrsqrt.f32 %v3242_v19  ;;  %v3241_v1 = vmul.f32 0.00390625, %v3239_v22  ;;  %v3357_v19 = vld [vmem:[#allocation17 + $0x1e8] sm:$0xff]  ;;  %v3351_v22 = vld [vmem:[#allocation17 + $0x1b8] sm:$0xff] }
 0xa01   : > { %v3243_v18 = vadd.f32 1e-05, %v3241_v1  ;;  %v3359_v1 = vld [vmem:[#allocation17 + $0x1f8] sm:$0xff] }
 0xa03   : > { %6033 = vrsqrt.f32 %v3243_v18  ;;  %v5421_v18 = vpack.c.bf16 %v3340_v13, %v3332_v56 }
 0xa09   : > { %v6032_v26 = vpop.eup %6031 }
 0xa0a   : > { %v3247_v4 = vmul.f32 %v6032_v26, %v7475_v24  ;;  %v3246_v23 = vmul.f32 %v6032_v26, %v7472_v37  ;;  %v5487_v26 = vpack.c.bf16 %v3359_v1, %v3351_v22  ;;  %v5501_v1 = vpack.c.bf16 %v3406_v32, %v3398_v16  ;;  %v3477_v16 = vld [vmem:[#allocation17 + $0x5a8] sm:$0xff] }
 0xa0b   : > { %v3485_v32 = vld [vmem:[#allocation17 + $0x5e8] sm:$0xff] }
 0xa0c   : > { %v3262_v38 = vmul.f32 %v3258_v8, %v3247_v4  ;;  %v3261_v21 = vmul.f32 %v3254_v15, %v3246_v23  ;;  %v3358_v4 = vld [vmem:[#allocation17 + $0x1f0] sm:$0xff]  ;;  %v3373_v23 = vld [vmem:[#allocation17 + $0x268] sm:$0xff] }
 0xa0d   : > { %v6034_v6 = vpop.eup %6033  ;;  %v5489_v35 = vpack.c.bf16 %v3358_v4, %v3350_v27  ;;  %v3429_v27 = vld [vmem:[#allocation17 + $0x428] sm:$0xff] }
 0xa0e   : > { %v3277_v62 = vadd.f32 %v3273_v14, %v3262_v38  ;;  %v7497_v24 = vadd.f32 %v3269_v28, %v3261_v21  ;;  %v3249_v25 = vmul.f32 %v6034_v6, %v7485_v5  ;;  %v3248_v37 = vmul.f32 %v6034_v6, %v7482_v44  ;;  %v3335_v5 = vld [vmem:[#allocation17 + $0x138] sm:$0xff]  ;;  %v3372_v38 = vld [vmem:[#allocation17 + $0x260] sm:$0xff]  ;;  %v3381_v6 = vld [vmem:[#allocation17 + $0x2a8] sm:$0xff] }
 0xa0f   : > { %v5483_v46 = vpack.c.bf16 %v3343_v60, %v3335_v5  ;;  %v5497_v5 = vpack.c.bf16 %v3390_v48, %v3382_v34  ;;  %v3396_v60 = vld [vmem:[#allocation17 + $0x320] sm:$0xff]  ;;  %v3437_v4 = vld [vmem:[#allocation17 + $0x468] sm:$0xff] }
 0xa10   : > { %3658 = vmatprep.mubr.f32.mxu0 %v3277_v62  ;;  %3735 = vmatprep.mubr.f32.mxu1 %v3277_v62  ;;  %v3264_v52 = vmul.f32 %v3258_v8, %v3249_v25  ;;  %v3263_v54 = vmul.f32 %v3254_v15, %v3248_v37  ;;  %v3356_v8 = vld [vmem:[#allocation17 + $0x1e0] sm:$0xff]  ;;  %v5423_v15 = vpack.c.bf16 %v3357_v19, %v3349_v17  ;;  %v3413_v17 = vld [vmem:[#allocation17 + $0x3a8] sm:$0xff]  ;;  %v3423_v19 = vld [vmem:[#allocation17 + $0x3f8] sm:$0xff] }
 0xa11   : > { %3659 = vmatmul.mubr.f32.vlgmr.msra.gmra.mrb[6].mxu0 %v7497_v24  ;;  %3736 = vmatmul.mubr.f32.vlgmr.msra.gmra.mrb[26].mxu1 %v7497_v24  ;;  %v5425_v33 = vpack.c.bf16 %v3356_v8, %v3348_v31  ;;  %v5429_v25 = vpack.c.bf16 %v3372_v38, %v3364_v36  ;;  %v5493_v37 = vpack.c.bf16 %v3374_v43, %v3366_v0  ;;  %v3445_v0 = vld [vmem:[#allocation17 + $0x4a8] sm:$0xff] }
 0xa12   : > { %5414 = vmatpush1.bf16.msra.mxu0 %v5413_v39  ;;  %5478 = vmatpush1.bf16.msra.mxu1 %v5477_v40  ;;  %v7503_v44 = vadd.f32 %v3273_v14, %v3264_v52  ;;  %v7505_v10 = vadd.f32 %v3269_v28, %v3263_v54  ;;  %v3365_v14 = vld [vmem:[#allocation17 + $0x228] sm:$0xff]  ;;  %v3367_v28 = vld [vmem:[#allocation17 + $0x238] sm:$0xff]  ;;  %v5443_v36 = vpack.c.bf16 %v3437_v4, %v3429_v27 }
 0xa13   : > { %5416 = vmatprep.subr.bf16.mxu0 %v5415_v47  ;;  %5480 = vmatprep.subr.bf16.mxu1 %v5479_v20  ;;  %v5427_v21 = vpack.c.bf16 %v3373_v23, %v3365_v14  ;;  %v5491_v49 = vpack.c.bf16 %v3375_v2, %v3367_v28  ;;  %v3389_v39 = vld [vmem:[#allocation17 + $0x2e8] sm:$0xff]  ;;  %v3383_v40 = vld [vmem:[#allocation17 + $0x2b8] sm:$0xff] }
 0xa14   : > { %3664 = vmatprep.mubr.f32.mxu0 %v7503_v44  ;;  %3741 = vmatprep.mubr.f32.mxu1 %v7503_v44  ;;  %v5431_v47 = vpack.c.bf16 %v3389_v39, %v3381_v6  ;;  %v3397_v52 = vld [vmem:[#allocation17 + $0x328] sm:$0xff]  ;;  %v3431_v14 = vld [vmem:[#allocation17 + $0x438] sm:$0xff] }
 0xa15   : > { %3665 = vmatmul.mubr.f32.gmra.mrb[8].mxu0 %v7505_v10  ;;  %3742 = vmatmul.mubr.f32.gmra.mrb[28].mxu1 %v7505_v10  ;;  %v3405_v54 = vld [vmem:[#allocation17 + $0x368] sm:$0xff]  ;;  %v3439_v23 = vld [vmem:[#allocation17 + $0x478] sm:$0xff] }
 0xa16   : > { %5418 = vmatpush1.bf16.msra.mxu0 %v5417_v58  ;;  %5482 = vmatpush1.bf16.msra.mxu1 %v5481_v12  ;;  %v3407_v58 = vld [vmem:[#allocation17 + $0x378] sm:$0xff]  ;;  %v3404_v12 = vld [vmem:[#allocation17 + $0x360] sm:$0xff]  ;;  %v5435_v56 = vpack.c.bf16 %v3405_v54, %v3397_v52  ;;  %v5507_v38 = vpack.c.bf16 %v3439_v23, %v3431_v14  ;;  %v3453_v43 = vld [vmem:[#allocation17 + $0x4e8] sm:$0xff] }
 0xa17   : > { %3812 = vmatprep.mubr.f32.mxu0 %v3277_v62  ;;  %3889 = vmatprep.mubr.f32.mxu1 %v3277_v62  ;;  %v3391_v62 = vld [vmem:[#allocation17 + $0x2f8] sm:$0xff]  ;;  %v5499_v13 = vpack.c.bf16 %v3407_v58, %v3399_v57  ;;  %v5437_v22 = vpack.c.bf16 %v3404_v12, %v3396_v60  ;;  %v5447_v45 = vpack.c.bf16 %v3453_v43, %v3445_v0  ;;  %v3461_v34 = vld [vmem:[#allocation17 + $0x528] sm:$0xff] }
 0xa18   : > { %5420 = vmatprep.subr.bf16.mxu0 %v5419_v51  ;;  %5484 = vmatprep.subr.bf16.mxu1 %v5483_v46  ;;  %v5495_v20 = vpack.c.bf16 %v3391_v62, %v3383_v40  ;;  %v3421_v51 = vld [vmem:[#allocation17 + $0x3e8] sm:$0xff]  ;;  %v3415_v46 = vld [vmem:[#allocation17 + $0x3b8] sm:$0xff] }
 0xa19   : > { %v5439_v31 = vpack.c.bf16 %v3421_v51, %v3413_v17  ;;  %v5503_v8 = vpack.c.bf16 %v3423_v19, %v3415_v46  ;;  %v3447_v6 = vld [vmem:[#allocation17 + $0x4b8] sm:$0xff]  ;;  %v3469_v48 = vld [vmem:[#allocation17 + $0x568] sm:$0xff] }
 0xa1a   : > { %5422 = vmatpush1.bf16.msra.mxu0 %v5421_v18  ;;  %5486 = vmatpush1.bf16.msra.mxu1 %v5485_v9  ;;  %v3412_v18 = vld [vmem:[#allocation17 + $0x3a0] sm:$0xff]  ;;  %v3455_v39 = vld [vmem:[#allocation17 + $0x4f8] sm:$0xff]  ;;  %v5451_v60 = vpack.c.bf16 %v3469_v48, %v3461_v34 }
 0xa1b   : > { %5424 = vmatprep.subr.bf16.mxu0 %v5423_v15  ;;  %5488 = vmatprep.subr.bf16.mxu1 %v5487_v26  ;;  %v3420_v9 = vld [vmem:[#allocation17 + $0x3e0] sm:$0xff]  ;;  %v3414_v15 = vld [vmem:[#allocation17 + $0x3b0] sm:$0xff]  ;;  %v5511_v7 = vpack.c.bf16 %v3455_v39, %v3447_v6  ;;  %v3463_v52 = vld [vmem:[#allocation17 + $0x538] sm:$0xff] }
 0xa1c   : > { %v3422_v26 = vld [vmem:[#allocation17 + $0x3f0] sm:$0xff]  ;;  %v5441_v28 = vpack.c.bf16 %v3420_v9, %v3412_v18  ;;  %v3471_v54 = vld [vmem:[#allocation17 + $0x578] sm:$0xff]  ;;  %v5455_v18 = vpack.c.bf16 %v3485_v32, %v3477_v16 }
 0xa1d   : > { %v5505_v2 = vpack.c.bf16 %v3422_v26, %v3414_v15  ;;  %v5515_v12 = vpack.c.bf16 %v3471_v54, %v3463_v52  ;;  %v3479_v17 = vld [vmem:[#allocation17 + $0x5b8] sm:$0xff]  ;;  %v3493_v15 = vld [vmem:[#allocation17 + $0x628] sm:$0xff] }
 0xa1e   : > { %5426 = vmatpush1.bf16.msra.mxu0 %v5425_v33  ;;  %5490 = vmatpush1.bf16.msra.mxu1 %v5489_v35  ;;  %v3428_v33 = vld [vmem:[#allocation17 + $0x420] sm:$0xff]  ;;  %v3487_v51 = vld [vmem:[#allocation17 + $0x5f8] sm:$0xff]  ;;  %v3501_v26 = vld [vmem:[#allocation17 + $0x668] sm:$0xff] }
 0xa1f   : > { %5428 = vmatprep.subr.bf16.mxu0 %v5427_v21  ;;  %5492 = vmatprep.subr.bf16.mxu1 %v5491_v49  ;;  %v3436_v35 = vld [vmem:[#allocation17 + $0x460] sm:$0xff]  ;;  %v3430_v21 = vld [vmem:[#allocation17 + $0x430] sm:$0xff]  ;;  %v5519_v9 = vpack.c.bf16 %v3487_v51, %v3479_v17  ;;  %v3495_v27 = vld [vmem:[#allocation17 + $0x638] sm:$0xff] }
 0xa20   : > { %v3438_v49 = vld [vmem:[#allocation17 + $0x470] sm:$0xff]  ;;  %v5445_v40 = vpack.c.bf16 %v3436_v35, %v3428_v33  ;;  %v3503_v4 = vld [vmem:[#allocation17 + $0x678] sm:$0xff]  ;;  %v5459_v33 = vpack.c.bf16 %v3501_v26, %v3493_v15 }
 0xa21   : > { %v5509_v62 = vpack.c.bf16 %v3438_v49, %v3430_v21  ;;  %v5523_v35 = vpack.c.bf16 %v3503_v4, %v3495_v27  ;;  %v3509_v21 = vld [vmem:[#allocation17 + $0x6a8] sm:$0xff]  ;;  %v3511_v0 = vld [vmem:[#allocation17 + $0x6b8] sm:$0xff] }
 0xa22   : > { %5430 = vmatpush1.bf16.msra.mxu0 %v5429_v25  ;;  %5494 = vmatpush1.bf16.msra.mxu1 %v5493_v37  ;;  %v3444_v25 = vld [vmem:[#allocation17 + $0x4a0] sm:$0xff]  ;;  %v3517_v49 = vld [vmem:[#allocation17 + $0x6e8] sm:$0xff]  ;;  %v3519_v43 = vld [vmem:[#allocation17 + $0x6f8] sm:$0xff] }
 0xa23   : > { %5432 = vmatprep.subr.bf16.mxu0 %v5431_v47  ;;  %5496 = vmatprep.subr.bf16.mxu1 %v5495_v20  ;;  %v3452_v37 = vld [vmem:[#allocation17 + $0x4e0] sm:$0xff]  ;;  %v3446_v47 = vld [vmem:[#allocation17 + $0x4b0] sm:$0xff]  ;;  %v3527_v34 = vld [vmem:[#allocation17 + $0x738] sm:$0xff] }
 0xa24   : > { %v3454_v20 = vld [vmem:[#allocation17 + $0x4f0] sm:$0xff]  ;;  %v5449_v57 = vpack.c.bf16 %v3452_v37, %v3444_v25  ;;  %v5463_v25 = vpack.c.bf16 %v3517_v49, %v3509_v21  ;;  %v5527_v37 = vpack.c.bf16 %v3519_v43, %v3511_v0  ;;  %v3535_v48 = vld [vmem:[#allocation17 + $0x778] sm:$0xff]  ;;  %v4030_v4 = vld [vmem:[#allocation20] sm:$0xff] }
 0xa25   : > { %v5513_v58 = vpack.c.bf16 %v3454_v20, %v3446_v47  ;;  %v3525_v47 = vld [vmem:[#allocation17 + $0x728] sm:$0xff]  ;;  %v3543_v16 = vld [vmem:[#allocation17 + $0x7b8] sm:$0xff]  ;;  %v4041_v21 = vld [vmem:[#allocation20 + $0x58] sm:$0xff] }
 0xa26   : > { %5434 = vmatpush1.bf16.msra.mxu0 %v5433_v59  ;;  %5498 = vmatpush1.bf16.msra.mxu1 %v5497_v5  ;;  %v3460_v59 = vld [vmem:[#allocation17 + $0x520] sm:$0xff]  ;;  %v3533_v20 = vld [vmem:[#allocation17 + $0x768] sm:$0xff]  ;;  %v3551_v32 = vld [vmem:[#allocation17 + $0x7f8] sm:$0xff] }
 0xa27   : > { %5436 = vmatprep.subr.bf16.mxu0 %v5435_v56  ;;  %5500 = vmatprep.subr.bf16.mxu1 %v5499_v13  ;;  %v3468_v5 = vld [vmem:[#allocation17 + $0x560] sm:$0xff]  ;;  %v3462_v56 = vld [vmem:[#allocation17 + $0x530] sm:$0xff]  ;;  %v4038_v43 = vld [vmem:[#allocation20 + $0x40] sm:$0xff] }
 0xa28   : > { %v3470_v13 = vld [vmem:[#allocation17 + $0x570] sm:$0xff]  ;;  %v5453_v46 = vpack.c.bf16 %v3468_v5, %v3460_v59  ;;  %v5467_v59 = vpack.c.bf16 %v3533_v20, %v3525_v47  ;;  %v5531_v5 = vpack.c.bf16 %v3535_v48, %v3527_v34  ;;  %v4046_v20 = vld [vmem:[#allocation20 + $0x80] sm:$0xff]  ;;  %v4048_v34 = vld [vmem:[#allocation20 + $0x90] sm:$0xff] }
 0xa29   : > { %v5517_v19 = vpack.c.bf16 %v3470_v13, %v3462_v56  ;;  %v3541_v56 = vld [vmem:[#allocation17 + $0x7a8] sm:$0xff]  ;;  %v4051_v48 = vld [vmem:[#allocation20 + $0xa8] sm:$0xff] }
 0xa2a   : > { %5438 = vmatpush1.bf16.msra.mxu0 %v5437_v22  ;;  %5502 = vmatpush1.bf16.msra.mxu1 %v5501_v1  ;;  %v3476_v22 = vld [vmem:[#allocation17 + $0x5a0] sm:$0xff]  ;;  %v3549_v13 = vld [vmem:[#allocation17 + $0x7e8] sm:$0xff] }
 0xa2b   : > { %5440 = vmatprep.subr.bf16.mxu0 %v5439_v31  ;;  %5504 = vmatprep.subr.bf16.mxu1 %v5503_v8  ;;  %v3484_v1 = vld [vmem:[#allocation17 + $0x5e0] sm:$0xff]  ;;  %v3478_v31 = vld [vmem:[#allocation17 + $0x5b0] sm:$0xff] }
 0xa2c   : > { %v3486_v8 = vld [vmem:[#allocation17 + $0x5f0] sm:$0xff]  ;;  %v5457_v14 = vpack.c.bf16 %v3484_v1, %v3476_v22  ;;  %v5535_v22 = vpack.c.bf16 %v3551_v32, %v3543_v16  ;;  %v3548_v1 = vld [vmem:[#allocation17 + $0x7e0] sm:$0xff] }
 0xa2d   : > { %v5521_v23 = vpack.c.bf16 %v3486_v8, %v3478_v31  ;;  %v4031_v31 = vld [vmem:[#allocation20 + $0x8] sm:$0xff]  ;;  %v4033_v8 = vld [vmem:[#allocation20 + $0x18] sm:$0xff] }
 0xa2e   : > { %5442 = vmatpush1.bf16.msra.mxu0 %v5441_v28  ;;  %5506 = vmatpush1.bf16.msra.mxu1 %v5505_v2  ;;  %v3492_v28 = vld [vmem:[#allocation17 + $0x620] sm:$0xff]  ;;  %v5539_v27 = vpack.c.bf16 %v4033_v8, %v4031_v31  ;;  %v4059_v16 = vld [vmem:[#allocation20 + $0xe8] sm:$0xff]  ;;  %v4062_v31 = vld [vmem:[#allocation20 + $0x100] sm:$0xff] }
 0xa2f   : > { %5444 = vmatprep.subr.bf16.mxu0 %v5443_v36  ;;  %5508 = vmatprep.subr.bf16.mxu1 %v5507_v38  ;;  %v3500_v2 = vld [vmem:[#allocation17 + $0x660] sm:$0xff]  ;;  %v3494_v36 = vld [vmem:[#allocation17 + $0x630] sm:$0xff]  ;;  %v4064_v8 = vld [vmem:[#allocation20 + $0x110] sm:$0xff] }
 0xa30   : > { %v3502_v38 = vld [vmem:[#allocation17 + $0x670] sm:$0xff]  ;;  %v5461_v6 = vpack.c.bf16 %v3500_v2, %v3492_v28  ;;  %v4037_v28 = vld [vmem:[#allocation20 + $0x38] sm:$0xff] }
 0xa31   : > { %v5525_v39 = vpack.c.bf16 %v3502_v38, %v3494_v36  ;;  %v4036_v36 = vld [vmem:[#allocation20 + $0x30] sm:$0xff]  ;;  %v4039_v38 = vld [vmem:[#allocation20 + $0x48] sm:$0xff]  ;;  %v4061_v32 = vld [vmem:[#allocation20 + $0xf8] sm:$0xff] }
 0xa32   : > { %5446 = vmatpush1.bf16.msra.mxu0 %v5445_v40  ;;  %5510 = vmatpush1.bf16.msra.mxu1 %v5509_v62  ;;  %v3508_v40 = vld [vmem:[#allocation17 + $0x6a0] sm:$0xff]  ;;  %v5547_v0 = vpack.c.bf16 %v4041_v21, %v4039_v38  ;;  %v4072_v38 = vld [vmem:[#allocation20 + $0x150] sm:$0xff] }
 0xa33   : > { %5448 = vmatprep.subr.bf16.mxu0 %v5447_v45  ;;  %5512 = vmatprep.subr.bf16.mxu1 %v5511_v7  ;;  %v3516_v62 = vld [vmem:[#allocation17 + $0x6e0] sm:$0xff]  ;;  %v3510_v45 = vld [vmem:[#allocation17 + $0x6b0] sm:$0xff] }
 0xa34   : > { %v3518_v7 = vld [vmem:[#allocation17 + $0x6f0] sm:$0xff]  ;;  %v5465_v52 = vpack.c.bf16 %v3516_v62, %v3508_v40  ;;  %v4045_v40 = vld [vmem:[#allocation20 + $0x78] sm:$0xff] }
 0xa35   : > { %v5529_v54 = vpack.c.bf16 %v3518_v7, %v3510_v45  ;;  %v4047_v45 = vld [vmem:[#allocation20 + $0x88] sm:$0xff] }
 0xa36   : > { %5450 = vmatpush1.bf16.msra.mxu0 %v5449_v57  ;;  %5514 = vmatpush1.bf16.msra.mxu1 %v5513_v58  ;;  %v3524_v57 = vld [vmem:[#allocation17 + $0x720] sm:$0xff] }
 0xa37   : > { %5452 = vmatprep.subr.bf16.mxu0 %v5451_v60  ;;  %5516 = vmatprep.subr.bf16.mxu1 %v5515_v12  ;;  %v3532_v58 = vld [vmem:[#allocation17 + $0x760] sm:$0xff]  ;;  %v3526_v60 = vld [vmem:[#allocation17 + $0x730] sm:$0xff] }
 0xa38   : > { %v3534_v12 = vld [vmem:[#allocation17 + $0x770] sm:$0xff]  ;;  %v5469_v17 = vpack.c.bf16 %v3532_v58, %v3524_v57  ;;  %v4050_v57 = vld [vmem:[#allocation20 + $0xa0] sm:$0xff]  ;;  %v4052_v58 = vld [vmem:[#allocation20 + $0xb0] sm:$0xff] }
 0xa39   : > { %v5533_v51 = vpack.c.bf16 %v3534_v12, %v3526_v60  ;;  %v5561_v60 = vpack.c.bf16 %v4052_v58, %v4050_v57  ;;  %v4086_v58 = vld [vmem:[#allocation20 + $0x1c0] sm:$0xff] }
 0xa3a   : > { %5454 = vmatpush1.bf16.msra.mxu0 %v5453_v46  ;;  %5518 = vmatpush1.bf16.msra.mxu1 %v5517_v19  ;;  %v3540_v46 = vld [vmem:[#allocation17 + $0x7a0] sm:$0xff]  ;;  %v5471_v19 = vpack.c.bf16 %v3549_v13, %v3541_v56  ;;  %v4054_v56 = vld [vmem:[#allocation20 + $0xc0] sm:$0xff]  ;;  %v4056_v13 = vld [vmem:[#allocation20 + $0xd0] sm:$0xff] }
 0xa3b   : > { %5456 = vmatprep.subr.bf16.mxu0 %v5455_v18  ;;  %5520 = vmatprep.subr.bf16.mxu1 %v5519_v9  ;;  %v3542_v18 = vld [vmem:[#allocation17 + $0x7b0] sm:$0xff]  ;;  %v5473_v15 = vpack.c.bf16 %v3548_v1, %v3540_v46  ;;  %v4058_v46 = vld [vmem:[#allocation20 + $0xe0] sm:$0xff] }
 0xa3c   : > { %v3550_v9 = vld [vmem:[#allocation17 + $0x7f0] sm:$0xff] }
 0xa3d   : > { %v5537_v26 = vpack.c.bf16 %v3550_v9, %v3542_v18  ;;  %v4063_v1 = vld [vmem:[#allocation20 + $0x108] sm:$0xff]  ;;  %v4065_v18 = vld [vmem:[#allocation20 + $0x118] sm:$0xff] }
 0xa3e   : > { %5458 = vmatpush1.bf16.msra.mxu0 %v5457_v14  ;;  %5522 = vmatpush1.bf16.msra.mxu1 %v5521_v23  ;;  %v4032_v14 = vld [vmem:[#allocation20 + $0x10] sm:$0xff]  ;;  %v4035_v23 = vld [vmem:[#allocation20 + $0x28] sm:$0xff]  ;;  %v5571_v9 = vpack.c.bf16 %v4065_v18, %v4063_v1 }
 0xa3f   : > { %5460 = vmatprep.subr.bf16.mxu0 %v5459_v33  ;;  %5524 = vmatprep.subr.bf16.mxu1 %v5523_v35  ;;  %v5541_v2 = vpack.c.bf16 %v4032_v14, %v4030_v4  ;;  %v5543_v33 = vpack.c.bf16 %v4037_v28, %v4035_v23  ;;  %v4034_v35 = vld [vmem:[#allocation20 + $0x20] sm:$0xff]  ;;  %v4068_v23 = vld [vmem:[#allocation20 + $0x130] sm:$0xff] }
 0xa40   : > { %v5545_v49 = vpack.c.bf16 %v4036_v36, %v4034_v35  ;;  %v4066_v14 = vld [vmem:[#allocation20 + $0x120] sm:$0xff] }
 0xa41   : > { %v5577_v28 = vpack.c.bf16 %v4068_v23, %v4066_v14  ;;  %v4070_v36 = vld [vmem:[#allocation20 + $0x140] sm:$0xff] }
 0xa42   : > { %5462 = vmatpush1.bf16.msra.mxu0 %v5461_v6  ;;  %5526 = vmatpush1.bf16.msra.mxu1 %v5525_v39  ;;  %v4040_v6 = vld [vmem:[#allocation20 + $0x50] sm:$0xff]  ;;  %v4043_v39 = vld [vmem:[#allocation20 + $0x68] sm:$0xff]  ;;  %v5581_v21 = vpack.c.bf16 %v4072_v38, %v4070_v36 }
 0xa43   : > { %5464 = vmatprep.subr.bf16.mxu0 %v5463_v25  ;;  %5528 = vmatprep.subr.bf16.mxu1 %v5527_v37  ;;  %v5551_v62 = vpack.c.bf16 %v4045_v40, %v4043_v39  ;;  %v4042_v25 = vld [vmem:[#allocation20 + $0x60] sm:$0xff]  ;;  %v4044_v37 = vld [vmem:[#allocation20 + $0x70] sm:$0xff] }
 0xa44   : > { %v5553_v7 = vpack.c.bf16 %v4044_v37, %v4042_v25  ;;  %v4076_v39 = vld [vmem:[#allocation20 + $0x170] sm:$0xff]  ;;  %v4078_v37 = vld [vmem:[#allocation20 + $0x180] sm:$0xff] }
 0xa46   : > { %5466 = vmatpush1.bf16.msra.mxu0 %v5465_v52  ;;  %5530 = vmatpush1.bf16.msra.mxu1 %v5529_v54  ;;  %v4053_v52 = vld [vmem:[#allocation20 + $0xb8] sm:$0xff] }
 0xa47   : > { %5468 = vmatprep.subr.bf16.mxu0 %v5467_v59  ;;  %5532 = vmatprep.subr.bf16.mxu1 %v5531_v5  ;;  %v5559_v54 = vpack.c.bf16 %v4053_v52, %v4051_v48  ;;  %v4055_v59 = vld [vmem:[#allocation20 + $0xc8] sm:$0xff]  ;;  %v4057_v5 = vld [vmem:[#allocation20 + $0xd8] sm:$0xff]  ;;  %v4084_v48 = vld [vmem:[#allocation20 + $0x1b0] sm:$0xff] }
 0xa48   : > { %v5563_v12 = vpack.c.bf16 %v4057_v5, %v4055_v59  ;;  %v4088_v59 = vld [vmem:[#allocation20 + $0x1d0] sm:$0xff] }
 0xa49   : > { %v5597_v5 = vpack.c.bf16 %v4088_v59, %v4086_v58 }
 0xa4a   : > { %5470 = vmatpush1.bf16.msra.mxu0 %v5469_v17  ;;  %5534 = vmatpush1.bf16.msra.mxu1 %v5533_v51  ;;  %v5565_v17 = vpack.c.bf16 %v4056_v13, %v4054_v56  ;;  %v5567_v51 = vpack.c.bf16 %v4061_v32, %v4059_v16  ;;  %v4090_v56 = vld [vmem:[#allocation20 + $0x1e0] sm:$0xff]  ;;  %v4092_v16 = vld [vmem:[#allocation20 + $0x1f0] sm:$0xff]  ;;  %v4095_v32 = vld [vmem:[#allocation20 + $0x208] sm:$0xff] }
 0xa4b   : > { %5472 = vmatprep.subr.bf16.mxu0 %v5471_v19  ;;  %5536 = vmatprep.subr.bf16.mxu1 %v5535_v22  ;;  %v4060_v19 = vld [vmem:[#allocation20 + $0xf0] sm:$0xff] }
 0xa4c   : > { %v5569_v22 = vpack.c.bf16 %v4060_v19, %v4058_v46  ;;  %v7517_v19 = vld [vmem:[#allocation19] sm:$0xff] }
 0xa4d   : > { %v3561_v1 = vrot.slane %v7517_v19, %v7096_v63  ;;  %v7526_v18 = vrot.slane %v7517_v19, %v894_v42 }
 0xa4e   : > { %5474 = vmatpush1.bf16.msra.mxu0 %v5473_v15  ;;  %5538 = vmatpush1.bf16.msra.mxu1 %v5537_v26  ;;  %v5573_v15 = vpack.c.bf16 %v4064_v8, %v4062_v31  ;;  %v4067_v26 = vld [vmem:[#allocation20 + $0x128] sm:$0xff] }
 0xa4f   : > { %5540 = vmatprep.subr.bf16.mxu0 %v5539_v27  ;;  %v4069_v27 = vld [vmem:[#allocation20 + $0x138] sm:$0xff] }
 0xa50   : > { %v5575_v4 = vpack.c.bf16 %v4069_v27, %v4067_v26 }
 0xa51   : > { %3813 = vmatmul.mubr.f32.vlgmr.msra.gmra.mrb[10].mxu0 %v7497_v24  ;;  %3890 = vmatmul.mubr.f32.vlgmr.msra.gmra.mrb[30].mxu1 %v7497_v24  ;;  %v5549_v24 = vpack.c.bf16 %v4040_v6, %v4038_v43  ;;  %v4074_v6 = vld [vmem:[#allocation20 + $0x160] sm:$0xff] }
 0xa52   : > { %3818 = vmatprep.mubr.f32.mxu0 %v7503_v44  ;;  %3895 = vmatprep.mubr.f32.mxu1 %v7503_v44  ;;  %v4049_v44 = vld [vmem:[#allocation20 + $0x98] sm:$0xff]  ;;  %v5585_v40 = vpack.c.bf16 %v4076_v39, %v4074_v6 }
 0xa53   : > { %5542 = vmatpush1.bf16.msra.mxu0 %v5541_v2  ;;  %v5555_v47 = vpack.c.bf16 %v4049_v44, %v4047_v45  ;;  %v4071_v2 = vld [vmem:[#allocation20 + $0x148] sm:$0xff]  ;;  %v4080_v45 = vld [vmem:[#allocation20 + $0x190] sm:$0xff] }
 0xa54   : > { %5544 = vmatprep.subr.bf16.mxu0 %v5543_v33  ;;  %v4073_v33 = vld [vmem:[#allocation20 + $0x158] sm:$0xff]  ;;  %v5589_v44 = vpack.c.bf16 %v4080_v45, %v4078_v37 }
 0xa55   : > { %3819 = vmatmul.mubr.f32.gmra.mrb[12].mxu0 %v7505_v10  ;;  %3896 = vmatmul.mubr.f32.gmra.mrb[32].mxu1 %v7505_v10  ;;  %v5557_v10 = vpack.c.bf16 %v4048_v34, %v4046_v20  ;;  %v5579_v35 = vpack.c.bf16 %v4073_v33, %v4071_v2  ;;  %v4082_v34 = vld [vmem:[#allocation20 + $0x1a0] sm:$0xff] }
 0xa56   : > { %v5593_v52 = vpack.c.bf16 %v4084_v48, %v4082_v34  ;;  %v4094_v48 = vld [vmem:[#allocation20 + $0x200] sm:$0xff] }
 0xa57   : > { %5546 = vmatpush1.bf16.msra.mxu0 %v5545_v49  ;;  %v4075_v49 = vld [vmem:[#allocation20 + $0x168] sm:$0xff] }
 0xa58   : > { %5548 = vmatprep.subr.bf16.mxu0 %v5547_v0  ;;  %v4077_v0 = vld [vmem:[#allocation20 + $0x178] sm:$0xff] }
 0xa59   : > { %v5583_v43 = vpack.c.bf16 %v4077_v0, %v4075_v49 }
 0xa5b   : > { %5550 = vmatpush1.bf16.msra.mxu0 %v5549_v24  ;;  %v4079_v24 = vld [vmem:[#allocation20 + $0x188] sm:$0xff] }
 0xa5c   : > { %5552 = vmatprep.subr.bf16.mxu0 %v5551_v62  ;;  %v4081_v62 = vld [vmem:[#allocation20 + $0x198] sm:$0xff] }
 0xa5d   : > { %v5587_v25 = vpack.c.bf16 %v4081_v62, %v4079_v24 }
 0xa5f   : > { %5554 = vmatpush1.bf16.msra.mxu0 %v5553_v7  ;;  %v4083_v7 = vld [vmem:[#allocation20 + $0x1a8] sm:$0xff] }
 0xa60   : > { %5556 = vmatprep.subr.bf16.mxu0 %v5555_v47  ;;  %v4085_v47 = vld [vmem:[#allocation20 + $0x1b8] sm:$0xff] }
 0xa61   : > { %v5591_v20 = vpack.c.bf16 %v4085_v47, %v4083_v7 }
 0xa63   : > { %5558 = vmatpush1.bf16.msra.mxu0 %v5557_v10  ;;  %v4087_v10 = vld [vmem:[#allocation20 + $0x1c8] sm:$0xff] }
 0xa64   : > { %5560 = vmatprep.subr.bf16.mxu0 %v5559_v54  ;;  %v4089_v54 = vld [vmem:[#allocation20 + $0x1d8] sm:$0xff] }
 0xa65   : > { %v5595_v57 = vpack.c.bf16 %v4089_v54, %v4087_v10  ;;  %v4099_v54 = vld [vmem:[#allocation20 + $0x228] sm:$0xff] }
 0xa67   : > { %5562 = vmatpush1.bf16.msra.mxu0 %v5561_v60  ;;  %v4091_v60 = vld [vmem:[#allocation20 + $0x1e8] sm:$0xff] }
 0xa68   : > { %5564 = vmatprep.subr.bf16.mxu0 %v5563_v12  ;;  %v4093_v12 = vld [vmem:[#allocation20 + $0x1f8] sm:$0xff] }
 0xa69   : > { %v5599_v13 = vpack.c.bf16 %v4093_v12, %v4091_v60 }
 0xa6b   : > { %5566 = vmatpush1.bf16.msra.mxu0 %v5565_v17  ;;  %v4097_v17 = vld [vmem:[#allocation20 + $0x218] sm:$0xff] }
 0xa6c   : > { %5568 = vmatprep.subr.bf16.mxu0 %v5567_v51  ;;  %v5601_v51 = vpack.c.bf16 %v4092_v16, %v4090_v56  ;;  %v5603_v46 = vpack.c.bf16 %v4097_v17, %v4095_v32  ;;  %v4100_v16 = vld [vmem:[#allocation20 + $0x230] sm:$0xff]  ;;  %v4103_v17 = vld [vmem:[#allocation20 + $0x248] sm:$0xff] }
 0xa6f   : > { %5570 = vmatpush1.bf16.msra.mxu0 %v5569_v22  ;;  %v3557_v22 = vrot.slane %v7517_v19, %v7099_v3 }
 0xa70   : > { %5572 = vmatprep.subr.bf16.mxu0 %v5571_v9 }
 0xa73   : > { %5574 = vmatpush1.bf16.msra.mxu0 %v5573_v15 }
 0xa74   : > { %5576 = vmatprep.subr.bf16.mxu0 %v5575_v4 }
 0xa77   : > { %5578 = vmatpush1.bf16.msra.mxu0 %v5577_v28 }
 0xa78   : > { %5580 = vmatprep.subr.bf16.mxu0 %v5579_v35 }
 0xa7b   : > { %5582 = vmatpush1.bf16.msra.mxu0 %v5581_v21 }
 0xa7c   : > { %5584 = vmatprep.subr.bf16.mxu0 %v5583_v43 }
 0xa7f   : > { %5586 = vmatpush1.bf16.msra.mxu0 %v5585_v40 }
 0xa80   : > { %5588 = vmatprep.subr.bf16.mxu0 %v5587_v25 }
 0xa83   : > { %5590 = vmatpush1.bf16.msra.mxu0 %v5589_v44 }
 0xa84   : > { %5592 = vmatprep.subr.bf16.mxu0 %v5591_v20 }
 0xa87   : > { %5594 = vmatpush1.bf16.msra.mxu0 %v5593_v52  ;;  %v4096_v52 = vld [vmem:[#allocation20 + $0x210] sm:$0xff] }
 0xa88   : > { %5596 = vmatprep.subr.bf16.mxu0 %v5595_v57  ;;  %v4101_v57 = vld [vmem:[#allocation20 + $0x238] sm:$0xff] }
 0xa89   : > { %v5607_v56 = vpack.c.bf16 %v4101_v57, %v4099_v54 }
 0xa8b   : > { %5598 = vmatpush1.bf16.msra.mxu0 %v5597_v5  ;;  %v5605_v5 = vpack.c.bf16 %v4096_v52, %v4094_v48  ;;  %v4123_v48 = vld [vmem:[#allocation20 + $0x2e8] sm:$0xff]  ;;  %v4125_v52 = vld [vmem:[#allocation20 + $0x2f8] sm:$0xff] }
 0xa8c   : > { %5600 = vmatprep.subr.bf16.mxu0 %v5599_v13  ;;  %v4098_v13 = vld [vmem:[#allocation20 + $0x220] sm:$0xff] }
 0xa8f   : > { %5602 = vmatpush1.bf16.msra.mxu0 %v5601_v51  ;;  %v4105_v51 = vld [vmem:[#allocation20 + $0x258] sm:$0xff] }
 0xa90   : > { %5604 = vmatprep.subr.bf16.mxu0 %v5603_v46 }
 0xae4   : > { %v3660_v9 = vpop.f32.mrb[6].mxu0  ;;  %v7528_v31 = vpop.f32.mrb[26].mxu1 }
 0xae5   : > { %v3661_v8 = vadd.f32 %v3660_v9, %v3557_v22  ;;  %v3662_v15 = vpop.f32.mrb[7].mxu0  ;;  %v3739_v26 = vpop.f32.mrb[27].mxu1 }
 0xae6   : > { %v3663_v27 = vadd.f32 %v3662_v15, %v3561_v1  ;;  %v7531_v4 = vadd.f32 %v3739_v26, %v7526_v18  ;;  %v5611_v15 = vpack.c.bf16 %v4105_v51, %v4103_v17  ;;  %v4102_v26 = vld [vmem:[#allocation20 + $0x240] sm:$0xff]  ;;  %v4131_v17 = vld [vmem:[#allocation20 + $0x328] sm:$0xff]  ;;  %v4133_v51 = vld [vmem:[#allocation20 + $0x338] sm:$0xff] }
 0xae7   : > { %v4876_v14 = vmul.f32 -1.702, %v3661_v8 }
 0xae8   : > { %v4877_v23 = vmul.f32 -1.702, %v3663_v27  ;;  %v4879_v28 = vmul.f32 -1.702, %v7531_v4  ;;  %v3666_v2 = vpop.f32.mrb[8].mxu0  ;;  %v7534_v33 = vpop.f32.mrb[28].mxu1 }
 0xae9   : > { %v3934_v35 = vmul.f32 1.442695, %v4876_v14  ;;  %v3667_v42 = vadd.f32 %v3666_v2, %v3557_v22  ;;  %v3668_v36 = vpop.f32.mrb[9].mxu0  ;;  %v7536_v38 = vpop.f32.mrb[29].mxu1 }
 0xaea   : > { %v3936_v21 = vmul.f32 1.442695, %v4877_v23  ;;  %v3940_v49 = vmul.f32 1.442695, %v4879_v28  ;;  %v3669_v0 = vadd.f32 %v3668_v36, %v3561_v1  ;;  %v5609_v1 = vpack.c.bf16 %v4100_v16, %v4098_v13  ;;  %v4109_v23 = vld [vmem:[#allocation20 + $0x278] sm:$0xff]  ;;  %v4108_v36 = vld [vmem:[#allocation20 + $0x270] sm:$0xff] }
 0xaeb   : > { %6035 = vpow2.f32 %v3934_v35  ;;  %v4884_v43 = vmul.f32 -1.702, %v3667_v42  ;;  %v4106_v35 = vld [vmem:[#allocation20 + $0x260] sm:$0xff]  ;;  %v7547_v54 = vadd.f32 %v7536_v38, %v7526_v18  ;;  %v7557_v18 = vrot.slane %v7517_v19, %v902_v30 }
 0xaec   : > { %v4885_v6 = vmul.f32 -1.702, %v3669_v0  ;;  %6037 = vpow2.f32 %v3936_v21  ;;  %v4111_v21 = vld [vmem:[#allocation20 + $0x288] sm:$0xff]  ;;  %v4126_v16 = vld [vmem:[#allocation20 + $0x300] sm:$0xff] }
 0xaed   : > { %v3950_v39 = vmul.f32 1.442695, %v4884_v43  ;;  %6039 = vpow2.f32 %v3940_v49  ;;  %v4113_v49 = vld [vmem:[#allocation20 + $0x298] sm:$0xff]  ;;  %v4110_v43 = vld [vmem:[#allocation20 + $0x280] sm:$0xff] }
 0xaee   : > { %v3952_v40 = vmul.f32 1.442695, %v4885_v6  ;;  %v4112_v6 = vld [vmem:[#allocation20 + $0x290] sm:$0xff] }
 0xaef   : > { %6041 = vpow2.f32 %v3950_v39  ;;  %v4117_v39 = vld [vmem:[#allocation20 + $0x2b8] sm:$0xff] }
 0xaf0   : > { %6043 = vpow2.f32 %v3952_v40  ;;  %v5621_v40 = vpack.c.bf16 %v4112_v6, %v4110_v43 }
 0xaf5   : > { %v6036_v24 = vpop.eup %6035 }
 0xaf6   : > { %v3966_v62 = vadd.f32 1.0, %v6036_v24  ;;  %v6038_v25 = vpop.eup %6037 }
 0xaf7   : > { %v6040_v37 = vpop.eup %6039  ;;  %v3967_v45 = vadd.f32 1.0, %v6038_v25  ;;  %v4116_v25 = vld [vmem:[#allocation20 + $0x2b0] sm:$0xff] }
 0xaf8   : > { %6045 = vrcp.f32 %v3966_v62  ;;  %v3969_v7 = vadd.f32 1.0, %v6040_v37  ;;  %v4114_v62 = vld [vmem:[#allocation20 + $0x2a0] sm:$0xff]  ;;  %v4119_v37 = vld [vmem:[#allocation20 + $0x2c8] sm:$0xff] }
 0xaf9   : > { %v6042_v44 = vpop.eup %6041  ;;  %6047 = vrcp.f32 %v3967_v45  ;;  %v4121_v45 = vld [vmem:[#allocation20 + $0x2d8] sm:$0xff] }
 0xafa   : > { %v3974_v47 = vadd.f32 1.0, %v6042_v44  ;;  %v6044_v20 = vpop.eup %6043  ;;  %6049 = vrcp.f32 %v3969_v7  ;;  %v3565_v44 = vrot.slane %v7517_v19, %v890_v41  ;;  %v5625_v7 = vpack.c.bf16 %v4116_v25, %v4114_v62  ;;  %v4122_v41 = vld [vmem:[#allocation20 + $0x2e0] sm:$0xff]  ;;  %v4141_v62 = vld [vmem:[#allocation20 + $0x378] sm:$0xff] }
 0xafb   : > { %v3975_v34 = vadd.f32 1.0, %v6044_v20  ;;  %v4118_v20 = vld [vmem:[#allocation20 + $0x2c0] sm:$0xff] }
 0xafc   : > { %6051 = vrcp.f32 %v3974_v47  ;;  %v5627_v47 = vpack.c.bf16 %v4121_v45, %v4119_v37  ;;  %v4138_v45 = vld [vmem:[#allocation20 + $0x360] sm:$0xff] }
 0xafd   : > { %6053 = vrcp.f32 %v3975_v34  ;;  %v4120_v34 = vld [vmem:[#allocation20 + $0x2d0] sm:$0xff] }
 0xafe   : > { %v5629_v57 = vpack.c.bf16 %v4120_v34, %v4118_v20 }
 0xb02   : > { %v6046_v10 = vpop.eup %6045 }
 0xb03   : > { %v6048_v58 = vpop.eup %6047  ;;  %v4014_v12 = vmul.f32 %v6046_v10, %v3661_v8  ;;  %v4107_v8 = vld [vmem:[#allocation20 + $0x268] sm:$0xff]  ;;  %v7543_v10 = vadd.f32 %v7528_v31, %v3565_v44  ;;  %v4887_v31 = vmul.f32 -1.702, %v7547_v54 }
 0xb04   : > { %v4015_v59 = vmul.f32 %v6048_v58, %v3663_v27  ;;  %v6050_v60 = vpop.eup %6049  ;;  %v4104_v27 = vld [vmem:[#allocation20 + $0x250] sm:$0xff]  ;;  %v5615_v2 = vpack.c.bf16 %v4109_v23, %v4107_v8  ;;  %v5631_v58 = vpack.c.bf16 %v4125_v52, %v4123_v48  ;;  %v4130_v8 = vld [vmem:[#allocation20 + $0x320] sm:$0xff] }
 0xb05   : > { %v4017_v14 = vmul.f32 %v6050_v60, %v7531_v4  ;;  %v5613_v28 = vpack.c.bf16 %v4104_v27, %v4102_v26  ;;  %v4115_v4 = vld [vmem:[#allocation20 + $0x2a8] sm:$0xff]  ;;  %v4129_v60 = vld [vmem:[#allocation20 + $0x318] sm:$0xff]  ;;  %v4132_v23 = vld [vmem:[#allocation20 + $0x330] sm:$0xff] }
 0xb06   : > { %v6052_v32 = vpop.eup %6051  ;;  %4350 = vmatprep.mubr.f32.mxu0 %v4015_v59  ;;  %v5623_v24 = vpack.c.bf16 %v4117_v39, %v4115_v4  ;;  %v4124_v59 = vld [vmem:[#allocation20 + $0x2f0] sm:$0xff]  ;;  %v5641_v43 = vpack.c.bf16 %v4132_v23, %v4130_v8  ;;  %v4134_v39 = vld [vmem:[#allocation20 + $0x340] sm:$0xff]  ;;  %v4155_v8 = vld [vmem:[#allocation20 + $0x3e8] sm:$0xff] }
 0xb07   : > { %v6054_v46 = vpop.eup %6053  ;;  %4351 = vmatmul.mubr.f32.vlgmr.msra.gmra.mrb[14].mxu0 %v4014_v12  ;;  %v4022_v9 = vmul.f32 %v6052_v32, %v3667_v42  ;;  %v5617_v42 = vpack.c.bf16 %v4108_v36, %v4106_v35  ;;  %v4878_v12 = vmul.f32 -1.702, %v7543_v10  ;;  %v5633_v13 = vpack.c.bf16 %v4124_v59, %v4122_v41  ;;  %v4128_v32 = vld [vmem:[#allocation20 + $0x310] sm:$0xff]  ;;  %v4142_v52 = vld [vmem:[#allocation20 + $0x380] sm:$0xff]  ;;  %v4147_v41 = vld [vmem:[#allocation20 + $0x3a8] sm:$0xff] }
 0xb08   : > { %v4023_v22 = vmul.f32 %v6054_v46, %v3669_v0  ;;  %5606 = vmatpush1.bf16.msra.mxu0 %v5605_v5  ;;  %v5619_v0 = vpack.c.bf16 %v4113_v49, %v4111_v21  ;;  %v4127_v5 = vld [vmem:[#allocation20 + $0x308] sm:$0xff]  ;;  %v5637_v27 = vpack.c.bf16 %v4128_v32, %v4126_v16  ;;  %v4149_v59 = vld [vmem:[#allocation20 + $0x3b8] sm:$0xff]  ;;  %v4148_v16 = vld [vmem:[#allocation20 + $0x3b0] sm:$0xff] }
 0xb09   : > { %5608 = vmatprep.subr.bf16.mxu0 %v5607_v56  ;;  %v7551_v56 = vadd.f32 %v7534_v33, %v3565_v44  ;;  %v5635_v38 = vpack.c.bf16 %v4129_v60, %v4127_v5  ;;  %v3938_v46 = vmul.f32 1.442695, %v4878_v12  ;;  %v4140_v44 = vld [vmem:[#allocation20 + $0x370] sm:$0xff]  ;;  %v4157_v23 = vld [vmem:[#allocation20 + $0x3f8] sm:$0xff] }
 0xb0a   : > { %4356 = vmatprep.mubr.f32.mxu0 %v4023_v22  ;;  %v5649_v20 = vpack.c.bf16 %v4140_v44, %v4138_v45 }
 0xb0b   : > { %4357 = vmatmul.mubr.f32.gmra.mrb[16].mxu0 %v4022_v9  ;;  %v4886_v22 = vmul.f32 -1.702, %v7551_v56  ;;  %v3956_v9 = vmul.f32 1.442695, %v4887_v31  ;;  %6055 = vpow2.f32 %v3938_v46 }
 0xb0c   : > { %5610 = vmatpush1.bf16.msra.mxu0 %v5609_v1  ;;  %4427 = vmatprep.mubr.f32.mxu0 %v4017_v14  ;;  %v5639_v14 = vpack.c.bf16 %v4133_v51, %v4131_v17  ;;  %v4151_v17 = vld [vmem:[#allocation20 + $0x3c8] sm:$0xff]  ;;  %v4153_v51 = vld [vmem:[#allocation20 + $0x3d8] sm:$0xff] }
 0xb0d   : > { %5612 = vmatprep.subr.bf16.mxu0 %v5611_v15  ;;  %v3954_v35 = vmul.f32 1.442695, %v4886_v22  ;;  %6057 = vpow2.f32 %v3956_v9 }
 0xb0f   : > { %6059 = vpow2.f32 %v3954_v35  ;;  %v4154_v35 = vld [vmem:[#allocation20 + $0x3e0] sm:$0xff] }
 0xb10   : > { %5614 = vmatpush1.bf16.msra.mxu0 %v5613_v28  ;;  %v4135_v28 = vld [vmem:[#allocation20 + $0x348] sm:$0xff] }
 0xb11   : > { %5616 = vmatprep.subr.bf16.mxu0 %v5615_v2  ;;  %v4137_v2 = vld [vmem:[#allocation20 + $0x358] sm:$0xff] }
 0xb12   : > { %v5643_v4 = vpack.c.bf16 %v4137_v2, %v4135_v28  ;;  %v5663_v2 = vpack.c.bf16 %v4157_v23, %v4155_v8  ;;  %v4178_v23 = vld [vmem:[#allocation20 + $0x4a0] sm:$0xff] }
 0xb14   : > { %5618 = vmatpush1.bf16.msra.mxu0 %v5617_v42 }
 0xb15   : > { %5620 = vmatprep.subr.bf16.mxu0 %v5619_v0  ;;  %v6056_v34 = vpop.eup %6055 }
 0xb16   : > { %v3968_v5 = vadd.f32 1.0, %v6056_v34  ;;  %v4164_v34 = vld [vmem:[#allocation20 + $0x430] sm:$0xff] }
 0xb18   : > { %5622 = vmatpush1.bf16.msra.mxu0 %v5621_v40  ;;  %v4136_v40 = vld [vmem:[#allocation20 + $0x350] sm:$0xff] }
 0xb19   : > { %5624 = vmatprep.subr.bf16.mxu0 %v5623_v24  ;;  %v4139_v24 = vld [vmem:[#allocation20 + $0x368] sm:$0xff]  ;;  %v5645_v25 = vpack.c.bf16 %v4136_v40, %v4134_v39  ;;  %v4158_v40 = vld [vmem:[#allocation20 + $0x400] sm:$0xff] }
 0xb1a   : > { %v5647_v37 = vpack.c.bf16 %v4141_v62, %v4139_v24  ;;  %v4160_v24 = vld [vmem:[#allocation20 + $0x410] sm:$0xff] }
 0xb1b   : > { %v5669_v44 = vpack.c.bf16 %v4160_v24, %v4158_v40  ;;  %v4184_v40 = vld [vmem:[#allocation20 + $0x4d0] sm:$0xff]  ;;  %v4187_v24 = vld [vmem:[#allocation20 + $0x4e8] sm:$0xff] }
 0xb1c   : > { %5626 = vmatpush1.bf16.msra.mxu0 %v5625_v7  ;;  %v4143_v7 = vld [vmem:[#allocation20 + $0x388] sm:$0xff] }
 0xb1d   : > { %5628 = vmatprep.subr.bf16.mxu0 %v5627_v47  ;;  %v4145_v47 = vld [vmem:[#allocation20 + $0x398] sm:$0xff] }
 0xb1e   : > { %v5651_v48 = vpack.c.bf16 %v4145_v47, %v4143_v7 }
 0xb20   : > { %5630 = vmatpush1.bf16.msra.mxu0 %v5629_v57  ;;  %v4144_v57 = vld [vmem:[#allocation20 + $0x390] sm:$0xff] }
 0xb21   : > { %5632 = vmatprep.subr.bf16.mxu0 %v5631_v58  ;;  %v6058_v58 = vpop.eup %6057  ;;  %v5653_v60 = vpack.c.bf16 %v4144_v57, %v4142_v52  ;;  %v4167_v57 = vld [vmem:[#allocation20 + $0x448] sm:$0xff] }
 0xb22   : > { %v6060_v12 = vpop.eup %6059  ;;  %v3977_v31 = vadd.f32 1.0, %v6058_v58  ;;  %v4169_v58 = vld [vmem:[#allocation20 + $0x458] sm:$0xff] }
 0xb23   : > { %v3976_v46 = vadd.f32 1.0, %v6060_v12  ;;  %v4166_v12 = vld [vmem:[#allocation20 + $0x440] sm:$0xff] }
 0xb24   : > { %v7560_v33 = vpop.f32.mrb[10].mxu0  ;;  %v7562_v1 = vpop.f32.mrb[30].mxu1  ;;  %5634 = vmatpush1.bf16.msra.mxu0 %v5633_v13  ;;  %v5655_v13 = vpack.c.bf16 %v4149_v59, %v4147_v41 }
 0xb25   : > { %v3816_v15 = vpop.f32.mrb[11].mxu0  ;;  %v7564_v26 = vpop.f32.mrb[31].mxu1  ;;  %5636 = vmatprep.subr.bf16.mxu0 %v5635_v38  ;;  %v4146_v38 = vld [vmem:[#allocation20 + $0x3a0] sm:$0xff] }
 0xb26   : > { %v7567_v30 = vadd.f32 %v3816_v15, %v7557_v18  ;;  %v5657_v22 = vpack.c.bf16 %v4148_v16, %v4146_v38  ;;  %v5659_v15 = vpack.c.bf16 %v4153_v51, %v4151_v17  ;;  %v4173_v38 = vld [vmem:[#allocation20 + $0x478] sm:$0xff]  ;;  %v4172_v17 = vld [vmem:[#allocation20 + $0x470] sm:$0xff]  ;;  %v4175_v51 = vld [vmem:[#allocation20 + $0x488] sm:$0xff] }
 0xb28   : > { %v4881_v36 = vmul.f32 -1.702, %v7567_v30  ;;  %v7570_v21 = vpop.f32.mrb[12].mxu0  ;;  %v7572_v49 = vpop.f32.mrb[32].mxu1  ;;  %5638 = vmatpush1.bf16.msra.mxu0 %v5637_v27  ;;  %v4150_v27 = vld [vmem:[#allocation20 + $0x3c0] sm:$0xff] }
 0xb29   : > { %v7574_v42 = vpop.f32.mrb[13].mxu0  ;;  %v7576_v0 = vpop.f32.mrb[33].mxu1  ;;  %5640 = vmatprep.subr.bf16.mxu0 %v5639_v14  ;;  %v4152_v14 = vld [vmem:[#allocation20 + $0x3d0] sm:$0xff] }
 0xb2a   : > { %v3944_v6 = vmul.f32 1.442695, %v4881_v36  ;;  %v5661_v28 = vpack.c.bf16 %v4152_v14, %v4150_v27  ;;  %v4156_v36 = vld [vmem:[#allocation20 + $0x3f0] sm:$0xff]  ;;  %v4179_v27 = vld [vmem:[#allocation20 + $0x4a8] sm:$0xff] }
 0xb2c   : > { %6061 = vpow2.f32 %v3944_v6  ;;  %5642 = vmatpush1.bf16.msra.mxu0 %v5641_v43  ;;  %v4159_v43 = vld [vmem:[#allocation20 + $0x408] sm:$0xff]  ;;  %v4161_v6 = vld [vmem:[#allocation20 + $0x418] sm:$0xff] }
 0xb2d   : > { %5644 = vmatprep.subr.bf16.mxu0 %v5643_v4  ;;  %6063 = vrcp.f32 %v3968_v5  ;;  %v5665_v4 = vpack.c.bf16 %v4156_v36, %v4154_v35  ;;  %v5667_v39 = vpack.c.bf16 %v4161_v6, %v4159_v43  ;;  %v4185_v35 = vld [vmem:[#allocation20 + $0x4d8] sm:$0xff]  ;;  %v3573_v36 = vrot.slane %v7517_v19, %v898_v29 }
 0xb2e   : > { %6065 = vrcp.f32 %v3977_v31  ;;  %v3584_v43 = vsub.s32 7, %v7093_v61 }
 0xb2f   : > { %6067 = vrcp.f32 %v3976_v46  ;;  %v4177_v46 = vld [vmem:[#allocation20 + $0x498] sm:$0xff] }
 0xb30   : > { %5646 = vmatpush1.bf16.msra.mxu0 %v5645_v25  ;;  %v4163_v25 = vld [vmem:[#allocation20 + $0x428] sm:$0xff] }
 0xb31   : > { %5648 = vmatprep.subr.bf16.mxu0 %v5647_v37  ;;  %v4165_v37 = vld [vmem:[#allocation20 + $0x438] sm:$0xff] }
 0xb32   : > { %v5671_v47 = vpack.c.bf16 %v4165_v37, %v4163_v25  ;;  %v7587_v25 = vadd.f32 %v7560_v33, %v3573_v36  ;;  %v7590_v37 = vrot.slane %v7517_v19, %v3584_v43  ;;  %v7598_v33 = vadd.f32 %v7570_v21, %v3573_v36  ;;  %v4206_v43 = vld [vmem:[#allocation20 + $0x580] sm:$0xff] }
 0xb34   : > { %5650 = vmatpush1.bf16.msra.mxu0 %v5649_v20  ;;  %v4162_v20 = vld [vmem:[#allocation20 + $0x420] sm:$0xff] }
 0xb35   : > { %5652 = vmatprep.subr.bf16.mxu0 %v5651_v48  ;;  %v5673_v59 = vpack.c.bf16 %v4164_v34, %v4162_v20  ;;  %v4191_v20 = vld [vmem:[#allocation20 + $0x508] sm:$0xff]  ;;  %v4193_v34 = vld [vmem:[#allocation20 + $0x518] sm:$0xff] }
 0xb36   : > { %v6062_v32 = vpop.eup %6061 }
 0xb37   : > { %v3971_v9 = vadd.f32 1.0, %v6062_v32  ;;  %v6064_v62 = vpop.eup %6063  ;;  %v4170_v32 = vld [vmem:[#allocation20 + $0x460] sm:$0xff] }
 0xb38   : > { %5654 = vmatpush1.bf16.msra.mxu0 %v5653_v60  ;;  %v6066_v45 = vpop.eup %6065  ;;  %v4016_v7 = vmul.f32 %v6064_v62, %v7543_v10  ;;  %v5675_v60 = vpack.c.bf16 %v4169_v58, %v4167_v57  ;;  %v4168_v10 = vld [vmem:[#allocation20 + $0x450] sm:$0xff]  ;;  %v4189_v62 = vld [vmem:[#allocation20 + $0x4f8] sm:$0xff]  ;;  %v5699_v57 = vpack.c.bf16 %v4193_v34, %v4191_v20  ;;  %v4190_v58 = vld [vmem:[#allocation20 + $0x500] sm:$0xff] }
 0xb39   : > { %5656 = vmatprep.subr.bf16.mxu0 %v5655_v13  ;;  %6069 = vrcp.f32 %v3971_v9  ;;  %v6068_v48 = vpop.eup %6067  ;;  %v4025_v52 = vmul.f32 %v6066_v45, %v7547_v54  ;;  %v4171_v13 = vld [vmem:[#allocation20 + $0x468] sm:$0xff]  ;;  %v5677_v54 = vpack.c.bf16 %v4168_v10, %v4166_v12  ;;  %v4174_v9 = vld [vmem:[#allocation20 + $0x480] sm:$0xff]  ;;  %v7594_v45 = vadd.f32 %v7574_v42, %v7557_v18  ;;  %v4212_v20 = vld [vmem:[#allocation20 + $0x5b0] sm:$0xff] }
 0xb3a   : > { %v4024_v5 = vmul.f32 %v6068_v48, %v7551_v56  ;;  %v5679_v16 = vpack.c.bf16 %v4173_v38, %v4171_v13  ;;  %v5681_v56 = vpack.c.bf16 %v4172_v17, %v4170_v32  ;;  %v4880_v48 = vmul.f32 -1.702, %v7587_v25  ;;  %v4194_v13 = vld [vmem:[#allocation20 + $0x520] sm:$0xff]  ;;  %v4196_v38 = vld [vmem:[#allocation20 + $0x530] sm:$0xff] }
 0xb3b   : > { %v4889_v18 = vmul.f32 -1.702, %v7594_v45  ;;  %v4888_v12 = vmul.f32 -1.702, %v7598_v33 }
 0xb3c   : > { %5658 = vmatpush1.bf16.msra.mxu0 %v5657_v22  ;;  %v5683_v22 = vpack.c.bf16 %v4177_v46, %v4175_v51  ;;  %v5705_v51 = vpack.c.bf16 %v4196_v38, %v4194_v13  ;;  %v4223_v13 = vld [vmem:[#allocation20 + $0x608] sm:$0xff]  ;;  %v4225_v38 = vld [vmem:[#allocation20 + $0x618] sm:$0xff] }
 0xb3d   : > { %5660 = vmatprep.subr.bf16.mxu0 %v5659_v15  ;;  %v4176_v15 = vld [vmem:[#allocation20 + $0x490] sm:$0xff]  ;;  %v3960_v10 = vmul.f32 1.442695, %v4889_v18  ;;  %v3958_v32 = vmul.f32 1.442695, %v4888_v12  ;;  %v4217_v18 = vld [vmem:[#allocation20 + $0x5d8] sm:$0xff] }
 0xb3e   : > { %v5685_v14 = vpack.c.bf16 %v4176_v15, %v4174_v9  ;;  %v4203_v9 = vld [vmem:[#allocation20 + $0x568] sm:$0xff]  ;;  %v4205_v15 = vld [vmem:[#allocation20 + $0x578] sm:$0xff] }
 0xb3f   : > { %v4221_v12 = vld [vmem:[#allocation20 + $0x5f8] sm:$0xff] }
 0xb40   : > { %5662 = vmatpush1.bf16.msra.mxu0 %v5661_v28  ;;  %v4180_v28 = vld [vmem:[#allocation20 + $0x4b0] sm:$0xff] }
 0xb41   : > { %5664 = vmatprep.subr.bf16.mxu0 %v5663_v2  ;;  %v4183_v2 = vld [vmem:[#allocation20 + $0x4c8] sm:$0xff]  ;;  %v5689_v6 = vpack.c.bf16 %v4180_v28, %v4178_v23  ;;  %v4209_v28 = vld [vmem:[#allocation20 + $0x598] sm:$0xff] }
 0xb42   : > { %v4207_v23 = vld [vmem:[#allocation20 + $0x588] sm:$0xff] }
 0xb43   : > { %v6070_v41 = vpop.eup %6069  ;;  %v5715_v36 = vpack.c.bf16 %v4209_v28, %v4207_v23  ;;  %v4231_v28 = vld [vmem:[#allocation20 + $0x648] sm:$0xff] }
 0xb44   : > { %5666 = vmatpush1.bf16.msra.mxu0 %v5665_v4  ;;  %v4019_v31 = vmul.f32 %v6070_v41, %v7567_v30  ;;  %v4181_v30 = vld [vmem:[#allocation20 + $0x4b8] sm:$0xff]  ;;  %v5691_v4 = vpack.c.bf16 %v4185_v35, %v4183_v2  ;;  %v4192_v41 = vld [vmem:[#allocation20 + $0x510] sm:$0xff] }
 0xb45   : > { %5668 = vmatprep.subr.bf16.mxu0 %v5667_v39  ;;  %v5687_v8 = vpack.c.bf16 %v4181_v30, %v4179_v27  ;;  %v4182_v39 = vld [vmem:[#allocation20 + $0x4c0] sm:$0xff]  ;;  %v5711_v30 = vpack.c.bf16 %v4205_v15, %v4203_v9 }
 0xb46   : > { %v5693_v29 = vpack.c.bf16 %v4184_v40, %v4182_v39  ;;  %v4211_v39 = vld [vmem:[#allocation20 + $0x5a8] sm:$0xff]  ;;  %v4213_v40 = vld [vmem:[#allocation20 + $0x5b8] sm:$0xff] }
 0xb47   : > { %4428 = vmatmul.mubr.f32.vlgmr.msra.gmra.mrb[14].mxu0 %v4016_v7  ;;  %v4186_v7 = vld [vmem:[#allocation20 + $0x4e0] sm:$0xff] }
 0xb48   : > { %4433 = vmatprep.mubr.f32.mxu0 %v4025_v52  ;;  %5670 = vmatpush1.bf16.msra.mxu0 %v5669_v44  ;;  %v5695_v44 = vpack.c.bf16 %v4189_v62, %v4187_v24  ;;  %v7602_v52 = vadd.f32 %v7564_v26, %v7590_v37 }
 0xb49   : > { %5672 = vmatprep.subr.bf16.mxu0 %v5671_v47  ;;  %v4188_v47 = vld [vmem:[#allocation20 + $0x4f0] sm:$0xff] }
 0xb4a   : > { %v5697_v42 = vpack.c.bf16 %v4188_v47, %v4186_v7  ;;  %v4883_v21 = vmul.f32 -1.702, %v7602_v52  ;;  %v5719_v7 = vpack.c.bf16 %v4213_v40, %v4211_v39  ;;  %v4210_v47 = vld [vmem:[#allocation20 + $0x5a0] sm:$0xff]  ;;  %v4235_v40 = vld [vmem:[#allocation20 + $0x668] sm:$0xff] }
 0xb4b   : > { %4434 = vmatmul.mubr.f32.gmra.mrb[16].mxu0 %v4024_v5  ;;  %v4197_v5 = vld [vmem:[#allocation20 + $0x538] sm:$0xff] }
 0xb4c   : > { %5674 = vmatpush1.bf16.msra.mxu0 %v5673_v59  ;;  %4504 = vmatprep.mubr.f32.mxu0 %v4019_v31  ;;  %v4195_v59 = vld [vmem:[#allocation20 + $0x528] sm:$0xff]  ;;  %v5701_v31 = vpack.c.bf16 %v4192_v41, %v4190_v58  ;;  %v3948_v17 = vmul.f32 1.442695, %v4883_v21 }
 0xb4d   : > { %5676 = vmatprep.subr.bf16.mxu0 %v5675_v60  ;;  %v3942_v60 = vmul.f32 1.442695, %v4880_v48  ;;  %v5703_v26 = vpack.c.bf16 %v4197_v5, %v4195_v59  ;;  %v4215_v48 = vld [vmem:[#allocation20 + $0x5c8] sm:$0xff]  ;;  %v4214_v59 = vld [vmem:[#allocation20 + $0x5c0] sm:$0xff]  ;;  %v4216_v5 = vld [vmem:[#allocation20 + $0x5d0] sm:$0xff] }
 0xb4e   : > { %v5723_v41 = vpack.c.bf16 %v4217_v18, %v4215_v48  ;;  %v5725_v21 = vpack.c.bf16 %v4216_v5, %v4214_v59  ;;  %v4240_v48 = vld [vmem:[#allocation20 + $0x690] sm:$0xff]  ;;  %v4243_v18 = vld [vmem:[#allocation20 + $0x6a8] sm:$0xff] }
 0xb4f   : > { %6071 = vpow2.f32 %v3942_v60  ;;  %v4219_v60 = vld [vmem:[#allocation20 + $0x5e8] sm:$0xff]  ;;  %v4244_v59 = vld [vmem:[#allocation20 + $0x6b0] sm:$0xff] }
 0xb50   : > { %5678 = vmatpush1.bf16.msra.mxu0 %v5677_v54  ;;  %v4199_v54 = vld [vmem:[#allocation20 + $0x548] sm:$0xff]  ;;  %6073 = vpow2.f32 %v3960_v10  ;;  %v5727_v10 = vpack.c.bf16 %v4221_v12, %v4219_v60  ;;  %v4249_v60 = vld [vmem:[#allocation20 + $0x6d8] sm:$0xff] }
 0xb51   : > { %5680 = vmatprep.subr.bf16.mxu0 %v5679_v16  ;;  %v4201_v16 = vld [vmem:[#allocation20 + $0x558] sm:$0xff]  ;;  %6075 = vpow2.f32 %v3958_v32  ;;  %v4222_v32 = vld [vmem:[#allocation20 + $0x600] sm:$0xff]  ;;  %v4247_v5 = vld [vmem:[#allocation20 + $0x6c8] sm:$0xff] }
 0xb52   : > { %v5707_v46 = vpack.c.bf16 %v4201_v16, %v4199_v54  ;;  %6077 = vpow2.f32 %v3948_v17  ;;  %v5731_v16 = vpack.c.bf16 %v4225_v38, %v4223_v13  ;;  %v4224_v17 = vld [vmem:[#allocation20 + $0x610] sm:$0xff]  ;;  %v4251_v13 = vld [vmem:[#allocation20 + $0x6e8] sm:$0xff]  ;;  %v4253_v38 = vld [vmem:[#allocation20 + $0x6f8] sm:$0xff] }
 0xb53   : > { %v5733_v9 = vpack.c.bf16 %v4224_v17, %v4222_v32  ;;  %v5759_v32 = vpack.c.bf16 %v4253_v38, %v4251_v13  ;;  %v4252_v17 = vld [vmem:[#allocation20 + $0x6f0] sm:$0xff] }
 0xb54   : > { %5682 = vmatpush1.bf16.msra.mxu0 %v5681_v56  ;;  %v4198_v56 = vld [vmem:[#allocation20 + $0x540] sm:$0xff] }
 0xb55   : > { %5684 = vmatprep.subr.bf16.mxu0 %v5683_v22  ;;  %v4200_v22 = vld [vmem:[#allocation20 + $0x550] sm:$0xff] }
 0xb56   : > { %v5709_v27 = vpack.c.bf16 %v4200_v22, %v4198_v56  ;;  %v4229_v56 = vld [vmem:[#allocation20 + $0x638] sm:$0xff] }
 0xb58   : > { %5686 = vmatpush1.bf16.msra.mxu0 %v5685_v14  ;;  %v4202_v14 = vld [vmem:[#allocation20 + $0x560] sm:$0xff] }
 0xb59   : > { %5688 = vmatprep.subr.bf16.mxu0 %v5687_v8  ;;  %v4204_v8 = vld [vmem:[#allocation20 + $0x570] sm:$0xff]  ;;  %v6072_v35 = vpop.eup %6071 }
 0xb5a   : > { %v5713_v2 = vpack.c.bf16 %v4204_v8, %v4202_v14  ;;  %v3970_v24 = vadd.f32 1.0, %v6072_v35  ;;  %v4228_v14 = vld [vmem:[#allocation20 + $0x630] sm:$0xff] }
 0xb5c   : > { %5690 = vmatpush1.bf16.msra.mxu0 %v5689_v6  ;;  %v4208_v6 = vld [vmem:[#allocation20 + $0x590] sm:$0xff]  ;;  %6079 = vrcp.f32 %v3970_v24  ;;  %v4237_v24 = vld [vmem:[#allocation20 + $0x678] sm:$0xff] }
 0xb5d   : > { %5692 = vmatprep.subr.bf16.mxu0 %v5691_v4  ;;  %v6074_v4 = vpop.eup %6073  ;;  %v5717_v62 = vpack.c.bf16 %v4208_v6, %v4206_v43 }
 0xb60   : > { %5694 = vmatpush1.bf16.msra.mxu0 %v5693_v29  ;;  %v6076_v29 = vpop.eup %6075 }
 0xb61   : > { %5696 = vmatprep.subr.bf16.mxu0 %v5695_v44  ;;  %v3979_v44 = vadd.f32 1.0, %v6074_v4  ;;  %v6078_v34 = vpop.eup %6077  ;;  %v4230_v4 = vld [vmem:[#allocation20 + $0x640] sm:$0xff] }
 0xb62   : > { %v3973_v58 = vadd.f32 1.0, %v6078_v34  ;;  %v4238_v34 = vld [vmem:[#allocation20 + $0x680] sm:$0xff] }
 0xb63   : > { %6081 = vrcp.f32 %v3979_v44  ;;  %v4236_v44 = vld [vmem:[#allocation20 + $0x670] sm:$0xff] }
 0xb64   : > { %5698 = vmatpush1.bf16.msra.mxu0 %v5697_v42  ;;  %v3978_v42 = vadd.f32 1.0, %v6076_v29  ;;  %v4234_v29 = vld [vmem:[#allocation20 + $0x660] sm:$0xff] }
 0xb65   : > { %5700 = vmatprep.subr.bf16.mxu0 %v5699_v57  ;;  %v5721_v57 = vpack.c.bf16 %v4212_v20, %v4210_v47  ;;  %v4241_v47 = vld [vmem:[#allocation20 + $0x698] sm:$0xff] }
 0xb66   : > { %6083 = vrcp.f32 %v3978_v42  ;;  %v3580_v42 = vsub.s32 6, %v7093_v61 }
 0xb67   : > { %6085 = vrcp.f32 %v3973_v58 }
 0xb68   : > { %5702 = vmatpush1.bf16.msra.mxu0 %v5701_v31  ;;  %v4218_v31 = vld [vmem:[#allocation20 + $0x5e0] sm:$0xff]  ;;  %v3581_v12 = vrot.slane %v7517_v19, %v3580_v42 }
 0xb69   : > { %5704 = vmatprep.subr.bf16.mxu0 %v5703_v26  ;;  %v4220_v26 = vld [vmem:[#allocation20 + $0x5f0] sm:$0xff]  ;;  %v4250_v19 = vld [vmem:[#allocation20 + $0x6e0] sm:$0xff] }
 0xb6a   : > { %v5729_v54 = vpack.c.bf16 %v4220_v26, %v4218_v31  ;;  %v4246_v31 = vld [vmem:[#allocation20 + $0x6c0] sm:$0xff]  ;;  %v4248_v26 = vld [vmem:[#allocation20 + $0x6d0] sm:$0xff]  ;;  %v7614_v61 = vadd.f32 %v7562_v1, %v3581_v12 }
 0xb6c   : > { %5706 = vmatpush1.bf16.msra.mxu0 %v5705_v51  ;;  %v6080_v51 = vpop.eup %6079 }
 0xb6d   : > { %5708 = vmatprep.subr.bf16.mxu0 %v5707_v46  ;;  %v4227_v46 = vld [vmem:[#allocation20 + $0x628] sm:$0xff]  ;;  %v6082_v22 = vpop.eup %6081  ;;  %v4018_v15 = vmul.f32 %v6080_v51, %v7587_v25  ;;  %v4232_v25 = vld [vmem:[#allocation20 + $0x650] sm:$0xff] }
 0xb6e   : > { %v4027_v23 = vmul.f32 %v6082_v22, %v7594_v45  ;;  %v5741_v45 = vpack.c.bf16 %v4232_v25, %v4230_v4  ;;  %v4255_v51 = vld [vmem:[#allocation20 + $0x708] sm:$0xff]  ;;  %v7622_v22 = vadd.f32 %v7572_v49, %v3581_v12  ;;  %v4258_v49 = vld [vmem:[#allocation20 + $0x720] sm:$0xff] }
 0xb70   : > { %5710 = vmatpush1.bf16.msra.mxu0 %v5709_v27  ;;  %v5735_v27 = vpack.c.bf16 %v4229_v56, %v4227_v46  ;;  %v6084_v8 = vpop.eup %6083  ;;  %v4257_v46 = vld [vmem:[#allocation20 + $0x718] sm:$0xff]  ;;  %v4882_v56 = vmul.f32 -1.702, %v7614_v61 }
 0xb71   : > { %5712 = vmatprep.subr.bf16.mxu0 %v5711_v30  ;;  %v4226_v30 = vld [vmem:[#allocation20 + $0x620] sm:$0xff]  ;;  %v6086_v35 = vpop.eup %6085  ;;  %v4026_v43 = vmul.f32 %v6084_v8, %v7598_v33  ;;  %v5745_v33 = vpack.c.bf16 %v4236_v44, %v4234_v29  ;;  %v4890_v8 = vmul.f32 -1.702, %v7622_v22 }
 0xb72   : > { %v4021_v39 = vmul.f32 %v6086_v35, %v7602_v52  ;;  %v4245_v52 = vld [vmem:[#allocation20 + $0x6b8] sm:$0xff]  ;;  %v4260_v35 = vld [vmem:[#allocation20 + $0x730] sm:$0xff]  ;;  %v4266_v44 = vld [vmem:[#allocation20 + $0x760] sm:$0xff] }
 0xb73   : > { %v5751_v58 = vpack.c.bf16 %v4245_v52, %v4243_v18  ;;  %v5769_v4 = vpack.c.bf16 %v4260_v35, %v4258_v49  ;;  %v4270_v18 = vld [vmem:[#allocation20 + $0x780] sm:$0xff]  ;;  %v4272_v52 = vld [vmem:[#allocation20 + $0x790] sm:$0xff] }
 0xb74   : > { %5714 = vmatpush1.bf16.msra.mxu0 %v5713_v2  ;;  %v4233_v2 = vld [vmem:[#allocation20 + $0x658] sm:$0xff] }
 0xb75   : > { %5716 = vmatprep.subr.bf16.mxu0 %v5715_v36  ;;  %v5737_v36 = vpack.c.bf16 %v4228_v14, %v4226_v30  ;;  %v5739_v6 = vpack.c.bf16 %v4233_v2, %v4231_v28  ;;  %v4261_v30 = vld [vmem:[#allocation20 + $0x738] sm:$0xff]  ;;  %v3946_v14 = vmul.f32 1.442695, %v4882_v56 }
 0xb77   : > { %6087 = vpow2.f32 %v3946_v14 }
 0xb78   : > { %5718 = vmatpush1.bf16.msra.mxu0 %v5717_v62  ;;  %v5743_v62 = vpack.c.bf16 %v4237_v24, %v4235_v40  ;;  %v4264_v40 = vld [vmem:[#allocation20 + $0x750] sm:$0xff]  ;;  %v4267_v24 = vld [vmem:[#allocation20 + $0x768] sm:$0xff] }
 0xb79   : > { %5720 = vmatprep.subr.bf16.mxu0 %v5719_v7  ;;  %v4239_v7 = vld [vmem:[#allocation20 + $0x688] sm:$0xff] }
 0xb7a   : > { %v5747_v20 = vpack.c.bf16 %v4241_v47, %v4239_v7  ;;  %v4268_v7 = vld [vmem:[#allocation20 + $0x770] sm:$0xff]  ;;  %v4271_v47 = vld [vmem:[#allocation20 + $0x788] sm:$0xff] }
 0xb7c   : > { %5722 = vmatpush1.bf16.msra.mxu0 %v5721_v57  ;;  %v5749_v57 = vpack.c.bf16 %v4240_v48, %v4238_v34 }
 0xb7d   : > { %5724 = vmatprep.subr.bf16.mxu0 %v5723_v41  ;;  %v4242_v41 = vld [vmem:[#allocation20 + $0x6a0] sm:$0xff] }
 0xb80   : > { %5726 = vmatpush1.bf16.msra.mxu0 %v5725_v21  ;;  %v5753_v21 = vpack.c.bf16 %v4244_v59, %v4242_v41  ;;  %v5781_v59 = vpack.c.bf16 %v4272_v52, %v4270_v18 }
 0xb81   : > { %5728 = vmatprep.subr.bf16.mxu0 %v5727_v10  ;;  %v5755_v10 = vpack.c.bf16 %v4249_v60, %v4247_v5  ;;  %v6088_v34 = vpop.eup %6087 }
 0xb82   : > { %v3972_v41 = vadd.f32 1.0, %v6088_v34 }
 0xb84   : > { %5730 = vmatpush1.bf16.msra.mxu0 %v5729_v54  ;;  %v7618_v54 = vadd.f32 %v7576_v0, %v7590_v37  ;;  %v5763_v0 = vpack.c.bf16 %v4257_v46, %v4255_v51  ;;  %v4254_v37 = vld [vmem:[#allocation20 + $0x700] sm:$0xff]  ;;  %v4285_v51 = vld [vmem:[#allocation20 + $0x7f8] sm:$0xff] }
 0xb85   : > { %5732 = vmatprep.subr.bf16.mxu0 %v5731_v16  ;;  %v5757_v16 = vpack.c.bf16 %v4248_v26, %v4246_v31  ;;  %v4279_v31 = vld [vmem:[#allocation20 + $0x7c8] sm:$0xff]  ;;  %v4281_v26 = vld [vmem:[#allocation20 + $0x7d8] sm:$0xff] }
 0xb86   : > { %v4891_v1 = vmul.f32 -1.702, %v7618_v54 }
 0xb87   : > { %4505 = vmatmul.mubr.f32.vlgmr.msra.gmra.mrb[14].mxu0 %v4018_v15  ;;  %v4256_v15 = vld [vmem:[#allocation20 + $0x710] sm:$0xff] }
 0xb88   : > { %4510 = vmatprep.mubr.f32.mxu0 %v4027_v23  ;;  %5734 = vmatpush1.bf16.msra.mxu0 %v5733_v9  ;;  %v5761_v9 = vpack.c.bf16 %v4252_v17, %v4250_v19  ;;  %v3964_v23 = vmul.f32 1.442695, %v4891_v1  ;;  %v5765_v28 = vpack.c.bf16 %v4256_v15, %v4254_v37  ;;  %v4280_v19 = vld [vmem:[#allocation20 + $0x7d0] sm:$0xff]  ;;  %v4283_v17 = vld [vmem:[#allocation20 + $0x7e8] sm:$0xff]  ;;  %v4282_v1 = vld [vmem:[#allocation20 + $0x7e0] sm:$0xff] }
 0xb89   : > { %5736 = vmatprep.subr.bf16.mxu0 %v5735_v27  ;;  %v4259_v27 = vld [vmem:[#allocation20 + $0x728] sm:$0xff]  ;;  %v5791_v56 = vpack.c.bf16 %v4285_v51, %v4283_v17 }
 0xb8a   : > { %v5767_v2 = vpack.c.bf16 %v4261_v30, %v4259_v27  ;;  %6089 = vpow2.f32 %v3964_v23  ;;  %v3280_v23 = vld [vmem:[#allocation22] sm:$0x3] }
 0xb8b   : > { %4511 = vmatmul.mubr.f32.gmra.mrb[16].mxu0 %v4026_v43  ;;  %v4265_v43 = vld [vmem:[#allocation20 + $0x758] sm:$0xff] }
 0xb8c   : > { %5738 = vmatpush1.bf16.msra.mxu0 %v5737_v36  ;;  %4581 = vmatprep.mubr.f32.mxu0 %v4021_v39  ;;  %v4263_v36 = vld [vmem:[#allocation20 + $0x748] sm:$0xff]  ;;  %v4262_v39 = vld [vmem:[#allocation20 + $0x740] sm:$0xff] }
 0xb8d   : > { %5740 = vmatprep.subr.bf16.mxu0 %v5739_v6  ;;  %v3962_v6 = vmul.f32 1.442695, %v4890_v8  ;;  %v5771_v25 = vpack.c.bf16 %v4265_v43, %v4263_v36 }
 0xb8f   : > { %6091 = vpow2.f32 %v3962_v6 }
 0xb90   : > { %5742 = vmatpush1.bf16.msra.mxu0 %v5741_v45  ;;  %v4269_v45 = vld [vmem:[#allocation20 + $0x778] sm:$0xff]  ;;  %6093 = vrcp.f32 %v3972_v41 }
 0xb91   : > { %5744 = vmatprep.subr.bf16.mxu0 %v5743_v62  ;;  %v5773_v62 = vpack.c.bf16 %v4264_v40, %v4262_v39  ;;  %v5775_v29 = vpack.c.bf16 %v4269_v45, %v4267_v24 }
 0xb94   : > { %5746 = vmatpush1.bf16.msra.mxu0 %v5745_v33  ;;  %v4273_v33 = vld [vmem:[#allocation20 + $0x798] sm:$0xff]  ;;  %v6090_v42 = vpop.eup %6089 }
 0xb95   : > { %5748 = vmatprep.subr.bf16.mxu0 %v5747_v20  ;;  %v5777_v20 = vpack.c.bf16 %v4268_v7, %v4266_v44  ;;  %v5779_v48 = vpack.c.bf16 %v4273_v33, %v4271_v47  ;;  %v3981_v60 = vadd.f32 1.0, %v6090_v42 }
 0xb97   : > { %6095 = vrcp.f32 %v3981_v60 }
 0xb98   : > { %5750 = vmatpush1.bf16.msra.mxu0 %v5749_v57  ;;  %v4275_v57 = vld [vmem:[#allocation20 + $0x7a8] sm:$0xff] }
 0xb99   : > { %5752 = vmatprep.subr.bf16.mxu0 %v5751_v58  ;;  %v4277_v58 = vld [vmem:[#allocation20 + $0x7b8] sm:$0xff]  ;;  %v6092_v5 = vpop.eup %6091 }
 0xb9a   : > { %v5783_v12 = vpack.c.bf16 %v4277_v58, %v4275_v57  ;;  %v3980_v13 = vadd.f32 1.0, %v6092_v5  ;;  %v6094_v37 = vpop.eup %6093 }
 0xb9b   : > { %v4020_v27 = vmul.f32 %v6094_v37, %v7614_v61 }
 0xb9c   : > { %5754 = vmatpush1.bf16.msra.mxu0 %v5753_v21  ;;  %v4274_v21 = vld [vmem:[#allocation20 + $0x7a0] sm:$0xff]  ;;  %6097 = vrcp.f32 %v3980_v13 }
 0xb9d   : > { %5756 = vmatprep.subr.bf16.mxu0 %v5755_v10  ;;  %v4276_v10 = vld [vmem:[#allocation20 + $0x7b0] sm:$0xff] }
 0xb9e   : > { %v5785_v38 = vpack.c.bf16 %v4276_v10, %v4274_v21 }
 0xba0   : > { %5758 = vmatpush1.bf16.msra.mxu0 %v5757_v16  ;;  %v5787_v16 = vpack.c.bf16 %v4281_v26, %v4279_v31 }
 0xba1   : > { %5760 = vmatprep.subr.bf16.mxu0 %v5759_v32  ;;  %v4278_v32 = vld [vmem:[#allocation20 + $0x7c0] sm:$0xff]  ;;  %v6096_v15 = vpop.eup %6095 }
 0xba2   : > { %v5789_v46 = vpack.c.bf16 %v4280_v19, %v4278_v32  ;;  %v4029_v14 = vmul.f32 %v6096_v15, %v7618_v54 }
 0xba4   : > { %5762 = vmatpush1.bf16.msra.mxu0 %v5761_v9  ;;  %v4284_v9 = vld [vmem:[#allocation20 + $0x7f0] sm:$0xff] }
 0xba5   : > { %5764 = vmatprep.subr.bf16.mxu0 %v5763_v0  ;;  %v5793_v0 = vpack.c.bf16 %v4284_v9, %v4282_v1 }
 0xba6   : > { %v6098_v30 = vpop.eup %6097 }
 0xba7   : > { %v4028_v8 = vmul.f32 %v6098_v30, %v7622_v22 }
 0xba8   : > { %5766 = vmatpush1.bf16.msra.mxu0 %v5765_v28  ;;  %v3285_v28 = vrot.slane %v3280_v23, %v7099_v3 }
 0xba9   : > { %5768 = vmatprep.subr.bf16.mxu0 %v5767_v2  ;;  %v3289_v2 = vrot.slane %v3280_v23, %v7096_v63 }
 0xbaa   : > { %v3292_v49 = vadd.f32 %v3285_v28, %v7456_v50  ;;  %v3294_v22 = vadd.f32 %v3285_v28, %v7464_v11 }
 0xbab   : > { %v3293_v36 = vadd.f32 %v3289_v2, %v7459_v53  ;;  %v3295_v3 = vadd.f32 %v3289_v2, %v7467_v55 }
 0xbac   : > { %5770 = vmatpush1.bf16.msra.mxu0 %v5769_v4 }
 0xbad   : > { %5772 = vmatprep.subr.bf16.mxu0 %v5771_v25 }
 0xbb0   : > { %5774 = vmatpush1.bf16.msra.mxu0 %v5773_v62 }
 0xbb1   : > { %5776 = vmatprep.subr.bf16.mxu0 %v5775_v29 }
 0xbb4   : > { %5778 = vmatpush1.bf16.msra.mxu0 %v5777_v20 }
 0xbb5   : > { %5780 = vmatprep.subr.bf16.mxu0 %v5779_v48 }
 0xbb8   : > { %5782 = vmatpush1.bf16.msra.mxu0 %v5781_v59 }
 0xbb9   : > { %5784 = vmatprep.subr.bf16.mxu0 %v5783_v12 }
 0xbbc   : > { %5786 = vmatpush1.bf16.msra.mxu0 %v5785_v38 }
 0xbbd   : > { %5788 = vmatprep.subr.bf16.mxu0 %v5787_v16 }
 0xbc0   : > { %5790 = vmatpush1.bf16.msra.mxu0 %v5789_v46 }
 0xbc1   : > { %5792 = vmatprep.subr.bf16.mxu0 %v5791_v56 }
 0xbc4   : > { %5794 = vmatpush1.bf16.msra.mxu0 %v5793_v0 }
 0xbc7   : > { %4582 = vmatmul.mubr.f32.vlgmr.msra.gmra.mrb[14].mxu0 %v4020_v27 }
 0xbc8   : > { %4587 = vmatprep.mubr.f32.mxu0 %v4029_v14 }
 0xbcb   : > { %4588 = vmatmul.mubr.f32.gmra.mrb[16].mxu0 %v4028_v8 }
 0xc9a   : > { %v4583_v35 = vpop.f32.mrb[14].mxu0 }
 0xc9b   : > { %v4594_v61 = vadd.f32 %v4583_v35, %v3292_v49  ;;  %v4585_v54 = vpop.f32.mrb[15].mxu0 }
 0xc9c   : > { %v4595_v43 = vadd.f32 %v4585_v54, %v3293_v36 }
 0xc9d   : > { %4598 = vst [vmem:[%s616_s17] sm:$0xff] %v4594_v61 }
 0xc9e   : > { %4599 = vst [vmem:[%s616_s17 + $0x8] sm:$0xff] %v4595_v43  ;;  %v4589_v63 = vpop.f32.mrb[16].mxu0 }
 0xc9f   : > { %v4596_v50 = vadd.f32 %v4589_v63, %v3294_v22  ;;  %v4591_v53 = vpop.f32.mrb[17].mxu0 }
 0xca0   : > { %v4597_v6 = vadd.f32 %v4591_v53, %v3295_v3 }
 0xca1   : > { %4600 = vst [vmem:[%s616_s17 + $0x10] sm:$0xff] %v4596_v50 }
 0xca2   : > { %4601 = vst [vmem:[%s616_s17 + $0x18] sm:$0xff] %v4597_v6 }
 0xca3   : > { %6482 = shalt.err (!%p6479_p11)
}
 0xca4   : > { %s6483_s13 = scalar_lea.hbm %s7643_s23, 512  ;;  %s6487_s19 = scalar_lea.hbm %s7756_s29, 1024 }
 0xca5   : > { %p6484_p6 = scmp.ne.s32.totalorder %s7643_s23, %s6483_s13  ;;  %p6488_p7 = scmp.lt.u32.totalorder %s7643_s23, %s7756_s29 }
 0xca6   : > { %p6489_p4 = scmp.lt.u32.totalorder %s6487_s19, %s6483_s13  ;;  %p6491_p3 = scmp.lt.u32.totalorder %s6483_s13, %s7643_s23 }
 0xca7   : > { %p6485_p12 = pnand %p6484_p6, %p7757_p8 }
 0xca8   : > { %p6490_p1 = por %p6489_p4, %p6488_p7 }
 0xca9   : > { %p6486_p5 = pneg %p6485_p12 }
 0xcaa   : > { %p6492_p13 = por %p6491_p3, %p6490_p1 }
 0xcac   : > { %p6493_p0 = pnand %p6492_p13, %p6486_p5 }
 0xcae   : > { %6496 = shalt.err (!%p6493_p0)
}
 0xcaf   : > { %s6584_s25 = smov 256   ;;  %s6585_s21 = smov 16  }
 0xcb0   : > { %5857 = dma.vmem_to_hbm [thread:$0]  (%p7757_p8), %s7637_s15, 512, %s7643_s23, %s4603_s24, %s6584_s25, %s6584_s25, %s6585_s21  }
 0xcb1 PF: > { %s7758_s2 = sld [smem:[#allocation32_spill]]  ;;  %p7759_p2 = scmp.ne.s32.totalorder %s7736_s0, 0 }
 0xcb2   : > { %p7760_p9 = scmp.ge.s32.totalorder %s6559_s28, 2 }
 0xcb4   : > { %p5901_p10 = pnand %p7760_p9, %p7759_p2 }
 0xcb7   : > { %s4631_s17 = sand.u32 1, %s7758_s2  }
 0xcb8   : > { %s4632_s13 = scalar_lea.sflag [#allocation4], %s4631_s17 }
 0xcb9   : > { %6542 = dma.done.wait (!%p5901_p10), %s4632_s13, 512  }
 0xcba   : > { %6544 = vsyncadd (!%p5901_p10), %s4632_s13, 4294966784  ;;  %p32_p11 = scmp.ge.s32.totalorder %s6939_s18, 4   ;;  %s7761_s25 = smov %s6551_s26 }
 0xcbb   : > { %s7762_s26 = smov %s6555_s27  ;;  %s7763_s27 = smov %s6950_s22 }
 0xcbc   : > { %s7764_s28 = smov %s6939_s18  ;;  %34 = sbr.rel (!%p32_p11) target bundleno = 17 (0x11), region = 165 }
 0xcc3   :  { %4637 = vsyncpa [#allocation3], 1 }
 0xcc4   :  { %4639 = vsyncpa [#allocation3 + $0x1], 1 }
 0xcc5   :  { %4640 = vsyncpa [#allocation6], 1 }
 0xcc6   :  { %4641 = vsyncpa [#allocation9], 1 }
 0xcc7   :  { %4642 = vsyncpa [#allocation12], 1 }
 0xcc8   :  { %4643 = vsyncpa [#allocation15], 1 }
 0xcc9   :  { %4644 = vsyncpa [#allocation18], 1 }
 0xcca   :  { %4645 = vsyncpa [#allocation21], 1 }
 0xccb   :  { %4646 = vsyncpa [#allocation4], 1 }
 0xccc   :  { %4648 = vsyncpa [#allocation4 + $0x1], 1 }

// kernel: tpu_custom_call.1
= control target key start
LH: loop header
LB: loop body
LE: loop exit
PB: predicated region body
PF: predicated region fallthrough
CT: control target
= control target key end

     0   :  { %s7687_s0 = inlined_call_operand.hbm [shape: f32[2,16,256], index: 0, kind: input, shape index: {}]   ;;  %s7688_s1 = inlined_call_operand.hbm [shape: f32[1,256], index: 1, kind: input, shape index: {}]   ;;  %s7689_s2 = inlined_call_operand.hbm [shape: f32[1,256], index: 2, kind: input, shape index: {}]   ;;  %s7690_s3 = inlined_call_operand.hbm [shape: f32[256,768], index: 3, kind: input, shape index: {}]   ;;  %s7691_s4 = inlined_call_operand.hbm [shape: f32[1,768], index: 4, kind: input, shape index: {}]   ;;  %s7692_s5 = inlined_call_operand.hbm [shape: f32[256,256], index: 5, kind: input, shape index: {}]   ;;  %s7693_s6 = inlined_call_operand.hbm [shape: f32[1,256], index: 6, kind: input, shape index: {}]   ;;  %s7694_s7 = inlined_call_operand.hbm [shape: f32[1,256], index: 7, kind: input, shape index: {}]   ;;  %s7695_s8 = inlined_call_operand.hbm [shape: f32[1,256], index: 8, kind: input, shape index: {}]   ;;  %s7696_s9 = inlined_call_operand.hbm [shape: f32[256,1024], index: 9, kind: input, shape index: {}]   ;;  %s7697_s10 = inlined_call_operand.hbm [shape: f32[1,1024], index: 10, kind: input, shape index: {}]   ;;  %s7698_s11 = inlined_call_operand.hbm [shape: f32[1024,256], index: 11, kind: input, shape index: {}]   ;;  %s7699_s12 = inlined_call_operand.hbm [shape: f32[1,256], index: 12, kind: input, shape index: {}]   ;;  %s7700_s13 = inlined_call_operand.hbm [shape: f32[2,16,256], index: 13, kind: output, shape index: {}]  }
   0x1   :  { %7714 = sst [smem:[#allocation35_spill]] %s7687_s0 }
   0x2   :  { %7715 = sst [smem:[#allocation36_spill]] %s7688_s1 }
   0x3   :  { %7716 = sst [smem:[#allocation37_spill]] %s7689_s2 }
   0x4   :  { %7717 = sst [smem:[#allocation38_spill]] %s7690_s3 }
   0x5   :  { %7718 = sst [smem:[#allocation39_spill]] %s7700_s13 }
   0x6   :  { %18 = vsyncpa [#allocation3], 0 }
   0x7   :  { %20 = vsyncpa [#allocation3 + $0x1], 0 }
   0x8   :  { %21 = vsyncpa [#allocation6], 0 }
   0x9   :  { %22 = vsyncpa [#allocation9], 0 }
   0xa   :  { %23 = vsyncpa [#allocation12], 0 }
   0xb   :  { %24 = vsyncpa [#allocation15], 0 }
   0xc   :  { %25 = vsyncpa [#allocation18], 0 }
   0xd   :  { %26 = vsyncpa [#allocation21], 0 }
   0xe   :  { %27 = vsyncpa [#allocation4], 0 }
   0xf   :  { %29 = vsyncpa [#allocation4 + $0x1], 0  ;;  %s6656_s25 = smov 0   ;;  %s6658_s26 = smov 0  }
  0x10   :  { %s6660_s27 = smov 0   ;;  %s6662_s28 = smov 0  }
  0x11 LB: > { %7719 = sst [smem:[#allocation32_spill]] %s6547_s25  ;;  %s6561_s29 = smov [#allocation5]   ;;  %s6559_s28 = sphi %s6662_s28, %s7764_s28   ;;  %s6555_s27 = sphi %s6660_s27, %s7763_s27   ;;  %s6551_s26 = sphi %s6658_s26, %s7762_s26   ;;  %s6547_s25 = sphi %s6656_s25, %s7761_s25  }
  0x12   : > { %s357_s30 = sshll.u32 %s6561_s29, 4  ;;  %s6677_s14 = sadd.s32 4294967295, %s6559_s28   ;;  %s358_s30 = int_to_ptr.vmem [resolvable:$true] %s357_s30 }
  0x13   : > { %7720 = sst [smem:[#allocation33_spill]] %s6677_s14  ;;  %p4804_p0 = scmp.ge.s32.totalorder %s6559_s28, 1 }
  0x14   : > { %p7702_p1 = scmp.eq.s32.totalorder %s6677_s14, 0  ;;  %p344_p2 = scmp.lt.s32.totalorder %s6559_s28, 3 }
  0x15   : > { %s6562_s16 = smov [#allocation8]   ;;  %s6563_s19 = smov [#allocation11]  }
  0x16   : > { %p6682_p3 = pnand %p4804_p0, %p344_p2  ;;  %s378_s17 = sshll.u32 %s6562_s16, 4  ;;  %s6689_s17 = int_to_ptr.vmem [resolvable:$true] %s378_s17 }
  0x17   : > { %s402_s20 = sshll.u32 %s6563_s19, 4  ;;  %s7724_s1 = sld [smem:[#allocation36_spill]]  ;;  %s6697_s20 = int_to_ptr.vmem [resolvable:$true] %s402_s20 }
  0x18   : > { %s7721_s15 = scalar_select %p6682_p3, 1, 0 }
  0x19   : > { %p5859_p5 = pneg %p6682_p3 }
  0x1a   : > { %7722 = sst [smem:[#allocation34_spill]] %s7721_s15 }
  0x1b   : > { %p6693_p6 = pnand %p5859_p5, %p7702_p1 }
  0x1d   : > { %s6103_s23 = scalar_lea.hbm %s7724_s1, 32  ;;  %p6707_p8 = pneg %p6693_p6 }
  0x1e   : > { %p6104_p7 = scmp.ne.s32.totalorder %s7724_s1, %s6103_s23  ;;  %p6110_p11 = scmp.lt.u32.totalorder %s6103_s23, %s7724_s1 }
  0x20   : > { %p6106_p9 = pnand %p6707_p8, %p6104_p7 }
  0x22   : > { %p6107_p10 = pneg %p6106_p9 }
  0x24   : > { %p6112_p12 = pnand %p6110_p11, %p6107_p10 }
  0x26   : > { %6115 = shalt.err (!%p6112_p12)
}
  0x27   : > { %s6116_s21 = scalar_lea.vmem %s358_s30, 32  ;;  %p6124_p5 = scmp.lt.s32.totalorder %s358_s30, %s358_s30 }
  0x28   : > { %p6117_p13 = scmp.ne.s32.totalorder %s358_s30, %s6116_s21  ;;  %p6125_p4 = scmp.lt.s32.totalorder %s6116_s21, %s6116_s21 }
  0x2a   : > { %p6119_p0 = pnand %p6117_p13, %p6707_p8  ;;  %p6126_p1 = por %p6125_p4, %p6124_p5 }
  0x2c   : > { %p6120_p2 = pneg %p6119_p0 }
  0x2e   : > { %p6127_p3 = pnand %p6126_p1, %p6120_p2 }
  0x30   : > { %6130 = shalt.err (!%p6127_p3)
}
  0x31   : > { %5862 = dma.hbm_to_vmem [thread:$0]  (!%p6693_p6), %s7724_s1, 32, %s358_s30, [#allocation6]  }
  0x32   : > { %s7726_s3 = sld [smem:[#allocation38_spill]] }
  0x38   : > { %s6131_s29 = scalar_lea.hbm %s7726_s3, 24576 }
  0x39   : > { %p6132_p7 = scmp.ne.s32.totalorder %s7726_s3, %s6131_s29  ;;  %p6138_p1 = scmp.lt.u32.totalorder %s6131_s29, %s7726_s3 }
  0x3b   : > { %p6134_p9 = pnand %p6132_p7, %p6707_p8 }
  0x3d   : > { %p6135_p4 = pneg %p6134_p9 }
  0x3f   : > { %p6140_p3 = pnand %p6138_p1, %p6135_p4 }
  0x41   : > { %6143 = shalt.err (!%p6140_p3)
}
  0x42   : > { %s6144_s30 = scalar_lea.vmem %s6689_s17, 24576  ;;  %p6152_p13 = scmp.lt.s32.totalorder %s6689_s17, %s6689_s17 }
  0x43   : > { %p6145_p10 = scmp.ne.s32.totalorder %s6689_s17, %s6144_s30  ;;  %p6153_p0 = scmp.lt.s32.totalorder %s6144_s30, %s6144_s30 }
  0x45   : > { %p6147_p11 = pnand %p6145_p10, %p6707_p8  ;;  %p6154_p2 = por %p6153_p0, %p6152_p13 }
  0x47   : > { %p6148_p12 = pneg %p6147_p11 }
  0x49   : > { %p6155_p5 = pnand %p6154_p2, %p6148_p12 }
  0x4b   : > { %6158 = shalt.err (!%p6155_p5)
}
  0x4c   : > { %s6564_s15 = smov 768   ;;  %s6565_s0 = smov 48  }
  0x4d   : > { %5868 = dma.hbm_to_vmem [thread:$0]  (!%p6693_p6), %s7726_s3, 24576, %s6689_s17, [#allocation9], %s6564_s15, %s6564_s15, %s6565_s0  }
  0x4e   : > { %s6159_s29 = scalar_lea.hbm %s7692_s5, 8192 }
  0x4f   : > { %p6160_p7 = scmp.ne.s32.totalorder %s7692_s5, %s6159_s29  ;;  %p6166_p1 = scmp.lt.u32.totalorder %s6159_s29, %s7692_s5 }
  0x51   : > { %p6162_p9 = pnand %p6160_p7, %p6707_p8 }
  0x53   : > { %p6163_p4 = pneg %p6162_p9 }
  0x55   : > { %p6168_p3 = pnand %p6166_p1, %p6163_p4 }
  0x57   : > { %6171 = shalt.err (!%p6168_p3)
}
  0x58   : > { %s6172_s17 = scalar_lea.vmem %s6697_s20, 8192  ;;  %p6180_p13 = scmp.lt.s32.totalorder %s6697_s20, %s6697_s20 }
  0x59   : > { %p6173_p10 = scmp.ne.s32.totalorder %s6697_s20, %s6172_s17  ;;  %p6181_p0 = scmp.lt.s32.totalorder %s6172_s17, %s6172_s17 }
  0x5b   : > { %p6175_p11 = pnand %p6173_p10, %p6707_p8  ;;  %p6182_p2 = por %p6181_p0, %p6180_p13 }
  0x5d   : > { %p6176_p12 = pneg %p6175_p11 }
  0x5f   : > { %p6183_p5 = pnand %p6182_p2, %p6176_p12 }
  0x61   : > { %6186 = shalt.err (!%p6183_p5)
}
  0x62   : > { %s7709_s15 = smov 256   ;;  %s7711_s1 = smov 16  }
  0x63   : > { %5874 = dma.hbm_to_vmem [thread:$0]  (!%p6693_p6), %s7692_s5, 8192, %s6697_s20, [#allocation12], %s7709_s15, %s7709_s15, %s7711_s1  }
  0x64   : > { %s6568_s24 = smov [#allocation14]   ;;  %s6569_s23 = smov [#allocation17]  }
  0x65   : > { %s427_s13 = sshll.u32 %s6568_s24, 4  ;;  %s448_s29 = sshll.u32 %s6569_s23, 4  ;;  %s428_s13 = int_to_ptr.vmem [resolvable:$true] %s427_s13  ;;  %s449_s29 = int_to_ptr.vmem [resolvable:$true] %s448_s29 }
  0x66   : > { %s6187_s30 = scalar_lea.hbm %s7694_s7, 32 }
  0x67   : > { %p6188_p7 = scmp.ne.s32.totalorder %s7694_s7, %s6187_s30  ;;  %p6194_p1 = scmp.lt.u32.totalorder %s6187_s30, %s7694_s7 }
  0x69   : > { %p6190_p9 = pnand %p6188_p7, %p6707_p8 }
  0x6b   : > { %p6191_p4 = pneg %p6190_p9 }
  0x6d   : > { %p6196_p3 = pnand %p6194_p1, %p6191_p4 }
  0x6f   : > { %6199 = shalt.err (!%p6196_p3)
}
  0x70   : > { %s6200_s20 = scalar_lea.vmem %s428_s13, 32  ;;  %p6208_p13 = scmp.lt.s32.totalorder %s428_s13, %s428_s13 }
  0x71   : > { %p6201_p10 = scmp.ne.s32.totalorder %s428_s13, %s6200_s20  ;;  %p6209_p0 = scmp.lt.s32.totalorder %s6200_s20, %s6200_s20 }
  0x73   : > { %p6203_p11 = pnand %p6201_p10, %p6707_p8  ;;  %p6210_p2 = por %p6209_p0, %p6208_p13 }
  0x75   : > { %p6204_p12 = pneg %p6203_p11 }
  0x77   : > { %p6211_p5 = pnand %p6210_p2, %p6204_p12 }
  0x79   : > { %6214 = shalt.err (!%p6211_p5)
}
  0x7a   : > { %5880 = dma.hbm_to_vmem [thread:$0]  (!%p6693_p6), %s7694_s7, 32, %s428_s13, [#allocation15]  }
  0x7b   : > { %s6215_s22 = scalar_lea.hbm %s7696_s9, 32768 }
  0x7c   : > { %p6216_p7 = scmp.ne.s32.totalorder %s7696_s9, %s6215_s22  ;;  %p6222_p1 = scmp.lt.u32.totalorder %s6215_s22, %s7696_s9 }
  0x7e   : > { %p6218_p9 = pnand %p6216_p7, %p6707_p8 }
  0x80   : > { %p6219_p4 = pneg %p6218_p9 }
  0x82   : > { %p6224_p3 = pnand %p6222_p1, %p6219_p4 }
  0x84   : > { %6227 = shalt.err (!%p6224_p3)
}
  0x85   : > { %s6228_s30 = scalar_lea.vmem %s449_s29, 32768  ;;  %p6236_p13 = scmp.lt.s32.totalorder %s449_s29, %s449_s29 }
  0x86   : > { %p6229_p10 = scmp.ne.s32.totalorder %s449_s29, %s6228_s30  ;;  %p6237_p0 = scmp.lt.s32.totalorder %s6228_s30, %s6228_s30 }
  0x88   : > { %p6231_p11 = pnand %p6229_p10, %p6707_p8  ;;  %p6238_p2 = por %p6237_p0, %p6236_p13 }
  0x8a   : > { %p6232_p12 = pneg %p6231_p11 }
  0x8c   : > { %p6239_p5 = pnand %p6238_p2, %p6232_p12 }
  0x8e   : > { %6242 = shalt.err (!%p6239_p5)
}
  0x8f   : > { %s6570_s13 = smov 1024   ;;  %s6571_s17 = smov 64  }
  0x90   : > { %5886 = dma.hbm_to_vmem [thread:$0]  (!%p6693_p6), %s7696_s9, 32768, %s449_s29, [#allocation18], %s6570_s13, %s6570_s13, %s6571_s17  }
  0x91   : > { %s6572_s0 = smov [#allocation20]   ;;  %s6573_s14 = smov [#allocation7]  }
  0x92   : > { %s472_s25 = sshll.u32 %s6572_s0, 4  ;;  %s368_s22 = sshll.u32 %s6573_s14, 4  ;;  %s473_s25 = int_to_ptr.vmem [resolvable:$true] %s472_s25  ;;  %s369_s22 = int_to_ptr.vmem [resolvable:$true] %s368_s22 }
  0x93   : > { %s6243_s19 = scalar_lea.hbm %s7698_s11, 32768 }
  0x94   : > { %p6244_p7 = scmp.ne.s32.totalorder %s7698_s11, %s6243_s19  ;;  %p6250_p1 = scmp.lt.u32.totalorder %s6243_s19, %s7698_s11 }
  0x96   : > { %p6246_p9 = pnand %p6244_p7, %p6707_p8 }
  0x98   : > { %p6247_p4 = pneg %p6246_p9 }
  0x9a   : > { %p6252_p3 = pnand %p6250_p1, %p6247_p4 }
  0x9c   : > { %6255 = shalt.err (!%p6252_p3)
}
  0x9d   : > { %s6256_s29 = scalar_lea.vmem %s473_s25, 32768  ;;  %p6264_p13 = scmp.lt.s32.totalorder %s473_s25, %s473_s25 }
  0x9e   : > { %p6257_p10 = scmp.ne.s32.totalorder %s473_s25, %s6256_s29  ;;  %p6265_p0 = scmp.lt.s32.totalorder %s6256_s29, %s6256_s29 }
  0xa0   : > { %p6259_p11 = pnand %p6257_p10, %p6707_p8  ;;  %p6266_p2 = por %p6265_p0, %p6264_p13 }
  0xa2   : > { %p6260_p12 = pneg %p6259_p11 }
  0xa4   : > { %p6267_p5 = pnand %p6266_p2, %p6260_p12 }
  0xa6   : > { %6270 = shalt.err (!%p6267_p5)
}
  0xa7   : > { %s7727_s13 = smov 16   ;;  %s7728_s17 = smov 256  }
  0xa8   : > { %5892 = dma.hbm_to_vmem [thread:$0]  (!%p6693_p6), %s7698_s11, 32768, %s473_s25, [#allocation21], %s7728_s17, %s7728_s17, %s7727_s13  }
  0xa9   : > { %s7729_s2 = sld [smem:[#allocation37_spill]] }
  0xaf   : > { %s6271_s0 = scalar_lea.hbm %s7729_s2, 32 }
  0xb0   : > { %p6272_p7 = scmp.ne.s32.totalorder %s7729_s2, %s6271_s0  ;;  %p6278_p1 = scmp.lt.u32.totalorder %s6271_s0, %s7729_s2 }
  0xb2   : > { %p6274_p9 = pnand %p6272_p7, %p6707_p8 }
  0xb4   : > { %p6275_p4 = pneg %p6274_p9 }
  0xb6   : > { %p6280_p3 = pnand %p6278_p1, %p6275_p4 }
  0xb8   : > { %6283 = shalt.err (!%p6280_p3)
}
  0xb9   : > { %s6284_s21 = scalar_lea.vmem %s369_s22, 32  ;;  %p6292_p13 = scmp.lt.s32.totalorder %s369_s22, %s369_s22 }
  0xba   : > { %p6285_p10 = scmp.ne.s32.totalorder %s369_s22, %s6284_s21  ;;  %p6293_p0 = scmp.lt.s32.totalorder %s6284_s21, %s6284_s21 }
  0xbc   : > { %p6287_p11 = pnand %p6285_p10, %p6707_p8  ;;  %p6294_p2 = por %p6293_p0, %p6292_p13 }
  0xbe   : > { %p6288_p12 = pneg %p6287_p11 }
  0xc0   : > { %p6295_p5 = pnand %p6294_p2, %p6288_p12 }
  0xc2   : > { %6298 = shalt.err (!%p6295_p5)
}
  0xc3   : > { %5865 = dma.hbm_to_vmem [thread:$0]  (!%p6693_p6), %s7729_s2, 32, %s369_s22, [#allocation6]  }
  0xc4   : > { %s6574_s29 = smov [#allocation10]   ;;  %s6575_s1 = smov [#allocation13]  }
  0xc5   : > { %s392_s15 = sshll.u32 %s6574_s29, 4  ;;  %s416_s20 = sshll.u32 %s6575_s1, 4  ;;  %s393_s15 = int_to_ptr.vmem [resolvable:$true] %s392_s15  ;;  %s417_s20 = int_to_ptr.vmem [resolvable:$true] %s416_s20 }
  0xc6   : > { %s6299_s14 = scalar_lea.hbm %s7691_s4, 96 }
  0xc7   : > { %p6300_p7 = scmp.ne.s32.totalorder %s7691_s4, %s6299_s14  ;;  %p6306_p1 = scmp.lt.u32.totalorder %s6299_s14, %s7691_s4 }
  0xc9   : > { %p6302_p9 = pnand %p6300_p7, %p6707_p8 }
  0xcb   : > { %p6303_p4 = pneg %p6302_p9 }
  0xcd   : > { %p6308_p3 = pnand %p6306_p1, %p6303_p4 }
  0xcf   : > { %6311 = shalt.err (!%p6308_p3)
}
  0xd0   : > { %s6312_s22 = scalar_lea.vmem %s393_s15, 96  ;;  %p6320_p13 = scmp.lt.s32.totalorder %s393_s15, %s393_s15 }
  0xd1   : > { %p6313_p10 = scmp.ne.s32.totalorder %s393_s15, %s6312_s22  ;;  %p6321_p0 = scmp.lt.s32.totalorder %s6312_s22, %s6312_s22 }
  0xd3   : > { %p6315_p11 = pnand %p6313_p10, %p6707_p8  ;;  %p6322_p2 = por %p6321_p0, %p6320_p13 }
  0xd5   : > { %p6316_p12 = pneg %p6315_p11 }
  0xd7   : > { %p6323_p5 = pnand %p6322_p2, %p6316_p12 }
  0xd9   : > { %6326 = shalt.err (!%p6323_p5)
}
  0xda   : > { %5871 = dma.hbm_to_vmem [thread:$0]  (!%p6693_p6), %s7691_s4, 96, %s393_s15, [#allocation9]  }
  0xdb   : > { %s6327_s3 = scalar_lea.hbm %s7693_s6, 32 }
  0xdc   : > { %p6328_p7 = scmp.ne.s32.totalorder %s7693_s6, %s6327_s3  ;;  %p6334_p1 = scmp.lt.u32.totalorder %s6327_s3, %s7693_s6 }
  0xde   : > { %p6330_p9 = pnand %p6328_p7, %p6707_p8 }
  0xe0   : > { %p6331_p4 = pneg %p6330_p9 }
  0xe2   : > { %p6336_p3 = pnand %p6334_p1, %p6331_p4 }
  0xe4   : > { %6339 = shalt.err (!%p6336_p3)
}
  0xe5   : > { %s6340_s19 = scalar_lea.vmem %s417_s20, 32  ;;  %p6348_p13 = scmp.lt.s32.totalorder %s417_s20, %s417_s20 }
  0xe6   : > { %p6341_p10 = scmp.ne.s32.totalorder %s417_s20, %s6340_s19  ;;  %p6349_p0 = scmp.lt.s32.totalorder %s6340_s19, %s6340_s19 }
  0xe8   : > { %p6343_p11 = pnand %p6341_p10, %p6707_p8  ;;  %p6350_p2 = por %p6349_p0, %p6348_p13 }
  0xea   : > { %p6344_p12 = pneg %p6343_p11 }
  0xec   : > { %p6351_p5 = pnand %p6350_p2, %p6344_p12 }
  0xee   : > { %6354 = shalt.err (!%p6351_p5)
}
  0xef   : > { %5877 = dma.hbm_to_vmem [thread:$0]  (!%p6693_p6), %s7693_s6, 32, %s417_s20, [#allocation12]  }
  0xf0   : > { %s6576_s22 = smov [#allocation16]   ;;  %s6577_s30 = smov [#allocation19]  }
  0xf1   : > { %s438_s25 = sshll.u32 %s6576_s22, 4  ;;  %s462_s29 = sshll.u32 %s6577_s30, 4  ;;  %s439_s25 = int_to_ptr.vmem [resolvable:$true] %s438_s25  ;;  %s463_s29 = int_to_ptr.vmem [resolvable:$true] %s462_s29 }
  0xf2   : > { %s6355_s0 = scalar_lea.hbm %s7695_s8, 32 }
  0xf3   : > { %p6356_p7 = scmp.ne.s32.totalorder %s7695_s8, %s6355_s0  ;;  %p6362_p1 = scmp.lt.u32.totalorder %s6355_s0, %s7695_s8 }
  0xf5   : > { %p6358_p9 = pnand %p6356_p7, %p6707_p8 }
  0xf7   : > { %p6359_p4 = pneg %p6358_p9 }
  0xf9   : > { %p6364_p3 = pnand %p6362_p1, %p6359_p4 }
  0xfb   : > { %6367 = shalt.err (!%p6364_p3)
}
  0xfc   : > { %s6368_s20 = scalar_lea.vmem %s439_s25, 32  ;;  %p6376_p13 = scmp.lt.s32.totalorder %s439_s25, %s439_s25 }
  0xfd   : > { %p6369_p10 = scmp.ne.s32.totalorder %s439_s25, %s6368_s20  ;;  %p6377_p0 = scmp.lt.s32.totalorder %s6368_s20, %s6368_s20 }
  0xff   : > { %p6371_p11 = pnand %p6369_p10, %p6707_p8  ;;  %p6378_p2 = por %p6377_p0, %p6376_p13 }
 0x101   : > { %p6372_p12 = pneg %p6371_p11 }
 0x103   : > { %p6379_p5 = pnand %p6378_p2, %p6372_p12 }
 0x105   : > { %6382 = shalt.err (!%p6379_p5)
}
 0x106   : > { %5883 = dma.hbm_to_vmem [thread:$0]  (!%p6693_p6), %s7695_s8, 32, %s439_s25, [#allocation15]  }
 0x107   : > { %s6383_s1 = scalar_lea.hbm %s7697_s10, 128 }
 0x108   : > { %p6384_p7 = scmp.ne.s32.totalorder %s7697_s10, %s6383_s1  ;;  %p6390_p1 = scmp.lt.u32.totalorder %s6383_s1, %s7697_s10 }
 0x10a   : > { %p6386_p9 = pnand %p6384_p7, %p6707_p8 }
 0x10c   : > { %p6387_p4 = pneg %p6386_p9 }
 0x10e   : > { %p6392_p3 = pnand %p6390_p1, %p6387_p4 }
 0x110   : > { %6395 = shalt.err (!%p6392_p3)
}
 0x111   : > { %s6396_s23 = scalar_lea.vmem %s463_s29, 128  ;;  %p6404_p13 = scmp.lt.s32.totalorder %s463_s29, %s463_s29 }
 0x112   : > { %p6397_p10 = scmp.ne.s32.totalorder %s463_s29, %s6396_s23  ;;  %p6405_p0 = scmp.lt.s32.totalorder %s6396_s23, %s6396_s23 }
 0x114   : > { %p6399_p11 = pnand %p6397_p10, %p6707_p8  ;;  %p6406_p2 = por %p6405_p0, %p6404_p13 }
 0x116   : > { %p6400_p12 = pneg %p6399_p11 }
 0x118   : > { %p6407_p5 = pnand %p6406_p2, %p6400_p12 }
 0x11a   : > { %6410 = shalt.err (!%p6407_p5)
}
 0x11b   : > { %5889 = dma.hbm_to_vmem [thread:$0]  (!%p6693_p6), %s7697_s10, 128, %s463_s29, [#allocation18]  }
 0x11c   : > { %s6578_s20 = smov [#allocation22]   ;;  %s6411_s30 = scalar_lea.hbm %s7699_s12, 32 }
 0x11d   : > { %s486_s15 = sshll.u32 %s6578_s20, 4  ;;  %p6412_p7 = scmp.ne.s32.totalorder %s7699_s12, %s6411_s30  ;;  %s487_s15 = int_to_ptr.vmem [resolvable:$true] %s486_s15 }
 0x11e   : > { %p6418_p1 = scmp.lt.u32.totalorder %s6411_s30, %s7699_s12 }
 0x11f   : > { %p6414_p9 = pnand %p6412_p7, %p6707_p8 }
 0x121   : > { %p6415_p4 = pneg %p6414_p9 }
 0x123   : > { %p6420_p3 = pnand %p6418_p1, %p6415_p4 }
 0x125   : > { %6423 = shalt.err (!%p6420_p3)
}
 0x126   : > { %s6424_s29 = scalar_lea.vmem %s487_s15, 32  ;;  %p6432_p13 = scmp.lt.s32.totalorder %s487_s15, %s487_s15 }
 0x127   : > { %p6425_p10 = scmp.ne.s32.totalorder %s487_s15, %s6424_s29  ;;  %p6433_p0 = scmp.lt.s32.totalorder %s6424_s29, %s6424_s29 }
 0x129   : > { %p6427_p11 = pnand %p6425_p10, %p6707_p8  ;;  %p6434_p2 = por %p6433_p0, %p6432_p13 }
 0x12b   : > { %p6428_p12 = pneg %p6427_p11 }
 0x12d   : > { %p6435_p5 = pnand %p6434_p2, %p6428_p12 }
 0x12f   : > { %6438 = shalt.err (!%p6435_p5)
}
 0x130   : > { %s7730_s16 = sld [smem:[#allocation32_spill]]  ;;  %s7731_s25 = sld [smem:[#allocation33_spill]] }
 0x131   : > { %5895 = dma.hbm_to_vmem [thread:$0]  (!%p6693_p6), %s7699_s12, 32, %s487_s15, [#allocation21]  }
 0x132   : > { %s4803_s19 = sadd.s32 4294967294, %s6559_s28   ;;  %s6939_s18 = sadd.s32 1, %s6559_s28  }
 0x133   : > { %s39_s20 = ssub.s32 %s6559_s28, %s6939_s18  ;;  %s42_s21 = sadd.s32 1, %s6555_s27 }
 0x134   : > { %p40_p8 = scmp.eq.s32.totalorder %s39_s20, 0  ;;  %p49_p7 = scmp.ne.s32.totalorder %s6555_s27, %s6551_s26 }
 0x135   : > { %p50_p9 = scmp.eq.s32.totalorder %s6559_s28, 0  ;;  %p337_p11 = scmp.eq.s32.totalorder %s4803_s19, 1 }
 0x136   : > { %p55_p4 = scmp.ne.s32.totalorder %s6551_s26, %s7730_s16  ;;  %p7733_p3 = scmp.eq.s32.totalorder %s7731_s25, 0 }
 0x137   : > { %s6950_s22 = scalar_select %p40_p8, %s6555_s27, %s42_s21  }
 0x138   : > { %p6952_p1 = por %p50_p9, %p49_p7  ;;  %p6958_p6 = por %p7733_p3, %p55_p4 }
 0x139   : > { %p331_p10 = scmp.eq.s32.totalorder %s7731_s25, 1  ;;  %p5916_p12 = scmp.lt.s32.totalorder %s6559_s28, 2 }
 0x13a   : > { %s497_s1 = sand.u32 1, %s6555_s27   ;;  %p6969_p0 = por %p337_p11, %p55_p4 }
 0x13b   : > { %p6965_p13 = por %p331_p10, %p49_p7  ;;  %s4818_s14 = sshll.u32 %s497_s1, 5 }
 0x13c   : > { %s7736_s0 = scalar_select %p6969_p0, 1, 0 }
 0x13d   : > { %s7735_s3 = scalar_select %p6965_p13, 1, 0 }
 0x13e   : > { %s4897_s29 = sshll.u32 %s6559_s28, 9  ;;  %s7737_s16 = sld [smem:[#allocation35_spill]] }
 0x13f   : > { %s501_s25 = scalar_lea.vmem [#allocation2], %s4818_s14  ;;  %p6983_p2 = pnand %p5916_p12, %p6952_p1 }
 0x140   : > { %s508_s19 = sshll.u32 %s501_s25, 4  ;;  %s6987_s2 = scalar_lea.sflag [#allocation3], %s497_s1  ;;  %s6979_s19 = int_to_ptr.vmem [resolvable:$true] %s508_s19 }
 0x141   : > { %p6441_p8 = pneg %p6983_p2 }
 0x144   : > { %s6977_s20 = scalar_lea.hbm %s7737_s16, %s4897_s29  ;;  %s6444_s30 = scalar_lea.hbm %s7737_s16, 1024 }
 0x145   : > { %s6439_s24 = scalar_lea.hbm %s6977_s20, 512  ;;  %p6445_p4 = scmp.lt.u32.totalorder %s6977_s20, %s7737_s16 }
 0x146   : > { %p6440_p5 = scmp.ne.s32.totalorder %s6977_s20, %s6439_s24  ;;  %p6446_p1 = scmp.lt.u32.totalorder %s6444_s30, %s6439_s24 }
 0x147   : > { %p6448_p10 = scmp.lt.u32.totalorder %s6439_s24, %s6977_s20 }
 0x148   : > { %p6442_p7 = pnand %p6441_p8, %p6440_p5  ;;  %p6447_p3 = por %p6446_p1, %p6445_p4 }
 0x14a   : > { %p6443_p9 = pneg %p6442_p7  ;;  %p6449_p11 = por %p6448_p10, %p6447_p3 }
 0x14c   : > { %p6450_p12 = pnand %p6449_p11, %p6443_p9 }
 0x14e   : > { %6453 = shalt.err (!%p6450_p12)
}
 0x14f   : > { %s6454_s1 = scalar_lea.vmem %s6979_s19, 512  ;;  %s6579_s14 = smov [#allocation2]  }
 0x150   : > { %p6455_p5 = scmp.ne.s32.totalorder %s6979_s19, %s6454_s1  ;;  %s6459_s29 = sshll.u32 %s6579_s14, 4  ;;  %s6460_s29 = int_to_ptr.vmem [resolvable:$false] %s6459_s29 }
 0x151   : > { %s6461_s23 = scalar_lea.vmem %s6460_s29, 1024  ;;  %p6462_p13 = scmp.lt.s32.totalorder %s6979_s19, %s6460_s29 }
 0x152   : > { %p6457_p7 = pnand %p6455_p5, %p6441_p8  ;;  %p6463_p4 = scmp.lt.s32.totalorder %s6461_s23, %s6454_s1 }
 0x154   : > { %p6458_p0 = pneg %p6457_p7  ;;  %p6464_p1 = por %p6463_p4, %p6462_p13 }
 0x156   : > { %p6465_p3 = pnand %p6464_p1, %p6458_p0 }
 0x158   : > { %6468 = shalt.err (!%p6465_p3)
}
 0x159   : > { %5899 = dma.hbm_to_vmem [thread:$0]  (!%p6983_p2), %s6977_s20, 512, %s6979_s19, %s6987_s2, %s7728_s17, %s7728_s17, %s7727_s13  }
 0x15a   : > { %s7739_s24 = sld [smem:[#allocation34_spill]] }
 0x160   : > { %p7740_p8 = scmp.ne.s32.totalorder %s7739_s24, 0 }
 0x161   : > { %s7021_s30 = sand.u32 (!%p7740_p8), 1, %s6551_s26  }
 0x162   : > { %520 = sbr.rel (%p7740_p8) target bundleno = 3249 (0xcb1), region = 72  ;;  %s4822_s25 = sshll.u32 (!%p7740_p8), %s7021_s30, 5 }
 0x163   : > { %s523_s1 = scalar_lea.sflag (!%p7740_p8), [#allocation3], %s7021_s30  ;;  %s7027_s21 = scalar_lea.vmem (!%p7740_p8), [#allocation2], %s4822_s25 }
 0x169   : > { %6514 = dma.done.wait (%p6958_p6), %s523_s1, 512  }
 0x16a   : > { %6516 = vsyncadd (%p6958_p6), %s523_s1, 4294966784  ;;  %s7741_s2 = sld [smem:[#allocation33_spill]] }
 0x170   : > { %p7742_p13 = scmp.eq.s32.totalorder %s7741_s2, 0 }
 0x172   : > { %6518 = dma.done.wait (%p7742_p13), [#allocation6], 64   ;;  %p7743_p0 = pmov %p7742_p13 }
 0x174   : > { %6520 = vsyncadd (%p7743_p0), [#allocation6], 4294967232  ;;  %p7744_p2 = pmov %p7743_p0 }
 0x175   : > { %p7745_p9 = pmov %p7743_p0 }
 0x176   : > { %6522 = dma.done.wait (%p7744_p2), [#allocation9], 24672  }
 0x177   : > { %6524 = vsyncadd (%p7745_p9), [#allocation9], 4294942624  ;;  %p7746_p10 = pmov %p7743_p0 }
 0x178   : > { %p7747_p11 = pmov %p7743_p0 }
 0x179   : > { %6526 = dma.done.wait (%p7746_p10), [#allocation12], 8224  }
 0x17a   : > { %6528 = vsyncadd (%p7747_p11), [#allocation12], 4294959072  ;;  %p7748_p6 = pmov %p7743_p0 }
 0x17b   : > { %p7749_p12 = pmov %p7743_p0 }
 0x17c   : > { %6530 = dma.done.wait (%p7748_p6), [#allocation15], 64  }
 0x17d   : > { %6532 = vsyncadd (%p7749_p12), [#allocation15], 4294967232  ;;  %p7750_p5 = pmov %p7743_p0 }
 0x17e   : > { %p7751_p7 = pmov %p7743_p0 }
 0x17f   : > { %6534 = dma.done.wait (%p7750_p5), [#allocation18], 32896  }
 0x180   : > { %6536 = vsyncadd (%p7751_p7), [#allocation18], 4294934400  ;;  %p7752_p4 = pmov %p7743_p0 }
 0x181   : > { %p7753_p1 = pmov %p7743_p0 }
 0x182   : > { %6538 = dma.done.wait (%p7752_p4), [#allocation21], 32800  }
 0x183   : > { %6540 = vsyncadd (%p7753_p1), [#allocation21], 4294934496  ;;  %v7058_v0 = vld [vmem:[%s7027_s21] sm:$0xff]  ;;  %v7061_v1 = vld [vmem:[%s7027_s21 + $0x8] sm:$0xff]  ;;  %s6580_s13 = smov 64   ;;  %vm2005_vm0 = vcmask 523264  }
 0x184   : > { %v7064_v2 = vld [vmem:[%s7027_s21 + $0x10] sm:$0xff]  ;;  %v623_v3 = vadd.f32 %v7061_v1, %v7058_v0  ;;  %v7069_v4 = vld [vmem:[%s7027_s21 + $0x18] sm:$0xff]  ;;  %v686_v8 = vld [vmem:[#allocation8] sm:$0xff]  ;;  %vm2354_vm2 = vcmask 130048   ;;  %s616_s17 = scalar_lea.vmem [#allocation23], %s4822_s25  ;;  %s4898_s20 = sshll.u32 %s7741_s2, 9 }
 0x185   : > { %v626_v5 = vadd.f32 %v7069_v4, %v7064_v2  ;;  %v687_v6 = vld [vmem:[#allocation8 + $0x8] sm:$0xff]  ;;  %v693_v7 = vld [vmem:[#allocation8 + $0x38] sm:$0xff]  ;;  %v692_v10 = vld [vmem:[#allocation8 + $0x30] sm:$0xff]  ;;  %s4616_s15 = sshll.u32 %s616_s17, 4  ;;  %s7756_s29 = sld [smem:[#allocation39_spill]]  ;;  %s7637_s15 = int_to_ptr.vmem [resolvable:$true] %s4616_s15 }
 0x186   : > { %624 = vadd.xlane.f32.xlu0 %v623_v3  ;;  %v4987_v9 = vpack.c.bf16 %v693_v7, %v687_v6  ;;  %v699_v11 = vld [vmem:[#allocation8 + $0x68] sm:$0xff]  ;;  %v705_v12 = vld [vmem:[#allocation8 + $0x98] sm:$0xff]  ;;  %v4989_v13 = vpack.c.bf16 %v692_v10, %v686_v8  ;;  %v698_v15 = vld [vmem:[#allocation8 + $0x60] sm:$0xff]  ;;  %s4603_s24 = scalar_lea.sflag [#allocation4], %s7021_s30  ;;  %s6469_s25 = scalar_lea.vmem %s7637_s15, 512 }
 0x187   : > { %v4991_v14 = vpack.c.bf16 %v705_v12, %v699_v11  ;;  %v704_v16 = vld [vmem:[#allocation8 + $0x90] sm:$0xff]  ;;  %v711_v17 = vld [vmem:[#allocation8 + $0xc8] sm:$0xff]  ;;  %v717_v18 = vld [vmem:[#allocation8 + $0xf8] sm:$0xff]  ;;  %p6470_p3 = scmp.ne.s32.totalorder %s7637_s15, %s6469_s25  ;;  %p7757_p8 = scmp.ne.s32.totalorder %s7735_s3, 0 }
 0x188   : > { %4988 = vmatprep.subr.bf16.mxu1 %v4987_v9  ;;  %v4993_v19 = vpack.c.bf16 %v704_v16, %v698_v15  ;;  %v4995_v20 = vpack.c.bf16 %v717_v18, %v711_v17  ;;  %v710_v21 = vld [vmem:[#allocation8 + $0xc0] sm:$0xff]  ;;  %v716_v22 = vld [vmem:[#allocation8 + $0xf0] sm:$0xff]  ;;  %v723_v23 = vld [vmem:[#allocation8 + $0x128] sm:$0xff]  ;;  %s6583_s1 = smov [#allocation23]  }
 0x189   : > { %4990 = vmatpush1.bf16.msra.mxu1 %v4989_v13  ;;  %v729_v24 = vld [vmem:[#allocation8 + $0x158] sm:$0xff]  ;;  %v4997_v25 = vpack.c.bf16 %v716_v22, %v710_v21  ;;  %v722_v27 = vld [vmem:[#allocation8 + $0x120] sm:$0xff]  ;;  %v728_v28 = vld [vmem:[#allocation8 + $0x150] sm:$0xff]  ;;  %p6471_p13 = pnand %p6470_p3, %p7757_p8 }
 0x18a   : > { %627 = vadd.xlane.f32.xlu0 %v626_v5  ;;  %4992 = vmatprep.subr.bf16.mxu1 %v4991_v14  ;;  %v4999_v26 = vpack.c.bf16 %v729_v24, %v723_v23  ;;  %v735_v29 = vld [vmem:[#allocation8 + $0x188] sm:$0xff]  ;;  %v741_v30 = vld [vmem:[#allocation8 + $0x1b8] sm:$0xff]  ;;  %v5001_v31 = vpack.c.bf16 %v728_v28, %v722_v27  ;;  %v734_v33 = vld [vmem:[#allocation8 + $0x180] sm:$0xff] }
 0x18b   : > { %v5003_v32 = vpack.c.bf16 %v741_v30, %v735_v29  ;;  %v740_v34 = vld [vmem:[#allocation8 + $0x1b0] sm:$0xff]  ;;  %v747_v35 = vld [vmem:[#allocation8 + $0x1e8] sm:$0xff]  ;;  %v753_v36 = vld [vmem:[#allocation8 + $0x218] sm:$0xff]  ;;  %s7643_s23 = scalar_lea.hbm %s7756_s29, %s4898_s20  ;;  %p6472_p0 = pneg %p6471_p13 }
 0x18c   : > { %v5005_v37 = vpack.c.bf16 %v740_v34, %v734_v33  ;;  %v5007_v38 = vpack.c.bf16 %v753_v36, %v747_v35  ;;  %v746_v39 = vld [vmem:[#allocation8 + $0x1e0] sm:$0xff]  ;;  %v752_v40 = vld [vmem:[#allocation8 + $0x210] sm:$0xff]  ;;  %v759_v41 = vld [vmem:[#allocation8 + $0x248] sm:$0xff] }
 0x18d   : > { %4994 = vmatpush1.bf16.msra.mxu1 %v4993_v19  ;;  %v765_v42 = vld [vmem:[#allocation8 + $0x278] sm:$0xff]  ;;  %v5009_v43 = vpack.c.bf16 %v752_v40, %v746_v39  ;;  %v758_v45 = vld [vmem:[#allocation8 + $0x240] sm:$0xff]  ;;  %v764_v46 = vld [vmem:[#allocation8 + $0x270] sm:$0xff] }
 0x18e   : > { %4996 = vmatprep.subr.bf16.mxu1 %v4995_v20  ;;  %v5011_v44 = vpack.c.bf16 %v765_v42, %v759_v41  ;;  %v771_v47 = vld [vmem:[#allocation8 + $0x2a8] sm:$0xff]  ;;  %v777_v48 = vld [vmem:[#allocation8 + $0x2d8] sm:$0xff]  ;;  %v5013_v49 = vpack.c.bf16 %v764_v46, %v758_v45  ;;  %v770_v51 = vld [vmem:[#allocation8 + $0x2a0] sm:$0xff] }
 0x18f   : > { %v5015_v50 = vpack.c.bf16 %v777_v48, %v771_v47  ;;  %v776_v52 = vld [vmem:[#allocation8 + $0x2d0] sm:$0xff]  ;;  %v783_v53 = vld [vmem:[#allocation8 + $0x308] sm:$0xff]  ;;  %v789_v54 = vld [vmem:[#allocation8 + $0x338] sm:$0xff] }
 0x190   : > { %v5017_v55 = vpack.c.bf16 %v776_v52, %v770_v51  ;;  %v5019_v56 = vpack.c.bf16 %v789_v54, %v783_v53  ;;  %v782_v57 = vld [vmem:[#allocation8 + $0x300] sm:$0xff]  ;;  %v788_v58 = vld [vmem:[#allocation8 + $0x330] sm:$0xff]  ;;  %v795_v59 = vld [vmem:[#allocation8 + $0x368] sm:$0xff] }
 0x191   : > { %4998 = vmatpush1.bf16.msra.mxu1 %v4997_v25  ;;  %v801_v60 = vld [vmem:[#allocation8 + $0x398] sm:$0xff]  ;;  %v5021_v61 = vpack.c.bf16 %v788_v58, %v782_v57  ;;  %v794_v63 = vld [vmem:[#allocation8 + $0x360] sm:$0xff]  ;;  %v800_v3 = vld [vmem:[#allocation8 + $0x390] sm:$0xff]  ;;  %v657_v57 = vlaneseq }
 0x192   : > { %5000 = vmatprep.subr.bf16.mxu1 %v4999_v26  ;;  %v5023_v62 = vpack.c.bf16 %v801_v60, %v795_v59  ;;  %v807_v5 = vld [vmem:[#allocation8 + $0x3c8] sm:$0xff]  ;;  %v813_v6 = vld [vmem:[#allocation8 + $0x3f8] sm:$0xff]  ;;  %v5025_v7 = vpack.c.bf16 %v800_v3, %v794_v63  ;;  %v806_v9 = vld [vmem:[#allocation8 + $0x3c0] sm:$0xff] }
 0x193   : > { %v5027_v8 = vpack.c.bf16 %v813_v6, %v807_v5  ;;  %v812_v10 = vld [vmem:[#allocation8 + $0x3f0] sm:$0xff]  ;;  %v819_v24 = vld [vmem:[#allocation8 + $0x428] sm:$0xff]  ;;  %v825_v25 = vld [vmem:[#allocation8 + $0x458] sm:$0xff] }
 0x194   : > { %v5029_v11 = vpack.c.bf16 %v812_v10, %v806_v9  ;;  %v5031_v26 = vpack.c.bf16 %v825_v25, %v819_v24  ;;  %v818_v27 = vld [vmem:[#allocation8 + $0x420] sm:$0xff]  ;;  %v824_v28 = vld [vmem:[#allocation8 + $0x450] sm:$0xff]  ;;  %v837_v29 = vld [vmem:[#allocation8 + $0x4b8] sm:$0xff] }
 0x195   : > { %5002 = vmatpush1.bf16.msra.mxu1 %v5001_v31  ;;  %v830_v31 = vld [vmem:[#allocation8 + $0x480] sm:$0xff]  ;;  %v843_v34 = vld [vmem:[#allocation8 + $0x4e8] sm:$0xff]  ;;  %v849_v35 = vld [vmem:[#allocation8 + $0x518] sm:$0xff] }
 0x196   : > { %5004 = vmatprep.subr.bf16.mxu1 %v5003_v32  ;;  %v836_v32 = vld [vmem:[#allocation8 + $0x4b0] sm:$0xff]  ;;  %v5039_v36 = vpack.c.bf16 %v849_v35, %v843_v34  ;;  %v855_v40 = vld [vmem:[#allocation8 + $0x548] sm:$0xff]  ;;  %v861_v41 = vld [vmem:[#allocation8 + $0x578] sm:$0xff] }
 0x197   : > { %v5037_v33 = vpack.c.bf16 %v836_v32, %v830_v31  ;;  %v854_v42 = vld [vmem:[#allocation8 + $0x540] sm:$0xff]  ;;  %v867_v45 = vld [vmem:[#allocation8 + $0x5a8] sm:$0xff]  ;;  %v873_v46 = vld [vmem:[#allocation8 + $0x5d8] sm:$0xff] }
 0x198   : > { %v5047_v48 = vpack.c.bf16 %v873_v46, %v867_v45  ;;  %v689_v52 = vld [vmem:[#allocation8 + $0x18] sm:$0xff]  ;;  %v695_v53 = vld [vmem:[#allocation8 + $0x48] sm:$0xff]  ;;  %v718_v34 = vld [vmem:[#allocation8 + $0x100] sm:$0xff] }
 0x199   : > { %5006 = vmatpush1.bf16.msra.mxu1 %v5005_v37  ;;  %v842_v37 = vld [vmem:[#allocation8 + $0x4e0] sm:$0xff]  ;;  %v5051_v54 = vpack.c.bf16 %v695_v53, %v689_v52  ;;  %v621_v5 = vld [vmem:[#allocation5] sm:$0x3]  ;;  %v622_v6 = vld [vmem:[#allocation7] sm:$0x3] }
 0x19a   : > { %5008 = vmatprep.subr.bf16.mxu1 %v5007_v38  ;;  %v848_v38 = vld [vmem:[#allocation8 + $0x510] sm:$0xff]  ;;  %v725_v35 = vld [vmem:[#allocation8 + $0x138] sm:$0xff]  ;;  %v742_v46 = vld [vmem:[#allocation8 + $0x1c0] sm:$0xff] }
 0x19b   : > { %v5041_v39 = vpack.c.bf16 %v848_v38, %v842_v37  ;;  %v736_v45 = vld [vmem:[#allocation8 + $0x190] sm:$0xff]  ;;  %v754_v52 = vld [vmem:[#allocation8 + $0x220] sm:$0xff]  ;;  %v761_v53 = vld [vmem:[#allocation8 + $0x258] sm:$0xff] }
 0x19c   : > { %vm7248_vm1 = vmpackc.low %vm2005_vm0, %vm2005_vm0 }
 0x19d   : > { %5010 = vmatpush1.bf16.msra.mxu1 %v5009_v43  ;;  %v5043_v43 = vpack.c.bf16 %v861_v41, %v855_v40  ;;  %v730_v40 = vld [vmem:[#allocation8 + $0x160] sm:$0xff]  ;;  %v737_v41 = vld [vmem:[#allocation8 + $0x198] sm:$0xff] }
 0x19e   : > { %5012 = vmatprep.subr.bf16.mxu1 %v5011_v44  ;;  %v860_v44 = vld [vmem:[#allocation8 + $0x570] sm:$0xff] }
 0x19f   : > { %v5045_v47 = vpack.c.bf16 %v860_v44, %v854_v42  ;;  %v743_v42 = vld [vmem:[#allocation8 + $0x1c8] sm:$0xff] }
 0x1a0   : > { %v5067_v44 = vpack.c.bf16 %v743_v42, %v737_v41  ;;  %v844_v42 = vld [vmem:[#allocation8 + $0x4f0] sm:$0xff] }
 0x1a1   : > { %5014 = vmatpush1.bf16.msra.mxu1 %v5013_v49  ;;  %v866_v49 = vld [vmem:[#allocation8 + $0x5a0] sm:$0xff] }
 0x1a2   : > { %5016 = vmatprep.subr.bf16.mxu1 %v5015_v50  ;;  %v872_v50 = vld [vmem:[#allocation8 + $0x5d0] sm:$0xff] }
 0x1a3   : > { %v5049_v51 = vpack.c.bf16 %v872_v50, %v866_v49  ;;  %v5069_v49 = vpack.c.bf16 %v742_v46, %v736_v45  ;;  %v863_v45 = vld [vmem:[#allocation8 + $0x588] sm:$0xff] }
 0x1a5   : > { %5018 = vmatpush1.bf16.msra.mxu1 %v5017_v55 }
 0x1a6   : > { %5020 = vmatprep.subr.bf16.mxu1 %v5019_v56 }
 0x1a9   : > { %5022 = vmatpush1.bf16.msra.mxu1 %v5021_v61  ;;  %v7093_v61 = vshrl.u32 %v657_v57, 7  ;;  %v760_v57 = vld [vmem:[#allocation8 + $0x250] sm:$0xff] }
 0x1aa   : > { %5024 = vmatprep.subr.bf16.mxu1 %v5023_v62 }
 0x1ab   : > { %v7096_v63 = vsub.s32 1, %v7093_v61  ;;  %v7099_v3 = vsub.s32 0, %v7093_v61 }
 0x1ad   : > { %5026 = vmatpush1.bf16.msra.mxu1 %v5025_v7  ;;  %v664_v7 = vrot.slane %v621_v5, %v7096_v63 }
 0x1ae   : > { %5028 = vmatprep.subr.bf16.mxu1 %v5027_v8  ;;  %v660_v8 = vrot.slane %v621_v5, %v7099_v3 }
 0x1b1   : > { %5030 = vmatpush1.bf16.msra.mxu1 %v5029_v11  ;;  %v679_v11 = vrot.slane %v622_v6, %v7096_v63 }
 0x1b2   : > { %5032 = vmatprep.subr.bf16.mxu1 %v5031_v26 }
 0x213   : > { %v625_v12 = vpop.xlane.xlu0 %624 }
 0x214   : > { %v630_v13 = vmul.f32 0.00390625, %v625_v12 }
 0x216   : > { %v7074_v14 = vsub.f32 %v7058_v0, %v630_v13  ;;  %v7077_v15 = vsub.f32 %v7061_v1, %v630_v13  ;;  %v675_v13 = vrot.slane %v622_v6, %v7099_v3  ;;  %v772_v6 = vld [vmem:[#allocation8 + $0x2b0] sm:$0xff] }
 0x217   : > { %v628_v16 = vpop.xlane.xlu0 %627 }
 0x218   : > { %v631_v17 = vmul.f32 0.00390625, %v628_v16  ;;  %v636_v18 = vmul.f32 %v7074_v14, %v7074_v14  ;;  %v637_v19 = vmul.f32 %v7077_v15, %v7077_v15  ;;  %v688_v16 = vld [vmem:[#allocation8 + $0x10] sm:$0xff] }
 0x21a   : > { %v7084_v20 = vsub.f32 %v7064_v2, %v631_v17  ;;  %v7087_v21 = vsub.f32 %v7069_v4, %v631_v17  ;;  %v640_v22 = vadd.f32 %v637_v19, %v636_v18  ;;  %v5033_v2 = vpack.c.bf16 %v824_v28, %v818_v27  ;;  %v831_v4 = vld [vmem:[#allocation8 + $0x488] sm:$0xff]  ;;  %v694_v17 = vld [vmem:[#allocation8 + $0x40] sm:$0xff] }
 0x21b   : > { %v5035_v30 = vpack.c.bf16 %v837_v29, %v831_v4  ;;  %v706_v28 = vld [vmem:[#allocation8 + $0xa0] sm:$0xff]  ;;  %v713_v29 = vld [vmem:[#allocation8 + $0xd8] sm:$0xff] }
 0x21c   : > { %641 = vadd.xlane.f32.xlu1 %v640_v22  ;;  %v638_v0 = vmul.f32 %v7084_v20, %v7084_v20  ;;  %v639_v1 = vmul.f32 %v7087_v21, %v7087_v21  ;;  %5034 = vmatpush1.bf16.msra.mxu1 %v5033_v2  ;;  %v701_v22 = vld [vmem:[#allocation8 + $0x78] sm:$0xff] }
 0x21d   : > { %5036 = vmatprep.subr.bf16.mxu1 %v5035_v30  ;;  %v719_v30 = vld [vmem:[#allocation8 + $0x108] sm:$0xff] }
 0x21e   : > { %v643_v23 = vadd.f32 %v639_v1, %v638_v0  ;;  %v707_v0 = vld [vmem:[#allocation8 + $0xa8] sm:$0xff] }
 0x21f   : > { %v5055_v27 = vpack.c.bf16 %v707_v0, %v701_v22  ;;  %v796_v22 = vld [vmem:[#allocation8 + $0x370] sm:$0xff]  ;;  %v802_v0 = vld [vmem:[#allocation8 + $0x3a0] sm:$0xff] }
 0x220   : > { %644 = vadd.xlane.f32.xlu1 %v643_v23  ;;  %5038 = vmatpush1.bf16.msra.mxu1 %v5037_v33  ;;  %v5053_v23 = vpack.c.bf16 %v694_v17, %v688_v16  ;;  %v797_v16 = vld [vmem:[#allocation8 + $0x378] sm:$0xff]  ;;  %v803_v17 = vld [vmem:[#allocation8 + $0x3a8] sm:$0xff] }
 0x221   : > { %5040 = vmatprep.subr.bf16.mxu1 %v5039_v36  ;;  %v731_v36 = vld [vmem:[#allocation8 + $0x168] sm:$0xff] }
 0x222   : > { %v5063_v38 = vpack.c.bf16 %v731_v36, %v725_v35  ;;  %v832_v36 = vld [vmem:[#allocation8 + $0x490] sm:$0xff] }
 0x224   : > { %5042 = vmatpush1.bf16.msra.mxu1 %v5041_v39  ;;  %v724_v39 = vld [vmem:[#allocation8 + $0x130] sm:$0xff] }
 0x225   : > { %5044 = vmatprep.subr.bf16.mxu1 %v5043_v43  ;;  %v5065_v43 = vpack.c.bf16 %v730_v40, %v724_v39  ;;  %v851_v39 = vld [vmem:[#allocation8 + $0x528] sm:$0xff] }
 0x228   : > { %5046 = vmatpush1.bf16.msra.mxu1 %v5045_v47  ;;  %v749_v47 = vld [vmem:[#allocation8 + $0x1f8] sm:$0xff] }
 0x229   : > { %5048 = vmatprep.subr.bf16.mxu1 %v5047_v48  ;;  %v755_v48 = vld [vmem:[#allocation8 + $0x228] sm:$0xff] }
 0x22a   : > { %v5071_v50 = vpack.c.bf16 %v755_v48, %v749_v47  ;;  %v856_v48 = vld [vmem:[#allocation8 + $0x550] sm:$0xff] }
 0x22c   : > { %5050 = vmatpush1.bf16.msra.mxu1 %v5049_v51  ;;  %v748_v51 = vld [vmem:[#allocation8 + $0x1f0] sm:$0xff] }
 0x22d   : > { %5052 = vmatprep.subr.bf16.mxu1 %v5051_v54  ;;  %v767_v54 = vld [vmem:[#allocation8 + $0x288] sm:$0xff] }
 0x2a9   : > { %v642_v55 = vpop.xlane.xlu1 %641 }
 0x2aa   : > { %v646_v56 = vmul.f32 0.00390625, %v642_v55  ;;  %v5073_v55 = vpack.c.bf16 %v754_v52, %v748_v51  ;;  %v875_v51 = vld [vmem:[#allocation8 + $0x5e8] sm:$0xff] }
 0x2ac   : > { %v648_v58 = vadd.f32 1e-05, %v646_v56  ;;  %v5075_v56 = vpack.c.bf16 %v767_v54, %v761_v53  ;;  %v868_v54 = vld [vmem:[#allocation8 + $0x5b0] sm:$0xff] }
 0x2ad   : > { %v645_v59 = vpop.xlane.xlu1 %644 }
 0x2ae   : > { %5995 = vrsqrt.f32 %v648_v58  ;;  %v647_v60 = vmul.f32 0.00390625, %v645_v59  ;;  %v766_v58 = vld [vmem:[#allocation8 + $0x280] sm:$0xff]  ;;  %v773_v59 = vld [vmem:[#allocation8 + $0x2b8] sm:$0xff] }
 0x2b0   : > { %v649_v62 = vadd.f32 1e-05, %v647_v60  ;;  %v779_v60 = vld [vmem:[#allocation8 + $0x2e8] sm:$0xff] }
 0x2b1   : > { %v5079_v5 = vpack.c.bf16 %v779_v60, %v773_v59  ;;  %v690_v60 = vld [vmem:[#allocation8 + $0x20] sm:$0xff] }
 0x2b2   : > { %5997 = vrsqrt.f32 %v649_v62  ;;  %v5077_v62 = vpack.c.bf16 %v766_v58, %v760_v57  ;;  %v697_v57 = vld [vmem:[#allocation8 + $0x58] sm:$0xff] }
 0x2b8   : > { %v5996_v9 = vpop.eup %5995 }
 0x2b9   : > { %v653_v10 = vmul.f32 %v5996_v9, %v7077_v15  ;;  %v652_v12 = vmul.f32 %v5996_v9, %v7074_v14  ;;  %v700_v14 = vld [vmem:[#allocation8 + $0x70] sm:$0xff]  ;;  %v791_v9 = vld [vmem:[#allocation8 + $0x348] sm:$0xff] }
 0x2ba   : > { %v5057_v33 = vpack.c.bf16 %v706_v28, %v700_v14  ;;  %v814_v14 = vld [vmem:[#allocation8 + $0x400] sm:$0xff]  ;;  %v821_v28 = vld [vmem:[#allocation8 + $0x438] sm:$0xff] }
 0x2bb   : > { %v668_v18 = vmul.f32 %v664_v7, %v653_v10  ;;  %v667_v19 = vmul.f32 %v660_v8, %v652_v12  ;;  %v784_v12 = vld [vmem:[#allocation8 + $0x310] sm:$0xff] }
 0x2bc   : > { %v5998_v1 = vpop.eup %5997 }
 0x2bd   : > { %v7107_v24 = vadd.f32 %v679_v11, %v668_v18  ;;  %v7109_v25 = vadd.f32 %v675_v13, %v667_v19  ;;  %v655_v15 = vmul.f32 %v5998_v1, %v7087_v21  ;;  %v654_v26 = vmul.f32 %v5998_v1, %v7084_v20  ;;  %v712_v20 = vld [vmem:[#allocation8 + $0xd0] sm:$0xff]  ;;  %v809_v1 = vld [vmem:[#allocation8 + $0x3d8] sm:$0xff] }
 0x2be   : > { %v5059_v21 = vpack.c.bf16 %v719_v30, %v713_v29  ;;  %v5061_v37 = vpack.c.bf16 %v718_v34, %v712_v20  ;;  %v5087_v19 = vpack.c.bf16 %v803_v17, %v797_v16  ;;  %v820_v30 = vld [vmem:[#allocation8 + $0x430] sm:$0xff]  ;;  %v839_v20 = vld [vmem:[#allocation8 + $0x4c8] sm:$0xff]  ;;  %v714_v17 = vld [vmem:[#allocation8 + $0xe0] sm:$0xff] }
 0x2bf   : > { %974 = vmatprep.mubr.f32.mxu1 %v7107_v24  ;;  %v670_v2 = vmul.f32 %v664_v7, %v655_v15  ;;  %v669_v4 = vmul.f32 %v660_v8, %v654_v26  ;;  %v778_v7 = vld [vmem:[#allocation8 + $0x2e0] sm:$0xff]  ;;  %v785_v8 = vld [vmem:[#allocation8 + $0x318] sm:$0xff]  ;;  %v5089_v15 = vpack.c.bf16 %v802_v0, %v796_v22 }
 0x2c0   : > { %975 = vmatmul.mubr.f32.vlgmr.msra.gmra.mrb[0].mxu1 %v7109_v25  ;;  %v5081_v10 = vpack.c.bf16 %v778_v7, %v772_v6  ;;  %v709_v6 = vld [vmem:[#allocation8 + $0xb8] sm:$0xff] }
 0x2c1   : > { %5054 = vmatpush1.bf16.msra.mxu1 %v5053_v23  ;;  %v7115_v31 = vadd.f32 %v679_v11, %v670_v2  ;;  %v7117_v32 = vadd.f32 %v675_v13, %v669_v4  ;;  %v5083_v11 = vpack.c.bf16 %v791_v9, %v785_v8  ;;  %v790_v13 = vld [vmem:[#allocation8 + $0x340] sm:$0xff]  ;;  %v815_v23 = vld [vmem:[#allocation8 + $0x408] sm:$0xff]  ;;  %v733_v22 = vld [vmem:[#allocation8 + $0x178] sm:$0xff] }
 0x2c2   : > { %5056 = vmatprep.subr.bf16.mxu1 %v5055_v27  ;;  %v5085_v18 = vpack.c.bf16 %v790_v13, %v784_v12  ;;  %v5091_v26 = vpack.c.bf16 %v815_v23, %v809_v1  ;;  %v808_v27 = vld [vmem:[#allocation8 + $0x3d0] sm:$0xff]  ;;  %v827_v2 = vld [vmem:[#allocation8 + $0x468] sm:$0xff]  ;;  %v702_v9 = vld [vmem:[#allocation8 + $0x80] sm:$0xff] }
 0x2c3   : > { %980 = vmatprep.mubr.f32.mxu1 %v7115_v31  ;;  %v5093_v4 = vpack.c.bf16 %v814_v14, %v808_v27  ;;  %v5095_v29 = vpack.c.bf16 %v827_v2, %v821_v28  ;;  %v721_v12 = vld [vmem:[#allocation8 + $0x118] sm:$0xff]  ;;  %v726_v23 = vld [vmem:[#allocation8 + $0x140] sm:$0xff] }
 0x2c4   : > { %981 = vmatmul.mubr.f32.gmra.mrb[2].mxu1 %v7117_v32  ;;  %v745_v27 = vld [vmem:[#allocation8 + $0x1d8] sm:$0xff]  ;;  %v738_v2 = vld [vmem:[#allocation8 + $0x1a0] sm:$0xff] }
 0x2c5   : > { %5058 = vmatpush1.bf16.msra.mxu1 %v5057_v33  ;;  %1051 = vmatprep.mubr.f32.mxu1 %v7107_v24  ;;  %v826_v33 = vld [vmem:[#allocation8 + $0x460] sm:$0xff] }
 0x2c6   : > { %5060 = vmatprep.subr.bf16.mxu1 %v5059_v21  ;;  %v833_v21 = vld [vmem:[#allocation8 + $0x498] sm:$0xff]  ;;  %v5097_v34 = vpack.c.bf16 %v826_v33, %v820_v30 }
 0x2c7   : > { %v5099_v35 = vpack.c.bf16 %v839_v20, %v833_v21  ;;  %v757_v30 = vld [vmem:[#allocation8 + $0x238] sm:$0xff]  ;;  %v756_v20 = vld [vmem:[#allocation8 + $0x230] sm:$0xff] }
 0x2c9   : > { %5062 = vmatpush1.bf16.msra.mxu1 %v5061_v37  ;;  %v838_v37 = vld [vmem:[#allocation8 + $0x4c0] sm:$0xff] }
 0x2ca   : > { %5064 = vmatprep.subr.bf16.mxu1 %v5063_v38  ;;  %v845_v38 = vld [vmem:[#allocation8 + $0x4f8] sm:$0xff]  ;;  %v5101_v40 = vpack.c.bf16 %v838_v37, %v832_v36 }
 0x2cb   : > { %v5103_v41 = vpack.c.bf16 %v851_v39, %v845_v38  ;;  %v762_v38 = vld [vmem:[#allocation8 + $0x260] sm:$0xff]  ;;  %v768_v39 = vld [vmem:[#allocation8 + $0x290] sm:$0xff] }
 0x2cd   : > { %5066 = vmatpush1.bf16.msra.mxu1 %v5065_v43  ;;  %v850_v43 = vld [vmem:[#allocation8 + $0x520] sm:$0xff] }
 0x2ce   : > { %5068 = vmatprep.subr.bf16.mxu1 %v5067_v44  ;;  %v857_v44 = vld [vmem:[#allocation8 + $0x558] sm:$0xff]  ;;  %v5105_v46 = vpack.c.bf16 %v850_v43, %v844_v42  ;;  %v5141_v42 = vpack.c.bf16 %v768_v39, %v762_v38 }
 0x2cf   : > { %v5107_v47 = vpack.c.bf16 %v863_v45, %v857_v44  ;;  %v774_v44 = vld [vmem:[#allocation8 + $0x2c0] sm:$0xff]  ;;  %v780_v45 = vld [vmem:[#allocation8 + $0x2f0] sm:$0xff] }
 0x2d1   : > { %5070 = vmatpush1.bf16.msra.mxu1 %v5069_v49  ;;  %v862_v49 = vld [vmem:[#allocation8 + $0x580] sm:$0xff] }
 0x2d2   : > { %5072 = vmatprep.subr.bf16.mxu1 %v5071_v50  ;;  %v869_v50 = vld [vmem:[#allocation8 + $0x5b8] sm:$0xff]  ;;  %v5109_v52 = vpack.c.bf16 %v862_v49, %v856_v48  ;;  %v5145_v48 = vpack.c.bf16 %v780_v45, %v774_v44 }
 0x2d3   : > { %v5111_v53 = vpack.c.bf16 %v875_v51, %v869_v50  ;;  %v786_v50 = vld [vmem:[#allocation8 + $0x320] sm:$0xff]  ;;  %v792_v51 = vld [vmem:[#allocation8 + $0x350] sm:$0xff] }
 0x2d5   : > { %5074 = vmatpush1.bf16.msra.mxu1 %v5073_v55  ;;  %v874_v55 = vld [vmem:[#allocation8 + $0x5e0] sm:$0xff] }
 0x2d6   : > { %5076 = vmatprep.subr.bf16.mxu1 %v5075_v56  ;;  %v691_v56 = vld [vmem:[#allocation8 + $0x28] sm:$0xff]  ;;  %v5113_v58 = vpack.c.bf16 %v874_v55, %v868_v54  ;;  %v5149_v54 = vpack.c.bf16 %v792_v51, %v786_v50 }
 0x2d7   : > { %v5115_v59 = vpack.c.bf16 %v697_v57, %v691_v56  ;;  %v798_v56 = vld [vmem:[#allocation8 + $0x380] sm:$0xff]  ;;  %v804_v57 = vld [vmem:[#allocation8 + $0x3b0] sm:$0xff] }
 0x2d9   : > { %5078 = vmatpush1.bf16.msra.mxu1 %v5077_v62  ;;  %v696_v62 = vld [vmem:[#allocation8 + $0x50] sm:$0xff] }
 0x2da   : > { %5080 = vmatprep.subr.bf16.mxu1 %v5079_v5  ;;  %v703_v5 = vld [vmem:[#allocation8 + $0x88] sm:$0xff]  ;;  %v5117_v7 = vpack.c.bf16 %v696_v62, %v690_v60  ;;  %v5153_v60 = vpack.c.bf16 %v804_v57, %v798_v56 }
 0x2db   : > { %v5119_v8 = vpack.c.bf16 %v709_v6, %v703_v5  ;;  %v810_v5 = vld [vmem:[#allocation8 + $0x3e0] sm:$0xff]  ;;  %v816_v6 = vld [vmem:[#allocation8 + $0x410] sm:$0xff] }
 0x2dd   : > { %5082 = vmatpush1.bf16.msra.mxu1 %v5081_v10  ;;  %v708_v10 = vld [vmem:[#allocation8 + $0xb0] sm:$0xff] }
 0x2de   : > { %5084 = vmatprep.subr.bf16.mxu1 %v5083_v11  ;;  %v715_v11 = vld [vmem:[#allocation8 + $0xe8] sm:$0xff]  ;;  %v5121_v13 = vpack.c.bf16 %v708_v10, %v702_v9  ;;  %v5157_v9 = vpack.c.bf16 %v816_v6, %v810_v5 }
 0x2df   : > { %v5123_v16 = vpack.c.bf16 %v721_v12, %v715_v11  ;;  %v822_v11 = vld [vmem:[#allocation8 + $0x440] sm:$0xff]  ;;  %v828_v12 = vld [vmem:[#allocation8 + $0x470] sm:$0xff] }
 0x2e1   : > { %5086 = vmatpush1.bf16.msra.mxu1 %v5085_v18  ;;  %v720_v18 = vld [vmem:[#allocation8 + $0x110] sm:$0xff] }
 0x2e2   : > { %5088 = vmatprep.subr.bf16.mxu1 %v5087_v19  ;;  %v727_v19 = vld [vmem:[#allocation8 + $0x148] sm:$0xff]  ;;  %v5125_v0 = vpack.c.bf16 %v720_v18, %v714_v17  ;;  %v5161_v17 = vpack.c.bf16 %v828_v12, %v822_v11 }
 0x2e3   : > { %v5127_v1 = vpack.c.bf16 %v733_v22, %v727_v19  ;;  %v834_v19 = vld [vmem:[#allocation8 + $0x4a0] sm:$0xff]  ;;  %v840_v22 = vld [vmem:[#allocation8 + $0x4d0] sm:$0xff] }
 0x2e5   : > { %5090 = vmatpush1.bf16.msra.mxu1 %v5089_v15  ;;  %v732_v15 = vld [vmem:[#allocation8 + $0x170] sm:$0xff] }
 0x2e6   : > { %5092 = vmatprep.subr.bf16.mxu1 %v5091_v26  ;;  %v739_v26 = vld [vmem:[#allocation8 + $0x1a8] sm:$0xff]  ;;  %v5129_v14 = vpack.c.bf16 %v732_v15, %v726_v23  ;;  %v5165_v23 = vpack.c.bf16 %v840_v22, %v834_v19 }
 0x2e7   : > { %v5131_v28 = vpack.c.bf16 %v745_v27, %v739_v26  ;;  %v846_v26 = vld [vmem:[#allocation8 + $0x500] sm:$0xff]  ;;  %v852_v27 = vld [vmem:[#allocation8 + $0x530] sm:$0xff] }
 0x2e9   : > { %5094 = vmatpush1.bf16.msra.mxu1 %v5093_v4  ;;  %v744_v4 = vld [vmem:[#allocation8 + $0x1d0] sm:$0xff] }
 0x2ea   : > { %5096 = vmatprep.subr.bf16.mxu1 %v5095_v29  ;;  %v751_v29 = vld [vmem:[#allocation8 + $0x208] sm:$0xff]  ;;  %v5133_v33 = vpack.c.bf16 %v744_v4, %v738_v2  ;;  %v5169_v2 = vpack.c.bf16 %v852_v27, %v846_v26 }
 0x2eb   : > { %v5135_v21 = vpack.c.bf16 %v757_v30, %v751_v29  ;;  %v858_v29 = vld [vmem:[#allocation8 + $0x560] sm:$0xff]  ;;  %v864_v30 = vld [vmem:[#allocation8 + $0x590] sm:$0xff] }
 0x2ed   : > { %5098 = vmatpush1.bf16.msra.mxu1 %v5097_v34  ;;  %v763_v34 = vld [vmem:[#allocation8 + $0x268] sm:$0xff] }
 0x2ee   : > { %5100 = vmatprep.subr.bf16.mxu1 %v5099_v35  ;;  %v769_v35 = vld [vmem:[#allocation8 + $0x298] sm:$0xff] }
 0x2ef   : > { %v5139_v37 = vpack.c.bf16 %v769_v35, %v763_v34  ;;  %v870_v34 = vld [vmem:[#allocation8 + $0x5c0] sm:$0xff]  ;;  %v876_v35 = vld [vmem:[#allocation8 + $0x5f0] sm:$0xff] }
 0x2f1   : > { %5102 = vmatpush1.bf16.msra.mxu1 %v5101_v40  ;;  %v775_v40 = vld [vmem:[#allocation8 + $0x2c8] sm:$0xff] }
 0x2f2   : > { %5104 = vmatprep.subr.bf16.mxu1 %v5103_v41  ;;  %v781_v41 = vld [vmem:[#allocation8 + $0x2f8] sm:$0xff] }
 0x2f3   : > { %v5143_v43 = vpack.c.bf16 %v781_v41, %v775_v40  ;;  %v890_v41 = vsub.s32 2, %v7093_v61 }
 0x2f5   : > { %5106 = vmatpush1.bf16.msra.mxu1 %v5105_v46  ;;  %v787_v46 = vld [vmem:[#allocation8 + $0x328] sm:$0xff] }
 0x2f6   : > { %5108 = vmatprep.subr.bf16.mxu1 %v5107_v47  ;;  %v793_v47 = vld [vmem:[#allocation8 + $0x358] sm:$0xff] }
 0x2f7   : > { %v5147_v49 = vpack.c.bf16 %v793_v47, %v787_v46 }
 0x2f9   : > { %5110 = vmatpush1.bf16.msra.mxu1 %v5109_v52  ;;  %v799_v52 = vld [vmem:[#allocation8 + $0x388] sm:$0xff] }
 0x2fa   : > { %5112 = vmatprep.subr.bf16.mxu1 %v5111_v53  ;;  %v805_v53 = vld [vmem:[#allocation8 + $0x3b8] sm:$0xff] }
 0x2fb   : > { %v5151_v55 = vpack.c.bf16 %v805_v53, %v799_v52 }
 0x2fd   : > { %5114 = vmatpush1.bf16.msra.mxu1 %v5113_v58  ;;  %v811_v58 = vld [vmem:[#allocation8 + $0x3e8] sm:$0xff] }
 0x2fe   : > { %5116 = vmatprep.subr.bf16.mxu1 %v5115_v59  ;;  %v817_v59 = vld [vmem:[#allocation8 + $0x418] sm:$0xff] }
 0x2ff   : > { %v5155_v62 = vpack.c.bf16 %v817_v59, %v811_v58 }
 0x300   : > { %1052 = vmatmul.mubr.f32.vlgmr.msra.gmra.mrb[4].mxu1 %v7109_v25 }
 0x301   : > { %1057 = vmatprep.mubr.f32.mxu1 %v7115_v31  ;;  %5118 = vmatpush1.bf16.msra.mxu1 %v5117_v7  ;;  %v823_v7 = vld [vmem:[#allocation8 + $0x448] sm:$0xff] }
 0x302   : > { %5120 = vmatprep.subr.bf16.mxu1 %v5119_v8  ;;  %v829_v8 = vld [vmem:[#allocation8 + $0x478] sm:$0xff] }
 0x303   : > { %v5159_v10 = vpack.c.bf16 %v829_v8, %v823_v7  ;;  %v6581_v8 = vmov 1983009808  }
 0x304   : > { %1058 = vmatmul.mubr.f32.gmra.mrb[6].mxu1 %v7117_v32 }
 0x305   : > { %5122 = vmatpush1.bf16.msra.mxu1 %v5121_v13  ;;  %1128 = vmatprep.mubr.f32.mxu1 %v7107_v24  ;;  %v750_v24 = vld [vmem:[#allocation8 + $0x200] sm:$0xff]  ;;  %v835_v13 = vld [vmem:[#allocation8 + $0x4a8] sm:$0xff] }
 0x306   : > { %5124 = vmatprep.subr.bf16.mxu1 %v5123_v16  ;;  %v5137_v36 = vpack.c.bf16 %v756_v20, %v750_v24  ;;  %v841_v16 = vld [vmem:[#allocation8 + $0x4d8] sm:$0xff]  ;;  %v5173_v24 = vpack.c.bf16 %v864_v30, %v858_v29 }
 0x307   : > { %v5163_v18 = vpack.c.bf16 %v841_v16, %v835_v13 }
 0x309   : > { %5126 = vmatpush1.bf16.msra.mxu1 %v5125_v0  ;;  %v847_v0 = vld [vmem:[#allocation8 + $0x508] sm:$0xff] }
 0x30a   : > { %5128 = vmatprep.subr.bf16.mxu1 %v5127_v1  ;;  %v853_v1 = vld [vmem:[#allocation8 + $0x538] sm:$0xff] }
 0x30b   : > { %v5167_v15 = vpack.c.bf16 %v853_v1, %v847_v0 }
 0x30d   : > { %5130 = vmatpush1.bf16.msra.mxu1 %v5129_v14  ;;  %v859_v14 = vld [vmem:[#allocation8 + $0x568] sm:$0xff] }
 0x30e   : > { %5132 = vmatprep.subr.bf16.mxu1 %v5131_v28  ;;  %v865_v28 = vld [vmem:[#allocation8 + $0x598] sm:$0xff] }
 0x30f   : > { %v5171_v4 = vpack.c.bf16 %v865_v28, %v859_v14 }
 0x311   : > { %5134 = vmatpush1.bf16.msra.mxu1 %v5133_v33  ;;  %v871_v33 = vld [vmem:[#allocation8 + $0x5c8] sm:$0xff] }
 0x312   : > { %5136 = vmatprep.subr.bf16.mxu1 %v5135_v21  ;;  %v877_v21 = vld [vmem:[#allocation8 + $0x5f8] sm:$0xff] }
 0x313   : > { %v5175_v20 = vpack.c.bf16 %v877_v21, %v871_v33 }
 0x315   : > { %5138 = vmatpush1.bf16.msra.mxu1 %v5137_v36  ;;  %v5177_v36 = vpack.c.bf16 %v876_v35, %v870_v34 }
 0x316   : > { %5140 = vmatprep.subr.bf16.mxu1 %v5139_v37 }
 0x319   : > { %5142 = vmatpush1.bf16.msra.mxu1 %v5141_v42  ;;  %v894_v42 = vsub.s32 3, %v7093_v61 }
 0x31a   : > { %5144 = vmatprep.subr.bf16.mxu1 %v5143_v43  ;;  %v7131_v43 = vld [vmem:[#allocation10] sm:$0x3f] }
 0x31b   : > { %v891_v44 = vrot.slane %v7131_v43, %v890_v41  ;;  %v887_v58 = vrot.slane %v7131_v43, %v7096_v63 }
 0x31d   : > { %5146 = vmatpush1.bf16.msra.mxu1 %v5145_v48 }
 0x31e   : > { %5148 = vmatprep.subr.bf16.mxu1 %v5147_v49 }
 0x321   : > { %5150 = vmatpush1.bf16.msra.mxu1 %v5149_v54 }
 0x322   : > { %5152 = vmatprep.subr.bf16.mxu1 %v5151_v55 }
 0x325   : > { %5154 = vmatpush1.bf16.msra.mxu1 %v5153_v60 }
 0x326   : > { %5156 = vmatprep.subr.bf16.mxu1 %v5155_v62 }
 0x329   : > { %5158 = vmatpush1.bf16.msra.mxu1 %v5157_v9  ;;  %v1160_v9 = vunpack.c.l.s4 %v6581_v8 }
 0x32a   : > { %5160 = vmatprep.subr.bf16.mxu1 %v5159_v10  ;;  %v6582_v10 = vmov 1934713408  }
 0x32b   : > { %v1192_v11 = vunpack.c.l.s4 %v6582_v10  ;;  %v1161_v12 = vunpack.c.0.s8 %v1160_v9 }
 0x32d   : > { %5162 = vmatpush1.bf16.msra.mxu1 %v5161_v17  ;;  %v1193_v13 = vunpack.c.0.s8 %v1192_v11 }
 0x32e   : > { %5164 = vmatprep.subr.bf16.mxu1 %v5163_v18  ;;  %v7170_v18 = vsub.s32 %v1161_v12, %v7093_v61 }
 0x32f   : > { %v7173_v0 = vsub.s32 %v1193_v13, %v7093_v61 }
 0x331   : > { %5166 = vmatpush1.bf16.msra.mxu1 %v5165_v23 }
 0x332   : > { %5168 = vmatprep.subr.bf16.mxu1 %v5167_v15 }
 0x335   : > { %5170 = vmatpush1.bf16.msra.mxu1 %v5169_v2 }
 0x336   : > { %5172 = vmatprep.subr.bf16.mxu1 %v5171_v4 }
 0x339   : > { %5174 = vmatpush1.bf16.msra.mxu1 %v5173_v24 }
 0x33a   : > { %5176 = vmatprep.subr.bf16.mxu1 %v5175_v20 }
 0x33d   : > { %5178 = vmatpush1.bf16.msra.mxu1 %v5177_v36 }
 0x340   : > { %1129 = vmatmul.mubr.f32.vlgmr.msra.gmra.mrb[8].mxu1 %v7109_v25  ;;  %v895_v25 = vrot.slane %v7131_v43, %v894_v42 }
 0x341   : > { %1134 = vmatprep.mubr.f32.mxu1 %v7115_v31 }
 0x344   : > { %1135 = vmatmul.mubr.f32.gmra.mrb[10].mxu1 %v7117_v32  ;;  %v883_v32 = vrot.slane %v7131_v43, %v7099_v3 }
 0x393   : > { %v976_v37 = vpop.f32.mrb[0].mxu1 }
 0x394   : > { %v978_v38 = vpop.f32.mrb[1].mxu1  ;;  %v977_v51 = vadd.f32 %v976_v37, %v883_v32 }
 0x395   : > { %v979_v59 = vadd.f32 %v978_v38, %v887_v58 }
 0x397   : > { %v982_v39 = vpop.f32.mrb[2].mxu1  ;;  %v1157_v27 = vcombine.low %v977_v51, %v979_v59  ;;  %v1158_v14 = vcombine.high %v977_v51, %v979_v59 }
 0x398   : > { %v984_v40 = vpop.f32.mrb[3].mxu1  ;;  %v983_v57 = vadd.f32 %v982_v39, %v883_v32 }
 0x399   : > { %v985_v60 = vadd.f32 %v984_v40, %v887_v58  ;;  %v1165_v36 = vrot.slane %v1157_v27, %v7170_v18  ;;  %v1172_v37 = vrot.slane %v1158_v14, %v7170_v18 }
 0x39b   : > { %v1225_v33 = vcombine.low %v983_v57, %v985_v60  ;;  %v1226_v21 = vcombine.high %v983_v57, %v985_v60 }
 0x39d   : > { %v7189_v32 = vrot.slane %v1226_v21, %v7170_v18 }
 0x3d3   : > { %v1053_v31 = vpop.f32.mrb[4].mxu1 }
 0x3d4   : > { %v1054_v45 = vadd.f32 %v1053_v31, %v891_v44  ;;  %v1055_v46 = vpop.f32.mrb[5].mxu1  ;;  %v7186_v31 = vrot.slane %v1225_v33, %v7170_v18 }
 0x3d5   : > { %v1056_v47 = vadd.f32 %v1055_v46, %v895_v25 }
 0x3d6   : > { %1431 = vrot.lane.b32.xlu0 %v1054_v45, %s6580_s13 }
 0x3d7   : > { %v1445_v48 = vcombine.low %v1054_v45, %v1056_v47  ;;  %v1446_v49 = vcombine.high %v1054_v45, %v1056_v47  ;;  %v1059_v50 = vpop.f32.mrb[6].mxu1  ;;  %1439 = vrot.lane.b32.xlu1 %v1056_v47, %s6580_s13 }
 0x3d8   : > { %v7143_v52 = vadd.f32 %v1059_v50, %v891_v44  ;;  %v1061_v53 = vpop.f32.mrb[7].mxu1 }
 0x3d9   : > { %v7145_v54 = vadd.f32 %v1061_v53, %v895_v25  ;;  %v1453_v1 = vrot.slane %v1445_v48, %v7170_v18  ;;  %v1460_v23 = vrot.slane %v1446_v49, %v7170_v18 }
 0x3da   : > { %1143 = vrot.lane.b32.xlu0 %v977_v51, %s6580_s13 }
 0x3db   : > { %v1513_v55 = vcombine.low %v7143_v52, %v7145_v54  ;;  %v1514_v56 = vcombine.high %v7143_v52, %v7145_v54  ;;  %1433 = vrot.lane.b32.xlu1 %v7143_v52, %s6580_s13 }
 0x3dd   : > { %v1521_v51 = vrot.slane %v1513_v55, %v7170_v18  ;;  %v1528_v52 = vrot.slane %v1514_v56, %v7170_v18 }
 0x3de   : > { %1145 = vrot.lane.b32.xlu0 %v983_v57, %s6580_s13 }
 0x3df   : > { %1441 = vrot.lane.b32.xlu1 %v7145_v54, %s6580_s13 }
 0x3e3   : > { %1151 = vrot.lane.b32.xlu1 %v979_v59, %s6580_s13 }
 0x3e7   : > { %1153 = vrot.lane.b32.xlu1 %v985_v60, %s6580_s13 }
 0x413   : > { %v7161_v62 = vpop.f32.mrb[8].mxu1 }
 0x414   : > { %v7163_v5 = vpop.f32.mrb[9].mxu1 }
 0x417   : > { %v7165_v6 = vpop.f32.mrb[10].mxu1 }
 0x418   : > { %v7167_v7 = vpop.f32.mrb[11].mxu1 }
 0x448   : > { %v1432_v16 = vpop.permute.xlu0 %1431 }
 0x449   : > { %v1440_v17 = vpop.permute.xlu1 %1439 }
 0x44a   : > { %v1461_v19 = vcombine.low %v1432_v16, %v1440_v17  ;;  %v1462_v22 = vcombine.high %v1432_v16, %v1440_v17 }
 0x44c   : > { %v1469_v15 = vrot.slane %v1461_v19, %v7170_v18  ;;  %v1476_v26 = vrot.slane %v1462_v22, %v7170_v18  ;;  %v1144_v53 = vpop.permute.xlu0 %1143 }
 0x44d   : > { %v1434_v28 = vpop.permute.xlu1 %1433 }
 0x44e   : > { %v1477_v2 = vcombine.low %v1453_v1, %v1469_v15  ;;  %v1478_v4 = vcombine.high %v1453_v1, %v1469_v15  ;;  %v1493_v29 = vcombine.low %v1460_v23, %v1476_v26  ;;  %v1494_v30 = vcombine.high %v1460_v23, %v1476_v26 }
 0x450   : > { %v1485_v24 = vrot.slane %v1477_v2, %v7173_v0  ;;  %v1492_v20 = vrot.slane %v1478_v4, %v7173_v0  ;;  %v1501_v34 = vrot.slane %v1493_v29, %v7173_v0  ;;  %v1508_v35 = vrot.slane %v1494_v30, %v7173_v0  ;;  %v1146_v33 = vpop.permute.xlu0 %1145 }
 0x451   : > { %v1442_v38 = vpop.permute.xlu1 %1441 }
 0x452   : > { %v1581_v39 = vcombine.low %v1485_v24, %v1492_v20  ;;  %v4840_v40 = vcombine.high %v1485_v24, %v1492_v20  ;;  %v1597_v44 = vcombine.low %v1501_v34, %v1508_v35  ;;  %v4841_v25 = vcombine.high %v1501_v34, %v1508_v35 }
 0x453   : > { %v1529_v45 = vcombine.low %v1434_v28, %v1442_v38  ;;  %v1530_v46 = vcombine.high %v1434_v28, %v1442_v38 }
 0x454   : > { %v7192_v47 = vrot.slane %v1581_v39, %v7170_v18  ;;  %v7195_v48 = vrot.slane %v4840_v40, %v7170_v18  ;;  %v7198_v49 = vrot.slane %v1597_v44, %v7170_v18  ;;  %v1612_v50 = vrot.slane %v4841_v25, %v7170_v18 }
 0x455   : > { %v1537_v54 = vrot.slane %v1529_v45, %v7170_v18  ;;  %v1544_v57 = vrot.slane %v1530_v46, %v7170_v18  ;;  %v1152_v58 = vpop.permute.xlu1 %1151 }
 0x456   : > { %v1173_v59 = vcombine.low %v1144_v53, %v1152_v58  ;;  %v1174_v60 = vcombine.high %v1144_v53, %v1152_v58  ;;  %v1613_v8 = vcombine.low %v7192_v47, %v7195_v48  ;;  %v1614_v9 = vcombine.high %v7192_v47, %v7195_v48 }
 0x457   : > { %v1545_v10 = vcombine.low %v1521_v51, %v1537_v54  ;;  %v1546_v11 = vcombine.high %v1521_v51, %v1537_v54  ;;  %v1561_v12 = vcombine.low %v1528_v52, %v1544_v57  ;;  %v1562_v55 = vcombine.high %v1528_v52, %v1544_v57 }
 0x458   : > { %v1181_v56 = vrot.slane %v1173_v59, %v7170_v18  ;;  %v1188_v13 = vrot.slane %v1174_v60, %v7170_v18  ;;  %v7212_v16 = vrot.slane %v1613_v8, %v7173_v0  ;;  %v1629_v17 = vcombine.low %v7198_v49, %v1612_v50 }
 0x459   : > { %v1553_v19 = vrot.slane %v1545_v10, %v7173_v0  ;;  %v1560_v22 = vrot.slane %v1546_v11, %v7173_v0  ;;  %v1569_v1 = vrot.slane %v1561_v12, %v7173_v0  ;;  %v1576_v23 = vrot.slane %v1562_v55, %v7173_v0  ;;  %v1154_v28 = vpop.permute.xlu1 %1153 }
 0x45a   : > { %v1189_v15 = vcombine.low %v1165_v36, %v1181_v56  ;;  %v1190_v26 = vcombine.high %v1165_v36, %v1181_v56  ;;  %v1205_v27 = vcombine.low %v1172_v37, %v1188_v13  ;;  %v1206_v14 = vcombine.high %v1172_v37, %v1188_v13 }
 0x45b   : > { %v1649_v2 = vcombine.low %v1553_v19, %v1560_v22  ;;  %v4842_v4 = vcombine.high %v1553_v19, %v1560_v22  ;;  %v1665_v29 = vcombine.low %v1569_v1, %v1576_v23  ;;  %v4843_v30 = vcombine.high %v1569_v1, %v1576_v23 }
 0x45c   : > { %v1197_v21 = vrot.slane %v1189_v15, %v7173_v0  ;;  %v1204_v24 = vrot.slane %v1190_v26, %v7173_v0  ;;  %v1213_v20 = vrot.slane %v1205_v27, %v7173_v0  ;;  %v1220_v34 = vrot.slane %v1206_v14, %v7173_v0 }
 0x45d   : > { %v1241_v35 = vcombine.low %v1146_v33, %v1154_v28  ;;  %v1242_v38 = vcombine.high %v1146_v33, %v1154_v28  ;;  %v1630_v36 = vcombine.high %v7198_v49, %v1612_v50  ;;  %v1637_v37 = vrot.slane %v1629_v17, %v7173_v0 }
 0x45e   : > { %v1656_v39 = vrot.slane %v1649_v2, %v7170_v18  ;;  %v1664_v40 = vrot.slane %v4842_v4, %v7170_v18  ;;  %v1672_v44 = vrot.slane %v1665_v29, %v7170_v18  ;;  %v1680_v25 = vrot.slane %v4843_v30, %v7170_v18 }
 0x45f   : > { %v1249_v45 = vrot.slane %v1241_v35, %v7170_v18  ;;  %v1256_v46 = vrot.slane %v1242_v38, %v7170_v18  ;;  %v1645_v47 = vcombine.low %v7212_v16, %v1637_v37  ;;  %v1646_v48 = vcombine.high %v7212_v16, %v1637_v37 }
 0x460   : > { %v1681_v51 = vcombine.low %v1656_v39, %v1664_v40  ;;  %v1682_v49 = vcombine.high %v1656_v39, %v1664_v40  ;;  %v1697_v50 = vcombine.low %v1672_v44, %v1680_v25  ;;  %v1698_v52 = vcombine.high %v1672_v44, %v1680_v25 }
 0x461   : > { %v1257_v53 = vcombine.low %v7186_v31, %v1249_v45  ;;  %v1258_v54 = vcombine.high %v7186_v31, %v1249_v45  ;;  %v1273_v57 = vcombine.low %v7189_v32, %v1256_v46  ;;  %v1274_v58 = vcombine.high %v7189_v32, %v1256_v46 }
 0x462   : > { %v1689_v59 = vrot.slane %v1681_v51, %v7173_v0  ;;  %v1705_v60 = vrot.slane %v1697_v50, %v7173_v0  ;;  %v1628_v8 = vrot.slane %v1614_v9, %v7173_v0  ;;  %v1644_v10 = vrot.slane %v1630_v36, %v7173_v0 }
 0x463   : > { %v1265_v11 = vrot.slane %v1257_v53, %v7173_v0  ;;  %v1272_v12 = vrot.slane %v1258_v54, %v7173_v0  ;;  %v1281_v55 = vrot.slane %v1273_v57, %v7173_v0  ;;  %v1288_v31 = vrot.slane %v1274_v58, %v7173_v0 }
 0x464   : > { %v1713_v56 = vcombine.low %v1689_v59, %v1705_v60  ;;  %v1714_v13 = vcombine.high %v1689_v59, %v1705_v60  ;;  %v1648_v16 = vcombine.high %v1628_v8, %v1644_v10  ;;  %v1696_v32 = vrot.slane %v1682_v49, %v7173_v0 }
 0x465   : > { %v1361_v17 = vcombine.low %v1265_v11, %v1272_v12  ;;  %v4838_v19 = vcombine.high %v1265_v11, %v1272_v12  ;;  %v1377_v22 = vcombine.low %v1281_v55, %v1288_v31  ;;  %v4839_v1 = vcombine.high %v1281_v55, %v1288_v31 }
 0x466   : > { %v5179_v23 = vpack.c.bf16 %v1713_v56, %v1645_v47  ;;  %v1712_v15 = vrot.slane %v1698_v52, %v7173_v0  ;;  %v1293_v26 = vcombine.low %v1197_v21, %v1204_v24  ;;  %v4836_v27 = vcombine.high %v1197_v21, %v1204_v24 }
 0x467   : > { %v1368_v14 = vrot.slane %v1361_v17, %v7170_v18  ;;  %v1376_v28 = vrot.slane %v4838_v19, %v7170_v18  ;;  %v1384_v2 = vrot.slane %v1377_v22, %v7170_v18  ;;  %v1392_v4 = vrot.slane %v4839_v1, %v7170_v18 }
 0x468   : > { %5181 = vmatprep.subr.msk.bf16.mxu0 %vm7248_vm1, %v5179_v23  ;;  %v1716_v29 = vcombine.high %v1696_v32, %v1712_v15  ;;  %v1300_v30 = vrot.slane %v1293_v26, %v7170_v18  ;;  %v1308_v33 = vrot.slane %v4836_v27, %v7170_v18  ;;  %v1309_v35 = vcombine.low %v1213_v20, %v1220_v34 }
 0x469   : > { %v1394_v38 = vcombine.high %v1368_v14, %v1376_v28  ;;  %v1410_v36 = vcombine.high %v1384_v2, %v1392_v4  ;;  %5184 = vmatpush3.bf16.xpose.msk.msra.mxu0 %vm7248_vm1, %v5179_v23  ;;  %v4837_v21 = vcombine.high %v1213_v20, %v1220_v34  ;;  %v5185_v24 = vpack.c.bf16 %v1714_v13, %v1646_v48 }
 0x46a   : > { %v5197_v37 = vpack.c.bf16 %v1716_v29, %v1648_v16  ;;  %v1316_v39 = vrot.slane %v1309_v35, %v7170_v18  ;;  %v1325_v40 = vcombine.low %v1300_v30, %v1308_v33  ;;  %v1326_v44 = vcombine.high %v1300_v30, %v1308_v33 }
 0x46b   : > { %v1324_v25 = vrot.slane %v4837_v21, %v7170_v18  ;;  %5187 = vmatprep.subr.msk.bf16.mxu0 %vm7248_vm1, %v5185_v24  ;;  %v1393_v45 = vcombine.low %v1368_v14, %v1376_v28  ;;  %v1408_v46 = vrot.slane %v1394_v38, %v7173_v0  ;;  %v1409_v47 = vcombine.low %v1384_v2, %v1392_v4 }
 0x46c   : > { %5199 = vmatprep.subr.msk.bf16.mxu1 %vm7248_vm1, %v5197_v37  ;;  %v1647_v51 = vcombine.low %v1628_v8, %v1644_v10  ;;  %v1333_v20 = vrot.slane %v1325_v40, %v7173_v0  ;;  %v1340_v49 = vrot.slane %v1326_v44, %v7173_v0  ;;  %v1424_v50 = vrot.slane %v1410_v36, %v7173_v0 }
 0x46d   : > { %5202 = vmatpush3.bf16.xpose.msk.msra.mxu1 %vm7248_vm1, %v5197_v37  ;;  %v1341_v34 = vcombine.low %v1316_v39, %v1324_v25  ;;  %v1342_v48 = vcombine.high %v1316_v39, %v1324_v25  ;;  %v1401_v52 = vrot.slane %v1393_v45, %v7173_v0  ;;  %v1417_v53 = vrot.slane %v1409_v47, %v7173_v0 }
 0x46e   : > { %v1715_v54 = vcombine.low %v1696_v32, %v1712_v15  ;;  %v1428_v11 = vcombine.high %v1408_v46, %v1424_v50  ;;  %v1427_v56 = vcombine.low %v1408_v46, %v1424_v50  ;;  %v898_v29 = vsub.s32 4, %v7093_v61 }
 0x46f   : > { %v1349_v57 = vrot.slane %v1341_v34, %v7173_v0  ;;  %v1356_v58 = vrot.slane %v1342_v48, %v7173_v0  ;;  %v1425_v10 = vcombine.low %v1401_v52, %v1417_v53  ;;  %v1426_v55 = vcombine.high %v1401_v52, %v1417_v53 }
 0x470   : > { %v5191_v59 = vpack.c.bf16 %v1715_v54, %v1647_v51  ;;  %v902_v30 = vsub.s32 5, %v7093_v61  ;;  %v899_v33 = vrot.slane %v7131_v43, %v898_v29 }
 0x471   : > { %v1357_v60 = vcombine.low %v1333_v20, %v1349_v57  ;;  %v1360_v8 = vcombine.high %v1340_v49, %v1356_v58  ;;  %v1358_v12 = vcombine.high %v1333_v20, %v1349_v57  ;;  %v1359_v31 = vcombine.low %v1340_v49, %v1356_v58 }
 0x472   : > { %v903_v35 = vrot.slane %v7131_v43, %v902_v30  ;;  %v7316_v38 = vadd.f32 %v7165_v6, %v899_v33  ;;  %v1131_v21 = vadd.f32 %v7161_v62, %v899_v33 }
 0x473   : > { %4935 = vmatprep.mubr.msk.f32.mxu0 %vm2005_vm0, %v1357_v60  ;;  %4956 = vmatprep.mubr.msk.f32.mxu1 %vm2005_vm0, %v1360_v8 }
 0x474   : > { %4936 = vmatmul.mubr.msk.f32.vlgmr.msra.gmra.mrb[0].mxu0 %vm2005_vm0, %v1425_v10  ;;  %4957 = vmatmul.mubr.msk.f32.vlgmr.msra.gmra.mrb[12].mxu1 %vm2005_vm0, %v1428_v11  ;;  %v1133_v36 = vadd.f32 %v7163_v5, %v903_v35 }
 0x475   : > { %5190 = vmatpush3.bf16.xpose.msk.msra.mxu0 %vm7248_vm1, %v5185_v24  ;;  %4942 = vmatprep.mubr.msk.f32.mxu0 %vm2005_vm0, %v1358_v12  ;;  %v7324_v24 = vadd.f32 %v7167_v7, %v903_v35 }
 0x476   : > { %5193 = vmatprep.subr.msk.bf16.mxu0 %vm7248_vm1, %v5191_v59 }
 0x47c   : > { %4943 = vmatmul.mubr.msk.f32.vlgmr.msra.gmra.mrb[2].mxu0 %vm2005_vm0, %v1426_v55 }
 0x47d   : > { %5196 = vmatpush3.bf16.xpose.msk.msra.mxu0 %vm7248_vm1, %v5191_v59  ;;  %4949 = vmatprep.mubr.msk.f32.mxu0 %vm2005_vm0, %v1359_v31 }
 0x484   : > { %4950 = vmatmul.mubr.msk.f32.vlgmr.msra.gmra.mrb[4].mxu0 %vm2005_vm0, %v1427_v56  ;;  %v1733_v56 = vcombine.low %v1131_v21, %v1133_v36 }
 0x547   : > { %v4937_v13 = vpop.f32.mrb[0].mxu0  ;;  %v7293_v16 = vpop.f32.mrb[12].mxu1 }
 0x548   : > { %v2084_v32 = vpop.f32.mrb[1].mxu0  ;;  %v7295_v17 = vpop.f32.mrb[13].mxu1  ;;  %v2358_v19 = vsel %vm2354_vm2, %v4937_v13, -inf  ;;  %v2376_v2 = vsel %vm2354_vm2, %v7293_v16, -inf }
 0x549   : > { %2359 = vmax.xlane.f32.xlu1 %v2358_v19  ;;  %v2355_v22 = vsel %vm2354_vm2, %v2084_v32, -inf  ;;  %v2373_v4 = vsel %vm2354_vm2, %v7295_v17, -inf }
 0x54a   : > { %2356 = vmax.xlane.f32.xlu0 %v2355_v22 }
 0x54f   : > { %v4944_v1 = vpop.f32.mrb[2].mxu0 }
 0x550   : > { %v2171_v9 = vpop.f32.mrb[3].mxu0  ;;  %v2364_v23 = vsel %vm2354_vm2, %v4944_v1, -inf }
 0x551   : > { %2365 = vmax.xlane.f32.xlu0 %v2364_v23  ;;  %v2361_v15 = vsel %vm2354_vm2, %v2171_v9, -inf }
 0x555   : > { %2362 = vmax.xlane.f32.xlu0 %v2361_v15  ;;  %v1741_v15 = vrot.slane %v1733_v56, %v7170_v18 }
 0x557   : > { %v4951_v26 = vpop.f32.mrb[4].mxu0 }
 0x558   : > { %v2258_v27 = vpop.f32.mrb[5].mxu0  ;;  %v2370_v14 = vsel %vm2354_vm2, %v4951_v26, -inf }
 0x559   : > { %2371 = vmax.xlane.f32.xlu1 %v2370_v14  ;;  %v2367_v28 = vsel %vm2354_vm2, %v2258_v27, -inf }
 0x55a   : > { %2368 = vmax.xlane.f32.xlu0 %v2367_v28 }
 0x55d   : > { %2377 = vmax.xlane.f32.xlu1 %v2376_v2 }
 0x55e   : > { %2374 = vmax.xlane.f32.xlu0 %v2373_v4 }
 0x56e   : > { %1721 = vrot.lane.b32.xlu1 %v7316_v38, %s6580_s13 }
 0x572   : > { %1727 = vrot.lane.b32.xlu1 %v1133_v36, %s6580_s13 }
 0x574   : > { %1719 = vrot.lane.b32.xlu0 %v1131_v21, %s6580_s13 }
 0x576   : > { %1729 = vrot.lane.b32.xlu1 %v7324_v24, %s6580_s13 }
 0x5d6   : > { %v2360_v43 = vpop.xlane.xlu1 %2359 }
 0x5d7   : > { %v2380_v6 = vsub.f32 %v4937_v13, %v2360_v43  ;;  %v2357_v37 = vpop.xlane.xlu0 %2356  ;;  %v1734_v13 = vcombine.high %v1131_v21, %v1133_v36 }
 0x5d8   : > { %v2379_v39 = vsub.f32 %v2084_v32, %v2357_v37 }
 0x5d9   : > { %v2389_v40 = vmul.f32 1.442695, %v2380_v6 }
 0x5da   : > { %v2387_v44 = vmul.f32 1.442695, %v2379_v39 }
 0x5db   : > { %5999 = vpow2.f32 %v2389_v40 }
 0x5dc   : > { %6001 = vpow2.f32 %v2387_v44 }
 0x5de   : > { %v2366_v5 = vpop.xlane.xlu0 %2365 }
 0x5df   : > { %v2382_v62 = vsub.f32 %v4944_v1, %v2366_v5  ;;  %v1801_v1 = vcombine.low %v7316_v38, %v7324_v24 }
 0x5e1   : > { %v2393_v25 = vmul.f32 1.442695, %v2382_v62  ;;  %v1809_v21 = vrot.slane %v1801_v1, %v7170_v18 }
 0x5e2   : > { %v2363_v45 = vpop.xlane.xlu0 %2362 }
 0x5e3   : > { %6003 = vpow2.f32 %v2393_v25  ;;  %v2381_v7 = vsub.f32 %v2171_v9, %v2363_v45  ;;  %v1802_v9 = vcombine.high %v7316_v38, %v7324_v24 }
 0x5e5   : > { %v7329_v46 = vpop.eup %5999  ;;  %v2391_v47 = vmul.f32 1.442695, %v2381_v7  ;;  %v1816_v24 = vrot.slane %v1802_v9, %v7170_v18 }
 0x5e6   : > { %v7331_v51 = vpop.eup %6001  ;;  %v2372_v20 = vpop.xlane.xlu1 %2371  ;;  %v2406_v34 = vsel %vm2354_vm2, %v7329_v46, 0.0 }
 0x5e7   : > { %6005 = vpow2.f32 %v2391_v47  ;;  %v2384_v48 = vsub.f32 %v4951_v26, %v2372_v20  ;;  %2407 = vadd.xlane.f32.xlu1 %v2406_v34  ;;  %v2369_v49 = vpop.xlane.xlu0 %2368  ;;  %v2403_v50 = vsel %vm2354_vm2, %v7331_v51, 0.0  ;;  %v1748_v26 = vrot.slane %v1734_v13, %v7170_v18 }
 0x5e8   : > { %v2383_v52 = vsub.f32 %v2258_v27, %v2369_v49  ;;  %2404 = vadd.xlane.f32.xlu0 %v2403_v50 }
 0x5e9   : > { %v2397_v53 = vmul.f32 1.442695, %v2384_v48 }
 0x5ea   : > { %v2395_v54 = vmul.f32 1.442695, %v2383_v52  ;;  %v2378_v57 = vpop.xlane.xlu1 %2377 }
 0x5eb   : > { %6007 = vpow2.f32 %v2397_v53  ;;  %v2386_v58 = vsub.f32 %v7293_v16, %v2378_v57  ;;  %v2375_v59 = vpop.xlane.xlu0 %2374 }
 0x5ec   : > { %v2385_v60 = vsub.f32 %v7295_v17, %v2375_v59  ;;  %6009 = vpow2.f32 %v2395_v54 }
 0x5ed   : > { %v7339_v8 = vpop.eup %6003  ;;  %v2401_v10 = vmul.f32 1.442695, %v2386_v58 }
 0x5ee   : > { %v2399_v11 = vmul.f32 1.442695, %v2385_v60  ;;  %v1722_v12 = vpop.permute.xlu1 %1721  ;;  %v2412_v55 = vsel %vm2354_vm2, %v7339_v8, 0.0 }
 0x5ef   : > { %6011 = vpow2.f32 %v2401_v10  ;;  %2413 = vadd.xlane.f32.xlu1 %v2412_v55  ;;  %v1720_v16 = vpop.permute.xlu0 %1719 }
 0x5f0   : > { %6013 = vpow2.f32 %v2399_v11 }
 0x5f1   : > { %v7343_v31 = vpop.eup %6005 }
 0x5f2   : > { %v1728_v32 = vpop.permute.xlu1 %1727  ;;  %v2409_v17 = vsel %vm2354_vm2, %v7343_v31, 0.0 }
 0x5f3   : > { %v1749_v19 = vcombine.low %v1720_v16, %v1728_v32  ;;  %v1750_v22 = vcombine.high %v1720_v16, %v1728_v32  ;;  %2410 = vadd.xlane.f32.xlu0 %v2409_v17 }
 0x5f5   : > { %v7351_v23 = vpop.eup %6007  ;;  %v1757_v27 = vrot.slane %v1749_v19, %v7170_v18  ;;  %v1764_v14 = vrot.slane %v1750_v22, %v7170_v18 }
 0x5f6   : > { %v1730_v28 = vpop.permute.xlu1 %1729  ;;  %v2418_v2 = vsel %vm2354_vm2, %v7351_v23, 0.0  ;;  %v7359_v4 = vpop.eup %6009 }
 0x5f7   : > { %v1765_v33 = vcombine.low %v1741_v15, %v1757_v27  ;;  %v1766_v35 = vcombine.high %v1741_v15, %v1757_v27  ;;  %v1781_v36 = vcombine.low %v1748_v26, %v1764_v14  ;;  %v1782_v38 = vcombine.high %v1748_v26, %v1764_v14  ;;  %2419 = vadd.xlane.f32.xlu0 %v2418_v2 }
 0x5f8   : > { %v1817_v43 = vcombine.low %v1722_v12, %v1730_v28  ;;  %v1818_v6 = vcombine.high %v1722_v12, %v1730_v28  ;;  %v2415_v7 = vsel %vm2354_vm2, %v7359_v4, 0.0 }
 0x5f9   : > { %v7363_v37 = vpop.eup %6011  ;;  %v1773_v39 = vrot.slane %v1765_v33, %v7173_v0  ;;  %v1780_v40 = vrot.slane %v1766_v35, %v7173_v0  ;;  %v1789_v44 = vrot.slane %v1781_v36, %v7173_v0  ;;  %v1796_v5 = vrot.slane %v1782_v38, %v7173_v0 }
 0x5fa   : > { %v1825_v62 = vrot.slane %v1817_v43, %v7170_v18  ;;  %v1832_v25 = vrot.slane %v1818_v6, %v7170_v18  ;;  %v2424_v45 = vsel %vm2354_vm2, %v7363_v37, 0.0  ;;  %v7375_v49 = vpop.eup %6013 }
 0x5fb   : > { %v1869_v47 = vcombine.low %v1773_v39, %v1780_v40  ;;  %v4844_v20 = vcombine.high %v1773_v39, %v1780_v40  ;;  %v1885_v34 = vcombine.low %v1789_v44, %v1796_v5  ;;  %v4845_v48 = vcombine.high %v1789_v44, %v1796_v5  ;;  %2425 = vadd.xlane.f32.xlu1 %v2424_v45 }
 0x5fc   : > { %v1833_v50 = vcombine.low %v1809_v21, %v1825_v62  ;;  %v1834_v52 = vcombine.high %v1809_v21, %v1825_v62  ;;  %v1849_v53 = vcombine.low %v1816_v24, %v1832_v25  ;;  %v1850_v54 = vcombine.high %v1816_v24, %v1832_v25  ;;  %2416 = vadd.xlane.f32.xlu0 %v2415_v7 }
 0x5fd   : > { %v1876_v57 = vrot.slane %v1869_v47, %v7170_v18  ;;  %v1884_v58 = vrot.slane %v4844_v20, %v7170_v18  ;;  %v1892_v59 = vrot.slane %v1885_v34, %v7170_v18  ;;  %v1900_v60 = vrot.slane %v4845_v48, %v7170_v18 }
 0x5fe   : > { %v1841_v10 = vrot.slane %v1833_v50, %v7173_v0  ;;  %v1848_v11 = vrot.slane %v1834_v52, %v7173_v0  ;;  %v1857_v12 = vrot.slane %v1849_v53, %v7173_v0  ;;  %v1864_v55 = vrot.slane %v1850_v54, %v7173_v0 }
 0x5ff   : > { %v2421_v56 = vsel %vm2354_vm2, %v7375_v49, 0.0  ;;  %v1901_v13 = vcombine.low %v1876_v57, %v1884_v58  ;;  %v1917_v16 = vcombine.low %v1892_v59, %v1900_v60  ;;  %v1902_v32 = vcombine.high %v1876_v57, %v1884_v58 }
 0x600   : > { %v1937_v17 = vcombine.low %v1841_v10, %v1848_v11  ;;  %v4846_v19 = vcombine.high %v1841_v10, %v1848_v11  ;;  %v1953_v22 = vcombine.low %v1857_v12, %v1864_v55  ;;  %v4847_v1 = vcombine.high %v1857_v12, %v1864_v55  ;;  %2422 = vadd.xlane.f32.xlu0 %v2421_v56 }
 0x601   : > { %v1916_v9 = vrot.slane %v1902_v32, %v7173_v0  ;;  %v1918_v15 = vcombine.high %v1892_v59, %v1900_v60  ;;  %v1909_v2 = vrot.slane %v1901_v13, %v7173_v0  ;;  %v1925_v33 = vrot.slane %v1917_v16, %v7173_v0 }
 0x602   : > { %v1944_v26 = vrot.slane %v1937_v17, %v7170_v18  ;;  %v1952_v27 = vrot.slane %v4846_v19, %v7170_v18  ;;  %v1960_v14 = vrot.slane %v1953_v22, %v7170_v18  ;;  %v1968_v28 = vrot.slane %v4847_v1, %v7170_v18 }
 0x603   : > { %v1932_v35 = vrot.slane %v1918_v15, %v7173_v0  ;;  %v1933_v62 = vcombine.low %v1909_v2, %v1925_v33  ;;  %v1934_v34 = vcombine.high %v1909_v2, %v1925_v33  ;;  %v3066_v2 = vld [vmem:[#allocation11 + $0x38] sm:$0xff] }
 0x604   : > { %v1969_v36 = vcombine.low %v1944_v26, %v1952_v27  ;;  %v1985_v38 = vcombine.low %v1960_v14, %v1968_v28  ;;  %v1970_v21 = vcombine.high %v1944_v26, %v1952_v27  ;;  %v1986_v24 = vcombine.high %v1960_v14, %v1968_v28  ;;  %v3060_v26 = vld [vmem:[#allocation11 + $0x8] sm:$0xff]  ;;  %v3062_v27 = vld [vmem:[#allocation11 + $0x18] sm:$0xff] }
 0x605   : > { %v1935_v43 = vcombine.low %v1916_v9, %v1932_v35  ;;  %v1936_v6 = vcombine.high %v1916_v9, %v1932_v35  ;;  %v5219_v14 = vpack.c.bf16 %v3062_v27, %v3060_v26  ;;  %v3064_v28 = vld [vmem:[#allocation11 + $0x28] sm:$0xff] }
 0x606   : > { %v1977_v39 = vrot.slane %v1969_v36, %v7173_v0  ;;  %v1993_v40 = vrot.slane %v1985_v38, %v7173_v0  ;;  %v1984_v44 = vrot.slane %v1970_v21, %v7173_v0  ;;  %v2000_v5 = vrot.slane %v1986_v24, %v7173_v0  ;;  %v3063_v36 = vld [vmem:[#allocation11 + $0x20] sm:$0xff]  ;;  %v3065_v38 = vld [vmem:[#allocation11 + $0x30] sm:$0xff]  ;;  %v3068_v21 = vld [vmem:[#allocation11 + $0x48] sm:$0xff] }
 0x607   : > { %v5223_v35 = vpack.c.bf16 %v3066_v2, %v3064_v28  ;;  %v3102_v28 = vld [vmem:[#allocation11 + $0x158] sm:$0xff] }
 0x608   : > { %v2001_v25 = vcombine.low %v1977_v39, %v1993_v40  ;;  %v2002_v45 = vcombine.high %v1977_v39, %v1993_v40  ;;  %v2003_v7 = vcombine.low %v1984_v44, %v2000_v5  ;;  %v2004_v47 = vcombine.high %v1984_v44, %v2000_v5  ;;  %v3072_v39 = vld [vmem:[#allocation11 + $0x68] sm:$0xff]  ;;  %v3074_v40 = vld [vmem:[#allocation11 + $0x78] sm:$0xff] }
 0x609   : > { %v5231_v5 = vpack.c.bf16 %v3074_v40, %v3072_v39  ;;  %v3110_v39 = vld [vmem:[#allocation11 + $0x198] sm:$0xff] }
 0x60a   : > { %v5203_v20 = vpack.c.bf16 %v2001_v25, %v1933_v62  ;;  %v5211_v48 = vpack.c.bf16 %v2003_v7, %v1935_v43  ;;  %v5215_v50 = vpack.c.bf16 %v2004_v47, %v1936_v6  ;;  %v5207_v52 = vpack.c.bf16 %v2002_v45, %v1934_v34  ;;  %v3067_v43 = vld [vmem:[#allocation11 + $0x40] sm:$0xff]  ;;  %v3069_v6 = vld [vmem:[#allocation11 + $0x50] sm:$0xff]  ;;  %v3076_v45 = vld [vmem:[#allocation11 + $0x88] sm:$0xff] }
 0x60b   : > { %v5229_v44 = vpack.c.bf16 %v3069_v6, %v3067_v43  ;;  %v3071_v62 = vld [vmem:[#allocation11 + $0x60] sm:$0xff]  ;;  %v3073_v25 = vld [vmem:[#allocation11 + $0x70] sm:$0xff]  ;;  %v3078_v7 = vld [vmem:[#allocation11 + $0x98] sm:$0xff] }
 0x60c   : > { %5204 = vmatprep.subr.bf16.mxu1 %v5203_v20  ;;  %v5233_v47 = vpack.c.bf16 %v3073_v25, %v3071_v62  ;;  %v3075_v34 = vld [vmem:[#allocation11 + $0x80] sm:$0xff]  ;;  %v3105_v43 = vld [vmem:[#allocation11 + $0x170] sm:$0xff]  ;;  %v3108_v6 = vld [vmem:[#allocation11 + $0x188] sm:$0xff] }
 0x60d   : > { %5206 = vmatpush3.bf16.msra.mxu1 %v5203_v20  ;;  %v5235_v20 = vpack.c.bf16 %v3078_v7, %v3076_v45  ;;  %v3109_v62 = vld [vmem:[#allocation11 + $0x190] sm:$0xff]  ;;  %v3112_v25 = vld [vmem:[#allocation11 + $0x1a8] sm:$0xff]  ;;  %v3114_v45 = vld [vmem:[#allocation11 + $0x1b8] sm:$0xff] }
 0x60e   : > { %5208 = vmatprep.subr.bf16.mxu1 %v5207_v52 }
 0x674   : > { %v2408_v53 = vpop.xlane.xlu1 %2407 }
 0x675   : > { %6015 = vrcp.f32 %v2408_v53  ;;  %v2405_v54 = vpop.xlane.xlu0 %2404 }
 0x676   : > { %6017 = vrcp.f32 %v2405_v54 }
 0x67c   : > { %v2414_v57 = vpop.xlane.xlu1 %2413 }
 0x67d   : > { %6019 = vrcp.f32 %v2414_v57  ;;  %v3079_v57 = vld [vmem:[#allocation11 + $0xa0] sm:$0xff] }
 0x67f   : > { %v6016_v58 = vpop.eup %6015 }
 0x680   : > { %v6018_v59 = vpop.eup %6017  ;;  %v2411_v60 = vpop.xlane.xlu0 %2410  ;;  %v2436_v11 = vmul.f32 %v6016_v58, %v7329_v46  ;;  %v3081_v58 = vld [vmem:[#allocation11 + $0xb0] sm:$0xff] }
 0x681   : > { %6021 = vrcp.f32 %v2411_v60  ;;  %v2435_v10 = vmul.f32 %v6018_v59, %v7331_v51  ;;  %v3084_v59 = vld [vmem:[#allocation11 + $0xc8] sm:$0xff]  ;;  %v3086_v60 = vld [vmem:[#allocation11 + $0xd8] sm:$0xff] }
 0x683   : > { %4963 = vmatprep.mubr.msk.f32.mxu1 %vm2354_vm2, %v2435_v10  ;;  %v5241_v10 = vpack.c.bf16 %v3081_v58, %v3079_v57  ;;  %v3117_v57 = vld [vmem:[#allocation11 + $0x1d0] sm:$0xff] }
 0x684   : > { %4964 = vmatmul.mubr.msk.f32.vlgmr.msra.gmra.mrb[14].mxu1 %vm2354_vm2, %v2436_v11  ;;  %v2420_v12 = vpop.xlane.xlu0 %2419  ;;  %v5243_v11 = vpack.c.bf16 %v3086_v60, %v3084_v59 }
 0x685   : > { %5210 = vmatpush3.bf16.msra.mxu1 %v5207_v52  ;;  %6023 = vrcp.f32 %v2420_v12  ;;  %v3082_v52 = vld [vmem:[#allocation11 + $0xb8] sm:$0xff]  ;;  %v3083_v12 = vld [vmem:[#allocation11 + $0xc0] sm:$0xff] }
 0x686   : > { %5212 = vmatprep.subr.bf16.mxu1 %v5211_v48 }
 0x687   : > { %v6020_v56 = vpop.eup %6019 }
 0x688   : > { %v2426_v13 = vpop.xlane.xlu1 %2425  ;;  %v2438_v17 = vmul.f32 %v6020_v56, %v7339_v8  ;;  %v3088_v56 = vld [vmem:[#allocation11 + $0xe8] sm:$0xff] }
 0x689   : > { %v2417_v55 = vpop.xlane.xlu0 %2416 }
 0x68a   : > { %6025 = vrcp.f32 %v2417_v55  ;;  %v3085_v55 = vld [vmem:[#allocation11 + $0xd0] sm:$0xff] }
 0x68b   : > { %v6022_v16 = vpop.eup %6021  ;;  %6027 = vrcp.f32 %v2426_v13  ;;  %v3090_v13 = vld [vmem:[#allocation11 + $0xf8] sm:$0xff] }
 0x68c   : > { %v2437_v32 = vmul.f32 %v6022_v16, %v7343_v31  ;;  %v5245_v16 = vpack.c.bf16 %v3085_v55, %v3083_v12 }
 0x68d   : > { %v2423_v51 = vpop.xlane.xlu0 %2422 }
 0x68e   : > { %6029 = vrcp.f32 %v2423_v51  ;;  %4970 = vmatprep.mubr.msk.f32.mxu1 %vm2354_vm2, %v2437_v32  ;;  %v5247_v32 = vpack.c.bf16 %v3090_v13, %v3088_v56  ;;  %v3089_v51 = vld [vmem:[#allocation11 + $0xf0] sm:$0xff] }
 0x68f   : > { %4971 = vmatmul.mubr.msk.f32.vlgmr.msra.gmra.mrb[16].mxu1 %vm2354_vm2, %v2438_v17  ;;  %v6024_v46 = vpop.eup %6023  ;;  %v3087_v17 = vld [vmem:[#allocation11 + $0xe0] sm:$0xff] }
 0x690   : > { %5214 = vmatpush3.bf16.msra.mxu1 %v5211_v48  ;;  %v2440_v1 = vmul.f32 %v6024_v46, %v7351_v23  ;;  %v3061_v23 = vld [vmem:[#allocation11 + $0x10] sm:$0xff]  ;;  %v3092_v46 = vld [vmem:[#allocation11 + $0x108] sm:$0xff] }
 0x691   : > { %5216 = vmatprep.subr.bf16.mxu1 %v5215_v50  ;;  %v3077_v48 = vld [vmem:[#allocation11 + $0x90] sm:$0xff] }
 0x692   : > { %v5237_v53 = vpack.c.bf16 %v3077_v48, %v3075_v34  ;;  %v3113_v34 = vld [vmem:[#allocation11 + $0x1b0] sm:$0xff]  ;;  %v3116_v48 = vld [vmem:[#allocation11 + $0x1c8] sm:$0xff] }
 0x694   : > { %v6026_v19 = vpop.eup %6025 }
 0x695   : > { %v2439_v22 = vmul.f32 %v6026_v19, %v7359_v4  ;;  %v6028_v9 = vpop.eup %6027  ;;  %v3059_v4 = vld [vmem:[#allocation11] sm:$0xff]  ;;  %v3094_v19 = vld [vmem:[#allocation11 + $0x118] sm:$0xff] }
 0x696   : > { %v2442_v15 = vmul.f32 %v6028_v9, %v7363_v37  ;;  %v5221_v33 = vpack.c.bf16 %v3061_v23, %v3059_v4  ;;  %v5225_v37 = vpack.c.bf16 %v3065_v38, %v3063_v36  ;;  %v3091_v9 = vld [vmem:[#allocation11 + $0x100] sm:$0xff]  ;;  %v3100_v23 = vld [vmem:[#allocation11 + $0x148] sm:$0xff]  ;;  %v3101_v36 = vld [vmem:[#allocation11 + $0x150] sm:$0xff] }
 0x697   : > { %4977 = vmatprep.mubr.msk.f32.mxu1 %vm2354_vm2, %v2439_v22  ;;  %v5249_v22 = vpack.c.bf16 %v3089_v51, %v3087_v17  ;;  %v3095_v4 = vld [vmem:[#allocation11 + $0x120] sm:$0xff]  ;;  %v3104_v38 = vld [vmem:[#allocation11 + $0x168] sm:$0xff] }
 0x698   : > { %v6030_v31 = vpop.eup %6029  ;;  %4978 = vmatmul.mubr.msk.f32.vlgmr.msra.gmra.mrb[18].mxu1 %vm2354_vm2, %v2440_v1  ;;  %v5251_v1 = vpack.c.bf16 %v3094_v19, %v3092_v46 }
 0x699   : > { %5218 = vmatpush3.bf16.msra.mxu1 %v5215_v50  ;;  %v2441_v8 = vmul.f32 %v6030_v31, %v7375_v49  ;;  %v3070_v49 = vld [vmem:[#allocation11 + $0x58] sm:$0xff]  ;;  %v3080_v50 = vld [vmem:[#allocation11 + $0xa8] sm:$0xff]  ;;  %v3093_v31 = vld [vmem:[#allocation11 + $0x110] sm:$0xff] }
 0x69a   : > { %5220 = vmatprep.subr.bf16.mxu1 %v5219_v14  ;;  %v5227_v24 = vpack.c.bf16 %v3070_v49, %v3068_v21  ;;  %v5239_v54 = vpack.c.bf16 %v3082_v52, %v3080_v50  ;;  %v5253_v26 = vpack.c.bf16 %v3093_v31, %v3091_v9  ;;  %v3097_v14 = vld [vmem:[#allocation11 + $0x130] sm:$0xff]  ;;  %v3106_v21 = vld [vmem:[#allocation11 + $0x178] sm:$0xff] }
 0x69b   : > { %4984 = vmatprep.mubr.msk.f32.mxu1 %vm2354_vm2, %v2441_v8  ;;  %v3096_v8 = vld [vmem:[#allocation11 + $0x128] sm:$0xff]  ;;  %v5257_v2 = vpack.c.bf16 %v3097_v14, %v3095_v4  ;;  %v3118_v50 = vld [vmem:[#allocation11 + $0x1d8] sm:$0xff] }
 0x69c   : > { %4985 = vmatmul.mubr.msk.f32.vlgmr.msra.gmra.mrb[20].mxu1 %vm2354_vm2, %v2442_v15  ;;  %v3098_v15 = vld [vmem:[#allocation11 + $0x138] sm:$0xff] }
 0x69d   : > { %5222 = vmatpush1.bf16.msra.mxu1 %v5221_v33  ;;  %v5255_v27 = vpack.c.bf16 %v3098_v15, %v3096_v8  ;;  %v5259_v33 = vpack.c.bf16 %v3102_v28, %v3100_v23 }
 0x69e   : > { %5224 = vmatprep.subr.bf16.mxu1 %v5223_v35  ;;  %v3099_v35 = vld [vmem:[#allocation11 + $0x140] sm:$0xff] }
 0x69f   : > { %v5261_v49 = vpack.c.bf16 %v3101_v36, %v3099_v35 }
 0x6a1   : > { %5226 = vmatpush1.bf16.msra.mxu1 %v5225_v37  ;;  %v5263_v37 = vpack.c.bf16 %v3106_v21, %v3104_v38 }
 0x6a2   : > { %5228 = vmatprep.subr.bf16.mxu1 %v5227_v24  ;;  %v3103_v24 = vld [vmem:[#allocation11 + $0x160] sm:$0xff] }
 0x6a3   : > { %v5265_v40 = vpack.c.bf16 %v3105_v43, %v3103_v24 }
 0x6a5   : > { %5230 = vmatpush1.bf16.msra.mxu1 %v5229_v44  ;;  %v5267_v44 = vpack.c.bf16 %v3110_v39, %v3108_v6 }
 0x6a6   : > { %5232 = vmatprep.subr.bf16.mxu1 %v5231_v5  ;;  %v3107_v5 = vld [vmem:[#allocation11 + $0x180] sm:$0xff] }
 0x6a7   : > { %v5269_v7 = vpack.c.bf16 %v3109_v62, %v3107_v5 }
 0x6a9   : > { %5234 = vmatpush1.bf16.msra.mxu1 %v5233_v47  ;;  %v5271_v47 = vpack.c.bf16 %v3114_v45, %v3112_v25 }
 0x6aa   : > { %5236 = vmatprep.subr.bf16.mxu1 %v5235_v20  ;;  %v3111_v20 = vld [vmem:[#allocation11 + $0x1a0] sm:$0xff] }
 0x6ab   : > { %v5273_v52 = vpack.c.bf16 %v3113_v34, %v3111_v20 }
 0x6ad   : > { %5238 = vmatpush1.bf16.msra.mxu1 %v5237_v53  ;;  %v5275_v53 = vpack.c.bf16 %v3118_v50, %v3116_v48 }
 0x6ae   : > { %5240 = vmatprep.subr.bf16.mxu1 %v5239_v54  ;;  %v3115_v54 = vld [vmem:[#allocation11 + $0x1c0] sm:$0xff] }
 0x6af   : > { %v5277_v58 = vpack.c.bf16 %v3117_v57, %v3115_v54 }
 0x6b1   : > { %5242 = vmatpush1.bf16.msra.mxu1 %v5241_v10 }
 0x6b2   : > { %5244 = vmatprep.subr.bf16.mxu1 %v5243_v11 }
 0x6b5   : > { %5246 = vmatpush1.bf16.msra.mxu1 %v5245_v16 }
 0x6b6   : > { %5248 = vmatprep.subr.bf16.mxu1 %v5247_v32 }
 0x6b9   : > { %5250 = vmatpush1.bf16.msra.mxu1 %v5249_v22 }
 0x6ba   : > { %5252 = vmatprep.subr.bf16.mxu1 %v5251_v1 }
 0x6bd   : > { %5254 = vmatpush1.bf16.msra.mxu1 %v5253_v26 }
 0x6be   : > { %5256 = vmatprep.subr.bf16.mxu1 %v5255_v27 }
 0x6c1   : > { %5258 = vmatpush1.bf16.msra.mxu1 %v5257_v2 }
 0x6c2   : > { %5260 = vmatprep.subr.bf16.mxu1 %v5259_v33 }
 0x6c5   : > { %5262 = vmatpush1.bf16.msra.mxu1 %v5261_v49 }
 0x6c6   : > { %5264 = vmatprep.subr.bf16.mxu1 %v5263_v37 }
 0x6c9   : > { %5266 = vmatpush1.bf16.msra.mxu1 %v5265_v40 }
 0x6ca   : > { %5268 = vmatprep.subr.bf16.mxu1 %v5267_v44 }
 0x6cd   : > { %5270 = vmatpush1.bf16.msra.mxu1 %v5269_v7 }
 0x6ce   : > { %5272 = vmatprep.subr.bf16.mxu1 %v5271_v47 }
 0x6d1   : > { %5274 = vmatpush1.bf16.msra.mxu1 %v5273_v52 }
 0x6d2   : > { %5276 = vmatprep.subr.bf16.mxu1 %v5275_v53 }
 0x6d5   : > { %5278 = vmatpush1.bf16.msra.mxu1 %v5277_v58 }
 0x757   : > { %v4965_v59 = vpop.f32.mrb[14].mxu1 }
 0x758   : > { %v2515_v60 = vpop.f32.mrb[15].mxu1 }
 0x762   : > { %v4972_v10 = vpop.f32.mrb[16].mxu1 }
 0x763   : > { %v2596_v11 = vpop.f32.mrb[17].mxu1 }
 0x76b   : > { %v4979_v12 = vpop.f32.mrb[18].mxu1 }
 0x76c   : > { %v2835_v55 = vcombine.low %v4965_v59, %v4979_v12  ;;  %v2836_v56 = vcombine.high %v4965_v59, %v4979_v12  ;;  %v2677_v13 = vpop.f32.mrb[19].mxu1 }
 0x76d   : > { %v2767_v16 = vcombine.low %v2515_v60, %v2677_v13  ;;  %v2768_v32 = vcombine.high %v2515_v60, %v2677_v13 }
 0x76e   : > { %v2843_v9 = vrot.slane %v2835_v55, %v7170_v18  ;;  %v2850_v31 = vrot.slane %v2836_v56, %v7170_v18  ;;  %v3120_v55 = vld [vmem:[#allocation11 + $0x1e8] sm:$0xff] }
 0x76f   : > { %v4986_v17 = vpop.f32.mrb[20].mxu1  ;;  %v2775_v26 = vrot.slane %v2767_v16, %v7170_v18  ;;  %v2782_v27 = vrot.slane %v2768_v32, %v7170_v18 }
 0x770   : > { %v2851_v51 = vcombine.low %v4972_v10, %v4986_v17  ;;  %v2852_v46 = vcombine.high %v4972_v10, %v4986_v17  ;;  %v2758_v19 = vpop.f32.mrb[21].mxu1  ;;  %v3122_v17 = vld [vmem:[#allocation11 + $0x1f8] sm:$0xff] }
 0x771   : > { %v2783_v22 = vcombine.low %v2596_v11, %v2758_v19  ;;  %v2784_v1 = vcombine.high %v2596_v11, %v2758_v19 }
 0x772   : > { %v2859_v8 = vrot.slane %v2851_v51, %v7170_v18  ;;  %v2866_v15 = vrot.slane %v2852_v46, %v7170_v18  ;;  %v3119_v51 = vld [vmem:[#allocation11 + $0x1e0] sm:$0xff]  ;;  %v3121_v46 = vld [vmem:[#allocation11 + $0x1f0] sm:$0xff] }
 0x773   : > { %v2791_v4 = vrot.slane %v2783_v22, %v7170_v18  ;;  %v2798_v14 = vrot.slane %v2784_v1, %v7170_v18 }
 0x774   : > { %v2867_v23 = vcombine.low %v2843_v9, %v2859_v8  ;;  %v2868_v28 = vcombine.high %v2843_v9, %v2859_v8  ;;  %v2883_v2 = vcombine.low %v2850_v31, %v2866_v15  ;;  %v2884_v33 = vcombine.high %v2850_v31, %v2866_v15 }
 0x775   : > { %v2799_v35 = vcombine.low %v2775_v26, %v2791_v4  ;;  %v2800_v36 = vcombine.high %v2775_v26, %v2791_v4  ;;  %v2815_v38 = vcombine.low %v2782_v27, %v2798_v14  ;;  %v2816_v21 = vcombine.high %v2782_v27, %v2798_v14 }
 0x776   : > { %v2875_v49 = vrot.slane %v2867_v23, %v7173_v0  ;;  %v2882_v37 = vrot.slane %v2868_v28, %v7173_v0  ;;  %v2891_v24 = vrot.slane %v2883_v2, %v7173_v0  ;;  %v2898_v43 = vrot.slane %v2884_v33, %v7173_v0 }
 0x777   : > { %v2807_v6 = vrot.slane %v2799_v35, %v7173_v0  ;;  %v2814_v39 = vrot.slane %v2800_v36, %v7173_v0  ;;  %v2823_v40 = vrot.slane %v2815_v38, %v7173_v0  ;;  %v2830_v44 = vrot.slane %v2816_v21, %v7173_v0 }
 0x778   : > { %v2971_v5 = vcombine.low %v2875_v49, %v2882_v37  ;;  %v4874_v62 = vcombine.high %v2875_v49, %v2882_v37  ;;  %v2987_v25 = vcombine.low %v2891_v24, %v2898_v43  ;;  %v4875_v45 = vcombine.high %v2891_v24, %v2898_v43 }
 0x779   : > { %v2903_v7 = vcombine.low %v2807_v6, %v2814_v39  ;;  %v4872_v47 = vcombine.high %v2807_v6, %v2814_v39  ;;  %v2919_v20 = vcombine.low %v2823_v40, %v2830_v44  ;;  %v4873_v34 = vcombine.high %v2823_v40, %v2830_v44 }
 0x77a   : > { %v2978_v48 = vrot.slane %v2971_v5, %v7170_v18  ;;  %v2986_v50 = vrot.slane %v4874_v62, %v7170_v18  ;;  %v2994_v52 = vrot.slane %v2987_v25, %v7170_v18  ;;  %v3002_v53 = vrot.slane %v4875_v45, %v7170_v18  ;;  %v3123_v62 = vld [vmem:[#allocation13] sm:$0x3] }
 0x77b   : > { %v2910_v54 = vrot.slane %v2903_v7, %v7170_v18  ;;  %v2918_v57 = vrot.slane %v4872_v47, %v7170_v18  ;;  %v2926_v58 = vrot.slane %v2919_v20, %v7170_v18  ;;  %v2934_v59 = vrot.slane %v4873_v34, %v7170_v18 }
 0x77c   : > { %v3003_v60 = vcombine.low %v2978_v48, %v2986_v50  ;;  %v3004_v10 = vcombine.high %v2978_v48, %v2986_v50  ;;  %v3019_v11 = vcombine.low %v2994_v52, %v3002_v53  ;;  %v3020_v12 = vcombine.high %v2994_v52, %v3002_v53  ;;  %v6099_v48 = vld [vmem:[%s7027_s21] sm:$0xff]  ;;  %v6100_v52 = vld [vmem:[%s7027_s21 + $0x8] sm:$0xff] }
 0x77d   : > { %v2935_v56 = vcombine.low %v2910_v54, %v2918_v57  ;;  %v2936_v13 = vcombine.high %v2910_v54, %v2918_v57  ;;  %v2951_v16 = vcombine.low %v2926_v58, %v2934_v59  ;;  %v2952_v32 = vcombine.high %v2926_v58, %v2934_v59 }
 0x77e   : > { %v3011_v19 = vrot.slane %v3003_v60, %v7173_v0  ;;  %v3018_v22 = vrot.slane %v3004_v10, %v7173_v0  ;;  %v3027_v1 = vrot.slane %v3019_v11, %v7173_v0  ;;  %v3034_v18 = vrot.slane %v3020_v12, %v7173_v0  ;;  %v6101_v10 = vld [vmem:[%s7027_s21 + $0x10] sm:$0xff]  ;;  %v6102_v12 = vld [vmem:[%s7027_s21 + $0x18] sm:$0xff]  ;;  %s6473_s21 = sshll.u32 %s6583_s1, 4  ;;  %s6474_s21 = int_to_ptr.vmem [resolvable:$false] %s6473_s21 }
 0x77f   : > { %v2943_v9 = vrot.slane %v2935_v56, %v7173_v0  ;;  %v2950_v31 = vrot.slane %v2936_v13, %v7173_v0  ;;  %v2959_v8 = vrot.slane %v2951_v16, %v7173_v0  ;;  %v2966_v15 = vrot.slane %v2952_v32, %v7173_v0  ;;  %v3297_v13 = vld [vmem:[#allocation17 + $0x8] sm:$0xff]  ;;  %v3299_v32 = vld [vmem:[#allocation17 + $0x18] sm:$0xff]  ;;  %s6475_s2 = scalar_lea.vmem %s6474_s21, 1024  ;;  %p6476_p2 = scmp.lt.s32.totalorder %s7637_s15, %s6474_s21 }
 0x780   : > { %v3036_v26 = vcombine.high %v3011_v19, %v3027_v1  ;;  %v3038_v27 = vcombine.high %v3018_v22, %v3034_v18  ;;  %v5279_v4 = vpack.c.bf16 %v3122_v17, %v3120_v55  ;;  %v5281_v14 = vpack.c.bf16 %v3121_v46, %v3119_v51  ;;  %v3305_v16 = vld [vmem:[#allocation17 + $0x48] sm:$0xff]  ;;  %v3307_v51 = vld [vmem:[#allocation17 + $0x58] sm:$0xff]  ;;  %v3296_v46 = vld [vmem:[#allocation17] sm:$0xff]  ;;  %p6477_p9 = scmp.lt.s32.totalorder %s6475_s2, %s6469_s25 }
 0x781   : > { %v2968_v23 = vcombine.high %v2943_v9, %v2959_v8  ;;  %v2970_v28 = vcombine.high %v2950_v31, %v2966_v15  ;;  %v2969_v2 = vcombine.low %v2950_v31, %v2966_v15  ;;  %v2967_v33 = vcombine.low %v2943_v9, %v2959_v8  ;;  %v3306_v9 = vld [vmem:[#allocation17 + $0x50] sm:$0xff]  ;;  %v3313_v31 = vld [vmem:[#allocation17 + $0x88] sm:$0xff] }
 0x782   : > { %v5990_v35 = vpack.i.bf16 %v3036_v26, %v3038_v27  ;;  %5280 = vmatprep.subr.bf16.mxu1 %v5279_v4  ;;  %v3037_v36 = vcombine.low %v3018_v22, %v3034_v18  ;;  %v3035_v38 = vcombine.low %v3011_v19, %v3027_v1  ;;  %v3128_v25 = vrot.slane %v3123_v62, %v7099_v3  ;;  %v3304_v19 = vld [vmem:[#allocation17 + $0x40] sm:$0xff]  ;;  %v3298_v18 = vld [vmem:[#allocation17 + $0x10] sm:$0xff]  ;;  %v3321_v15 = vld [vmem:[#allocation17 + $0xc8] sm:$0xff]  ;;  %p6478_p10 = por %p6477_p9, %p6476_p2 }
 0x783   : > { %v5985_v21 = vpack.i.bf16 %v2968_v23, %v2970_v28  ;;  %5282 = vmatpush1.bf16.msra.mxu1 %v5281_v14  ;;  %v3132_v45 = vrot.slane %v3123_v62, %v7096_v63  ;;  %v5283_v17 = vpack.c.bf16 %v3305_v16, %v3297_v13  ;;  %v5347_v22 = vpack.c.bf16 %v3307_v51, %v3299_v32  ;;  %v3315_v26 = vld [vmem:[#allocation17 + $0x98] sm:$0xff]  ;;  %v3312_v23 = vld [vmem:[#allocation17 + $0x80] sm:$0xff]  ;;  %v3353_v62 = vld [vmem:[#allocation17 + $0x1c8] sm:$0xff] }
 0x784   : > { %5991 = vrot.lane.b32.xlu1 %v5990_v35, %s6580_s13  ;;  %v5285_v1 = vpack.c.bf16 %v3304_v19, %v3296_v46  ;;  %v5349_v8 = vpack.c.bf16 %v3306_v9, %v3298_v18  ;;  %v3323_v27 = vld [vmem:[#allocation17 + $0xd8] sm:$0xff]  ;;  %v5287_v4 = vpack.c.bf16 %v3321_v15, %v3313_v31  ;;  %v3320_v28 = vld [vmem:[#allocation17 + $0xc0] sm:$0xff]  ;;  %v3322_v35 = vld [vmem:[#allocation17 + $0xd0] sm:$0xff]  ;;  %p6479_p11 = pnand %p6478_p10, %p6472_p0 }
 0x785   : > { %5986 = vrot.lane.b32.xlu0 %v5985_v21, %s6580_s13  ;;  %5284 = vmatprep.subr.bf16.mxu0 %v5283_v17  ;;  %v5351_v14 = vpack.c.bf16 %v3323_v27, %v3315_v26  ;;  %v3360_v13 = vld [vmem:[#allocation17 + $0x200] sm:$0xff]  ;;  %v3362_v32 = vld [vmem:[#allocation17 + $0x210] sm:$0xff]  ;;  %v3377_v46 = vld [vmem:[#allocation17 + $0x288] sm:$0xff] }
 0x786   : > { %5348 = vmatprep.subr.bf16.mxu1 %v5347_v22  ;;  %5286 = vmatpush1.bf16.msra.mxu0 %v5285_v1  ;;  %v3368_v16 = vld [vmem:[#allocation17 + $0x240] sm:$0xff]  ;;  %v3370_v51 = vld [vmem:[#allocation17 + $0x250] sm:$0xff]  ;;  %v3385_v19 = vld [vmem:[#allocation17 + $0x2c8] sm:$0xff] }
 0x787   : > { %5288 = vmatprep.subr.bf16.mxu0 %v5287_v4  ;;  %v3379_v22 = vld [vmem:[#allocation17 + $0x298] sm:$0xff]  ;;  %v5301_v18 = vpack.c.bf16 %v3368_v16, %v3360_v13  ;;  %v5365_v9 = vpack.c.bf16 %v3370_v51, %v3362_v32  ;;  %v5303_v31 = vpack.c.bf16 %v3385_v19, %v3377_v46  ;;  %v3384_v15 = vld [vmem:[#allocation17 + $0x2c0] sm:$0xff]  ;;  %v3378_v26 = vld [vmem:[#allocation17 + $0x290] sm:$0xff] }
 0x788   : > { %v3387_v1 = vld [vmem:[#allocation17 + $0x2d8] sm:$0xff]  ;;  %v3386_v4 = vld [vmem:[#allocation17 + $0x2d0] sm:$0xff]  ;;  %v3441_v13 = vld [vmem:[#allocation17 + $0x488] sm:$0xff] }
 0x789   : > { %v5367_v27 = vpack.c.bf16 %v3387_v1, %v3379_v22  ;;  %v3449_v16 = vld [vmem:[#allocation17 + $0x4c8] sm:$0xff]  ;;  %v3443_v32 = vld [vmem:[#allocation17 + $0x498] sm:$0xff]  ;;  %v3440_v22 = vld [vmem:[#allocation17 + $0x480] sm:$0xff] }
 0x78a   : > { %v5319_v19 = vpack.c.bf16 %v3449_v16, %v3441_v13  ;;  %v3448_v1 = vld [vmem:[#allocation17 + $0x4c0] sm:$0xff]  ;;  %v3497_v13 = vld [vmem:[#allocation17 + $0x648] sm:$0xff]  ;;  %v3491_v16 = vld [vmem:[#allocation17 + $0x618] sm:$0xff] }
 0x7f6   : > { %v5992_v49 = vpop.permute.xlu1 %5991 }
 0x7f7   : > { %v5987_v0 = vpop.permute.xlu0 %5986  ;;  %v5993_v37 = vunpack.i.l.bf16 %v5992_v49  ;;  %v5994_v40 = vunpack.i.h.bf16 %v5992_v49 }
 0x7f8   : > { %v5989_v24 = vunpack.i.h.bf16 %v5987_v0  ;;  %v5988_v43 = vunpack.i.l.bf16 %v5987_v0  ;;  %v3331_v0 = vld [vmem:[#allocation17 + $0x118] sm:$0xff] }
 0x7f9   : > { %v3058_v44 = vsel %vm2005_vm0, %v3037_v36, %v5993_v37  ;;  %v3056_v5 = vsel %vm2005_vm0, %v3035_v38, %v5994_v40  ;;  %v3329_v36 = vld [vmem:[#allocation17 + $0x108] sm:$0xff]  ;;  %v3339_v37 = vld [vmem:[#allocation17 + $0x158] sm:$0xff]  ;;  %v3338_v40 = vld [vmem:[#allocation17 + $0x150] sm:$0xff] }
 0x7fa   : > { %v3057_v6 = vsel %vm2005_vm0, %v2969_v2, %v5988_v43  ;;  %v3055_v39 = vsel %vm2005_vm0, %v2967_v33, %v5989_v24  ;;  %v3314_v2 = vld [vmem:[#allocation17 + $0x90] sm:$0xff]  ;;  %v5289_v33 = vpack.c.bf16 %v3320_v28, %v3312_v23  ;;  %v3337_v38 = vld [vmem:[#allocation17 + $0x148] sm:$0xff]  ;;  %v3328_v24 = vld [vmem:[#allocation17 + $0x100] sm:$0xff]  ;;  %v5355_v43 = vpack.c.bf16 %v3339_v37, %v3331_v0 }
 0x7fb   : > { %3199 = vmatprep.mubr.f32.mxu1 %v3057_v6  ;;  %v5353_v21 = vpack.c.bf16 %v3322_v35, %v3314_v2  ;;  %v5291_v49 = vpack.c.bf16 %v3337_v38, %v3329_v36  ;;  %v3336_v6 = vld [vmem:[#allocation17 + $0x140] sm:$0xff]  ;;  %v3401_v23 = vld [vmem:[#allocation17 + $0x348] sm:$0xff]  ;;  %v3395_v28 = vld [vmem:[#allocation17 + $0x318] sm:$0xff]  ;;  %v5369_v35 = vpack.c.bf16 %v3386_v4, %v3378_v26  ;;  %v5321_v4 = vpack.c.bf16 %v3448_v1, %v3440_v22 }
 0x7fc   : > { %3200 = vmatmul.mubr.f32.vlgmr.msra.gmra.mrb[22].mxu1 %v3055_v39  ;;  %v3330_v39 = vld [vmem:[#allocation17 + $0x110] sm:$0xff]  ;;  %5290 = vmatpush1.bf16.msra.mxu0 %v5289_v33  ;;  %v3403_v2 = vld [vmem:[#allocation17 + $0x358] sm:$0xff]  ;;  %v3392_v38 = vld [vmem:[#allocation17 + $0x300] sm:$0xff] }
 0x7fd   : > { %3205 = vmatprep.mubr.f32.mxu1 %v3058_v44  ;;  %5350 = vmatpush1.bf16.msra.mxu1 %v5349_v8  ;;  %v5293_v44 = vpack.c.bf16 %v3336_v6, %v3328_v24  ;;  %v3376_v8 = vld [vmem:[#allocation17 + $0x280] sm:$0xff]  ;;  %v5371_v0 = vpack.c.bf16 %v3403_v2, %v3395_v28  ;;  %v3402_v37 = vld [vmem:[#allocation17 + $0x350] sm:$0xff]  ;;  %v3409_v24 = vld [vmem:[#allocation17 + $0x388] sm:$0xff] }
 0x7fe   : > { %5352 = vmatprep.subr.bf16.mxu1 %v5351_v14  ;;  %5292 = vmatprep.subr.bf16.mxu0 %v5291_v49  ;;  %v3393_v14 = vld [vmem:[#allocation17 + $0x308] sm:$0xff]  ;;  %v5305_v33 = vpack.c.bf16 %v3384_v15, %v3376_v8  ;;  %v3394_v49 = vld [vmem:[#allocation17 + $0x310] sm:$0xff]  ;;  %v3411_v6 = vld [vmem:[#allocation17 + $0x398] sm:$0xff] }
 0x7ff   : > { %v5307_v36 = vpack.c.bf16 %v3401_v23, %v3393_v14  ;;  %v3457_v8 = vld [vmem:[#allocation17 + $0x508] sm:$0xff]  ;;  %v3459_v26 = vld [vmem:[#allocation17 + $0x518] sm:$0xff]  ;;  %v3456_v28 = vld [vmem:[#allocation17 + $0x500] sm:$0xff] }
 0x800   : > { %3206 = vmatmul.mubr.f32.gmra.mrb[24].mxu1 %v3056_v5  ;;  %v3345_v5 = vld [vmem:[#allocation17 + $0x188] sm:$0xff]  ;;  %5294 = vmatpush1.bf16.msra.mxu0 %v5293_v44  ;;  %v5373_v44 = vpack.c.bf16 %v3402_v37, %v3394_v49  ;;  %v3464_v2 = vld [vmem:[#allocation17 + $0x540] sm:$0xff]  ;;  %v3490_v1 = vld [vmem:[#allocation17 + $0x610] sm:$0xff] }
 0x801   : > { %5354 = vmatpush1.bf16.msra.mxu1 %v5353_v21  ;;  %v3400_v21 = vld [vmem:[#allocation17 + $0x340] sm:$0xff]  ;;  %v3465_v15 = vld [vmem:[#allocation17 + $0x548] sm:$0xff] }
 0x802   : > { %5356 = vmatprep.subr.bf16.mxu1 %v5355_v43  ;;  %v3417_v43 = vld [vmem:[#allocation17 + $0x3c8] sm:$0xff]  ;;  %v5323_v23 = vpack.c.bf16 %v3465_v15, %v3457_v8  ;;  %v3507_v15 = vld [vmem:[#allocation17 + $0x698] sm:$0xff] }
 0x803   : > { %v3513_v8 = vld [vmem:[#allocation17 + $0x6c8] sm:$0xff] }
 0x8cf   : > { %v3201_v7 = vpop.f32.mrb[22].mxu1 }
 0x8d0   : > { %v3202_v47 = vadd.f32 %v3201_v7, %v3128_v25  ;;  %v3203_v20 = vpop.f32.mrb[23].mxu1  ;;  %v5295_v7 = vpack.c.bf16 %v3353_v62, %v3345_v5  ;;  %v5311_v5 = vpack.c.bf16 %v3417_v43, %v3409_v24  ;;  %v3408_v62 = vld [vmem:[#allocation17 + $0x380] sm:$0xff] }
 0x8d1   : > { %v3204_v34 = vadd.f32 %v3203_v20, %v3132_v45  ;;  %v3344_v20 = vld [vmem:[#allocation17 + $0x180] sm:$0xff] }
 0x8d2   : > { %v7456_v50 = vadd.f32 %v6099_v48, %v3202_v47  ;;  %v3355_v47 = vld [vmem:[#allocation17 + $0x1d8] sm:$0xff]  ;;  %5296 = vmatprep.subr.bf16.mxu0 %v5295_v7 }
 0x8d3   : > { %v7459_v53 = vadd.f32 %v6100_v52, %v3204_v34  ;;  %v3207_v54 = vpop.f32.mrb[24].mxu1  ;;  %v3352_v34 = vld [vmem:[#allocation17 + $0x1c0] sm:$0xff]  ;;  %v3346_v52 = vld [vmem:[#allocation17 + $0x190] sm:$0xff] }
 0x8d4   : > { %v3208_v57 = vadd.f32 %v3207_v54, %v3128_v25  ;;  %v3209_v58 = vpop.f32.mrb[25].mxu1  ;;  %v3347_v25 = vld [vmem:[#allocation17 + $0x198] sm:$0xff]  ;;  %v3354_v54 = vld [vmem:[#allocation17 + $0x1d0] sm:$0xff] }
 0x8d5   : > { %v3210_v59 = vadd.f32 %v3209_v58, %v3132_v45  ;;  %v3218_v60 = vadd.f32 %v7459_v53, %v7456_v50  ;;  %v5357_v45 = vpack.c.bf16 %v3338_v40, %v3330_v39  ;;  %v5359_v48 = vpack.c.bf16 %v3355_v47, %v3347_v25  ;;  %v3369_v58 = vld [vmem:[#allocation17 + $0x248] sm:$0xff]  ;;  %v3419_v39 = vld [vmem:[#allocation17 + $0x3d8] sm:$0xff]  ;;  %v3416_v25 = vld [vmem:[#allocation17 + $0x3c0] sm:$0xff] }
 0x8d6   : > { %v7464_v11 = vadd.f32 %v6101_v10, %v3208_v57  ;;  %v3361_v57 = vld [vmem:[#allocation17 + $0x208] sm:$0xff]  ;;  %v5297_v10 = vpack.c.bf16 %v3352_v34, %v3344_v20  ;;  %v5309_v40 = vpack.c.bf16 %v3400_v21, %v3392_v38  ;;  %v5375_v7 = vpack.c.bf16 %v3419_v39, %v3411_v6  ;;  %v3418_v47 = vld [vmem:[#allocation17 + $0x3d0] sm:$0xff] }
 0x8d7   : > { %v7467_v55 = vadd.f32 %v6102_v12, %v3210_v59  ;;  %3219 = vadd.xlane.f32.xlu1 %v3218_v60  ;;  %v3363_v59 = vld [vmem:[#allocation17 + $0x218] sm:$0xff]  ;;  %5358 = vmatpush1.bf16.msra.mxu1 %v5357_v45  ;;  %v5361_v12 = vpack.c.bf16 %v3354_v54, %v3346_v52  ;;  %v3410_v45 = vld [vmem:[#allocation17 + $0x390] sm:$0xff]  ;;  %v3425_v20 = vld [vmem:[#allocation17 + $0x408] sm:$0xff]  ;;  %v5313_v54 = vpack.c.bf16 %v3416_v25, %v3408_v62 }
 0x8d8   : > { %v3371_v60 = vld [vmem:[#allocation17 + $0x258] sm:$0xff]  ;;  %5360 = vmatprep.subr.bf16.mxu1 %v5359_v48  ;;  %5298 = vmatpush1.bf16.msra.mxu0 %v5297_v10  ;;  %v3433_v34 = vld [vmem:[#allocation17 + $0x448] sm:$0xff]  ;;  %v3426_v10 = vld [vmem:[#allocation17 + $0x410] sm:$0xff]  ;;  %v5325_v38 = vpack.c.bf16 %v3464_v2, %v3456_v28 }
 0x8d9   : > { %v3221_v56 = vadd.f32 %v7467_v55, %v7464_v11  ;;  %v5363_v17 = vpack.c.bf16 %v3371_v60, %v3363_v59  ;;  %v3427_v48 = vld [vmem:[#allocation17 + $0x418] sm:$0xff]  ;;  %v3424_v59 = vld [vmem:[#allocation17 + $0x400] sm:$0xff]  ;;  %v3506_v28 = vld [vmem:[#allocation17 + $0x690] sm:$0xff] }
 0x8da   : > { %v3435_v52 = vld [vmem:[#allocation17 + $0x458] sm:$0xff]  ;;  %v3432_v60 = vld [vmem:[#allocation17 + $0x440] sm:$0xff] }
 0x8db   : > { %3222 = vadd.xlane.f32.xlu0 %v3221_v56  ;;  %v5299_v56 = vpack.c.bf16 %v3369_v58, %v3361_v57  ;;  %5362 = vmatpush1.bf16.msra.mxu1 %v5361_v12  ;;  %v5377_v57 = vpack.c.bf16 %v3418_v47, %v3410_v45  ;;  %v5315_v58 = vpack.c.bf16 %v3433_v34, %v3425_v20  ;;  %v3473_v47 = vld [vmem:[#allocation17 + $0x588] sm:$0xff]  ;;  %v3475_v34 = vld [vmem:[#allocation17 + $0x598] sm:$0xff] }
 0x8dc   : > { %5364 = vmatprep.subr.bf16.mxu1 %v5363_v17  ;;  %v5379_v12 = vpack.c.bf16 %v3435_v52, %v3427_v48  ;;  %v3451_v17 = vld [vmem:[#allocation17 + $0x4d8] sm:$0xff]  ;;  %v5317_v51 = vpack.c.bf16 %v3432_v60, %v3424_v59  ;;  %v3481_v20 = vld [vmem:[#allocation17 + $0x5c8] sm:$0xff]  ;;  %v3474_v60 = vld [vmem:[#allocation17 + $0x590] sm:$0xff] }
 0x8dd   : > { %5300 = vmatprep.subr.bf16.mxu0 %v5299_v56  ;;  %v3434_v56 = vld [vmem:[#allocation17 + $0x450] sm:$0xff]  ;;  %v5327_v48 = vpack.c.bf16 %v3481_v20, %v3473_v47  ;;  %v3483_v52 = vld [vmem:[#allocation17 + $0x5d8] sm:$0xff] }
 0x8de   : > { %5302 = vmatpush1.bf16.msra.mxu0 %v5301_v18  ;;  %v5381_v46 = vpack.c.bf16 %v3434_v56, %v3426_v10  ;;  %v3442_v18 = vld [vmem:[#allocation17 + $0x490] sm:$0xff]  ;;  %v3489_v56 = vld [vmem:[#allocation17 + $0x608] sm:$0xff]  ;;  %v3539_v47 = vld [vmem:[#allocation17 + $0x798] sm:$0xff] }
 0x8df   : > { %5366 = vmatpush1.bf16.msra.mxu1 %v5365_v9  ;;  %5304 = vmatprep.subr.bf16.mxu0 %v5303_v31  ;;  %v5383_v9 = vpack.c.bf16 %v3451_v17, %v3443_v32  ;;  %v3450_v31 = vld [vmem:[#allocation17 + $0x4d0] sm:$0xff]  ;;  %v5331_v32 = vpack.c.bf16 %v3497_v13, %v3489_v56  ;;  %v3499_v17 = vld [vmem:[#allocation17 + $0x658] sm:$0xff]  ;;  %v3309_v56 = vld [vmem:[#allocation17 + $0x68] sm:$0xff] }
 0x8e0   : > { %5368 = vmatprep.subr.bf16.mxu1 %v5367_v27  ;;  %v3467_v27 = vld [vmem:[#allocation17 + $0x558] sm:$0xff]  ;;  %v5385_v14 = vpack.c.bf16 %v3450_v31, %v3442_v18  ;;  %v3482_v10 = vld [vmem:[#allocation17 + $0x5d0] sm:$0xff] }
 0x8e1   : > { %v3498_v18 = vld [vmem:[#allocation17 + $0x650] sm:$0xff]  ;;  %v3303_v13 = vld [vmem:[#allocation17 + $0x38] sm:$0xff] }
 0x8e2   : > { %5306 = vmatpush1.bf16.msra.mxu0 %v5305_v33  ;;  %v5387_v33 = vpack.c.bf16 %v3467_v27, %v3459_v26  ;;  %v5397_v31 = vpack.c.bf16 %v3498_v18, %v3490_v1  ;;  %v3515_v26 = vld [vmem:[#allocation17 + $0x6d8] sm:$0xff] }
 0x8e3   : > { %5370 = vmatpush1.bf16.msra.mxu1 %v5369_v35  ;;  %5308 = vmatprep.subr.bf16.mxu0 %v5307_v36  ;;  %v3458_v35 = vld [vmem:[#allocation17 + $0x510] sm:$0xff] }
 0x8e4   : > { %5372 = vmatprep.subr.bf16.mxu1 %v5371_v0  ;;  %v3466_v36 = vld [vmem:[#allocation17 + $0x550] sm:$0xff] }
 0x8e5   : > { %v5389_v21 = vpack.c.bf16 %v3466_v36, %v3458_v35  ;;  %v3521_v35 = vld [vmem:[#allocation17 + $0x708] sm:$0xff] }
 0x8e6   : > { %5310 = vmatpush1.bf16.msra.mxu0 %v5309_v40  ;;  %v3529_v36 = vld [vmem:[#allocation17 + $0x748] sm:$0xff] }
 0x8e7   : > { %5374 = vmatpush1.bf16.msra.mxu1 %v5373_v44  ;;  %5312 = vmatprep.subr.bf16.mxu0 %v5311_v5 }
 0x8e8   : > { %5376 = vmatprep.subr.bf16.mxu1 %v5375_v7 }
 0x8ea   : > { %5314 = vmatpush1.bf16.msra.mxu0 %v5313_v54  ;;  %v3472_v54 = vld [vmem:[#allocation17 + $0x580] sm:$0xff] }
 0x8eb   : > { %5378 = vmatpush1.bf16.msra.mxu1 %v5377_v57  ;;  %5316 = vmatprep.subr.bf16.mxu0 %v5315_v58  ;;  %v3480_v57 = vld [vmem:[#allocation17 + $0x5c0] sm:$0xff]  ;;  %v5391_v58 = vpack.c.bf16 %v3483_v52, %v3475_v34 }
 0x8ec   : > { %5380 = vmatprep.subr.bf16.mxu1 %v5379_v12  ;;  %v5329_v59 = vpack.c.bf16 %v3480_v57, %v3472_v54  ;;  %v5393_v12 = vpack.c.bf16 %v3482_v10, %v3474_v60  ;;  %v3536_v52 = vld [vmem:[#allocation17 + $0x780] sm:$0xff] }
 0x8ed   : > { %v3544_v54 = vld [vmem:[#allocation17 + $0x7c0] sm:$0xff] }
 0x8ee   : > { %5318 = vmatpush1.bf16.msra.mxu0 %v5317_v51  ;;  %v3488_v51 = vld [vmem:[#allocation17 + $0x600] sm:$0xff]  ;;  %v5345_v60 = vpack.c.bf16 %v3544_v54, %v3536_v52 }
 0x8ef   : > { %5382 = vmatpush1.bf16.msra.mxu1 %v5381_v46  ;;  %5320 = vmatprep.subr.bf16.mxu0 %v5319_v19  ;;  %v3496_v46 = vld [vmem:[#allocation17 + $0x640] sm:$0xff]  ;;  %v5395_v19 = vpack.c.bf16 %v3499_v17, %v3491_v16 }
 0x8f0   : > { %5384 = vmatprep.subr.bf16.mxu1 %v5383_v9  ;;  %v5333_v22 = vpack.c.bf16 %v3496_v46, %v3488_v51  ;;  %v3505_v9 = vld [vmem:[#allocation17 + $0x688] sm:$0xff] }
 0x8f1   : > { %v5335_v27 = vpack.c.bf16 %v3513_v8, %v3505_v9  ;;  %v3216_v9 = vld [vmem:[#allocation14] sm:$0x3] }
 0x8f2   : > { %5322 = vmatpush1.bf16.msra.mxu0 %v5321_v4  ;;  %v5399_v4 = vpack.c.bf16 %v3515_v26, %v3507_v15  ;;  %v3258_v8 = vrot.slane %v3216_v9, %v7096_v63  ;;  %v3254_v15 = vrot.slane %v3216_v9, %v7099_v3 }
 0x8f3   : > { %5386 = vmatpush1.bf16.msra.mxu1 %v5385_v14  ;;  %5324 = vmatprep.subr.bf16.mxu0 %v5323_v23  ;;  %v3504_v14 = vld [vmem:[#allocation17 + $0x680] sm:$0xff] }
 0x8f4   : > { %5388 = vmatprep.subr.bf16.mxu1 %v5387_v33  ;;  %v3512_v23 = vld [vmem:[#allocation17 + $0x6c0] sm:$0xff]  ;;  %v3514_v33 = vld [vmem:[#allocation17 + $0x6d0] sm:$0xff] }
 0x8f5   : > { %v5337_v2 = vpack.c.bf16 %v3512_v23, %v3504_v14 }
 0x8f6   : > { %5326 = vmatpush1.bf16.msra.mxu0 %v5325_v38  ;;  %v5401_v38 = vpack.c.bf16 %v3514_v33, %v3506_v28  ;;  %v3302_v33 = vld [vmem:[#allocation17 + $0x30] sm:$0xff] }
 0x8f7   : > { %5390 = vmatpush1.bf16.msra.mxu1 %v5389_v21  ;;  %5328 = vmatprep.subr.bf16.mxu0 %v5327_v48  ;;  %v5339_v21 = vpack.c.bf16 %v3529_v36, %v3521_v35  ;;  %v3547_v48 = vld [vmem:[#allocation17 + $0x7d8] sm:$0xff]  ;;  %v3310_v35 = vld [vmem:[#allocation17 + $0x70] sm:$0xff]  ;;  %v3317_v36 = vld [vmem:[#allocation17 + $0xa8] sm:$0xff] }
 0x8f8   : > { %5392 = vmatprep.subr.bf16.mxu1 %v5391_v58  ;;  %v5407_v57 = vpack.c.bf16 %v3547_v48, %v3539_v47  ;;  %v3538_v58 = vld [vmem:[#allocation17 + $0x790] sm:$0xff] }
 0x8f9   : > { %v3326_v48 = vld [vmem:[#allocation17 + $0xf0] sm:$0xff] }
 0x8fa   : > { %5330 = vmatpush1.bf16.msra.mxu0 %v5329_v59  ;;  %v3546_v59 = vld [vmem:[#allocation17 + $0x7d0] sm:$0xff] }
 0x8fb   : > { %5394 = vmatpush1.bf16.msra.mxu1 %v5393_v12  ;;  %5332 = vmatprep.subr.bf16.mxu0 %v5331_v32  ;;  %v5409_v10 = vpack.c.bf16 %v3546_v59, %v3538_v58  ;;  %v3301_v12 = vld [vmem:[#allocation17 + $0x28] sm:$0xff]  ;;  %v3311_v32 = vld [vmem:[#allocation17 + $0x78] sm:$0xff] }
 0x8fc   : > { %5396 = vmatprep.subr.bf16.mxu1 %v5395_v19  ;;  %v5411_v16 = vpack.c.bf16 %v3309_v56, %v3301_v12  ;;  %v5475_v17 = vpack.c.bf16 %v3311_v32, %v3303_v13  ;;  %v3341_v59 = vld [vmem:[#allocation17 + $0x168] sm:$0xff]  ;;  %v3332_v56 = vld [vmem:[#allocation17 + $0x120] sm:$0xff]  ;;  %v3342_v32 = vld [vmem:[#allocation17 + $0x170] sm:$0xff] }
 0x8fd   : > { %v3340_v13 = vld [vmem:[#allocation17 + $0x160] sm:$0xff] }
 0x8fe   : > { %5334 = vmatpush1.bf16.msra.mxu0 %v5333_v22 }
 0x8ff   : > { %5398 = vmatpush1.bf16.msra.mxu1 %v5397_v31  ;;  %5336 = vmatprep.subr.bf16.mxu0 %v5335_v27  ;;  %v3217_v31 = vld [vmem:[#allocation16] sm:$0x3]  ;;  %v3300_v27 = vld [vmem:[#allocation17 + $0x20] sm:$0xff] }
 0x900   : > { %5400 = vmatprep.subr.bf16.mxu1 %v5399_v4  ;;  %v3273_v14 = vrot.slane %v3217_v31, %v7096_v63  ;;  %v3269_v28 = vrot.slane %v3217_v31, %v7099_v3  ;;  %v3348_v31 = vld [vmem:[#allocation17 + $0x1a0] sm:$0xff] }
 0x902   : > { %5338 = vmatpush1.bf16.msra.mxu0 %v5337_v2  ;;  %v3308_v2 = vld [vmem:[#allocation17 + $0x60] sm:$0xff] }
 0x903   : > { %5402 = vmatpush1.bf16.msra.mxu1 %v5401_v38  ;;  %5340 = vmatprep.subr.bf16.mxu0 %v5339_v21 }
 0x964   : > { %v3220_v49 = vpop.xlane.xlu1 %3219 }
 0x965   : > { %v3224_v0 = vmul.f32 0.00390625, %v3220_v49  ;;  %v3523_v49 = vld [vmem:[#allocation17 + $0x718] sm:$0xff] }
 0x967   : > { %v7472_v37 = vsub.f32 %v7456_v50, %v3224_v0  ;;  %v7475_v24 = vsub.f32 %v7459_v53, %v3224_v0  ;;  %v3531_v0 = vld [vmem:[#allocation17 + $0x758] sm:$0xff] }
 0x968   : > { %v3223_v43 = vpop.xlane.xlu0 %3222 }
 0x969   : > { %v3225_v6 = vmul.f32 0.00390625, %v3223_v43  ;;  %v3230_v39 = vmul.f32 %v7472_v37, %v7472_v37  ;;  %v3231_v40 = vmul.f32 %v7475_v24, %v7475_v24  ;;  %v3520_v43 = vld [vmem:[#allocation17 + $0x700] sm:$0xff] }
 0x96b   : > { %v7482_v44 = vsub.f32 %v7464_v11, %v3225_v6  ;;  %v7485_v5 = vsub.f32 %v7467_v55, %v3225_v6  ;;  %v3234_v62 = vadd.f32 %v3231_v40, %v3230_v39  ;;  %v5403_v6 = vpack.c.bf16 %v3531_v0, %v3523_v49  ;;  %v3528_v39 = vld [vmem:[#allocation17 + $0x740] sm:$0xff]  ;;  %v3522_v40 = vld [vmem:[#allocation17 + $0x710] sm:$0xff]  ;;  %v3325_v49 = vld [vmem:[#allocation17 + $0xe8] sm:$0xff] }
 0x96c   : > { %v3319_v0 = vld [vmem:[#allocation17 + $0xb8] sm:$0xff]  ;;  %v5415_v47 = vpack.c.bf16 %v3325_v49, %v3317_v36  ;;  %v3364_v36 = vld [vmem:[#allocation17 + $0x220] sm:$0xff] }
 0x96d   : > { %3235 = vadd.xlane.f32.xlu0 %v3234_v62  ;;  %v3232_v25 = vmul.f32 %v7482_v44, %v7482_v44  ;;  %v3233_v45 = vmul.f32 %v7485_v5, %v7485_v5  ;;  %v3530_v62 = vld [vmem:[#allocation17 + $0x750] sm:$0xff]  ;;  %5404 = vmatprep.subr.bf16.mxu1 %v5403_v6 }
 0x96e   : > { %v5405_v20 = vpack.c.bf16 %v3530_v62, %v3522_v40  ;;  %v5477_v40 = vpack.c.bf16 %v3310_v35, %v3302_v33 }
 0x96f   : > { %v3237_v7 = vadd.f32 %v3233_v45, %v3232_v25  ;;  %v5341_v25 = vpack.c.bf16 %v3528_v39, %v3520_v43  ;;  %v3537_v45 = vld [vmem:[#allocation17 + $0x788] sm:$0xff]  ;;  %v3327_v43 = vld [vmem:[#allocation17 + $0xf8] sm:$0xff]  ;;  %v5413_v39 = vpack.c.bf16 %v3308_v2, %v3300_v27  ;;  %v3350_v27 = vld [vmem:[#allocation17 + $0x1b0] sm:$0xff] }
 0x970   : > { %5406 = vmatpush1.bf16.msra.mxu1 %v5405_v20  ;;  %v5479_v20 = vpack.c.bf16 %v3327_v43, %v3319_v0  ;;  %v3375_v2 = vld [vmem:[#allocation17 + $0x278] sm:$0xff]  ;;  %v3366_v0 = vld [vmem:[#allocation17 + $0x230] sm:$0xff] }
 0x971   : > { %3238 = vadd.xlane.f32.xlu1 %v3237_v7  ;;  %v3545_v7 = vld [vmem:[#allocation17 + $0x7c8] sm:$0xff]  ;;  %5342 = vmatpush1.bf16.msra.mxu0 %v5341_v25  ;;  %v3374_v43 = vld [vmem:[#allocation17 + $0x270] sm:$0xff] }
 0x972   : > { %v5343_v34 = vpack.c.bf16 %v3545_v7, %v3537_v45  ;;  %5408 = vmatprep.subr.bf16.mxu1 %v5407_v57  ;;  %v3316_v45 = vld [vmem:[#allocation17 + $0xa0] sm:$0xff]  ;;  %v3333_v57 = vld [vmem:[#allocation17 + $0x128] sm:$0xff] }
 0x973   : > { %v3324_v7 = vld [vmem:[#allocation17 + $0xe0] sm:$0xff] }
 0x974   : > { %5344 = vmatprep.subr.bf16.mxu0 %v5343_v34  ;;  %5410 = vmatpush1.bf16.msra.mxu1 %v5409_v10  ;;  %v3318_v34 = vld [vmem:[#allocation17 + $0xb0] sm:$0xff]  ;;  %v5417_v58 = vpack.c.bf16 %v3324_v7, %v3316_v45  ;;  %v3380_v45 = vld [vmem:[#allocation17 + $0x2a0] sm:$0xff] }
 0x975   : > { %5346 = vmatpush1.bf16.msra.mxu0 %v5345_v60  ;;  %5476 = vmatprep.subr.bf16.mxu1 %v5475_v17  ;;  %v3343_v60 = vld [vmem:[#allocation17 + $0x178] sm:$0xff]  ;;  %v5481_v12 = vpack.c.bf16 %v3326_v48, %v3318_v34  ;;  %v3349_v17 = vld [vmem:[#allocation17 + $0x1a8] sm:$0xff]  ;;  %v3388_v7 = vld [vmem:[#allocation17 + $0x2e0] sm:$0xff] }
 0x976   : > { %5412 = vmatprep.subr.bf16.mxu0 %v5411_v16  ;;  %v3334_v16 = vld [vmem:[#allocation17 + $0x130] sm:$0xff] }
 0x977   : > { %v5485_v9 = vpack.c.bf16 %v3342_v32, %v3334_v16  ;;  %v3382_v34 = vld [vmem:[#allocation17 + $0x2b0] sm:$0xff] }
 0x978   : > { %v3390_v48 = vld [vmem:[#allocation17 + $0x2f0] sm:$0xff] }
 0x979   : > { %v3398_v16 = vld [vmem:[#allocation17 + $0x330] sm:$0xff] }
 0x97a   : > { %v3406_v32 = vld [vmem:[#allocation17 + $0x370] sm:$0xff] }
 0x9fa   : > { %v3236_v51 = vpop.xlane.xlu0 %3235 }
 0x9fb   : > { %v3240_v46 = vmul.f32 0.00390625, %v3236_v51  ;;  %v5419_v51 = vpack.c.bf16 %v3341_v59, %v3333_v57  ;;  %v3399_v57 = vld [vmem:[#allocation17 + $0x338] sm:$0xff]  ;;  %v5433_v59 = vpack.c.bf16 %v3388_v7, %v3380_v45 }
 0x9fd   : > { %v3242_v19 = vadd.f32 1e-05, %v3240_v46 }
 0x9fe   : > { %v3239_v22 = vpop.xlane.xlu1 %3238 }
 0x9ff   : > { %6031 = vrsqrt.f32 %v3242_v19  ;;  %v3241_v1 = vmul.f32 0.00390625, %v3239_v22  ;;  %v3357_v19 = vld [vmem:[#allocation17 + $0x1e8] sm:$0xff]  ;;  %v3351_v22 = vld [vmem:[#allocation17 + $0x1b8] sm:$0xff] }
 0xa01   : > { %v3243_v18 = vadd.f32 1e-05, %v3241_v1  ;;  %v3359_v1 = vld [vmem:[#allocation17 + $0x1f8] sm:$0xff] }
 0xa03   : > { %6033 = vrsqrt.f32 %v3243_v18  ;;  %v5421_v18 = vpack.c.bf16 %v3340_v13, %v3332_v56 }
 0xa09   : > { %v6032_v26 = vpop.eup %6031 }
 0xa0a   : > { %v3247_v4 = vmul.f32 %v6032_v26, %v7475_v24  ;;  %v3246_v23 = vmul.f32 %v6032_v26, %v7472_v37  ;;  %v5487_v26 = vpack.c.bf16 %v3359_v1, %v3351_v22  ;;  %v5501_v1 = vpack.c.bf16 %v3406_v32, %v3398_v16  ;;  %v3477_v16 = vld [vmem:[#allocation17 + $0x5a8] sm:$0xff] }
 0xa0b   : > { %v3485_v32 = vld [vmem:[#allocation17 + $0x5e8] sm:$0xff] }
 0xa0c   : > { %v3262_v38 = vmul.f32 %v3258_v8, %v3247_v4  ;;  %v3261_v21 = vmul.f32 %v3254_v15, %v3246_v23  ;;  %v3358_v4 = vld [vmem:[#allocation17 + $0x1f0] sm:$0xff]  ;;  %v3373_v23 = vld [vmem:[#allocation17 + $0x268] sm:$0xff] }
 0xa0d   : > { %v6034_v6 = vpop.eup %6033  ;;  %v5489_v35 = vpack.c.bf16 %v3358_v4, %v3350_v27  ;;  %v3429_v27 = vld [vmem:[#allocation17 + $0x428] sm:$0xff] }
 0xa0e   : > { %v3277_v62 = vadd.f32 %v3273_v14, %v3262_v38  ;;  %v7497_v24 = vadd.f32 %v3269_v28, %v3261_v21  ;;  %v3249_v25 = vmul.f32 %v6034_v6, %v7485_v5  ;;  %v3248_v37 = vmul.f32 %v6034_v6, %v7482_v44  ;;  %v3335_v5 = vld [vmem:[#allocation17 + $0x138] sm:$0xff]  ;;  %v3372_v38 = vld [vmem:[#allocation17 + $0x260] sm:$0xff]  ;;  %v3381_v6 = vld [vmem:[#allocation17 + $0x2a8] sm:$0xff] }
 0xa0f   : > { %v5483_v46 = vpack.c.bf16 %v3343_v60, %v3335_v5  ;;  %v5497_v5 = vpack.c.bf16 %v3390_v48, %v3382_v34  ;;  %v3396_v60 = vld [vmem:[#allocation17 + $0x320] sm:$0xff]  ;;  %v3437_v4 = vld [vmem:[#allocation17 + $0x468] sm:$0xff] }
 0xa10   : > { %3658 = vmatprep.mubr.f32.mxu0 %v3277_v62  ;;  %3735 = vmatprep.mubr.f32.mxu1 %v3277_v62  ;;  %v3264_v52 = vmul.f32 %v3258_v8, %v3249_v25  ;;  %v3263_v54 = vmul.f32 %v3254_v15, %v3248_v37  ;;  %v3356_v8 = vld [vmem:[#allocation17 + $0x1e0] sm:$0xff]  ;;  %v5423_v15 = vpack.c.bf16 %v3357_v19, %v3349_v17  ;;  %v3413_v17 = vld [vmem:[#allocation17 + $0x3a8] sm:$0xff]  ;;  %v3423_v19 = vld [vmem:[#allocation17 + $0x3f8] sm:$0xff] }
 0xa11   : > { %3659 = vmatmul.mubr.f32.vlgmr.msra.gmra.mrb[6].mxu0 %v7497_v24  ;;  %3736 = vmatmul.mubr.f32.vlgmr.msra.gmra.mrb[26].mxu1 %v7497_v24  ;;  %v5425_v33 = vpack.c.bf16 %v3356_v8, %v3348_v31  ;;  %v5429_v25 = vpack.c.bf16 %v3372_v38, %v3364_v36  ;;  %v5493_v37 = vpack.c.bf16 %v3374_v43, %v3366_v0  ;;  %v3445_v0 = vld [vmem:[#allocation17 + $0x4a8] sm:$0xff] }
 0xa12   : > { %5414 = vmatpush1.bf16.msra.mxu0 %v5413_v39  ;;  %5478 = vmatpush1.bf16.msra.mxu1 %v5477_v40  ;;  %v7503_v44 = vadd.f32 %v3273_v14, %v3264_v52  ;;  %v7505_v10 = vadd.f32 %v3269_v28, %v3263_v54  ;;  %v3365_v14 = vld [vmem:[#allocation17 + $0x228] sm:$0xff]  ;;  %v3367_v28 = vld [vmem:[#allocation17 + $0x238] sm:$0xff]  ;;  %v5443_v36 = vpack.c.bf16 %v3437_v4, %v3429_v27 }
 0xa13   : > { %5416 = vmatprep.subr.bf16.mxu0 %v5415_v47  ;;  %5480 = vmatprep.subr.bf16.mxu1 %v5479_v20  ;;  %v5427_v21 = vpack.c.bf16 %v3373_v23, %v3365_v14  ;;  %v5491_v49 = vpack.c.bf16 %v3375_v2, %v3367_v28  ;;  %v3389_v39 = vld [vmem:[#allocation17 + $0x2e8] sm:$0xff]  ;;  %v3383_v40 = vld [vmem:[#allocation17 + $0x2b8] sm:$0xff] }
 0xa14   : > { %3664 = vmatprep.mubr.f32.mxu0 %v7503_v44  ;;  %3741 = vmatprep.mubr.f32.mxu1 %v7503_v44  ;;  %v5431_v47 = vpack.c.bf16 %v3389_v39, %v3381_v6  ;;  %v3397_v52 = vld [vmem:[#allocation17 + $0x328] sm:$0xff]  ;;  %v3431_v14 = vld [vmem:[#allocation17 + $0x438] sm:$0xff] }
 0xa15   : > { %3665 = vmatmul.mubr.f32.gmra.mrb[8].mxu0 %v7505_v10  ;;  %3742 = vmatmul.mubr.f32.gmra.mrb[28].mxu1 %v7505_v10  ;;  %v3405_v54 = vld [vmem:[#allocation17 + $0x368] sm:$0xff]  ;;  %v3439_v23 = vld [vmem:[#allocation17 + $0x478] sm:$0xff] }
 0xa16   : > { %5418 = vmatpush1.bf16.msra.mxu0 %v5417_v58  ;;  %5482 = vmatpush1.bf16.msra.mxu1 %v5481_v12  ;;  %v3407_v58 = vld [vmem:[#allocation17 + $0x378] sm:$0xff]  ;;  %v3404_v12 = vld [vmem:[#allocation17 + $0x360] sm:$0xff]  ;;  %v5435_v56 = vpack.c.bf16 %v3405_v54, %v3397_v52  ;;  %v5507_v38 = vpack.c.bf16 %v3439_v23, %v3431_v14  ;;  %v3453_v43 = vld [vmem:[#allocation17 + $0x4e8] sm:$0xff] }
 0xa17   : > { %3812 = vmatprep.mubr.f32.mxu0 %v3277_v62  ;;  %3889 = vmatprep.mubr.f32.mxu1 %v3277_v62  ;;  %v3391_v62 = vld [vmem:[#allocation17 + $0x2f8] sm:$0xff]  ;;  %v5499_v13 = vpack.c.bf16 %v3407_v58, %v3399_v57  ;;  %v5437_v22 = vpack.c.bf16 %v3404_v12, %v3396_v60  ;;  %v5447_v45 = vpack.c.bf16 %v3453_v43, %v3445_v0  ;;  %v3461_v34 = vld [vmem:[#allocation17 + $0x528] sm:$0xff] }
 0xa18   : > { %5420 = vmatprep.subr.bf16.mxu0 %v5419_v51  ;;  %5484 = vmatprep.subr.bf16.mxu1 %v5483_v46  ;;  %v5495_v20 = vpack.c.bf16 %v3391_v62, %v3383_v40  ;;  %v3421_v51 = vld [vmem:[#allocation17 + $0x3e8] sm:$0xff]  ;;  %v3415_v46 = vld [vmem:[#allocation17 + $0x3b8] sm:$0xff] }
 0xa19   : > { %v5439_v31 = vpack.c.bf16 %v3421_v51, %v3413_v17  ;;  %v5503_v8 = vpack.c.bf16 %v3423_v19, %v3415_v46  ;;  %v3447_v6 = vld [vmem:[#allocation17 + $0x4b8] sm:$0xff]  ;;  %v3469_v48 = vld [vmem:[#allocation17 + $0x568] sm:$0xff] }
 0xa1a   : > { %5422 = vmatpush1.bf16.msra.mxu0 %v5421_v18  ;;  %5486 = vmatpush1.bf16.msra.mxu1 %v5485_v9  ;;  %v3412_v18 = vld [vmem:[#allocation17 + $0x3a0] sm:$0xff]  ;;  %v3455_v39 = vld [vmem:[#allocation17 + $0x4f8] sm:$0xff]  ;;  %v5451_v60 = vpack.c.bf16 %v3469_v48, %v3461_v34 }
 0xa1b   : > { %5424 = vmatprep.subr.bf16.mxu0 %v5423_v15  ;;  %5488 = vmatprep.subr.bf16.mxu1 %v5487_v26  ;;  %v3420_v9 = vld [vmem:[#allocation17 + $0x3e0] sm:$0xff]  ;;  %v3414_v15 = vld [vmem:[#allocation17 + $0x3b0] sm:$0xff]  ;;  %v5511_v7 = vpack.c.bf16 %v3455_v39, %v3447_v6  ;;  %v3463_v52 = vld [vmem:[#allocation17 + $0x538] sm:$0xff] }
 0xa1c   : > { %v3422_v26 = vld [vmem:[#allocation17 + $0x3f0] sm:$0xff]  ;;  %v5441_v28 = vpack.c.bf16 %v3420_v9, %v3412_v18  ;;  %v3471_v54 = vld [vmem:[#allocation17 + $0x578] sm:$0xff]  ;;  %v5455_v18 = vpack.c.bf16 %v3485_v32, %v3477_v16 }
 0xa1d   : > { %v5505_v2 = vpack.c.bf16 %v3422_v26, %v3414_v15  ;;  %v5515_v12 = vpack.c.bf16 %v3471_v54, %v3463_v52  ;;  %v3479_v17 = vld [vmem:[#allocation17 + $0x5b8] sm:$0xff]  ;;  %v3493_v15 = vld [vmem:[#allocation17 + $0x628] sm:$0xff] }
 0xa1e   : > { %5426 = vmatpush1.bf16.msra.mxu0 %v5425_v33  ;;  %5490 = vmatpush1.bf16.msra.mxu1 %v5489_v35  ;;  %v3428_v33 = vld [vmem:[#allocation17 + $0x420] sm:$0xff]  ;;  %v3487_v51 = vld [vmem:[#allocation17 + $0x5f8] sm:$0xff]  ;;  %v3501_v26 = vld [vmem:[#allocation17 + $0x668] sm:$0xff] }
 0xa1f   : > { %5428 = vmatprep.subr.bf16.mxu0 %v5427_v21  ;;  %5492 = vmatprep.subr.bf16.mxu1 %v5491_v49  ;;  %v3436_v35 = vld [vmem:[#allocation17 + $0x460] sm:$0xff]  ;;  %v3430_v21 = vld [vmem:[#allocation17 + $0x430] sm:$0xff]  ;;  %v5519_v9 = vpack.c.bf16 %v3487_v51, %v3479_v17  ;;  %v3495_v27 = vld [vmem:[#allocation17 + $0x638] sm:$0xff] }
 0xa20   : > { %v3438_v49 = vld [vmem:[#allocation17 + $0x470] sm:$0xff]  ;;  %v5445_v40 = vpack.c.bf16 %v3436_v35, %v3428_v33  ;;  %v3503_v4 = vld [vmem:[#allocation17 + $0x678] sm:$0xff]  ;;  %v5459_v33 = vpack.c.bf16 %v3501_v26, %v3493_v15 }
 0xa21   : > { %v5509_v62 = vpack.c.bf16 %v3438_v49, %v3430_v21  ;;  %v5523_v35 = vpack.c.bf16 %v3503_v4, %v3495_v27  ;;  %v3509_v21 = vld [vmem:[#allocation17 + $0x6a8] sm:$0xff]  ;;  %v3511_v0 = vld [vmem:[#allocation17 + $0x6b8] sm:$0xff] }
 0xa22   : > { %5430 = vmatpush1.bf16.msra.mxu0 %v5429_v25  ;;  %5494 = vmatpush1.bf16.msra.mxu1 %v5493_v37  ;;  %v3444_v25 = vld [vmem:[#allocation17 + $0x4a0] sm:$0xff]  ;;  %v3517_v49 = vld [vmem:[#allocation17 + $0x6e8] sm:$0xff]  ;;  %v3519_v43 = vld [vmem:[#allocation17 + $0x6f8] sm:$0xff] }
 0xa23   : > { %5432 = vmatprep.subr.bf16.mxu0 %v5431_v47  ;;  %5496 = vmatprep.subr.bf16.mxu1 %v5495_v20  ;;  %v3452_v37 = vld [vmem:[#allocation17 + $0x4e0] sm:$0xff]  ;;  %v3446_v47 = vld [vmem:[#allocation17 + $0x4b0] sm:$0xff]  ;;  %v3527_v34 = vld [vmem:[#allocation17 + $0x738] sm:$0xff] }
 0xa24   : > { %v3454_v20 = vld [vmem:[#allocation17 + $0x4f0] sm:$0xff]  ;;  %v5449_v57 = vpack.c.bf16 %v3452_v37, %v3444_v25  ;;  %v5463_v25 = vpack.c.bf16 %v3517_v49, %v3509_v21  ;;  %v5527_v37 = vpack.c.bf16 %v3519_v43, %v3511_v0  ;;  %v3535_v48 = vld [vmem:[#allocation17 + $0x778] sm:$0xff]  ;;  %v4030_v4 = vld [vmem:[#allocation20] sm:$0xff] }
 0xa25   : > { %v5513_v58 = vpack.c.bf16 %v3454_v20, %v3446_v47  ;;  %v3525_v47 = vld [vmem:[#allocation17 + $0x728] sm:$0xff]  ;;  %v3543_v16 = vld [vmem:[#allocation17 + $0x7b8] sm:$0xff]  ;;  %v4041_v21 = vld [vmem:[#allocation20 + $0x58] sm:$0xff] }
 0xa26   : > { %5434 = vmatpush1.bf16.msra.mxu0 %v5433_v59  ;;  %5498 = vmatpush1.bf16.msra.mxu1 %v5497_v5  ;;  %v3460_v59 = vld [vmem:[#allocation17 + $0x520] sm:$0xff]  ;;  %v3533_v20 = vld [vmem:[#allocation17 + $0x768] sm:$0xff]  ;;  %v3551_v32 = vld [vmem:[#allocation17 + $0x7f8] sm:$0xff] }
 0xa27   : > { %5436 = vmatprep.subr.bf16.mxu0 %v5435_v56  ;;  %5500 = vmatprep.subr.bf16.mxu1 %v5499_v13  ;;  %v3468_v5 = vld [vmem:[#allocation17 + $0x560] sm:$0xff]  ;;  %v3462_v56 = vld [vmem:[#allocation17 + $0x530] sm:$0xff]  ;;  %v4038_v43 = vld [vmem:[#allocation20 + $0x40] sm:$0xff] }
 0xa28   : > { %v3470_v13 = vld [vmem:[#allocation17 + $0x570] sm:$0xff]  ;;  %v5453_v46 = vpack.c.bf16 %v3468_v5, %v3460_v59  ;;  %v5467_v59 = vpack.c.bf16 %v3533_v20, %v3525_v47  ;;  %v5531_v5 = vpack.c.bf16 %v3535_v48, %v3527_v34  ;;  %v4046_v20 = vld [vmem:[#allocation20 + $0x80] sm:$0xff]  ;;  %v4048_v34 = vld [vmem:[#allocation20 + $0x90] sm:$0xff] }
 0xa29   : > { %v5517_v19 = vpack.c.bf16 %v3470_v13, %v3462_v56  ;;  %v3541_v56 = vld [vmem:[#allocation17 + $0x7a8] sm:$0xff]  ;;  %v4051_v48 = vld [vmem:[#allocation20 + $0xa8] sm:$0xff] }
 0xa2a   : > { %5438 = vmatpush1.bf16.msra.mxu0 %v5437_v22  ;;  %5502 = vmatpush1.bf16.msra.mxu1 %v5501_v1  ;;  %v3476_v22 = vld [vmem:[#allocation17 + $0x5a0] sm:$0xff]  ;;  %v3549_v13 = vld [vmem:[#allocation17 + $0x7e8] sm:$0xff] }
 0xa2b   : > { %5440 = vmatprep.subr.bf16.mxu0 %v5439_v31  ;;  %5504 = vmatprep.subr.bf16.mxu1 %v5503_v8  ;;  %v3484_v1 = vld [vmem:[#allocation17 + $0x5e0] sm:$0xff]  ;;  %v3478_v31 = vld [vmem:[#allocation17 + $0x5b0] sm:$0xff] }
 0xa2c   : > { %v3486_v8 = vld [vmem:[#allocation17 + $0x5f0] sm:$0xff]  ;;  %v5457_v14 = vpack.c.bf16 %v3484_v1, %v3476_v22  ;;  %v5535_v22 = vpack.c.bf16 %v3551_v32, %v3543_v16  ;;  %v3548_v1 = vld [vmem:[#allocation17 + $0x7e0] sm:$0xff] }
 0xa2d   : > { %v5521_v23 = vpack.c.bf16 %v3486_v8, %v3478_v31  ;;  %v4031_v31 = vld [vmem:[#allocation20 + $0x8] sm:$0xff]  ;;  %v4033_v8 = vld [vmem:[#allocation20 + $0x18] sm:$0xff] }
 0xa2e   : > { %5442 = vmatpush1.bf16.msra.mxu0 %v5441_v28  ;;  %5506 = vmatpush1.bf16.msra.mxu1 %v5505_v2  ;;  %v3492_v28 = vld [vmem:[#allocation17 + $0x620] sm:$0xff]  ;;  %v5539_v27 = vpack.c.bf16 %v4033_v8, %v4031_v31  ;;  %v4059_v16 = vld [vmem:[#allocation20 + $0xe8] sm:$0xff]  ;;  %v4062_v31 = vld [vmem:[#allocation20 + $0x100] sm:$0xff] }
 0xa2f   : > { %5444 = vmatprep.subr.bf16.mxu0 %v5443_v36  ;;  %5508 = vmatprep.subr.bf16.mxu1 %v5507_v38  ;;  %v3500_v2 = vld [vmem:[#allocation17 + $0x660] sm:$0xff]  ;;  %v3494_v36 = vld [vmem:[#allocation17 + $0x630] sm:$0xff]  ;;  %v4064_v8 = vld [vmem:[#allocation20 + $0x110] sm:$0xff] }
 0xa30   : > { %v3502_v38 = vld [vmem:[#allocation17 + $0x670] sm:$0xff]  ;;  %v5461_v6 = vpack.c.bf16 %v3500_v2, %v3492_v28  ;;  %v4037_v28 = vld [vmem:[#allocation20 + $0x38] sm:$0xff] }
 0xa31   : > { %v5525_v39 = vpack.c.bf16 %v3502_v38, %v3494_v36  ;;  %v4036_v36 = vld [vmem:[#allocation20 + $0x30] sm:$0xff]  ;;  %v4039_v38 = vld [vmem:[#allocation20 + $0x48] sm:$0xff]  ;;  %v4061_v32 = vld [vmem:[#allocation20 + $0xf8] sm:$0xff] }
 0xa32   : > { %5446 = vmatpush1.bf16.msra.mxu0 %v5445_v40  ;;  %5510 = vmatpush1.bf16.msra.mxu1 %v5509_v62  ;;  %v3508_v40 = vld [vmem:[#allocation17 + $0x6a0] sm:$0xff]  ;;  %v5547_v0 = vpack.c.bf16 %v4041_v21, %v4039_v38  ;;  %v4072_v38 = vld [vmem:[#allocation20 + $0x150] sm:$0xff] }
 0xa33   : > { %5448 = vmatprep.subr.bf16.mxu0 %v5447_v45  ;;  %5512 = vmatprep.subr.bf16.mxu1 %v5511_v7  ;;  %v3516_v62 = vld [vmem:[#allocation17 + $0x6e0] sm:$0xff]  ;;  %v3510_v45 = vld [vmem:[#allocation17 + $0x6b0] sm:$0xff] }
 0xa34   : > { %v3518_v7 = vld [vmem:[#allocation17 + $0x6f0] sm:$0xff]  ;;  %v5465_v52 = vpack.c.bf16 %v3516_v62, %v3508_v40  ;;  %v4045_v40 = vld [vmem:[#allocation20 + $0x78] sm:$0xff] }
 0xa35   : > { %v5529_v54 = vpack.c.bf16 %v3518_v7, %v3510_v45  ;;  %v4047_v45 = vld [vmem:[#allocation20 + $0x88] sm:$0xff] }
 0xa36   : > { %5450 = vmatpush1.bf16.msra.mxu0 %v5449_v57  ;;  %5514 = vmatpush1.bf16.msra.mxu1 %v5513_v58  ;;  %v3524_v57 = vld [vmem:[#allocation17 + $0x720] sm:$0xff] }
 0xa37   : > { %5452 = vmatprep.subr.bf16.mxu0 %v5451_v60  ;;  %5516 = vmatprep.subr.bf16.mxu1 %v5515_v12  ;;  %v3532_v58 = vld [vmem:[#allocation17 + $0x760] sm:$0xff]  ;;  %v3526_v60 = vld [vmem:[#allocation17 + $0x730] sm:$0xff] }
 0xa38   : > { %v3534_v12 = vld [vmem:[#allocation17 + $0x770] sm:$0xff]  ;;  %v5469_v17 = vpack.c.bf16 %v3532_v58, %v3524_v57  ;;  %v4050_v57 = vld [vmem:[#allocation20 + $0xa0] sm:$0xff]  ;;  %v4052_v58 = vld [vmem:[#allocation20 + $0xb0] sm:$0xff] }
 0xa39   : > { %v5533_v51 = vpack.c.bf16 %v3534_v12, %v3526_v60  ;;  %v5561_v60 = vpack.c.bf16 %v4052_v58, %v4050_v57  ;;  %v4086_v58 = vld [vmem:[#allocation20 + $0x1c0] sm:$0xff] }
 0xa3a   : > { %5454 = vmatpush1.bf16.msra.mxu0 %v5453_v46  ;;  %5518 = vmatpush1.bf16.msra.mxu1 %v5517_v19  ;;  %v3540_v46 = vld [vmem:[#allocation17 + $0x7a0] sm:$0xff]  ;;  %v5471_v19 = vpack.c.bf16 %v3549_v13, %v3541_v56  ;;  %v4054_v56 = vld [vmem:[#allocation20 + $0xc0] sm:$0xff]  ;;  %v4056_v13 = vld [vmem:[#allocation20 + $0xd0] sm:$0xff] }
 0xa3b   : > { %5456 = vmatprep.subr.bf16.mxu0 %v5455_v18  ;;  %5520 = vmatprep.subr.bf16.mxu1 %v5519_v9  ;;  %v3542_v18 = vld [vmem:[#allocation17 + $0x7b0] sm:$0xff]  ;;  %v5473_v15 = vpack.c.bf16 %v3548_v1, %v3540_v46  ;;  %v4058_v46 = vld [vmem:[#allocation20 + $0xe0] sm:$0xff] }
 0xa3c   : > { %v3550_v9 = vld [vmem:[#allocation17 + $0x7f0] sm:$0xff] }
 0xa3d   : > { %v5537_v26 = vpack.c.bf16 %v3550_v9, %v3542_v18  ;;  %v4063_v1 = vld [vmem:[#allocation20 + $0x108] sm:$0xff]  ;;  %v4065_v18 = vld [vmem:[#allocation20 + $0x118] sm:$0xff] }
 0xa3e   : > { %5458 = vmatpush1.bf16.msra.mxu0 %v5457_v14  ;;  %5522 = vmatpush1.bf16.msra.mxu1 %v5521_v23  ;;  %v4032_v14 = vld [vmem:[#allocation20 + $0x10] sm:$0xff]  ;;  %v4035_v23 = vld [vmem:[#allocation20 + $0x28] sm:$0xff]  ;;  %v5571_v9 = vpack.c.bf16 %v4065_v18, %v4063_v1 }
 0xa3f   : > { %5460 = vmatprep.subr.bf16.mxu0 %v5459_v33  ;;  %5524 = vmatprep.subr.bf16.mxu1 %v5523_v35  ;;  %v5541_v2 = vpack.c.bf16 %v4032_v14, %v4030_v4  ;;  %v5543_v33 = vpack.c.bf16 %v4037_v28, %v4035_v23  ;;  %v4034_v35 = vld [vmem:[#allocation20 + $0x20] sm:$0xff]  ;;  %v4068_v23 = vld [vmem:[#allocation20 + $0x130] sm:$0xff] }
 0xa40   : > { %v5545_v49 = vpack.c.bf16 %v4036_v36, %v4034_v35  ;;  %v4066_v14 = vld [vmem:[#allocation20 + $0x120] sm:$0xff] }
 0xa41   : > { %v5577_v28 = vpack.c.bf16 %v4068_v23, %v4066_v14  ;;  %v4070_v36 = vld [vmem:[#allocation20 + $0x140] sm:$0xff] }
 0xa42   : > { %5462 = vmatpush1.bf16.msra.mxu0 %v5461_v6  ;;  %5526 = vmatpush1.bf16.msra.mxu1 %v5525_v39  ;;  %v4040_v6 = vld [vmem:[#allocation20 + $0x50] sm:$0xff]  ;;  %v4043_v39 = vld [vmem:[#allocation20 + $0x68] sm:$0xff]  ;;  %v5581_v21 = vpack.c.bf16 %v4072_v38, %v4070_v36 }
 0xa43   : > { %5464 = vmatprep.subr.bf16.mxu0 %v5463_v25  ;;  %5528 = vmatprep.subr.bf16.mxu1 %v5527_v37  ;;  %v5551_v62 = vpack.c.bf16 %v4045_v40, %v4043_v39  ;;  %v4042_v25 = vld [vmem:[#allocation20 + $0x60] sm:$0xff]  ;;  %v4044_v37 = vld [vmem:[#allocation20 + $0x70] sm:$0xff] }
 0xa44   : > { %v5553_v7 = vpack.c.bf16 %v4044_v37, %v4042_v25  ;;  %v4076_v39 = vld [vmem:[#allocation20 + $0x170] sm:$0xff]  ;;  %v4078_v37 = vld [vmem:[#allocation20 + $0x180] sm:$0xff] }
 0xa46   : > { %5466 = vmatpush1.bf16.msra.mxu0 %v5465_v52  ;;  %5530 = vmatpush1.bf16.msra.mxu1 %v5529_v54  ;;  %v4053_v52 = vld [vmem:[#allocation20 + $0xb8] sm:$0xff] }
 0xa47   : > { %5468 = vmatprep.subr.bf16.mxu0 %v5467_v59  ;;  %5532 = vmatprep.subr.bf16.mxu1 %v5531_v5  ;;  %v5559_v54 = vpack.c.bf16 %v4053_v52, %v4051_v48  ;;  %v4055_v59 = vld [vmem:[#allocation20 + $0xc8] sm:$0xff]  ;;  %v4057_v5 = vld [vmem:[#allocation20 + $0xd8] sm:$0xff]  ;;  %v4084_v48 = vld [vmem:[#allocation20 + $0x1b0] sm:$0xff] }
 0xa48   : > { %v5563_v12 = vpack.c.bf16 %v4057_v5, %v4055_v59  ;;  %v4088_v59 = vld [vmem:[#allocation20 + $0x1d0] sm:$0xff] }
 0xa49   : > { %v5597_v5 = vpack.c.bf16 %v4088_v59, %v4086_v58 }
 0xa4a   : > { %5470 = vmatpush1.bf16.msra.mxu0 %v5469_v17  ;;  %5534 = vmatpush1.bf16.msra.mxu1 %v5533_v51  ;;  %v5565_v17 = vpack.c.bf16 %v4056_v13, %v4054_v56  ;;  %v5567_v51 = vpack.c.bf16 %v4061_v32, %v4059_v16  ;;  %v4090_v56 = vld [vmem:[#allocation20 + $0x1e0] sm:$0xff]  ;;  %v4092_v16 = vld [vmem:[#allocation20 + $0x1f0] sm:$0xff]  ;;  %v4095_v32 = vld [vmem:[#allocation20 + $0x208] sm:$0xff] }
 0xa4b   : > { %5472 = vmatprep.subr.bf16.mxu0 %v5471_v19  ;;  %5536 = vmatprep.subr.bf16.mxu1 %v5535_v22  ;;  %v4060_v19 = vld [vmem:[#allocation20 + $0xf0] sm:$0xff] }
 0xa4c   : > { %v5569_v22 = vpack.c.bf16 %v4060_v19, %v4058_v46  ;;  %v7517_v19 = vld [vmem:[#allocation19] sm:$0xff] }
 0xa4d   : > { %v3561_v1 = vrot.slane %v7517_v19, %v7096_v63  ;;  %v7526_v18 = vrot.slane %v7517_v19, %v894_v42 }
 0xa4e   : > { %5474 = vmatpush1.bf16.msra.mxu0 %v5473_v15  ;;  %5538 = vmatpush1.bf16.msra.mxu1 %v5537_v26  ;;  %v5573_v15 = vpack.c.bf16 %v4064_v8, %v4062_v31  ;;  %v4067_v26 = vld [vmem:[#allocation20 + $0x128] sm:$0xff] }
 0xa4f   : > { %5540 = vmatprep.subr.bf16.mxu0 %v5539_v27  ;;  %v4069_v27 = vld [vmem:[#allocation20 + $0x138] sm:$0xff] }
 0xa50   : > { %v5575_v4 = vpack.c.bf16 %v4069_v27, %v4067_v26 }
 0xa51   : > { %3813 = vmatmul.mubr.f32.vlgmr.msra.gmra.mrb[10].mxu0 %v7497_v24  ;;  %3890 = vmatmul.mubr.f32.vlgmr.msra.gmra.mrb[30].mxu1 %v7497_v24  ;;  %v5549_v24 = vpack.c.bf16 %v4040_v6, %v4038_v43  ;;  %v4074_v6 = vld [vmem:[#allocation20 + $0x160] sm:$0xff] }
 0xa52   : > { %3818 = vmatprep.mubr.f32.mxu0 %v7503_v44  ;;  %3895 = vmatprep.mubr.f32.mxu1 %v7503_v44  ;;  %v4049_v44 = vld [vmem:[#allocation20 + $0x98] sm:$0xff]  ;;  %v5585_v40 = vpack.c.bf16 %v4076_v39, %v4074_v6 }
 0xa53   : > { %5542 = vmatpush1.bf16.msra.mxu0 %v5541_v2  ;;  %v5555_v47 = vpack.c.bf16 %v4049_v44, %v4047_v45  ;;  %v4071_v2 = vld [vmem:[#allocation20 + $0x148] sm:$0xff]  ;;  %v4080_v45 = vld [vmem:[#allocation20 + $0x190] sm:$0xff] }
 0xa54   : > { %5544 = vmatprep.subr.bf16.mxu0 %v5543_v33  ;;  %v4073_v33 = vld [vmem:[#allocation20 + $0x158] sm:$0xff]  ;;  %v5589_v44 = vpack.c.bf16 %v4080_v45, %v4078_v37 }
 0xa55   : > { %3819 = vmatmul.mubr.f32.gmra.mrb[12].mxu0 %v7505_v10  ;;  %3896 = vmatmul.mubr.f32.gmra.mrb[32].mxu1 %v7505_v10  ;;  %v5557_v10 = vpack.c.bf16 %v4048_v34, %v4046_v20  ;;  %v5579_v35 = vpack.c.bf16 %v4073_v33, %v4071_v2  ;;  %v4082_v34 = vld [vmem:[#allocation20 + $0x1a0] sm:$0xff] }
 0xa56   : > { %v5593_v52 = vpack.c.bf16 %v4084_v48, %v4082_v34  ;;  %v4094_v48 = vld [vmem:[#allocation20 + $0x200] sm:$0xff] }
 0xa57   : > { %5546 = vmatpush1.bf16.msra.mxu0 %v5545_v49  ;;  %v4075_v49 = vld [vmem:[#allocation20 + $0x168] sm:$0xff] }
 0xa58   : > { %5548 = vmatprep.subr.bf16.mxu0 %v5547_v0  ;;  %v4077_v0 = vld [vmem:[#allocation20 + $0x178] sm:$0xff] }
 0xa59   : > { %v5583_v43 = vpack.c.bf16 %v4077_v0, %v4075_v49 }
 0xa5b   : > { %5550 = vmatpush1.bf16.msra.mxu0 %v5549_v24  ;;  %v4079_v24 = vld [vmem:[#allocation20 + $0x188] sm:$0xff] }
 0xa5c   : > { %5552 = vmatprep.subr.bf16.mxu0 %v5551_v62  ;;  %v4081_v62 = vld [vmem:[#allocation20 + $0x198] sm:$0xff] }
 0xa5d   : > { %v5587_v25 = vpack.c.bf16 %v4081_v62, %v4079_v24 }
 0xa5f   : > { %5554 = vmatpush1.bf16.msra.mxu0 %v5553_v7  ;;  %v4083_v7 = vld [vmem:[#allocation20 + $0x1a8] sm:$0xff] }
 0xa60   : > { %5556 = vmatprep.subr.bf16.mxu0 %v5555_v47  ;;  %v4085_v47 = vld [vmem:[#allocation20 + $0x1b8] sm:$0xff] }
 0xa61   : > { %v5591_v20 = vpack.c.bf16 %v4085_v47, %v4083_v7 }
 0xa63   : > { %5558 = vmatpush1.bf16.msra.mxu0 %v5557_v10  ;;  %v4087_v10 = vld [vmem:[#allocation20 + $0x1c8] sm:$0xff] }
 0xa64   : > { %5560 = vmatprep.subr.bf16.mxu0 %v5559_v54  ;;  %v4089_v54 = vld [vmem:[#allocation20 + $0x1d8] sm:$0xff] }
 0xa65   : > { %v5595_v57 = vpack.c.bf16 %v4089_v54, %v4087_v10  ;;  %v4099_v54 = vld [vmem:[#allocation20 + $0x228] sm:$0xff] }
 0xa67   : > { %5562 = vmatpush1.bf16.msra.mxu0 %v5561_v60  ;;  %v4091_v60 = vld [vmem:[#allocation20 + $0x1e8] sm:$0xff] }
 0xa68   : > { %5564 = vmatprep.subr.bf16.mxu0 %v5563_v12  ;;  %v4093_v12 = vld [vmem:[#allocation20 + $0x1f8] sm:$0xff] }
 0xa69   : > { %v5599_v13 = vpack.c.bf16 %v4093_v12, %v4091_v60 }
 0xa6b   : > { %5566 = vmatpush1.bf16.msra.mxu0 %v5565_v17  ;;  %v4097_v17 = vld [vmem:[#allocation20 + $0x218] sm:$0xff] }
 0xa6c   : > { %5568 = vmatprep.subr.bf16.mxu0 %v5567_v51  ;;  %v5601_v51 = vpack.c.bf16 %v4092_v16, %v4090_v56  ;;  %v5603_v46 = vpack.c.bf16 %v4097_v17, %v4095_v32  ;;  %v4100_v16 = vld [vmem:[#allocation20 + $0x230] sm:$0xff]  ;;  %v4103_v17 = vld [vmem:[#allocation20 + $0x248] sm:$0xff] }
 0xa6f   : > { %5570 = vmatpush1.bf16.msra.mxu0 %v5569_v22  ;;  %v3557_v22 = vrot.slane %v7517_v19, %v7099_v3 }
 0xa70   : > { %5572 = vmatprep.subr.bf16.mxu0 %v5571_v9 }
 0xa73   : > { %5574 = vmatpush1.bf16.msra.mxu0 %v5573_v15 }
 0xa74   : > { %5576 = vmatprep.subr.bf16.mxu0 %v5575_v4 }
 0xa77   : > { %5578 = vmatpush1.bf16.msra.mxu0 %v5577_v28 }
 0xa78   : > { %5580 = vmatprep.subr.bf16.mxu0 %v5579_v35 }
 0xa7b   : > { %5582 = vmatpush1.bf16.msra.mxu0 %v5581_v21 }
 0xa7c   : > { %5584 = vmatprep.subr.bf16.mxu0 %v5583_v43 }
 0xa7f   : > { %5586 = vmatpush1.bf16.msra.mxu0 %v5585_v40 }
 0xa80   : > { %5588 = vmatprep.subr.bf16.mxu0 %v5587_v25 }
 0xa83   : > { %5590 = vmatpush1.bf16.msra.mxu0 %v5589_v44 }
 0xa84   : > { %5592 = vmatprep.subr.bf16.mxu0 %v5591_v20 }
 0xa87   : > { %5594 = vmatpush1.bf16.msra.mxu0 %v5593_v52  ;;  %v4096_v52 = vld [vmem:[#allocation20 + $0x210] sm:$0xff] }
 0xa88   : > { %5596 = vmatprep.subr.bf16.mxu0 %v5595_v57  ;;  %v4101_v57 = vld [vmem:[#allocation20 + $0x238] sm:$0xff] }
 0xa89   : > { %v5607_v56 = vpack.c.bf16 %v4101_v57, %v4099_v54 }
 0xa8b   : > { %5598 = vmatpush1.bf16.msra.mxu0 %v5597_v5  ;;  %v5605_v5 = vpack.c.bf16 %v4096_v52, %v4094_v48  ;;  %v4123_v48 = vld [vmem:[#allocation20 + $0x2e8] sm:$0xff]  ;;  %v4125_v52 = vld [vmem:[#allocation20 + $0x2f8] sm:$0xff] }
 0xa8c   : > { %5600 = vmatprep.subr.bf16.mxu0 %v5599_v13  ;;  %v4098_v13 = vld [vmem:[#allocation20 + $0x220] sm:$0xff] }
 0xa8f   : > { %5602 = vmatpush1.bf16.msra.mxu0 %v5601_v51  ;;  %v4105_v51 = vld [vmem:[#allocation20 + $0x258] sm:$0xff] }
 0xa90   : > { %5604 = vmatprep.subr.bf16.mxu0 %v5603_v46 }
 0xae4   : > { %v3660_v9 = vpop.f32.mrb[6].mxu0  ;;  %v7528_v31 = vpop.f32.mrb[26].mxu1 }
 0xae5   : > { %v3661_v8 = vadd.f32 %v3660_v9, %v3557_v22  ;;  %v3662_v15 = vpop.f32.mrb[7].mxu0  ;;  %v3739_v26 = vpop.f32.mrb[27].mxu1 }
 0xae6   : > { %v3663_v27 = vadd.f32 %v3662_v15, %v3561_v1  ;;  %v7531_v4 = vadd.f32 %v3739_v26, %v7526_v18  ;;  %v5611_v15 = vpack.c.bf16 %v4105_v51, %v4103_v17  ;;  %v4102_v26 = vld [vmem:[#allocation20 + $0x240] sm:$0xff]  ;;  %v4131_v17 = vld [vmem:[#allocation20 + $0x328] sm:$0xff]  ;;  %v4133_v51 = vld [vmem:[#allocation20 + $0x338] sm:$0xff] }
 0xae7   : > { %v4876_v14 = vmul.f32 -1.702, %v3661_v8 }
 0xae8   : > { %v4877_v23 = vmul.f32 -1.702, %v3663_v27  ;;  %v4879_v28 = vmul.f32 -1.702, %v7531_v4  ;;  %v3666_v2 = vpop.f32.mrb[8].mxu0  ;;  %v7534_v33 = vpop.f32.mrb[28].mxu1 }
 0xae9   : > { %v3934_v35 = vmul.f32 1.442695, %v4876_v14  ;;  %v3667_v42 = vadd.f32 %v3666_v2, %v3557_v22  ;;  %v3668_v36 = vpop.f32.mrb[9].mxu0  ;;  %v7536_v38 = vpop.f32.mrb[29].mxu1 }
 0xaea   : > { %v3936_v21 = vmul.f32 1.442695, %v4877_v23  ;;  %v3940_v49 = vmul.f32 1.442695, %v4879_v28  ;;  %v3669_v0 = vadd.f32 %v3668_v36, %v3561_v1  ;;  %v5609_v1 = vpack.c.bf16 %v4100_v16, %v4098_v13  ;;  %v4109_v23 = vld [vmem:[#allocation20 + $0x278] sm:$0xff]  ;;  %v4108_v36 = vld [vmem:[#allocation20 + $0x270] sm:$0xff] }
 0xaeb   : > { %6035 = vpow2.f32 %v3934_v35  ;;  %v4884_v43 = vmul.f32 -1.702, %v3667_v42  ;;  %v4106_v35 = vld [vmem:[#allocation20 + $0x260] sm:$0xff]  ;;  %v7547_v54 = vadd.f32 %v7536_v38, %v7526_v18  ;;  %v7557_v18 = vrot.slane %v7517_v19, %v902_v30 }
 0xaec   : > { %v4885_v6 = vmul.f32 -1.702, %v3669_v0  ;;  %6037 = vpow2.f32 %v3936_v21  ;;  %v4111_v21 = vld [vmem:[#allocation20 + $0x288] sm:$0xff]  ;;  %v4126_v16 = vld [vmem:[#allocation20 + $0x300] sm:$0xff] }
 0xaed   : > { %v3950_v39 = vmul.f32 1.442695, %v4884_v43  ;;  %6039 = vpow2.f32 %v3940_v49  ;;  %v4113_v49 = vld [vmem:[#allocation20 + $0x298] sm:$0xff]  ;;  %v4110_v43 = vld [vmem:[#allocation20 + $0x280] sm:$0xff] }
 0xaee   : > { %v3952_v40 = vmul.f32 1.442695, %v4885_v6  ;;  %v4112_v6 = vld [vmem:[#allocation20 + $0x290] sm:$0xff] }
 0xaef   : > { %6041 = vpow2.f32 %v3950_v39  ;;  %v4117_v39 = vld [vmem:[#allocation20 + $0x2b8] sm:$0xff] }
 0xaf0   : > { %6043 = vpow2.f32 %v3952_v40  ;;  %v5621_v40 = vpack.c.bf16 %v4112_v6, %v4110_v43 }
 0xaf5   : > { %v6036_v24 = vpop.eup %6035 }
 0xaf6   : > { %v3966_v62 = vadd.f32 1.0, %v6036_v24  ;;  %v6038_v25 = vpop.eup %6037 }
 0xaf7   : > { %v6040_v37 = vpop.eup %6039  ;;  %v3967_v45 = vadd.f32 1.0, %v6038_v25  ;;  %v4116_v25 = vld [vmem:[#allocation20 + $0x2b0] sm:$0xff] }
 0xaf8   : > { %6045 = vrcp.f32 %v3966_v62  ;;  %v3969_v7 = vadd.f32 1.0, %v6040_v37  ;;  %v4114_v62 = vld [vmem:[#allocation20 + $0x2a0] sm:$0xff]  ;;  %v4119_v37 = vld [vmem:[#allocation20 + $0x2c8] sm:$0xff] }
 0xaf9   : > { %v6042_v44 = vpop.eup %6041  ;;  %6047 = vrcp.f32 %v3967_v45  ;;  %v4121_v45 = vld [vmem:[#allocation20 + $0x2d8] sm:$0xff] }
 0xafa   : > { %v3974_v47 = vadd.f32 1.0, %v6042_v44  ;;  %v6044_v20 = vpop.eup %6043  ;;  %6049 = vrcp.f32 %v3969_v7  ;;  %v3565_v44 = vrot.slane %v7517_v19, %v890_v41  ;;  %v5625_v7 = vpack.c.bf16 %v4116_v25, %v4114_v62  ;;  %v4122_v41 = vld [vmem:[#allocation20 + $0x2e0] sm:$0xff]  ;;  %v4141_v62 = vld [vmem:[#allocation20 + $0x378] sm:$0xff] }
 0xafb   : > { %v3975_v34 = vadd.f32 1.0, %v6044_v20  ;;  %v4118_v20 = vld [vmem:[#allocation20 + $0x2c0] sm:$0xff] }
 0xafc   : > { %6051 = vrcp.f32 %v3974_v47  ;;  %v5627_v47 = vpack.c.bf16 %v4121_v45, %v4119_v37  ;;  %v4138_v45 = vld [vmem:[#allocation20 + $0x360] sm:$0xff] }
 0xafd   : > { %6053 = vrcp.f32 %v3975_v34  ;;  %v4120_v34 = vld [vmem:[#allocation20 + $0x2d0] sm:$0xff] }
 0xafe   : > { %v5629_v57 = vpack.c.bf16 %v4120_v34, %v4118_v20 }
 0xb02   : > { %v6046_v10 = vpop.eup %6045 }
 0xb03   : > { %v6048_v58 = vpop.eup %6047  ;;  %v4014_v12 = vmul.f32 %v6046_v10, %v3661_v8  ;;  %v4107_v8 = vld [vmem:[#allocation20 + $0x268] sm:$0xff]  ;;  %v7543_v10 = vadd.f32 %v7528_v31, %v3565_v44  ;;  %v4887_v31 = vmul.f32 -1.702, %v7547_v54 }
 0xb04   : > { %v4015_v59 = vmul.f32 %v6048_v58, %v3663_v27  ;;  %v6050_v60 = vpop.eup %6049  ;;  %v4104_v27 = vld [vmem:[#allocation20 + $0x250] sm:$0xff]  ;;  %v5615_v2 = vpack.c.bf16 %v4109_v23, %v4107_v8  ;;  %v5631_v58 = vpack.c.bf16 %v4125_v52, %v4123_v48  ;;  %v4130_v8 = vld [vmem:[#allocation20 + $0x320] sm:$0xff] }
 0xb05   : > { %v4017_v14 = vmul.f32 %v6050_v60, %v7531_v4  ;;  %v5613_v28 = vpack.c.bf16 %v4104_v27, %v4102_v26  ;;  %v4115_v4 = vld [vmem:[#allocation20 + $0x2a8] sm:$0xff]  ;;  %v4129_v60 = vld [vmem:[#allocation20 + $0x318] sm:$0xff]  ;;  %v4132_v23 = vld [vmem:[#allocation20 + $0x330] sm:$0xff] }
 0xb06   : > { %v6052_v32 = vpop.eup %6051  ;;  %4350 = vmatprep.mubr.f32.mxu0 %v4015_v59  ;;  %v5623_v24 = vpack.c.bf16 %v4117_v39, %v4115_v4  ;;  %v4124_v59 = vld [vmem:[#allocation20 + $0x2f0] sm:$0xff]  ;;  %v5641_v43 = vpack.c.bf16 %v4132_v23, %v4130_v8  ;;  %v4134_v39 = vld [vmem:[#allocation20 + $0x340] sm:$0xff]  ;;  %v4155_v8 = vld [vmem:[#allocation20 + $0x3e8] sm:$0xff] }
 0xb07   : > { %v6054_v46 = vpop.eup %6053  ;;  %4351 = vmatmul.mubr.f32.vlgmr.msra.gmra.mrb[14].mxu0 %v4014_v12  ;;  %v4022_v9 = vmul.f32 %v6052_v32, %v3667_v42  ;;  %v5617_v42 = vpack.c.bf16 %v4108_v36, %v4106_v35  ;;  %v4878_v12 = vmul.f32 -1.702, %v7543_v10  ;;  %v5633_v13 = vpack.c.bf16 %v4124_v59, %v4122_v41  ;;  %v4128_v32 = vld [vmem:[#allocation20 + $0x310] sm:$0xff]  ;;  %v4142_v52 = vld [vmem:[#allocation20 + $0x380] sm:$0xff]  ;;  %v4147_v41 = vld [vmem:[#allocation20 + $0x3a8] sm:$0xff] }
 0xb08   : > { %v4023_v22 = vmul.f32 %v6054_v46, %v3669_v0  ;;  %5606 = vmatpush1.bf16.msra.mxu0 %v5605_v5  ;;  %v5619_v0 = vpack.c.bf16 %v4113_v49, %v4111_v21  ;;  %v4127_v5 = vld [vmem:[#allocation20 + $0x308] sm:$0xff]  ;;  %v5637_v27 = vpack.c.bf16 %v4128_v32, %v4126_v16  ;;  %v4149_v59 = vld [vmem:[#allocation20 + $0x3b8] sm:$0xff]  ;;  %v4148_v16 = vld [vmem:[#allocation20 + $0x3b0] sm:$0xff] }
 0xb09   : > { %5608 = vmatprep.subr.bf16.mxu0 %v5607_v56  ;;  %v7551_v56 = vadd.f32 %v7534_v33, %v3565_v44  ;;  %v5635_v38 = vpack.c.bf16 %v4129_v60, %v4127_v5  ;;  %v3938_v46 = vmul.f32 1.442695, %v4878_v12  ;;  %v4140_v44 = vld [vmem:[#allocation20 + $0x370] sm:$0xff]  ;;  %v4157_v23 = vld [vmem:[#allocation20 + $0x3f8] sm:$0xff] }
 0xb0a   : > { %4356 = vmatprep.mubr.f32.mxu0 %v4023_v22  ;;  %v5649_v20 = vpack.c.bf16 %v4140_v44, %v4138_v45 }
 0xb0b   : > { %4357 = vmatmul.mubr.f32.gmra.mrb[16].mxu0 %v4022_v9  ;;  %v4886_v22 = vmul.f32 -1.702, %v7551_v56  ;;  %v3956_v9 = vmul.f32 1.442695, %v4887_v31  ;;  %6055 = vpow2.f32 %v3938_v46 }
 0xb0c   : > { %5610 = vmatpush1.bf16.msra.mxu0 %v5609_v1  ;;  %4427 = vmatprep.mubr.f32.mxu0 %v4017_v14  ;;  %v5639_v14 = vpack.c.bf16 %v4133_v51, %v4131_v17  ;;  %v4151_v17 = vld [vmem:[#allocation20 + $0x3c8] sm:$0xff]  ;;  %v4153_v51 = vld [vmem:[#allocation20 + $0x3d8] sm:$0xff] }
 0xb0d   : > { %5612 = vmatprep.subr.bf16.mxu0 %v5611_v15  ;;  %v3954_v35 = vmul.f32 1.442695, %v4886_v22  ;;  %6057 = vpow2.f32 %v3956_v9 }
 0xb0f   : > { %6059 = vpow2.f32 %v3954_v35  ;;  %v4154_v35 = vld [vmem:[#allocation20 + $0x3e0] sm:$0xff] }
 0xb10   : > { %5614 = vmatpush1.bf16.msra.mxu0 %v5613_v28  ;;  %v4135_v28 = vld [vmem:[#allocation20 + $0x348] sm:$0xff] }
 0xb11   : > { %5616 = vmatprep.subr.bf16.mxu0 %v5615_v2  ;;  %v4137_v2 = vld [vmem:[#allocation20 + $0x358] sm:$0xff] }
 0xb12   : > { %v5643_v4 = vpack.c.bf16 %v4137_v2, %v4135_v28  ;;  %v5663_v2 = vpack.c.bf16 %v4157_v23, %v4155_v8  ;;  %v4178_v23 = vld [vmem:[#allocation20 + $0x4a0] sm:$0xff] }
 0xb14   : > { %5618 = vmatpush1.bf16.msra.mxu0 %v5617_v42 }
 0xb15   : > { %5620 = vmatprep.subr.bf16.mxu0 %v5619_v0  ;;  %v6056_v34 = vpop.eup %6055 }
 0xb16   : > { %v3968_v5 = vadd.f32 1.0, %v6056_v34  ;;  %v4164_v34 = vld [vmem:[#allocation20 + $0x430] sm:$0xff] }
 0xb18   : > { %5622 = vmatpush1.bf16.msra.mxu0 %v5621_v40  ;;  %v4136_v40 = vld [vmem:[#allocation20 + $0x350] sm:$0xff] }
 0xb19   : > { %5624 = vmatprep.subr.bf16.mxu0 %v5623_v24  ;;  %v4139_v24 = vld [vmem:[#allocation20 + $0x368] sm:$0xff]  ;;  %v5645_v25 = vpack.c.bf16 %v4136_v40, %v4134_v39  ;;  %v4158_v40 = vld [vmem:[#allocation20 + $0x400] sm:$0xff] }
 0xb1a   : > { %v5647_v37 = vpack.c.bf16 %v4141_v62, %v4139_v24  ;;  %v4160_v24 = vld [vmem:[#allocation20 + $0x410] sm:$0xff] }
 0xb1b   : > { %v5669_v44 = vpack.c.bf16 %v4160_v24, %v4158_v40  ;;  %v4184_v40 = vld [vmem:[#allocation20 + $0x4d0] sm:$0xff]  ;;  %v4187_v24 = vld [vmem:[#allocation20 + $0x4e8] sm:$0xff] }
 0xb1c   : > { %5626 = vmatpush1.bf16.msra.mxu0 %v5625_v7  ;;  %v4143_v7 = vld [vmem:[#allocation20 + $0x388] sm:$0xff] }
 0xb1d   : > { %5628 = vmatprep.subr.bf16.mxu0 %v5627_v47  ;;  %v4145_v47 = vld [vmem:[#allocation20 + $0x398] sm:$0xff] }
 0xb1e   : > { %v5651_v48 = vpack.c.bf16 %v4145_v47, %v4143_v7 }
 0xb20   : > { %5630 = vmatpush1.bf16.msra.mxu0 %v5629_v57  ;;  %v4144_v57 = vld [vmem:[#allocation20 + $0x390] sm:$0xff] }
 0xb21   : > { %5632 = vmatprep.subr.bf16.mxu0 %v5631_v58  ;;  %v6058_v58 = vpop.eup %6057  ;;  %v5653_v60 = vpack.c.bf16 %v4144_v57, %v4142_v52  ;;  %v4167_v57 = vld [vmem:[#allocation20 + $0x448] sm:$0xff] }
 0xb22   : > { %v6060_v12 = vpop.eup %6059  ;;  %v3977_v31 = vadd.f32 1.0, %v6058_v58  ;;  %v4169_v58 = vld [vmem:[#allocation20 + $0x458] sm:$0xff] }
 0xb23   : > { %v3976_v46 = vadd.f32 1.0, %v6060_v12  ;;  %v4166_v12 = vld [vmem:[#allocation20 + $0x440] sm:$0xff] }
 0xb24   : > { %v7560_v33 = vpop.f32.mrb[10].mxu0  ;;  %v7562_v1 = vpop.f32.mrb[30].mxu1  ;;  %5634 = vmatpush1.bf16.msra.mxu0 %v5633_v13  ;;  %v5655_v13 = vpack.c.bf16 %v4149_v59, %v4147_v41 }
 0xb25   : > { %v3816_v15 = vpop.f32.mrb[11].mxu0  ;;  %v7564_v26 = vpop.f32.mrb[31].mxu1  ;;  %5636 = vmatprep.subr.bf16.mxu0 %v5635_v38  ;;  %v4146_v38 = vld [vmem:[#allocation20 + $0x3a0] sm:$0xff] }
 0xb26   : > { %v7567_v30 = vadd.f32 %v3816_v15, %v7557_v18  ;;  %v5657_v22 = vpack.c.bf16 %v4148_v16, %v4146_v38  ;;  %v5659_v15 = vpack.c.bf16 %v4153_v51, %v4151_v17  ;;  %v4173_v38 = vld [vmem:[#allocation20 + $0x478] sm:$0xff]  ;;  %v4172_v17 = vld [vmem:[#allocation20 + $0x470] sm:$0xff]  ;;  %v4175_v51 = vld [vmem:[#allocation20 + $0x488] sm:$0xff] }
 0xb28   : > { %v4881_v36 = vmul.f32 -1.702, %v7567_v30  ;;  %v7570_v21 = vpop.f32.mrb[12].mxu0  ;;  %v7572_v49 = vpop.f32.mrb[32].mxu1  ;;  %5638 = vmatpush1.bf16.msra.mxu0 %v5637_v27  ;;  %v4150_v27 = vld [vmem:[#allocation20 + $0x3c0] sm:$0xff] }
 0xb29   : > { %v7574_v42 = vpop.f32.mrb[13].mxu0  ;;  %v7576_v0 = vpop.f32.mrb[33].mxu1  ;;  %5640 = vmatprep.subr.bf16.mxu0 %v5639_v14  ;;  %v4152_v14 = vld [vmem:[#allocation20 + $0x3d0] sm:$0xff] }
 0xb2a   : > { %v3944_v6 = vmul.f32 1.442695, %v4881_v36  ;;  %v5661_v28 = vpack.c.bf16 %v4152_v14, %v4150_v27  ;;  %v4156_v36 = vld [vmem:[#allocation20 + $0x3f0] sm:$0xff]  ;;  %v4179_v27 = vld [vmem:[#allocation20 + $0x4a8] sm:$0xff] }
 0xb2c   : > { %6061 = vpow2.f32 %v3944_v6  ;;  %5642 = vmatpush1.bf16.msra.mxu0 %v5641_v43  ;;  %v4159_v43 = vld [vmem:[#allocation20 + $0x408] sm:$0xff]  ;;  %v4161_v6 = vld [vmem:[#allocation20 + $0x418] sm:$0xff] }
 0xb2d   : > { %5644 = vmatprep.subr.bf16.mxu0 %v5643_v4  ;;  %6063 = vrcp.f32 %v3968_v5  ;;  %v5665_v4 = vpack.c.bf16 %v4156_v36, %v4154_v35  ;;  %v5667_v39 = vpack.c.bf16 %v4161_v6, %v4159_v43  ;;  %v4185_v35 = vld [vmem:[#allocation20 + $0x4d8] sm:$0xff]  ;;  %v3573_v36 = vrot.slane %v7517_v19, %v898_v29 }
 0xb2e   : > { %6065 = vrcp.f32 %v3977_v31  ;;  %v3584_v43 = vsub.s32 7, %v7093_v61 }
 0xb2f   : > { %6067 = vrcp.f32 %v3976_v46  ;;  %v4177_v46 = vld [vmem:[#allocation20 + $0x498] sm:$0xff] }
 0xb30   : > { %5646 = vmatpush1.bf16.msra.mxu0 %v5645_v25  ;;  %v4163_v25 = vld [vmem:[#allocation20 + $0x428] sm:$0xff] }
 0xb31   : > { %5648 = vmatprep.subr.bf16.mxu0 %v5647_v37  ;;  %v4165_v37 = vld [vmem:[#allocation20 + $0x438] sm:$0xff] }
 0xb32   : > { %v5671_v47 = vpack.c.bf16 %v4165_v37, %v4163_v25  ;;  %v7587_v25 = vadd.f32 %v7560_v33, %v3573_v36  ;;  %v7590_v37 = vrot.slane %v7517_v19, %v3584_v43  ;;  %v7598_v33 = vadd.f32 %v7570_v21, %v3573_v36  ;;  %v4206_v43 = vld [vmem:[#allocation20 + $0x580] sm:$0xff] }
 0xb34   : > { %5650 = vmatpush1.bf16.msra.mxu0 %v5649_v20  ;;  %v4162_v20 = vld [vmem:[#allocation20 + $0x420] sm:$0xff] }
 0xb35   : > { %5652 = vmatprep.subr.bf16.mxu0 %v5651_v48  ;;  %v5673_v59 = vpack.c.bf16 %v4164_v34, %v4162_v20  ;;  %v4191_v20 = vld [vmem:[#allocation20 + $0x508] sm:$0xff]  ;;  %v4193_v34 = vld [vmem:[#allocation20 + $0x518] sm:$0xff] }
 0xb36   : > { %v6062_v32 = vpop.eup %6061 }
 0xb37   : > { %v3971_v9 = vadd.f32 1.0, %v6062_v32  ;;  %v6064_v62 = vpop.eup %6063  ;;  %v4170_v32 = vld [vmem:[#allocation20 + $0x460] sm:$0xff] }
 0xb38   : > { %5654 = vmatpush1.bf16.msra.mxu0 %v5653_v60  ;;  %v6066_v45 = vpop.eup %6065  ;;  %v4016_v7 = vmul.f32 %v6064_v62, %v7543_v10  ;;  %v5675_v60 = vpack.c.bf16 %v4169_v58, %v4167_v57  ;;  %v4168_v10 = vld [vmem:[#allocation20 + $0x450] sm:$0xff]  ;;  %v4189_v62 = vld [vmem:[#allocation20 + $0x4f8] sm:$0xff]  ;;  %v5699_v57 = vpack.c.bf16 %v4193_v34, %v4191_v20  ;;  %v4190_v58 = vld [vmem:[#allocation20 + $0x500] sm:$0xff] }
 0xb39   : > { %5656 = vmatprep.subr.bf16.mxu0 %v5655_v13  ;;  %6069 = vrcp.f32 %v3971_v9  ;;  %v6068_v48 = vpop.eup %6067  ;;  %v4025_v52 = vmul.f32 %v6066_v45, %v7547_v54  ;;  %v4171_v13 = vld [vmem:[#allocation20 + $0x468] sm:$0xff]  ;;  %v5677_v54 = vpack.c.bf16 %v4168_v10, %v4166_v12  ;;  %v4174_v9 = vld [vmem:[#allocation20 + $0x480] sm:$0xff]  ;;  %v7594_v45 = vadd.f32 %v7574_v42, %v7557_v18  ;;  %v4212_v20 = vld [vmem:[#allocation20 + $0x5b0] sm:$0xff] }
 0xb3a   : > { %v4024_v5 = vmul.f32 %v6068_v48, %v7551_v56  ;;  %v5679_v16 = vpack.c.bf16 %v4173_v38, %v4171_v13  ;;  %v5681_v56 = vpack.c.bf16 %v4172_v17, %v4170_v32  ;;  %v4880_v48 = vmul.f32 -1.702, %v7587_v25  ;;  %v4194_v13 = vld [vmem:[#allocation20 + $0x520] sm:$0xff]  ;;  %v4196_v38 = vld [vmem:[#allocation20 + $0x530] sm:$0xff] }
 0xb3b   : > { %v4889_v18 = vmul.f32 -1.702, %v7594_v45  ;;  %v4888_v12 = vmul.f32 -1.702, %v7598_v33 }
 0xb3c   : > { %5658 = vmatpush1.bf16.msra.mxu0 %v5657_v22  ;;  %v5683_v22 = vpack.c.bf16 %v4177_v46, %v4175_v51  ;;  %v5705_v51 = vpack.c.bf16 %v4196_v38, %v4194_v13  ;;  %v4223_v13 = vld [vmem:[#allocation20 + $0x608] sm:$0xff]  ;;  %v4225_v38 = vld [vmem:[#allocation20 + $0x618] sm:$0xff] }
 0xb3d   : > { %5660 = vmatprep.subr.bf16.mxu0 %v5659_v15  ;;  %v4176_v15 = vld [vmem:[#allocation20 + $0x490] sm:$0xff]  ;;  %v3960_v10 = vmul.f32 1.442695, %v4889_v18  ;;  %v3958_v32 = vmul.f32 1.442695, %v4888_v12  ;;  %v4217_v18 = vld [vmem:[#allocation20 + $0x5d8] sm:$0xff] }
 0xb3e   : > { %v5685_v14 = vpack.c.bf16 %v4176_v15, %v4174_v9  ;;  %v4203_v9 = vld [vmem:[#allocation20 + $0x568] sm:$0xff]  ;;  %v4205_v15 = vld [vmem:[#allocation20 + $0x578] sm:$0xff] }
 0xb3f   : > { %v4221_v12 = vld [vmem:[#allocation20 + $0x5f8] sm:$0xff] }
 0xb40   : > { %5662 = vmatpush1.bf16.msra.mxu0 %v5661_v28  ;;  %v4180_v28 = vld [vmem:[#allocation20 + $0x4b0] sm:$0xff] }
 0xb41   : > { %5664 = vmatprep.subr.bf16.mxu0 %v5663_v2  ;;  %v4183_v2 = vld [vmem:[#allocation20 + $0x4c8] sm:$0xff]  ;;  %v5689_v6 = vpack.c.bf16 %v4180_v28, %v4178_v23  ;;  %v4209_v28 = vld [vmem:[#allocation20 + $0x598] sm:$0xff] }
 0xb42   : > { %v4207_v23 = vld [vmem:[#allocation20 + $0x588] sm:$0xff] }
 0xb43   : > { %v6070_v41 = vpop.eup %6069  ;;  %v5715_v36 = vpack.c.bf16 %v4209_v28, %v4207_v23  ;;  %v4231_v28 = vld [vmem:[#allocation20 + $0x648] sm:$0xff] }
 0xb44   : > { %5666 = vmatpush1.bf16.msra.mxu0 %v5665_v4  ;;  %v4019_v31 = vmul.f32 %v6070_v41, %v7567_v30  ;;  %v4181_v30 = vld [vmem:[#allocation20 + $0x4b8] sm:$0xff]  ;;  %v5691_v4 = vpack.c.bf16 %v4185_v35, %v4183_v2  ;;  %v4192_v41 = vld [vmem:[#allocation20 + $0x510] sm:$0xff] }
 0xb45   : > { %5668 = vmatprep.subr.bf16.mxu0 %v5667_v39  ;;  %v5687_v8 = vpack.c.bf16 %v4181_v30, %v4179_v27  ;;  %v4182_v39 = vld [vmem:[#allocation20 + $0x4c0] sm:$0xff]  ;;  %v5711_v30 = vpack.c.bf16 %v4205_v15, %v4203_v9 }
 0xb46   : > { %v5693_v29 = vpack.c.bf16 %v4184_v40, %v4182_v39  ;;  %v4211_v39 = vld [vmem:[#allocation20 + $0x5a8] sm:$0xff]  ;;  %v4213_v40 = vld [vmem:[#allocation20 + $0x5b8] sm:$0xff] }
 0xb47   : > { %4428 = vmatmul.mubr.f32.vlgmr.msra.gmra.mrb[14].mxu0 %v4016_v7  ;;  %v4186_v7 = vld [vmem:[#allocation20 + $0x4e0] sm:$0xff] }
 0xb48   : > { %4433 = vmatprep.mubr.f32.mxu0 %v4025_v52  ;;  %5670 = vmatpush1.bf16.msra.mxu0 %v5669_v44  ;;  %v5695_v44 = vpack.c.bf16 %v4189_v62, %v4187_v24  ;;  %v7602_v52 = vadd.f32 %v7564_v26, %v7590_v37 }
 0xb49   : > { %5672 = vmatprep.subr.bf16.mxu0 %v5671_v47  ;;  %v4188_v47 = vld [vmem:[#allocation20 + $0x4f0] sm:$0xff] }
 0xb4a   : > { %v5697_v42 = vpack.c.bf16 %v4188_v47, %v4186_v7  ;;  %v4883_v21 = vmul.f32 -1.702, %v7602_v52  ;;  %v5719_v7 = vpack.c.bf16 %v4213_v40, %v4211_v39  ;;  %v4210_v47 = vld [vmem:[#allocation20 + $0x5a0] sm:$0xff]  ;;  %v4235_v40 = vld [vmem:[#allocation20 + $0x668] sm:$0xff] }
 0xb4b   : > { %4434 = vmatmul.mubr.f32.gmra.mrb[16].mxu0 %v4024_v5  ;;  %v4197_v5 = vld [vmem:[#allocation20 + $0x538] sm:$0xff] }
 0xb4c   : > { %5674 = vmatpush1.bf16.msra.mxu0 %v5673_v59  ;;  %4504 = vmatprep.mubr.f32.mxu0 %v4019_v31  ;;  %v4195_v59 = vld [vmem:[#allocation20 + $0x528] sm:$0xff]  ;;  %v5701_v31 = vpack.c.bf16 %v4192_v41, %v4190_v58  ;;  %v3948_v17 = vmul.f32 1.442695, %v4883_v21 }
 0xb4d   : > { %5676 = vmatprep.subr.bf16.mxu0 %v5675_v60  ;;  %v3942_v60 = vmul.f32 1.442695, %v4880_v48  ;;  %v5703_v26 = vpack.c.bf16 %v4197_v5, %v4195_v59  ;;  %v4215_v48 = vld [vmem:[#allocation20 + $0x5c8] sm:$0xff]  ;;  %v4214_v59 = vld [vmem:[#allocation20 + $0x5c0] sm:$0xff]  ;;  %v4216_v5 = vld [vmem:[#allocation20 + $0x5d0] sm:$0xff] }
 0xb4e   : > { %v5723_v41 = vpack.c.bf16 %v4217_v18, %v4215_v48  ;;  %v5725_v21 = vpack.c.bf16 %v4216_v5, %v4214_v59  ;;  %v4240_v48 = vld [vmem:[#allocation20 + $0x690] sm:$0xff]  ;;  %v4243_v18 = vld [vmem:[#allocation20 + $0x6a8] sm:$0xff] }
 0xb4f   : > { %6071 = vpow2.f32 %v3942_v60  ;;  %v4219_v60 = vld [vmem:[#allocation20 + $0x5e8] sm:$0xff]  ;;  %v4244_v59 = vld [vmem:[#allocation20 + $0x6b0] sm:$0xff] }
 0xb50   : > { %5678 = vmatpush1.bf16.msra.mxu0 %v5677_v54  ;;  %v4199_v54 = vld [vmem:[#allocation20 + $0x548] sm:$0xff]  ;;  %6073 = vpow2.f32 %v3960_v10  ;;  %v5727_v10 = vpack.c.bf16 %v4221_v12, %v4219_v60  ;;  %v4249_v60 = vld [vmem:[#allocation20 + $0x6d8] sm:$0xff] }
 0xb51   : > { %5680 = vmatprep.subr.bf16.mxu0 %v5679_v16  ;;  %v4201_v16 = vld [vmem:[#allocation20 + $0x558] sm:$0xff]  ;;  %6075 = vpow2.f32 %v3958_v32  ;;  %v4222_v32 = vld [vmem:[#allocation20 + $0x600] sm:$0xff]  ;;  %v4247_v5 = vld [vmem:[#allocation20 + $0x6c8] sm:$0xff] }
 0xb52   : > { %v5707_v46 = vpack.c.bf16 %v4201_v16, %v4199_v54  ;;  %6077 = vpow2.f32 %v3948_v17  ;;  %v5731_v16 = vpack.c.bf16 %v4225_v38, %v4223_v13  ;;  %v4224_v17 = vld [vmem:[#allocation20 + $0x610] sm:$0xff]  ;;  %v4251_v13 = vld [vmem:[#allocation20 + $0x6e8] sm:$0xff]  ;;  %v4253_v38 = vld [vmem:[#allocation20 + $0x6f8] sm:$0xff] }
 0xb53   : > { %v5733_v9 = vpack.c.bf16 %v4224_v17, %v4222_v32  ;;  %v5759_v32 = vpack.c.bf16 %v4253_v38, %v4251_v13  ;;  %v4252_v17 = vld [vmem:[#allocation20 + $0x6f0] sm:$0xff] }
 0xb54   : > { %5682 = vmatpush1.bf16.msra.mxu0 %v5681_v56  ;;  %v4198_v56 = vld [vmem:[#allocation20 + $0x540] sm:$0xff] }
 0xb55   : > { %5684 = vmatprep.subr.bf16.mxu0 %v5683_v22  ;;  %v4200_v22 = vld [vmem:[#allocation20 + $0x550] sm:$0xff] }
 0xb56   : > { %v5709_v27 = vpack.c.bf16 %v4200_v22, %v4198_v56  ;;  %v4229_v56 = vld [vmem:[#allocation20 + $0x638] sm:$0xff] }
 0xb58   : > { %5686 = vmatpush1.bf16.msra.mxu0 %v5685_v14  ;;  %v4202_v14 = vld [vmem:[#allocation20 + $0x560] sm:$0xff] }
 0xb59   : > { %5688 = vmatprep.subr.bf16.mxu0 %v5687_v8  ;;  %v4204_v8 = vld [vmem:[#allocation20 + $0x570] sm:$0xff]  ;;  %v6072_v35 = vpop.eup %6071 }
 0xb5a   : > { %v5713_v2 = vpack.c.bf16 %v4204_v8, %v4202_v14  ;;  %v3970_v24 = vadd.f32 1.0, %v6072_v35  ;;  %v4228_v14 = vld [vmem:[#allocation20 + $0x630] sm:$0xff] }
 0xb5c   : > { %5690 = vmatpush1.bf16.msra.mxu0 %v5689_v6  ;;  %v4208_v6 = vld [vmem:[#allocation20 + $0x590] sm:$0xff]  ;;  %6079 = vrcp.f32 %v3970_v24  ;;  %v4237_v24 = vld [vmem:[#allocation20 + $0x678] sm:$0xff] }
 0xb5d   : > { %5692 = vmatprep.subr.bf16.mxu0 %v5691_v4  ;;  %v6074_v4 = vpop.eup %6073  ;;  %v5717_v62 = vpack.c.bf16 %v4208_v6, %v4206_v43 }
 0xb60   : > { %5694 = vmatpush1.bf16.msra.mxu0 %v5693_v29  ;;  %v6076_v29 = vpop.eup %6075 }
 0xb61   : > { %5696 = vmatprep.subr.bf16.mxu0 %v5695_v44  ;;  %v3979_v44 = vadd.f32 1.0, %v6074_v4  ;;  %v6078_v34 = vpop.eup %6077  ;;  %v4230_v4 = vld [vmem:[#allocation20 + $0x640] sm:$0xff] }
 0xb62   : > { %v3973_v58 = vadd.f32 1.0, %v6078_v34  ;;  %v4238_v34 = vld [vmem:[#allocation20 + $0x680] sm:$0xff] }
 0xb63   : > { %6081 = vrcp.f32 %v3979_v44  ;;  %v4236_v44 = vld [vmem:[#allocation20 + $0x670] sm:$0xff] }
 0xb64   : > { %5698 = vmatpush1.bf16.msra.mxu0 %v5697_v42  ;;  %v3978_v42 = vadd.f32 1.0, %v6076_v29  ;;  %v4234_v29 = vld [vmem:[#allocation20 + $0x660] sm:$0xff] }
 0xb65   : > { %5700 = vmatprep.subr.bf16.mxu0 %v5699_v57  ;;  %v5721_v57 = vpack.c.bf16 %v4212_v20, %v4210_v47  ;;  %v4241_v47 = vld [vmem:[#allocation20 + $0x698] sm:$0xff] }
 0xb66   : > { %6083 = vrcp.f32 %v3978_v42  ;;  %v3580_v42 = vsub.s32 6, %v7093_v61 }
 0xb67   : > { %6085 = vrcp.f32 %v3973_v58 }
 0xb68   : > { %5702 = vmatpush1.bf16.msra.mxu0 %v5701_v31  ;;  %v4218_v31 = vld [vmem:[#allocation20 + $0x5e0] sm:$0xff]  ;;  %v3581_v12 = vrot.slane %v7517_v19, %v3580_v42 }
 0xb69   : > { %5704 = vmatprep.subr.bf16.mxu0 %v5703_v26  ;;  %v4220_v26 = vld [vmem:[#allocation20 + $0x5f0] sm:$0xff]  ;;  %v4250_v19 = vld [vmem:[#allocation20 + $0x6e0] sm:$0xff] }
 0xb6a   : > { %v5729_v54 = vpack.c.bf16 %v4220_v26, %v4218_v31  ;;  %v4246_v31 = vld [vmem:[#allocation20 + $0x6c0] sm:$0xff]  ;;  %v4248_v26 = vld [vmem:[#allocation20 + $0x6d0] sm:$0xff]  ;;  %v7614_v61 = vadd.f32 %v7562_v1, %v3581_v12 }
 0xb6c   : > { %5706 = vmatpush1.bf16.msra.mxu0 %v5705_v51  ;;  %v6080_v51 = vpop.eup %6079 }
 0xb6d   : > { %5708 = vmatprep.subr.bf16.mxu0 %v5707_v46  ;;  %v4227_v46 = vld [vmem:[#allocation20 + $0x628] sm:$0xff]  ;;  %v6082_v22 = vpop.eup %6081  ;;  %v4018_v15 = vmul.f32 %v6080_v51, %v7587_v25  ;;  %v4232_v25 = vld [vmem:[#allocation20 + $0x650] sm:$0xff] }
 0xb6e   : > { %v4027_v23 = vmul.f32 %v6082_v22, %v7594_v45  ;;  %v5741_v45 = vpack.c.bf16 %v4232_v25, %v4230_v4  ;;  %v4255_v51 = vld [vmem:[#allocation20 + $0x708] sm:$0xff]  ;;  %v7622_v22 = vadd.f32 %v7572_v49, %v3581_v12  ;;  %v4258_v49 = vld [vmem:[#allocation20 + $0x720] sm:$0xff] }
 0xb70   : > { %5710 = vmatpush1.bf16.msra.mxu0 %v5709_v27  ;;  %v5735_v27 = vpack.c.bf16 %v4229_v56, %v4227_v46  ;;  %v6084_v8 = vpop.eup %6083  ;;  %v4257_v46 = vld [vmem:[#allocation20 + $0x718] sm:$0xff]  ;;  %v4882_v56 = vmul.f32 -1.702, %v7614_v61 }
 0xb71   : > { %5712 = vmatprep.subr.bf16.mxu0 %v5711_v30  ;;  %v4226_v30 = vld [vmem:[#allocation20 + $0x620] sm:$0xff]  ;;  %v6086_v35 = vpop.eup %6085  ;;  %v4026_v43 = vmul.f32 %v6084_v8, %v7598_v33  ;;  %v5745_v33 = vpack.c.bf16 %v4236_v44, %v4234_v29  ;;  %v4890_v8 = vmul.f32 -1.702, %v7622_v22 }
 0xb72   : > { %v4021_v39 = vmul.f32 %v6086_v35, %v7602_v52  ;;  %v4245_v52 = vld [vmem:[#allocation20 + $0x6b8] sm:$0xff]  ;;  %v4260_v35 = vld [vmem:[#allocation20 + $0x730] sm:$0xff]  ;;  %v4266_v44 = vld [vmem:[#allocation20 + $0x760] sm:$0xff] }
 0xb73   : > { %v5751_v58 = vpack.c.bf16 %v4245_v52, %v4243_v18  ;;  %v5769_v4 = vpack.c.bf16 %v4260_v35, %v4258_v49  ;;  %v4270_v18 = vld [vmem:[#allocation20 + $0x780] sm:$0xff]  ;;  %v4272_v52 = vld [vmem:[#allocation20 + $0x790] sm:$0xff] }
 0xb74   : > { %5714 = vmatpush1.bf16.msra.mxu0 %v5713_v2  ;;  %v4233_v2 = vld [vmem:[#allocation20 + $0x658] sm:$0xff] }
 0xb75   : > { %5716 = vmatprep.subr.bf16.mxu0 %v5715_v36  ;;  %v5737_v36 = vpack.c.bf16 %v4228_v14, %v4226_v30  ;;  %v5739_v6 = vpack.c.bf16 %v4233_v2, %v4231_v28  ;;  %v4261_v30 = vld [vmem:[#allocation20 + $0x738] sm:$0xff]  ;;  %v3946_v14 = vmul.f32 1.442695, %v4882_v56 }
 0xb77   : > { %6087 = vpow2.f32 %v3946_v14 }
 0xb78   : > { %5718 = vmatpush1.bf16.msra.mxu0 %v5717_v62  ;;  %v5743_v62 = vpack.c.bf16 %v4237_v24, %v4235_v40  ;;  %v4264_v40 = vld [vmem:[#allocation20 + $0x750] sm:$0xff]  ;;  %v4267_v24 = vld [vmem:[#allocation20 + $0x768] sm:$0xff] }
 0xb79   : > { %5720 = vmatprep.subr.bf16.mxu0 %v5719_v7  ;;  %v4239_v7 = vld [vmem:[#allocation20 + $0x688] sm:$0xff] }
 0xb7a   : > { %v5747_v20 = vpack.c.bf16 %v4241_v47, %v4239_v7  ;;  %v4268_v7 = vld [vmem:[#allocation20 + $0x770] sm:$0xff]  ;;  %v4271_v47 = vld [vmem:[#allocation20 + $0x788] sm:$0xff] }
 0xb7c   : > { %5722 = vmatpush1.bf16.msra.mxu0 %v5721_v57  ;;  %v5749_v57 = vpack.c.bf16 %v4240_v48, %v4238_v34 }
 0xb7d   : > { %5724 = vmatprep.subr.bf16.mxu0 %v5723_v41  ;;  %v4242_v41 = vld [vmem:[#allocation20 + $0x6a0] sm:$0xff] }
 0xb80   : > { %5726 = vmatpush1.bf16.msra.mxu0 %v5725_v21  ;;  %v5753_v21 = vpack.c.bf16 %v4244_v59, %v4242_v41  ;;  %v5781_v59 = vpack.c.bf16 %v4272_v52, %v4270_v18 }
 0xb81   : > { %5728 = vmatprep.subr.bf16.mxu0 %v5727_v10  ;;  %v5755_v10 = vpack.c.bf16 %v4249_v60, %v4247_v5  ;;  %v6088_v34 = vpop.eup %6087 }
 0xb82   : > { %v3972_v41 = vadd.f32 1.0, %v6088_v34 }
 0xb84   : > { %5730 = vmatpush1.bf16.msra.mxu0 %v5729_v54  ;;  %v7618_v54 = vadd.f32 %v7576_v0, %v7590_v37  ;;  %v5763_v0 = vpack.c.bf16 %v4257_v46, %v4255_v51  ;;  %v4254_v37 = vld [vmem:[#allocation20 + $0x700] sm:$0xff]  ;;  %v4285_v51 = vld [vmem:[#allocation20 + $0x7f8] sm:$0xff] }
 0xb85   : > { %5732 = vmatprep.subr.bf16.mxu0 %v5731_v16  ;;  %v5757_v16 = vpack.c.bf16 %v4248_v26, %v4246_v31  ;;  %v4279_v31 = vld [vmem:[#allocation20 + $0x7c8] sm:$0xff]  ;;  %v4281_v26 = vld [vmem:[#allocation20 + $0x7d8] sm:$0xff] }
 0xb86   : > { %v4891_v1 = vmul.f32 -1.702, %v7618_v54 }
 0xb87   : > { %4505 = vmatmul.mubr.f32.vlgmr.msra.gmra.mrb[14].mxu0 %v4018_v15  ;;  %v4256_v15 = vld [vmem:[#allocation20 + $0x710] sm:$0xff] }
 0xb88   : > { %4510 = vmatprep.mubr.f32.mxu0 %v4027_v23  ;;  %5734 = vmatpush1.bf16.msra.mxu0 %v5733_v9  ;;  %v5761_v9 = vpack.c.bf16 %v4252_v17, %v4250_v19  ;;  %v3964_v23 = vmul.f32 1.442695, %v4891_v1  ;;  %v5765_v28 = vpack.c.bf16 %v4256_v15, %v4254_v37  ;;  %v4280_v19 = vld [vmem:[#allocation20 + $0x7d0] sm:$0xff]  ;;  %v4283_v17 = vld [vmem:[#allocation20 + $0x7e8] sm:$0xff]  ;;  %v4282_v1 = vld [vmem:[#allocation20 + $0x7e0] sm:$0xff] }
 0xb89   : > { %5736 = vmatprep.subr.bf16.mxu0 %v5735_v27  ;;  %v4259_v27 = vld [vmem:[#allocation20 + $0x728] sm:$0xff]  ;;  %v5791_v56 = vpack.c.bf16 %v4285_v51, %v4283_v17 }
 0xb8a   : > { %v5767_v2 = vpack.c.bf16 %v4261_v30, %v4259_v27  ;;  %6089 = vpow2.f32 %v3964_v23  ;;  %v3280_v23 = vld [vmem:[#allocation22] sm:$0x3] }
 0xb8b   : > { %4511 = vmatmul.mubr.f32.gmra.mrb[16].mxu0 %v4026_v43  ;;  %v4265_v43 = vld [vmem:[#allocation20 + $0x758] sm:$0xff] }
 0xb8c   : > { %5738 = vmatpush1.bf16.msra.mxu0 %v5737_v36  ;;  %4581 = vmatprep.mubr.f32.mxu0 %v4021_v39  ;;  %v4263_v36 = vld [vmem:[#allocation20 + $0x748] sm:$0xff]  ;;  %v4262_v39 = vld [vmem:[#allocation20 + $0x740] sm:$0xff] }
 0xb8d   : > { %5740 = vmatprep.subr.bf16.mxu0 %v5739_v6  ;;  %v3962_v6 = vmul.f32 1.442695, %v4890_v8  ;;  %v5771_v25 = vpack.c.bf16 %v4265_v43, %v4263_v36 }
 0xb8f   : > { %6091 = vpow2.f32 %v3962_v6 }
 0xb90   : > { %5742 = vmatpush1.bf16.msra.mxu0 %v5741_v45  ;;  %v4269_v45 = vld [vmem:[#allocation20 + $0x778] sm:$0xff]  ;;  %6093 = vrcp.f32 %v3972_v41 }
 0xb91   : > { %5744 = vmatprep.subr.bf16.mxu0 %v5743_v62  ;;  %v5773_v62 = vpack.c.bf16 %v4264_v40, %v4262_v39  ;;  %v5775_v29 = vpack.c.bf16 %v4269_v45, %v4267_v24 }
 0xb94   : > { %5746 = vmatpush1.bf16.msra.mxu0 %v5745_v33  ;;  %v4273_v33 = vld [vmem:[#allocation20 + $0x798] sm:$0xff]  ;;  %v6090_v42 = vpop.eup %6089 }
 0xb95   : > { %5748 = vmatprep.subr.bf16.mxu0 %v5747_v20  ;;  %v5777_v20 = vpack.c.bf16 %v4268_v7, %v4266_v44  ;;  %v5779_v48 = vpack.c.bf16 %v4273_v33, %v4271_v47  ;;  %v3981_v60 = vadd.f32 1.0, %v6090_v42 }
 0xb97   : > { %6095 = vrcp.f32 %v3981_v60 }
 0xb98   : > { %5750 = vmatpush1.bf16.msra.mxu0 %v5749_v57  ;;  %v4275_v57 = vld [vmem:[#allocation20 + $0x7a8] sm:$0xff] }
 0xb99   : > { %5752 = vmatprep.subr.bf16.mxu0 %v5751_v58  ;;  %v4277_v58 = vld [vmem:[#allocation20 + $0x7b8] sm:$0xff]  ;;  %v6092_v5 = vpop.eup %6091 }
 0xb9a   : > { %v5783_v12 = vpack.c.bf16 %v4277_v58, %v4275_v57  ;;  %v3980_v13 = vadd.f32 1.0, %v6092_v5  ;;  %v6094_v37 = vpop.eup %6093 }
 0xb9b   : > { %v4020_v27 = vmul.f32 %v6094_v37, %v7614_v61 }
 0xb9c   : > { %5754 = vmatpush1.bf16.msra.mxu0 %v5753_v21  ;;  %v4274_v21 = vld [vmem:[#allocation20 + $0x7a0] sm:$0xff]  ;;  %6097 = vrcp.f32 %v3980_v13 }
 0xb9d   : > { %5756 = vmatprep.subr.bf16.mxu0 %v5755_v10  ;;  %v4276_v10 = vld [vmem:[#allocation20 + $0x7b0] sm:$0xff] }
 0xb9e   : > { %v5785_v38 = vpack.c.bf16 %v4276_v10, %v4274_v21 }
 0xba0   : > { %5758 = vmatpush1.bf16.msra.mxu0 %v5757_v16  ;;  %v5787_v16 = vpack.c.bf16 %v4281_v26, %v4279_v31 }
 0xba1   : > { %5760 = vmatprep.subr.bf16.mxu0 %v5759_v32  ;;  %v4278_v32 = vld [vmem:[#allocation20 + $0x7c0] sm:$0xff]  ;;  %v6096_v15 = vpop.eup %6095 }
 0xba2   : > { %v5789_v46 = vpack.c.bf16 %v4280_v19, %v4278_v32  ;;  %v4029_v14 = vmul.f32 %v6096_v15, %v7618_v54 }
 0xba4   : > { %5762 = vmatpush1.bf16.msra.mxu0 %v5761_v9  ;;  %v4284_v9 = vld [vmem:[#allocation20 + $0x7f0] sm:$0xff] }
 0xba5   : > { %5764 = vmatprep.subr.bf16.mxu0 %v5763_v0  ;;  %v5793_v0 = vpack.c.bf16 %v4284_v9, %v4282_v1 }
 0xba6   : > { %v6098_v30 = vpop.eup %6097 }
 0xba7   : > { %v4028_v8 = vmul.f32 %v6098_v30, %v7622_v22 }
 0xba8   : > { %5766 = vmatpush1.bf16.msra.mxu0 %v5765_v28  ;;  %v3285_v28 = vrot.slane %v3280_v23, %v7099_v3 }
 0xba9   : > { %5768 = vmatprep.subr.bf16.mxu0 %v5767_v2  ;;  %v3289_v2 = vrot.slane %v3280_v23, %v7096_v63 }
 0xbaa   : > { %v3292_v49 = vadd.f32 %v3285_v28, %v7456_v50  ;;  %v3294_v22 = vadd.f32 %v3285_v28, %v7464_v11 }
 0xbab   : > { %v3293_v36 = vadd.f32 %v3289_v2, %v7459_v53  ;;  %v3295_v3 = vadd.f32 %v3289_v2, %v7467_v55 }
 0xbac   : > { %5770 = vmatpush1.bf16.msra.mxu0 %v5769_v4 }
 0xbad   : > { %5772 = vmatprep.subr.bf16.mxu0 %v5771_v25 }
 0xbb0   : > { %5774 = vmatpush1.bf16.msra.mxu0 %v5773_v62 }
 0xbb1   : > { %5776 = vmatprep.subr.bf16.mxu0 %v5775_v29 }
 0xbb4   : > { %5778 = vmatpush1.bf16.msra.mxu0 %v5777_v20 }
 0xbb5   : > { %5780 = vmatprep.subr.bf16.mxu0 %v5779_v48 }
 0xbb8   : > { %5782 = vmatpush1.bf16.msra.mxu0 %v5781_v59 }
 0xbb9   : > { %5784 = vmatprep.subr.bf16.mxu0 %v5783_v12 }
 0xbbc   : > { %5786 = vmatpush1.bf16.msra.mxu0 %v5785_v38 }
 0xbbd   : > { %5788 = vmatprep.subr.bf16.mxu0 %v5787_v16 }
 0xbc0   : > { %5790 = vmatpush1.bf16.msra.mxu0 %v5789_v46 }
 0xbc1   : > { %5792 = vmatprep.subr.bf16.mxu0 %v5791_v56 }
 0xbc4   : > { %5794 = vmatpush1.bf16.msra.mxu0 %v5793_v0 }
 0xbc7   : > { %4582 = vmatmul.mubr.f32.vlgmr.msra.gmra.mrb[14].mxu0 %v4020_v27 }
 0xbc8   : > { %4587 = vmatprep.mubr.f32.mxu0 %v4029_v14 }
 0xbcb   : > { %4588 = vmatmul.mubr.f32.gmra.mrb[16].mxu0 %v4028_v8 }
 0xc9a   : > { %v4583_v35 = vpop.f32.mrb[14].mxu0 }
 0xc9b   : > { %v4594_v61 = vadd.f32 %v4583_v35, %v3292_v49  ;;  %v4585_v54 = vpop.f32.mrb[15].mxu0 }
 0xc9c   : > { %v4595_v43 = vadd.f32 %v4585_v54, %v3293_v36 }
 0xc9d   : > { %4598 = vst [vmem:[%s616_s17] sm:$0xff] %v4594_v61 }
 0xc9e   : > { %4599 = vst [vmem:[%s616_s17 + $0x8] sm:$0xff] %v4595_v43  ;;  %v4589_v63 = vpop.f32.mrb[16].mxu0 }
 0xc9f   : > { %v4596_v50 = vadd.f32 %v4589_v63, %v3294_v22  ;;  %v4591_v53 = vpop.f32.mrb[17].mxu0 }
 0xca0   : > { %v4597_v6 = vadd.f32 %v4591_v53, %v3295_v3 }
 0xca1   : > { %4600 = vst [vmem:[%s616_s17 + $0x10] sm:$0xff] %v4596_v50 }
 0xca2   : > { %4601 = vst [vmem:[%s616_s17 + $0x18] sm:$0xff] %v4597_v6 }
 0xca3   : > { %6482 = shalt.err (!%p6479_p11)
}
 0xca4   : > { %s6483_s13 = scalar_lea.hbm %s7643_s23, 512  ;;  %s6487_s19 = scalar_lea.hbm %s7756_s29, 1024 }
 0xca5   : > { %p6484_p6 = scmp.ne.s32.totalorder %s7643_s23, %s6483_s13  ;;  %p6488_p7 = scmp.lt.u32.totalorder %s7643_s23, %s7756_s29 }
 0xca6   : > { %p6489_p4 = scmp.lt.u32.totalorder %s6487_s19, %s6483_s13  ;;  %p6491_p3 = scmp.lt.u32.totalorder %s6483_s13, %s7643_s23 }
 0xca7   : > { %p6485_p12 = pnand %p6484_p6, %p7757_p8 }
 0xca8   : > { %p6490_p1 = por %p6489_p4, %p6488_p7 }
 0xca9   : > { %p6486_p5 = pneg %p6485_p12 }
 0xcaa   : > { %p6492_p13 = por %p6491_p3, %p6490_p1 }
 0xcac   : > { %p6493_p0 = pnand %p6492_p13, %p6486_p5 }
 0xcae   : > { %6496 = shalt.err (!%p6493_p0)
}
 0xcaf   : > { %s6584_s25 = smov 256   ;;  %s6585_s21 = smov 16  }
 0xcb0   : > { %5857 = dma.vmem_to_hbm [thread:$0]  (%p7757_p8), %s7637_s15, 512, %s7643_s23, %s4603_s24, %s6584_s25, %s6584_s25, %s6585_s21  }
 0xcb1 PF: > { %s7758_s2 = sld [smem:[#allocation32_spill]]  ;;  %p7759_p2 = scmp.ne.s32.totalorder %s7736_s0, 0 }
 0xcb2   : > { %p7760_p9 = scmp.ge.s32.totalorder %s6559_s28, 2 }
 0xcb4   : > { %p5901_p10 = pnand %p7760_p9, %p7759_p2 }
 0xcb7   : > { %s4631_s17 = sand.u32 1, %s7758_s2  }
 0xcb8   : > { %s4632_s13 = scalar_lea.sflag [#allocation4], %s4631_s17 }
 0xcb9   : > { %6542 = dma.done.wait (!%p5901_p10), %s4632_s13, 512  }
 0xcba   : > { %6544 = vsyncadd (!%p5901_p10), %s4632_s13, 4294966784  ;;  %p32_p11 = scmp.ge.s32.totalorder %s6939_s18, 4   ;;  %s7761_s25 = smov %s6551_s26 }
 0xcbb   : > { %s7762_s26 = smov %s6555_s27  ;;  %s7763_s27 = smov %s6950_s22 }
 0xcbc   : > { %s7764_s28 = smov %s6939_s18  ;;  %34 = sbr.rel (!%p32_p11) target bundleno = 17 (0x11), region = 165 }
 0xcc3   :  { %4637 = vsyncpa [#allocation3], 1 }
 0xcc4   :  { %4639 = vsyncpa [#allocation3 + $0x1], 1 }
 0xcc5   :  { %4640 = vsyncpa [#allocation6], 1 }
 0xcc6   :  { %4641 = vsyncpa [#allocation9], 1 }
 0xcc7   :  { %4642 = vsyncpa [#allocation12], 1 }
 0xcc8   :  { %4643 = vsyncpa [#allocation15], 1 }
 0xcc9   :  { %4644 = vsyncpa [#allocation18], 1 }
 0xcca   :  { %4645 = vsyncpa [#allocation21], 1 }
 0xccb   :  { %4646 = vsyncpa [#allocation4], 1 }
 0xccc   :  { %4648 = vsyncpa [#allocation4 + $0x1], 1 }

</bundles_post_ra>
